<compile_context>
chip_gen: v5e
topology: v5e:2x2
jax: 0.10.0
libtpu: 0.0.40
codegen_flags: <defaults>
</compile_context>

<pallas_src>
import functools

import jax
import jax.numpy as jnp
from jax.experimental import pallas as pl
from jax.experimental.pallas import tpu as pltpu


def _heatflow_kernel(xcol_ref, w1_ref, b1_ref, w2_ref, b2_ref, w3_ref, b3_ref,
                     w4_ref, b4_ref, o_ref, pad_ref, patch_ref, *, H, W, Ch,
                     Cout):
    """Fused 4-layer forward pass for one batch element.

    xcol_ref : (1, H*W, K1p)      layer-1 im2col patches (K1p >= 9*Cin)
    w1_ref   : (K1p, Ch)          layer-1 weights, (tap, cin)-major rows
    w2_ref   : (9*Ch, Ch)         layer-2 weights
    w3_ref   : (9*Ch, Ch)         layer-3 weights
    w4_ref   : (Cout, 9, Ch)      layer-4 weights (tap-major, channel on lanes)
    b*_ref   : (1, Ch) VMEM / (Cout,) SMEM biases
    o_ref    : (1, Cout, H, W)    output, directly NCHW
    pad_ref  : (H+2, W+2, Ch)     VMEM scratch, zero border, reused per layer
    patch_ref: (H*W, 9*Ch)        VMEM im2col scratch for layers 2 & 3
    """
    HW = H * W

    # Zero the padded-activation scratch once per grid step; only the (H, W)
    # interior is overwritten below, so the border stays zero for all layers.
    pad_ref[...] = jnp.zeros_like(pad_ref)

    # ---- layer 1: single im2col matmul (K = 9*Cin) + ReLU -----------------
    a = jnp.dot(xcol_ref[0], w1_ref[...], preferred_element_type=jnp.float32)
    a = jnp.maximum(a + b1_ref[...], 0.0)                        # (HW, Ch)
    pad_ref[1:H + 1, 1:W + 1, :] = a.reshape(H, W, Ch)

    # ---- layers 2 & 3: in-VMEM im2col (K = 9*Ch) + one MXU matmul each ----
    for w_ref, b_ref in ((w2_ref, b2_ref), (w3_ref, b3_ref)):
        for t in range(9):
            ky, kx = divmod(t, 3)
            patch_ref[:, t * Ch:(t + 1) * Ch] = (
                pad_ref[ky:ky + H, kx:kx + W, :].reshape(HW, Ch))
        a = jnp.dot(patch_ref[...], w_ref[...],
                    preferred_element_type=jnp.float32)
        a = jnp.maximum(a + b_ref[...], 0.0)                     # (HW, Ch)
        pad_ref[1:H + 1, 1:W + 1, :] = a.reshape(H, W, Ch)

    # ---- layer 4 (no ReLU): tiny Cout -> 9 VPU FMAs + lane reduction ------
    # Result is written directly in NCHW layout (no size-1 trailing dim).
    for co in range(Cout):
        acc = jnp.zeros((H, W), jnp.float32)
        for t in range(9):
            ky, kx = divmod(t, 3)
            acc = acc + jnp.sum(
                pad_ref[ky:ky + H, kx:kx + W, :] * w4_ref[co, t, :], axis=-1)
        o_ref[0, co] = (acc + b4_ref[co]).astype(o_ref.dtype)


def heat_flow_nn(x_nchw, params):
    """Forward pass equivalent to HeatFlowNN.forward (NCHW in, NCHW out)."""
    N, Cin, H, W = x_nchw.shape
    Ch = params["w1"].shape[-1]
    Cout = params["w4"].shape[-1]

    # Layer-1 im2col on the (tiny) raw input only: (N, H*W, 9*Cin).
    x = jnp.transpose(x_nchw, (0, 2, 3, 1))                     # NHWC
    xp = jnp.pad(x, ((0, 0), (1, 1), (1, 1), (0, 0)))
    cols = [xp[:, ky:ky + H, kx:kx + W, :]
            for ky in range(3) for kx in range(3)]
    xcol = jnp.concatenate(cols, axis=-1).reshape(N, H * W, 9 * Cin)

    # Pad layer-1 contracting dim up to a sublane multiple (zeros, free).
    K1 = 9 * Cin
    K1p = ((K1 + 7) // 8) * 8
    w1r = params["w1"].reshape(K1, Ch)
    if K1p != K1:
        xcol = jnp.pad(xcol, ((0, 0), (0, 0), (0, K1p - K1)))
        w1r = jnp.pad(w1r, ((0, K1p - K1), (0, 0)))

    w2r = params["w2"].reshape(9 * Ch, Ch)
    w3r = params["w3"].reshape(9 * Ch, Ch)
    w4r = jnp.transpose(params["w4"], (3, 0, 1, 2)).reshape(Cout, 9, Ch)
    b1 = params["b1"].reshape(1, Ch)
    b2 = params["b2"].reshape(1, Ch)
    b3 = params["b3"].reshape(1, Ch)
    b4 = params["b4"].reshape(Cout)

    kernel = functools.partial(_heatflow_kernel, H=H, W=W, Ch=Ch, Cout=Cout)
    return pl.pallas_call(
        kernel,
        out_shape=jax.ShapeDtypeStruct((N, Cout, H, W), jnp.float32),
        grid=(N,),
        in_specs=[
            pl.BlockSpec((1, H * W, K1p), lambda n: (n, 0, 0)),      # xcol
            pl.BlockSpec((K1p, Ch), lambda n: (0, 0)),               # w1
            pl.BlockSpec((1, Ch), lambda n: (0, 0)),                 # b1
            pl.BlockSpec((9 * Ch, Ch), lambda n: (0, 0)),            # w2
            pl.BlockSpec((1, Ch), lambda n: (0, 0)),                 # b2
            pl.BlockSpec((9 * Ch, Ch), lambda n: (0, 0)),            # w3
            pl.BlockSpec((1, Ch), lambda n: (0, 0)),                 # b3
            pl.BlockSpec((Cout, 9, Ch), lambda n: (0, 0, 0)),        # w4
            pl.BlockSpec(memory_space=pltpu.MemorySpace.SMEM),       # b4
        ],
        out_specs=pl.BlockSpec((1, Cout, H, W), lambda n: (n, 0, 0, 0)),
        scratch_shapes=[
            pltpu.VMEM((H + 2, W + 2, Ch), jnp.float32),   # padded activation
            pltpu.VMEM((H * W, 9 * Ch), jnp.float32),      # im2col patches
        ],
        compiler_params=pltpu.CompilerParams(
            dimension_semantics=("parallel",)),
    )(xcol, w1r, b1, w2r, b2, w3r, b3, w4r, b4)


def init_params(key, input_channels, output_channels, hidden_channels):
    """Deterministic init matching nn.Conv2d shapes (weights stored as HWIO)."""
    chans = [(input_channels, hidden_channels),
             (hidden_channels, hidden_channels),
             (hidden_channels, hidden_channels),
             (hidden_channels, output_channels)]
    params = {}
    for i, (cin, cout) in enumerate(chans, start=1):
        key, kw, kb = jax.random.split(key, 3)
        bound = 1.0 / jnp.sqrt(cin * 3 * 3)  # kaiming-uniform-like bound
        params[f"w{i}"] = jax.random.uniform(
            kw, (3, 3, cin, cout), jnp.float32, -bound, bound)
        params[f"b{i}"] = jax.random.uniform(
            kb, (cout,), jnp.float32, -bound, bound)
    return params


def _reference(x_nchw, params):
    """Pure-JAX reference (lax conv) for correctness check."""
    x = jnp.transpose(x_nchw, (0, 2, 3, 1))
    dn = ("NHWC", "HWIO", "NHWC")
    def conv(x, w, b, relu):
        y = jax.lax.conv_general_dilated(x, w, (1, 1), "SAME",
                                         dimension_numbers=dn) + b
        return jnp.maximum(y, 0.0) if relu else y
    x = conv(x, params["w1"], params["b1"], True)
    x = conv(x, params["w2"], params["b2"], True)
    x = conv(x, params["w3"], params["b3"], True)
    x = conv(x, params["w4"], params["b4"], False)
    return jnp.transpose(x, (0, 3, 1, 2))


if __name__ == "__main__":
    input_channels, output_channels, hidden_channels = 1, 1, 32
    key = jax.random.PRNGKey(0)
    kx, kp = jax.random.split(key)

    # Small PyTorch-style NCHW input: batch=2, channels=1, 16x16 grid.
    x = jax.random.normal(kx, (2, input_channels, 16, 16), jnp.float32)
    params = init_params(kp, input_channels, output_channels, hidden_channels)

    fwd = jax.jit(heat_flow_nn)
    out = jax.block_until_ready(fwd(x, params))

    ref = jax.block_until_ready(_reference(x, params))
    assert out.shape == (2, output_channels, 16, 16), out.shape
    assert jnp.allclose(out, ref, atol=1e-4, rtol=1e-4), "mismatch vs reference"

    print("KERNEL_OK")
</pallas_src>

<mosaic_0001>
module attributes {stable_mosaic.version = 11 : i64} {
  func.func @_heatflow_kernel(%arg0: i32, %arg1: memref<1x256x16xf32, #tpu.memory_space<vmem>>, %arg2: memref<16x32xf32, #tpu.memory_space<vmem>>, %arg3: memref<1x32xf32, #tpu.memory_space<vmem>>, %arg4: memref<288x32xf32, #tpu.memory_space<vmem>>, %arg5: memref<1x32xf32, #tpu.memory_space<vmem>>, %arg6: memref<288x32xf32, #tpu.memory_space<vmem>>, %arg7: memref<1x32xf32, #tpu.memory_space<vmem>>, %arg8: memref<1x9x32xf32, #tpu.memory_space<vmem>>, %arg9: memref<1xf32, #tpu.memory_space<smem>>, %arg10: memref<1x1x16x16xf32, #tpu.memory_space<vmem>>, %arg11: memref<18x18x32xf32, #tpu.memory_space<vmem>>, %arg12: memref<256x288xf32, #tpu.memory_space<vmem>>) attributes {dimension_semantics = [#tpu.dimension_semantics<parallel>], iteration_bounds = array<i64: 2>, scalar_prefetch = 0 : i64, scratch_operands = 2 : i64, tpu.core_type = #tpu.core_type<tc>, window_params = [{transform_indices = @transform_0, window_bounds = array<i64: 1, 256, 16>}, {pipeline_mode = #tpu.pipeline_mode<synchronous>, transform_indices = @transform_1, window_bounds = array<i64: 16, 32>}, {pipeline_mode = #tpu.pipeline_mode<synchronous>, transform_indices = @transform_2, window_bounds = array<i64: 1, 32>}, {pipeline_mode = #tpu.pipeline_mode<synchronous>, transform_indices = @transform_3, window_bounds = array<i64: 288, 32>}, {pipeline_mode = #tpu.pipeline_mode<synchronous>, transform_indices = @transform_4, window_bounds = array<i64: 1, 32>}, {pipeline_mode = #tpu.pipeline_mode<synchronous>, transform_indices = @transform_5, window_bounds = array<i64: 288, 32>}, {pipeline_mode = #tpu.pipeline_mode<synchronous>, transform_indices = @transform_6, window_bounds = array<i64: 1, 32>}, {pipeline_mode = #tpu.pipeline_mode<synchronous>, transform_indices = @transform_7, window_bounds = array<i64: 1, 9, 32>}, {transform_indices = @transform_8, window_bounds = array<i64: 1>}, {transform_indices = @transform_9, window_bounds = array<i64: 1, 1, 16, 16>}]} {
    %cst = arith.constant 0.000000e+00 : f32
    %0 = vector.broadcast %cst : f32 to vector<18x18x32xf32>
    %c0 = arith.constant 0 : index
    %c0_0 = arith.constant 0 : index
    %c0_1 = arith.constant 0 : index
    %1 = vector.load %arg11[%c0, %c0_0, %c0_1] : memref<18x18x32xf32, #tpu.memory_space<vmem>>, vector<18x18x32xf32>
    tpu.vector_store %arg11[%c0, %c0_0, %c0_1], %0 {strides = array<i32>} : memref<18x18x32xf32, #tpu.memory_space<vmem>>, vector<18x18x32xf32>,
    %c0_2 = arith.constant 0 : index
    %c0_3 = arith.constant 0 : index
    %c0_4 = arith.constant 0 : index
    %2 = vector.load %arg1[%c0_2, %c0_3, %c0_4] : memref<1x256x16xf32, #tpu.memory_space<vmem>>, vector<1x256x16xf32>
    %3 = vector.shape_cast %2 : vector<1x256x16xf32> to vector<256x16xf32>
    %c0_5 = arith.constant 0 : index
    %c0_6 = arith.constant 0 : index
    %4 = vector.load %arg2[%c0_5, %c0_6] : memref<16x32xf32, #tpu.memory_space<vmem>>, vector<16x32xf32>
    %cst_7 = arith.constant dense<0.000000e+00> : vector<256x32xf32>
    %5 = tpu.matmul %3, %4, %cst_7 {dimension_numbers = #tpu.dot_dimension_numbers<[1], [0], [0], [1], [0, 0, 1, 1], [], []>} : vector<256x16xf32>, vector<16x32xf32>, vector<256x32xf32> -> vector<256x32xf32>
    %c0_8 = arith.constant 0 : index
    %c0_9 = arith.constant 0 : index
    %6 = vector.load %arg3[%c0_8, %c0_9] : memref<1x32xf32, #tpu.memory_space<vmem>>, vector<1x32xf32>
    %7 = vector.broadcast %6 : vector<1x32xf32> to vector<256x32xf32>
    %8 = arith.addf %5, %7 : vector<256x32xf32>
    %cst_10 = arith.constant 0.000000e+00 : f32
    %9 = vector.broadcast %cst_10 : f32 to vector<256x32xf32>
    %10 = arith.maximumf %8, %9 : vector<256x32xf32>
    %11 = vector.shape_cast %10 : vector<256x32xf32> to vector<16x16x32xf32>
    %c1 = arith.constant 1 : index
    %c1_11 = arith.constant 1 : index
    %c0_12 = arith.constant 0 : index
    %12 = vector.load %arg11[%c1, %c1_11, %c0_12] : memref<18x18x32xf32, #tpu.memory_space<vmem>>, vector<16x16x32xf32>
    tpu.vector_store %arg11[%c1, %c1_11, %c0_12], %11 {strides = array<i32>} : memref<18x18x32xf32, #tpu.memory_space<vmem>>, vector<16x16x32xf32>,
    %c0_13 = arith.constant 0 : index
    %c0_14 = arith.constant 0 : index
    %c0_15 = arith.constant 0 : index
    %13 = vector.load %arg11[%c0_13, %c0_14, %c0_15] : memref<18x18x32xf32, #tpu.memory_space<vmem>>, vector<16x16x32xf32>
    %14 = vector.shape_cast %13 : vector<16x16x32xf32> to vector<256x32xf32>
    %c0_16 = arith.constant 0 : index
    %c0_17 = arith.constant 0 : index
    %15 = vector.load %arg12[%c0_16, %c0_17] : memref<256x288xf32, #tpu.memory_space<vmem>>, vector<256x32xf32>
    tpu.vector_store %arg12[%c0_16, %c0_17], %14 {strides = array<i32>} : memref<256x288xf32, #tpu.memory_space<vmem>>, vector<256x32xf32>,
    %c0_18 = arith.constant 0 : index
    %c1_19 = arith.constant 1 : index
    %c0_20 = arith.constant 0 : index
    %16 = vector.load %arg11[%c0_18, %c1_19, %c0_20] : memref<18x18x32xf32, #tpu.memory_space<vmem>>, vector<16x16x32xf32>
    %17 = vector.shape_cast %16 : vector<16x16x32xf32> to vector<256x32xf32>
    %c0_21 = arith.constant 0 : index
    %c32 = arith.constant 32 : index
    %18 = vector.load %arg12[%c0_21, %c32] : memref<256x288xf32, #tpu.memory_space<vmem>>, vector<256x32xf32>
    tpu.vector_store %arg12[%c0_21, %c32], %17 {strides = array<i32>} : memref<256x288xf32, #tpu.memory_space<vmem>>, vector<256x32xf32>,
    %c0_22 = arith.constant 0 : index
    %c2 = arith.constant 2 : index
    %c0_23 = arith.constant 0 : index
    %19 = vector.load %arg11[%c0_22, %c2, %c0_23] : memref<18x18x32xf32, #tpu.memory_space<vmem>>, vector<16x16x32xf32>
    %20 = vector.shape_cast %19 : vector<16x16x32xf32> to vector<256x32xf32>
    %c0_24 = arith.constant 0 : index
    %c64 = arith.constant 64 : index
    %21 = vector.load %arg12[%c0_24, %c64] : memref<256x288xf32, #tpu.memory_space<vmem>>, vector<256x32xf32>
    tpu.vector_store %arg12[%c0_24, %c64], %20 {strides = array<i32>} : memref<256x288xf32, #tpu.memory_space<vmem>>, vector<256x32xf32>,
    %c1_25 = arith.constant 1 : index
    %c0_26 = arith.constant 0 : index
    %c0_27 = arith.constant 0 : index
    %22 = vector.load %arg11[%c1_25, %c0_26, %c0_27] : memref<18x18x32xf32, #tpu.memory_space<vmem>>, vector<16x16x32xf32>
    %23 = vector.shape_cast %22 : vector<16x16x32xf32> to vector<256x32xf32>
    %c0_28 = arith.constant 0 : index
    %c96 = arith.constant 96 : index
    %24 = vector.load %arg12[%c0_28, %c96] : memref<256x288xf32, #tpu.memory_space<vmem>>, vector<256x32xf32>
    tpu.vector_store %arg12[%c0_28, %c96], %23 {strides = array<i32>} : memref<256x288xf32, #tpu.memory_space<vmem>>, vector<256x32xf32>,
    %c1_29 = arith.constant 1 : index
    %c1_30 = arith.constant 1 : index
    %c0_31 = arith.constant 0 : index
    %25 = vector.load %arg11[%c1_29, %c1_30, %c0_31] : memref<18x18x32xf32, #tpu.memory_space<vmem>>, vector<16x16x32xf32>
    %26 = vector.shape_cast %25 : vector<16x16x32xf32> to vector<256x32xf32>
    %c0_32 = arith.constant 0 : index
    %c128 = arith.constant 128 : index
    %27 = vector.load %arg12[%c0_32, %c128] : memref<256x288xf32, #tpu.memory_space<vmem>>, vector<256x32xf32>
    tpu.vector_store %arg12[%c0_32, %c128], %26 {strides = array<i32>} : memref<256x288xf32, #tpu.memory_space<vmem>>, vector<256x32xf32>,
    %c1_33 = arith.constant 1 : index
    %c2_34 = arith.constant 2 : index
    %c0_35 = arith.constant 0 : index
    %28 = vector.load %arg11[%c1_33, %c2_34, %c0_35] : memref<18x18x32xf32, #tpu.memory_space<vmem>>, vector<16x16x32xf32>
    %29 = vector.shape_cast %28 : vector<16x16x32xf32> to vector<256x32xf32>
    %c0_36 = arith.constant 0 : index
    %c160 = arith.constant 160 : index
    %30 = vector.load %arg12[%c0_36, %c160] : memref<256x288xf32, #tpu.memory_space<vmem>>, vector<256x32xf32>
    tpu.vector_store %arg12[%c0_36, %c160], %29 {strides = array<i32>} : memref<256x288xf32, #tpu.memory_space<vmem>>, vector<256x32xf32>,
    %c2_37 = arith.constant 2 : index
    %c0_38 = arith.constant 0 : index
    %c0_39 = arith.constant 0 : index
    %31 = vector.load %arg11[%c2_37, %c0_38, %c0_39] : memref<18x18x32xf32, #tpu.memory_space<vmem>>, vector<16x16x32xf32>
    %32 = vector.shape_cast %31 : vector<16x16x32xf32> to vector<256x32xf32>
    %c0_40 = arith.constant 0 : index
    %c192 = arith.constant 192 : index
    %33 = vector.load %arg12[%c0_40, %c192] : memref<256x288xf32, #tpu.memory_space<vmem>>, vector<256x32xf32>
    tpu.vector_store %arg12[%c0_40, %c192], %32 {strides = array<i32>} : memref<256x288xf32, #tpu.memory_space<vmem>>, vector<256x32xf32>,
    %c2_41 = arith.constant 2 : index
    %c1_42 = arith.constant 1 : index
    %c0_43 = arith.constant 0 : index
    %34 = vector.load %arg11[%c2_41, %c1_42, %c0_43] : memref<18x18x32xf32, #tpu.memory_space<vmem>>, vector<16x16x32xf32>
    %35 = vector.shape_cast %34 : vector<16x16x32xf32> to vector<256x32xf32>
    %c0_44 = arith.constant 0 : index
    %c224 = arith.constant 224 : index
    %36 = vector.load %arg12[%c0_44, %c224] : memref<256x288xf32, #tpu.memory_space<vmem>>, vector<256x32xf32>
    tpu.vector_store %arg12[%c0_44, %c224], %35 {strides = array<i32>} : memref<256x288xf32, #tpu.memory_space<vmem>>, vector<256x32xf32>,
    %c2_45 = arith.constant 2 : index
    %c2_46 = arith.constant 2 : index
    %c0_47 = arith.constant 0 : index
    %37 = vector.load %arg11[%c2_45, %c2_46, %c0_47] : memref<18x18x32xf32, #tpu.memory_space<vmem>>, vector<16x16x32xf32>
    %38 = vector.shape_cast %37 : vector<16x16x32xf32> to vector<256x32xf32>
    %c0_48 = arith.constant 0 : index
    %c256 = arith.constant 256 : index
    %39 = vector.load %arg12[%c0_48, %c256] : memref<256x288xf32, #tpu.memory_space<vmem>>, vector<256x32xf32>
    tpu.vector_store %arg12[%c0_48, %c256], %38 {strides = array<i32>} : memref<256x288xf32, #tpu.memory_space<vmem>>, vector<256x32xf32>,
    %c0_49 = arith.constant 0 : index
    %c0_50 = arith.constant 0 : index
    %40 = vector.load %arg12[%c0_49, %c0_50] : memref<256x288xf32, #tpu.memory_space<vmem>>, vector<256x288xf32>
    %c0_51 = arith.constant 0 : index
    %c0_52 = arith.constant 0 : index
    %41 = vector.load %arg4[%c0_51, %c0_52] : memref<288x32xf32, #tpu.memory_space<vmem>>, vector<288x32xf32>
    %cst_53 = arith.constant dense<0.000000e+00> : vector<256x32xf32>
    %42 = tpu.matmul %40, %41, %cst_53 {dimension_numbers = #tpu.dot_dimension_numbers<[1], [0], [0], [1], [0, 0, 1, 1], [], []>} : vector<256x288xf32>, vector<288x32xf32>, vector<256x32xf32> -> vector<256x32xf32>
    %c0_54 = arith.constant 0 : index
    %c0_55 = arith.constant 0 : index
    %43 = vector.load %arg5[%c0_54, %c0_55] : memref<1x32xf32, #tpu.memory_space<vmem>>, vector<1x32xf32>
    %44 = vector.broadcast %43 : vector<1x32xf32> to vector<256x32xf32>
    %45 = arith.addf %42, %44 : vector<256x32xf32>
    %cst_56 = arith.constant 0.000000e+00 : f32
    %46 = vector.broadcast %cst_56 : f32 to vector<256x32xf32>
    %47 = arith.maximumf %45, %46 : vector<256x32xf32>
    %48 = vector.shape_cast %47 : vector<256x32xf32> to vector<16x16x32xf32>
    %c1_57 = arith.constant 1 : index
    %c1_58 = arith.constant 1 : index
    %c0_59 = arith.constant 0 : index
    %49 = vector.load %arg11[%c1_57, %c1_58, %c0_59] : memref<18x18x32xf32, #tpu.memory_space<vmem>>, vector<16x16x32xf32>
    tpu.vector_store %arg11[%c1_57, %c1_58, %c0_59], %48 {strides = array<i32>} : memref<18x18x32xf32, #tpu.memory_space<vmem>>, vector<16x16x32xf32>,
    %c0_60 = arith.constant 0 : index
    %c0_61 = arith.constant 0 : index
    %c0_62 = arith.constant 0 : index
    %50 = vector.load %arg11[%c0_60, %c0_61, %c0_62] : memref<18x18x32xf32, #tpu.memory_space<vmem>>, vector<16x16x32xf32>
    %51 = vector.shape_cast %50 : vector<16x16x32xf32> to vector<256x32xf32>
    %c0_63 = arith.constant 0 : index
    %c0_64 = arith.constant 0 : index
    %52 = vector.load %arg12[%c0_63, %c0_64] : memref<256x288xf32, #tpu.memory_space<vmem>>, vector<256x32xf32>
    tpu.vector_store %arg12[%c0_63, %c0_64], %51 {strides = array<i32>} : memref<256x288xf32, #tpu.memory_space<vmem>>, vector<256x32xf32>,
    %c0_65 = arith.constant 0 : index
    %c1_66 = arith.constant 1 : index
    %c0_67 = arith.constant 0 : index
    %53 = vector.load %arg11[%c0_65, %c1_66, %c0_67] : memref<18x18x32xf32, #tpu.memory_space<vmem>>, vector<16x16x32xf32>
    %54 = vector.shape_cast %53 : vector<16x16x32xf32> to vector<256x32xf32>
    %c0_68 = arith.constant 0 : index
    %c32_69 = arith.constant 32 : index
    %55 = vector.load %arg12[%c0_68, %c32_69] : memref<256x288xf32, #tpu.memory_space<vmem>>, vector<256x32xf32>
    tpu.vector_store %arg12[%c0_68, %c32_69], %54 {strides = array<i32>} : memref<256x288xf32, #tpu.memory_space<vmem>>, vector<256x32xf32>,
    %c0_70 = arith.constant 0 : index
    %c2_71 = arith.constant 2 : index
    %c0_72 = arith.constant 0 : index
    %56 = vector.load %arg11[%c0_70, %c2_71, %c0_72] : memref<18x18x32xf32, #tpu.memory_space<vmem>>, vector<16x16x32xf32>
    %57 = vector.shape_cast %56 : vector<16x16x32xf32> to vector<256x32xf32>
    %c0_73 = arith.constant 0 : index
    %c64_74 = arith.constant 64 : index
    %58 = vector.load %arg12[%c0_73, %c64_74] : memref<256x288xf32, #tpu.memory_space<vmem>>, vector<256x32xf32>
    tpu.vector_store %arg12[%c0_73, %c64_74], %57 {strides = array<i32>} : memref<256x288xf32, #tpu.memory_space<vmem>>, vector<256x32xf32>,
    %c1_75 = arith.constant 1 : index
    %c0_76 = arith.constant 0 : index
    %c0_77 = arith.constant 0 : index
    %59 = vector.load %arg11[%c1_75, %c0_76, %c0_77] : memref<18x18x32xf32, #tpu.memory_space<vmem>>, vector<16x16x32xf32>
    %60 = vector.shape_cast %59 : vector<16x16x32xf32> to vector<256x32xf32>
    %c0_78 = arith.constant 0 : index
    %c96_79 = arith.constant 96 : index
    %61 = vector.load %arg12[%c0_78, %c96_79] : memref<256x288xf32, #tpu.memory_space<vmem>>, vector<256x32xf32>
    tpu.vector_store %arg12[%c0_78, %c96_79], %60 {strides = array<i32>} : memref<256x288xf32, #tpu.memory_space<vmem>>, vector<256x32xf32>,
    %c1_80 = arith.constant 1 : index
    %c1_81 = arith.constant 1 : index
    %c0_82 = arith.constant 0 : index
    %62 = vector.load %arg11[%c1_80, %c1_81, %c0_82] : memref<18x18x32xf32, #tpu.memory_space<vmem>>, vector<16x16x32xf32>
    %63 = vector.shape_cast %62 : vector<16x16x32xf32> to vector<256x32xf32>
    %c0_83 = arith.constant 0 : index
    %c128_84 = arith.constant 128 : index
    %64 = vector.load %arg12[%c0_83, %c128_84] : memref<256x288xf32, #tpu.memory_space<vmem>>, vector<256x32xf32>
    tpu.vector_store %arg12[%c0_83, %c128_84], %63 {strides = array<i32>} : memref<256x288xf32, #tpu.memory_space<vmem>>, vector<256x32xf32>,
    %c1_85 = arith.constant 1 : index
    %c2_86 = arith.constant 2 : index
    %c0_87 = arith.constant 0 : index
    %65 = vector.load %arg11[%c1_85, %c2_86, %c0_87] : memref<18x18x32xf32, #tpu.memory_space<vmem>>, vector<16x16x32xf32>
    %66 = vector.shape_cast %65 : vector<16x16x32xf32> to vector<256x32xf32>
    %c0_88 = arith.constant 0 : index
    %c160_89 = arith.constant 160 : index
    %67 = vector.load %arg12[%c0_88, %c160_89] : memref<256x288xf32, #tpu.memory_space<vmem>>, vector<256x32xf32>
    tpu.vector_store %arg12[%c0_88, %c160_89], %66 {strides = array<i32>} : memref<256x288xf32, #tpu.memory_space<vmem>>, vector<256x32xf32>,
    %c2_90 = arith.constant 2 : index
    %c0_91 = arith.constant 0 : index
    %c0_92 = arith.constant 0 : index
    %68 = vector.load %arg11[%c2_90, %c0_91, %c0_92] : memref<18x18x32xf32, #tpu.memory_space<vmem>>, vector<16x16x32xf32>
    %69 = vector.shape_cast %68 : vector<16x16x32xf32> to vector<256x32xf32>
    %c0_93 = arith.constant 0 : index
    %c192_94 = arith.constant 192 : index
    %70 = vector.load %arg12[%c0_93, %c192_94] : memref<256x288xf32, #tpu.memory_space<vmem>>, vector<256x32xf32>
    tpu.vector_store %arg12[%c0_93, %c192_94], %69 {strides = array<i32>} : memref<256x288xf32, #tpu.memory_space<vmem>>, vector<256x32xf32>,
    %c2_95 = arith.constant 2 : index
    %c1_96 = arith.constant 1 : index
    %c0_97 = arith.constant 0 : index
    %71 = vector.load %arg11[%c2_95, %c1_96, %c0_97] : memref<18x18x32xf32, #tpu.memory_space<vmem>>, vector<16x16x32xf32>
    %72 = vector.shape_cast %71 : vector<16x16x32xf32> to vector<256x32xf32>
    %c0_98 = arith.constant 0 : index
    %c224_99 = arith.constant 224 : index
    %73 = vector.load %arg12[%c0_98, %c224_99] : memref<256x288xf32, #tpu.memory_space<vmem>>, vector<256x32xf32>
    tpu.vector_store %arg12[%c0_98, %c224_99], %72 {strides = array<i32>} : memref<256x288xf32, #tpu.memory_space<vmem>>, vector<256x32xf32>,
    %c2_100 = arith.constant 2 : index
    %c2_101 = arith.constant 2 : index
    %c0_102 = arith.constant 0 : index
    %74 = vector.load %arg11[%c2_100, %c2_101, %c0_102] : memref<18x18x32xf32, #tpu.memory_space<vmem>>, vector<16x16x32xf32>
    %75 = vector.shape_cast %74 : vector<16x16x32xf32> to vector<256x32xf32>
    %c0_103 = arith.constant 0 : index
    %c256_104 = arith.constant 256 : index
    %76 = vector.load %arg12[%c0_103, %c256_104] : memref<256x288xf32, #tpu.memory_space<vmem>>, vector<256x32xf32>
    tpu.vector_store %arg12[%c0_103, %c256_104], %75 {strides = array<i32>} : memref<256x288xf32, #tpu.memory_space<vmem>>, vector<256x32xf32>,
    %c0_105 = arith.constant 0 : index
    %c0_106 = arith.constant 0 : index
    %77 = vector.load %arg12[%c0_105, %c0_106] : memref<256x288xf32, #tpu.memory_space<vmem>>, vector<256x288xf32>
    %c0_107 = arith.constant 0 : index
    %c0_108 = arith.constant 0 : index
    %78 = vector.load %arg6[%c0_107, %c0_108] : memref<288x32xf32, #tpu.memory_space<vmem>>, vector<288x32xf32>
    %cst_109 = arith.constant dense<0.000000e+00> : vector<256x32xf32>
    %79 = tpu.matmul %77, %78, %cst_109 {dimension_numbers = #tpu.dot_dimension_numbers<[1], [0], [0], [1], [0, 0, 1, 1], [], []>} : vector<256x288xf32>, vector<288x32xf32>, vector<256x32xf32> -> vector<256x32xf32>
    %c0_110 = arith.constant 0 : index
    %c0_111 = arith.constant 0 : index
    %80 = vector.load %arg7[%c0_110, %c0_111] : memref<1x32xf32, #tpu.memory_space<vmem>>, vector<1x32xf32>
    %81 = vector.broadcast %80 : vector<1x32xf32> to vector<256x32xf32>
    %82 = arith.addf %79, %81 : vector<256x32xf32>
    %cst_112 = arith.constant 0.000000e+00 : f32
    %83 = vector.broadcast %cst_112 : f32 to vector<256x32xf32>
    %84 = arith.maximumf %82, %83 : vector<256x32xf32>
    %85 = vector.shape_cast %84 : vector<256x32xf32> to vector<16x16x32xf32>
    %c1_113 = arith.constant 1 : index
    %c1_114 = arith.constant 1 : index
    %c0_115 = arith.constant 0 : index
    %86 = vector.load %arg11[%c1_113, %c1_114, %c0_115] : memref<18x18x32xf32, #tpu.memory_space<vmem>>, vector<16x16x32xf32>
    tpu.vector_store %arg11[%c1_113, %c1_114, %c0_115], %85 {strides = array<i32>} : memref<18x18x32xf32, #tpu.memory_space<vmem>>, vector<16x16x32xf32>,
    %cst_116 = arith.constant 0.000000e+00 : f32
    %87 = vector.broadcast %cst_116 : f32 to vector<16x16xf32>
    %c0_117 = arith.constant 0 : index
    %c0_118 = arith.constant 0 : index
    %c0_119 = arith.constant 0 : index
    %88 = vector.load %arg11[%c0_117, %c0_118, %c0_119] : memref<18x18x32xf32, #tpu.memory_space<vmem>>, vector<16x16x32xf32>
    %c0_120 = arith.constant 0 : index
    %c0_121 = arith.constant 0 : index
    %c0_122 = arith.constant 0 : index
    %89 = vector.load %arg8[%c0_120, %c0_121, %c0_122] : memref<1x9x32xf32, #tpu.memory_space<vmem>>, vector<1x1x32xf32>
    %90 = vector.shape_cast %89 : vector<1x1x32xf32> to vector<32xf32>
    %91 = vector.shape_cast %90 : vector<32xf32> to vector<1x1x32xf32>
    %92 = vector.broadcast %91 : vector<1x1x32xf32> to vector<16x16x32xf32>
    %93 = arith.mulf %88, %92 : vector<16x16x32xf32>
    %cst_123 = arith.constant dense<0.000000e+00> : vector<16x16xf32>
    %94 = vector.multi_reduction <add>, %93, %cst_123 [2] : vector<16x16x32xf32> to vector<16x16xf32>
    %95 = arith.addf %87, %94 : vector<16x16xf32>
    %c0_124 = arith.constant 0 : index
    %c1_125 = arith.constant 1 : index
    %c0_126 = arith.constant 0 : index
    %96 = vector.load %arg11[%c0_124, %c1_125, %c0_126] : memref<18x18x32xf32, #tpu.memory_space<vmem>>, vector<16x16x32xf32>
    %c0_127 = arith.constant 0 : index
    %c1_128 = arith.constant 1 : index
    %c0_129 = arith.constant 0 : index
    %97 = vector.load %arg8[%c0_127, %c1_128, %c0_129] : memref<1x9x32xf32, #tpu.memory_space<vmem>>, vector<1x1x32xf32>
    %98 = vector.shape_cast %97 : vector<1x1x32xf32> to vector<32xf32>
    %99 = vector.shape_cast %98 : vector<32xf32> to vector<1x1x32xf32>
    %100 = vector.broadcast %99 : vector<1x1x32xf32> to vector<16x16x32xf32>
    %101 = arith.mulf %96, %100 : vector<16x16x32xf32>
    %cst_130 = arith.constant dense<0.000000e+00> : vector<16x16xf32>
    %102 = vector.multi_reduction <add>, %101, %cst_130 [2] : vector<16x16x32xf32> to vector<16x16xf32>
    %103 = arith.addf %95, %102 : vector<16x16xf32>
    %c0_131 = arith.constant 0 : index
    %c2_132 = arith.constant 2 : index
    %c0_133 = arith.constant 0 : index
    %104 = vector.load %arg11[%c0_131, %c2_132, %c0_133] : memref<18x18x32xf32, #tpu.memory_space<vmem>>, vector<16x16x32xf32>
    %c0_134 = arith.constant 0 : index
    %c2_135 = arith.constant 2 : index
    %c0_136 = arith.constant 0 : index
    %105 = vector.load %arg8[%c0_134, %c2_135, %c0_136] : memref<1x9x32xf32, #tpu.memory_space<vmem>>, vector<1x1x32xf32>
    %106 = vector.shape_cast %105 : vector<1x1x32xf32> to vector<32xf32>
    %107 = vector.shape_cast %106 : vector<32xf32> to vector<1x1x32xf32>
    %108 = vector.broadcast %107 : vector<1x1x32xf32> to vector<16x16x32xf32>
    %109 = arith.mulf %104, %108 : vector<16x16x32xf32>
    %cst_137 = arith.constant dense<0.000000e+00> : vector<16x16xf32>
    %110 = vector.multi_reduction <add>, %109, %cst_137 [2] : vector<16x16x32xf32> to vector<16x16xf32>
    %111 = arith.addf %103, %110 : vector<16x16xf32>
    %c1_138 = arith.constant 1 : index
    %c0_139 = arith.constant 0 : index
    %c0_140 = arith.constant 0 : index
    %112 = vector.load %arg11[%c1_138, %c0_139, %c0_140] : memref<18x18x32xf32, #tpu.memory_space<vmem>>, vector<16x16x32xf32>
    %c0_141 = arith.constant 0 : index
    %c3 = arith.constant 3 : index
    %c0_142 = arith.constant 0 : index
    %113 = vector.load %arg8[%c0_141, %c3, %c0_142] : memref<1x9x32xf32, #tpu.memory_space<vmem>>, vector<1x1x32xf32>
    %114 = vector.shape_cast %113 : vector<1x1x32xf32> to vector<32xf32>
    %115 = vector.shape_cast %114 : vector<32xf32> to vector<1x1x32xf32>
    %116 = vector.broadcast %115 : vector<1x1x32xf32> to vector<16x16x32xf32>
    %117 = arith.mulf %112, %116 : vector<16x16x32xf32>
    %cst_143 = arith.constant dense<0.000000e+00> : vector<16x16xf32>
    %118 = vector.multi_reduction <add>, %117, %cst_143 [2] : vector<16x16x32xf32> to vector<16x16xf32>
    %119 = arith.addf %111, %118 : vector<16x16xf32>
    %c1_144 = arith.constant 1 : index
    %c1_145 = arith.constant 1 : index
    %c0_146 = arith.constant 0 : index
    %120 = vector.load %arg11[%c1_144, %c1_145, %c0_146] : memref<18x18x32xf32, #tpu.memory_space<vmem>>, vector<16x16x32xf32>
    %c0_147 = arith.constant 0 : index
    %c4 = arith.constant 4 : index
    %c0_148 = arith.constant 0 : index
    %121 = vector.load %arg8[%c0_147, %c4, %c0_148] : memref<1x9x32xf32, #tpu.memory_space<vmem>>, vector<1x1x32xf32>
    %122 = vector.shape_cast %121 : vector<1x1x32xf32> to vector<32xf32>
    %123 = vector.shape_cast %122 : vector<32xf32> to vector<1x1x32xf32>
    %124 = vector.broadcast %123 : vector<1x1x32xf32> to vector<16x16x32xf32>
    %125 = arith.mulf %120, %124 : vector<16x16x32xf32>
    %cst_149 = arith.constant dense<0.000000e+00> : vector<16x16xf32>
    %126 = vector.multi_reduction <add>, %125, %cst_149 [2] : vector<16x16x32xf32> to vector<16x16xf32>
    %127 = arith.addf %119, %126 : vector<16x16xf32>
    %c1_150 = arith.constant 1 : index
    %c2_151 = arith.constant 2 : index
    %c0_152 = arith.constant 0 : index
    %128 = vector.load %arg11[%c1_150, %c2_151, %c0_152] : memref<18x18x32xf32, #tpu.memory_space<vmem>>, vector<16x16x32xf32>
    %c0_153 = arith.constant 0 : index
    %c5 = arith.constant 5 : index
    %c0_154 = arith.constant 0 : index
    %129 = vector.load %arg8[%c0_153, %c5, %c0_154] : memref<1x9x32xf32, #tpu.memory_space<vmem>>, vector<1x1x32xf32>
    %130 = vector.shape_cast %129 : vector<1x1x32xf32> to vector<32xf32>
    %131 = vector.shape_cast %130 : vector<32xf32> to vector<1x1x32xf32>
    %132 = vector.broadcast %131 : vector<1x1x32xf32> to vector<16x16x32xf32>
    %133 = arith.mulf %128, %132 : vector<16x16x32xf32>
    %cst_155 = arith.constant dense<0.000000e+00> : vector<16x16xf32>
    %134 = vector.multi_reduction <add>, %133, %cst_155 [2] : vector<16x16x32xf32> to vector<16x16xf32>
    %135 = arith.addf %127, %134 : vector<16x16xf32>
    %c2_156 = arith.constant 2 : index
    %c0_157 = arith.constant 0 : index
    %c0_158 = arith.constant 0 : index
    %136 = vector.load %arg11[%c2_156, %c0_157, %c0_158] : memref<18x18x32xf32, #tpu.memory_space<vmem>>, vector<16x16x32xf32>
    %c0_159 = arith.constant 0 : index
    %c6 = arith.constant 6 : index
    %c0_160 = arith.constant 0 : index
    %137 = vector.load %arg8[%c0_159, %c6, %c0_160] : memref<1x9x32xf32, #tpu.memory_space<vmem>>, vector<1x1x32xf32>
    %138 = vector.shape_cast %137 : vector<1x1x32xf32> to vector<32xf32>
    %139 = vector.shape_cast %138 : vector<32xf32> to vector<1x1x32xf32>
    %140 = vector.broadcast %139 : vector<1x1x32xf32> to vector<16x16x32xf32>
    %141 = arith.mulf %136, %140 : vector<16x16x32xf32>
    %cst_161 = arith.constant dense<0.000000e+00> : vector<16x16xf32>
    %142 = vector.multi_reduction <add>, %141, %cst_161 [2] : vector<16x16x32xf32> to vector<16x16xf32>
    %143 = arith.addf %135, %142 : vector<16x16xf32>
    %c2_162 = arith.constant 2 : index
    %c1_163 = arith.constant 1 : index
    %c0_164 = arith.constant 0 : index
    %144 = vector.load %arg11[%c2_162, %c1_163, %c0_164] : memref<18x18x32xf32, #tpu.memory_space<vmem>>, vector<16x16x32xf32>
    %c0_165 = arith.constant 0 : index
    %c7 = arith.constant 7 : index
    %c0_166 = arith.constant 0 : index
    %145 = vector.load %arg8[%c0_165, %c7, %c0_166] : memref<1x9x32xf32, #tpu.memory_space<vmem>>, vector<1x1x32xf32>
    %146 = vector.shape_cast %145 : vector<1x1x32xf32> to vector<32xf32>
    %147 = vector.shape_cast %146 : vector<32xf32> to vector<1x1x32xf32>
    %148 = vector.broadcast %147 : vector<1x1x32xf32> to vector<16x16x32xf32>
    %149 = arith.mulf %144, %148 : vector<16x16x32xf32>
    %cst_167 = arith.constant dense<0.000000e+00> : vector<16x16xf32>
    %150 = vector.multi_reduction <add>, %149, %cst_167 [2] : vector<16x16x32xf32> to vector<16x16xf32>
    %151 = arith.addf %143, %150 : vector<16x16xf32>
    %c2_168 = arith.constant 2 : index
    %c2_169 = arith.constant 2 : index
    %c0_170 = arith.constant 0 : index
    %152 = vector.load %arg11[%c2_168, %c2_169, %c0_170] : memref<18x18x32xf32, #tpu.memory_space<vmem>>, vector<16x16x32xf32>
    %c0_171 = arith.constant 0 : index
    %c8 = arith.constant 8 : index
    %c0_172 = arith.constant 0 : index
    %153 = vector.load %arg8[%c0_171, %c8, %c0_172] : memref<1x9x32xf32, #tpu.memory_space<vmem>>, vector<1x1x32xf32>
    %154 = vector.shape_cast %153 : vector<1x1x32xf32> to vector<32xf32>
    %155 = vector.shape_cast %154 : vector<32xf32> to vector<1x1x32xf32>
    %156 = vector.broadcast %155 : vector<1x1x32xf32> to vector<16x16x32xf32>
    %157 = arith.mulf %152, %156 : vector<16x16x32xf32>
    %cst_173 = arith.constant dense<0.000000e+00> : vector<16x16xf32>
    %158 = vector.multi_reduction <add>, %157, %cst_173 [2] : vector<16x16x32xf32> to vector<16x16xf32>
    %159 = arith.addf %151, %158 : vector<16x16xf32>
    %c0_174 = arith.constant 0 : index
    %160 = memref.load %arg9[%c0_174] : memref<1xf32, #tpu.memory_space<smem>>
    %161 = vector.broadcast %160 : f32 to vector<16x16xf32>
    %162 = arith.addf %159, %161 : vector<16x16xf32>
    %c0_175 = arith.constant 0 : index
    %c0_176 = arith.constant 0 : index
    %c0_177 = arith.constant 0 : index
    %c0_178 = arith.constant 0 : index
    %163 = vector.load %arg10[%c0_175, %c0_176, %c0_177, %c0_178] : memref<1x1x16x16xf32, #tpu.memory_space<vmem>>, vector<1x1x16x16xf32>
    %164 = vector.shape_cast %163 : vector<1x1x16x16xf32> to vector<16x16xf32>
    %165 = vector.shape_cast %162 : vector<16x16xf32> to vector<1x1x16x16xf32>
    tpu.vector_store %arg10[%c0_175, %c0_176, %c0_177, %c0_178], %165 {strides = array<i32>} : memref<1x1x16x16xf32, #tpu.memory_space<vmem>>, vector<1x1x16x16xf32>,
    return
  }
  func.func @transform_0(%arg0: i32) -> (i32, i32, i32) {
    %c0_i32 = arith.constant 0 : i32
    %c0_i32_0 = arith.constant 0 : i32
    %c0_i32_1 = arith.constant 0 : i32
    return %arg0, %c0_i32, %c0_i32_0 : i32, i32, i32
  }
  func.func @transform_1(%arg0: i32) -> (i32, i32) {
    %c0_i32 = arith.constant 0 : i32
    %c0_i32_0 = arith.constant 0 : i32
    %c0_i32_1 = arith.constant 0 : i32
    return %c0_i32, %c0_i32_0 : i32, i32
  }
  func.func @transform_2(%arg0: i32) -> (i32, i32) {
    %c0_i32 = arith.constant 0 : i32
    %c0_i32_0 = arith.constant 0 : i32
    %c0_i32_1 = arith.constant 0 : i32
    return %c0_i32, %c0_i32_0 : i32, i32
  }
  func.func @transform_3(%arg0: i32) -> (i32, i32) {
    %c0_i32 = arith.constant 0 : i32
    %c0_i32_0 = arith.constant 0 : i32
    %c0_i32_1 = arith.constant 0 : i32
    return %c0_i32, %c0_i32_0 : i32, i32
  }
  func.func @transform_4(%arg0: i32) -> (i32, i32) {
    %c0_i32 = arith.constant 0 : i32
    %c0_i32_0 = arith.constant 0 : i32
    %c0_i32_1 = arith.constant 0 : i32
    return %c0_i32, %c0_i32_0 : i32, i32
  }
  func.func @transform_5(%arg0: i32) -> (i32, i32) {
    %c0_i32 = arith.constant 0 : i32
    %c0_i32_0 = arith.constant 0 : i32
    %c0_i32_1 = arith.constant 0 : i32
    return %c0_i32, %c0_i32_0 : i32, i32
  }
  func.func @transform_6(%arg0: i32) -> (i32, i32) {
    %c0_i32 = arith.constant 0 : i32
    %c0_i32_0 = arith.constant 0 : i32
    %c0_i32_1 = arith.constant 0 : i32
    return %c0_i32, %c0_i32_0 : i32, i32
  }
  func.func @transform_7(%arg0: i32) -> (i32, i32, i32) {
    %c0_i32 = arith.constant 0 : i32
    %c0_i32_0 = arith.constant 0 : i32
    %c0_i32_1 = arith.constant 0 : i32
    %c0_i32_2 = arith.constant 0 : i32
    return %c0_i32, %c0_i32_0, %c0_i32_1 : i32, i32, i32
  }
  func.func @transform_8(%arg0: i32) -> i32 {
    %c0_i32 = arith.constant 0 : i32
    %c0_i32_0 = arith.constant 0 : i32
    return %c0_i32 : i32
  }
  func.func @transform_9(%arg0: i32) -> (i32, i32, i32, i32) {
    %c0_i32 = arith.constant 0 : i32
    %c0_i32_0 = arith.constant 0 : i32
    %c0_i32_1 = arith.constant 0 : i32
    %c0_i32_2 = arith.constant 0 : i32
    return %arg0, %c0_i32, %c0_i32_0, %c0_i32_1 : i32, i32, i32, i32
  }
}

</mosaic_0001>

<bundles_post_ra>
// kernel: heat_flow_nn.1
= control target key start
LH: loop header
LB: loop body
LE: loop exit
PB: predicated region body
PF: predicated region fallthrough
CT: control target
= control target key end

     0   :  { %s11297_s0 = inlined_call_operand.vmem [shape: f32[2,256,16], index: 0, kind: input, shape index: {}]   ;;  %s11298_s1 = inlined_call_operand.vmem [shape: f32[16,32], index: 1, kind: input, shape index: {}]   ;;  %s11299_s2 = inlined_call_operand.vmem [shape: f32[1,32], index: 2, kind: input, shape index: {}]   ;;  %s11300_s3 = inlined_call_operand.vmem [shape: f32[288,32], index: 3, kind: input, shape index: {}]   ;;  %s11301_s4 = inlined_call_operand.vmem [shape: f32[1,32], index: 4, kind: input, shape index: {}]   ;;  %s11302_s5 = inlined_call_operand.vmem [shape: f32[288,32], index: 5, kind: input, shape index: {}]   ;;  %s11303_s6 = inlined_call_operand.vmem [shape: f32[1,32], index: 6, kind: input, shape index: {}]   ;;  %s11304_s7 = inlined_call_operand.vmem [shape: f32[1,9,32], index: 7, kind: input, shape index: {}]   ;;  %s11305_s8 = inlined_call_operand.<no memory space> [shape: f32[1], index: 8, kind: input, shape index: {}]   ;;  %s11306_s9 = inlined_call_operand.hbm [shape: f32[2,1,16,16], index: 9, kind: output, shape index: {}]  }
   0x1   :  { %14 = sst [smem:[#allocation4]] %s11305_s8 }
   0x2   :  { %15 = vsyncpa [#allocation6], 0 }
   0x3   :  { %17 = vsyncpa [#allocation6 + $0x1], 0  ;;  %s6958_s11 = smov 0   ;;  %s6960_s12 = smov 0  }
   0x4   :  { %s6962_s13 = smov 0   ;;  %s6964_s14 = smov 0  }
   0x5 LB: > { %s6979_s8 = sadd.s32 4294967295, %s6897_s14   ;;  %s6630_s15 = sadd.s32 4294967294, %s6897_s14   ;;  %s6897_s14 = sphi %s6964_s14, %s11552_s14   ;;  %s6893_s13 = sphi %s6962_s13, %s11551_s13   ;;  %s6889_s12 = sphi %s6960_s12, %s11550_s12   ;;  %s6885_s11 = sphi %s6958_s11, %s11549_s11  }
   0x6   : > { %s6983_s16 = sadd.s32 1, %s6897_s14   ;;  %s224_s17 = sadd.s32 1, %s6893_s13 }
   0x7   : > { %s221_s18 = ssub.s32 %s6897_s14, %s6983_s16  ;;  %p234_p0 = scmp.ne.s32.totalorder %s6893_s13, %s6889_s12 }
   0x8   : > { %p222_p1 = scmp.eq.s32.totalorder %s221_s18, 0  ;;  %p235_p2 = scmp.eq.s32.totalorder %s6979_s8, 1 }
   0x9   : > { %p240_p3 = scmp.ne.s32.totalorder %s6889_s12, %s6885_s11  ;;  %p241_p4 = scmp.eq.s32.totalorder %s6630_s15, 1 }
   0xa   : > { %s6994_s19 = scalar_select %p222_p1, %s6893_s13, %s224_s17  }
   0xb   : > { %p6996_p5 = por %p235_p2, %p234_p0  ;;  %p7000_p6 = por %p241_p4, %p240_p3 }
   0xc   : > { %p6633_p7 = scmp.ge.s32.totalorder %s6897_s14, 1  ;;  %p291_p8 = scmp.lt.s32.totalorder %s6897_s14, 3 }
   0xe   : > { %p292_p9 = pnand %p6633_p7, %p291_p8 }
  0x10   : > { %295 = sbr.rel (%p292_p9) target bundleno = 2454 (0x996), region = 56 }
  0x15   : > { %v421_v0 = vld [vmem:[%s11298_s1 + $0x8] sm:$0xff]  ;;  %v420_v1 = vld [vmem:[%s11298_s1] sm:$0xff]  ;;  %p327_p10 = scmp.lt.s32.totalorder %s6979_s8, 1  ;;  %vm426_vm0 = vcmask 130048   ;;  %vm332_vm1 = vcmask 261120   ;;  %v6899_v20 = vmov 0.0  }
  0x16   : > { %537 = vmatpush.msra.mxu0 %v421_v0  ;;  %6740 = vmatpush.msra.mxu2 %v421_v0  ;;  %333 = vst.msk [vmem:[#allocation2] sm:$0xff] %vm332_vm1, %v6899_v20  ;;  %s6900_s10 = smov 32   ;;  %s6901_s15 = smov 64   ;;  %vm335_vm2 = vcmask 254976   ;;  %v7156_v28 = vld [vmem:[%s11299_s2] ss:$0 sm:$0xff] }
  0x17   : > { %s328_s26 = scalar_select %p327_p10, %s6979_s8, 1  ;;  %334 = vst.msk [vmem:[#allocation2 + $0x8] sm:$0xff] %vm332_vm1, %v6899_v20  ;;  %vm925_vm3 = vcmask 523520   ;;  %vm1118_vm4 = vcmask 785920   ;;  %vm1311_vm5 = vcmask 1048320   ;;  %vm6480_vm6 = vcmask 130112  }
  0x18   : > { %538 = vmatpush.msra.mxu0 %v420_v1  ;;  %6741 = vmatpush.msra.mxu2 %v420_v1  ;;  %337 = vst.msk [vmem:[#allocation2 + $0x18] sm:$0xff] %vm332_vm1, %v6899_v20  ;;  %s6902_s22 = smov 96   ;;  %s6409_s23 = sld [smem:[#allocation4]]  ;;  %vm6527_vm7 = vcmask 1041409   ;;  %vm6529_vm8 = vcmask 1042434   ;;  %vm6531_vm9 = vcmask 1043459  }
  0x19   : > { %s6738_s27 = sshll.u32 %s328_s26, 8  ;;  %338 = vst.msk [vmem:[#allocation2 + $0x20] sm:$0xff] %vm332_vm1, %v6899_v20  ;;  %vm6533_vm10 = vcmask 1044484   ;;  %vm6535_vm11 = vcmask 1045509   ;;  %vm6537_vm12 = vcmask 1046534   ;;  %s324_s24 = sand.u32 1, %s6889_s12  }
  0x1a   : > { %s7017_s30 = scalar_lea.vmem %s11297_s0, %s6738_s27  ;;  %340 = vst.msk [vmem:[#allocation2 + $0x30] sm:$0xff] %vm332_vm1, %v6899_v20  ;;  %s6634_s25 = sshll.u32 %s324_s24, 4  ;;  %vm6539_vm13 = vcmask 1047559  }
  0x1b   : > { %v388_v2 = vld [vmem:[%s7017_s30] sm:$0xff]  ;;  %v413_v3 = vld [vmem:[%s7017_s30 + $0xc8] sm:$0xff]  ;;  %v414_v5 = vld [vmem:[%s7017_s30 + $0xd0] sm:$0xff]  ;;  %341 = vst.msk [vmem:[#allocation2 + $0x38] sm:$0xff] %vm332_vm1, %v6899_v20  ;;  %s6739_s26 = sshll.u32 %s6979_s8, 4  ;;  %s326_s27 = scalar_lea.vmem [#allocation5], %s6634_s25 }
  0x1c   : > { %6637 = vmatmul.msk.f32.vlgmr.msra.gmra.mxu0 %vm426_vm0, %v388_v2  ;;  %6662 = vmatmul.msk.f32.vlgmr.msra.gmra.mxu2 %vm426_vm0, %v413_v3  ;;  %v389_v4 = vld [vmem:[%s7017_s30 + $0x8] sm:$0xff]  ;;  %v390_v6 = vld [vmem:[%s7017_s30 + $0x10] sm:$0xff]  ;;  %v415_v7 = vld [vmem:[%s7017_s30 + $0xd8] sm:$0xff]  ;;  %343 = vst.msk [vmem:[#allocation2 + $0x48] sm:$0xff] %vm332_vm1, %v6899_v20  ;;  %s6564_s8 = scalar_lea.hbm %s11306_s9, %s6739_s26  ;;  %s6553_s29 = scalar_lea.sflag [#allocation6], %s324_s24 }
  0x1d   : > { %v391_v8 = vld [vmem:[%s7017_s30 + $0x18] sm:$0xff]  ;;  %v392_v9 = vld [vmem:[%s7017_s30 + $0x20] sm:$0xff]  ;;  %v393_v11 = vld [vmem:[%s7017_s30 + $0x28] sm:$0xff]  ;;  %344 = vst.msk [vmem:[#allocation2 + $0x50] sm:$0xff] %vm332_vm1, %v6899_v20  ;;  %s6855_s25 = scalar_lea.hbm %s11306_s9, 32 }
  0x1e   : > { %v416_v10 = vld [vmem:[%s7017_s30 + $0xe0] sm:$0xff]  ;;  %v417_v12 = vld [vmem:[%s7017_s30 + $0xe8] sm:$0xff]  ;;  %v394_v13 = vld [vmem:[%s7017_s30 + $0x30] sm:$0xff]  ;;  %346 = vst.msk [vmem:[#allocation2 + $0x60] sm:$0xff] %vm332_vm1, %v6899_v20 }
  0x1f   : > { %v395_v14 = vld [vmem:[%s7017_s30 + $0x38] sm:$0xff]  ;;  %v396_v15 = vld [vmem:[%s7017_s30 + $0x40] sm:$0xff]  ;;  %v397_v16 = vld [vmem:[%s7017_s30 + $0x48] sm:$0xff]  ;;  %347 = vst.msk [vmem:[#allocation2 + $0x68] sm:$0xff] %vm332_vm1, %v6899_v20 }
  0x20   : > { %v418_v17 = vld [vmem:[%s7017_s30 + $0xf0] sm:$0xff]  ;;  %v419_v19 = vld [vmem:[%s7017_s30 + $0xf8] sm:$0xff]  ;;  %v765_v22 = vld [vmem:[#allocation2 + $0x1] sm:$0xff]  ;;  %349 = vst.msk [vmem:[#allocation2 + $0x78] sm:$0xff] %vm332_vm1, %v6899_v20 }
  0x21   : > { %v398_v18 = vld [vmem:[%s7017_s30 + $0x50] sm:$0xff]  ;;  %v399_v21 = vld [vmem:[%s7017_s30 + $0x58] sm:$0xff]  ;;  %829 = vrot.lane.b32.xlu0 %v765_v22, %s6900_s10  ;;  %350 = vst.msk [vmem:[#allocation2 + $0x80] sm:$0xff] %vm332_vm1, %v6899_v20  ;;  %v400_v23 = vld [vmem:[%s7017_s30 + $0x60] sm:$0xff] }
  0x22   : > { %352 = vst.msk [vmem:[#allocation2 + $0x90] sm:$0xff] %vm332_vm1, %v6899_v20  ;;  %v401_v24 = vld [vmem:[%s7017_s30 + $0x68] sm:$0xff]  ;;  %v402_v26 = vld [vmem:[%s7017_s30 + $0x70] sm:$0xff]  ;;  %v403_v27 = vld [vmem:[%s7017_s30 + $0x78] sm:$0xff] }
  0x23   : > { %353 = vst.msk [vmem:[#allocation2 + $0x98] sm:$0xff] %vm332_vm1, %v6899_v20  ;;  %v958_v25 = vld [vmem:[#allocation2 + $0x2] sm:$0xff]  ;;  %v406_v48 = vld [vmem:[%s7017_s30 + $0x90] sm:$0xff]  ;;  %v407_v61 = vld [vmem:[%s7017_s30 + $0x98] sm:$0xff] }
  0x24   : > { %6638 = vmatmul.msk.f32.gmra.mxu0 %vm426_vm0, %v389_v4  ;;  %6663 = vmatmul.msk.f32.gmra.mxu2 %vm426_vm0, %v414_v5  ;;  %355 = vst.msk [vmem:[#allocation2 + $0xa8] sm:$0xff] %vm332_vm1, %v6899_v20  ;;  %v404_v31 = vld [vmem:[%s7017_s30 + $0x80] sm:$0xff]  ;;  %v405_v38 = vld [vmem:[%s7017_s30 + $0x88] sm:$0xff] }
  0x25   : > { %356 = vst.msk [vmem:[#allocation2 + $0xb0] sm:$0xff] %vm332_vm1, %v6899_v20  ;;  %1022 = vrot.lane.b32.xlu2 %v958_v25, %s6901_s15  ;;  %v410_v25 = vld [vmem:[%s7017_s30 + $0xb0] sm:$0xff] }
  0x26   : > { %358 = vst.msk [vmem:[#allocation2 + $0xc0] sm:$0xff] %vm332_vm1, %v6899_v20 }
  0x27   : > { %359 = vst.msk [vmem:[#allocation2 + $0xc8] sm:$0xff] %vm332_vm1, %v6899_v20 }
  0x28   : > { %361 = vst.msk [vmem:[#allocation2 + $0xd8] sm:$0xff] %vm332_vm1, %v6899_v20 }
  0x29   : > { %362 = vst.msk [vmem:[#allocation2 + $0xe0] sm:$0xff] %vm332_vm1, %v6899_v20 }
  0x2a   : > { %364 = vst.msk [vmem:[#allocation2 + $0xf0] sm:$0xff] %vm332_vm1, %v6899_v20 }
  0x2b   : > { %365 = vst.msk [vmem:[#allocation2 + $0xf8] sm:$0xff] %vm332_vm1, %v6899_v20 }
  0x2c   : > { %6639 = vmatmul.msk.f32.gmra.mxu0 %vm426_vm0, %v390_v6  ;;  %6664 = vmatmul.msk.f32.gmra.mxu2 %vm426_vm0, %v415_v7  ;;  %367 = vst.msk [vmem:[#allocation2 + $0x108] sm:$0xff] %vm332_vm1, %v6899_v20  ;;  %v408_v7 = vld [vmem:[%s7017_s30 + $0xa0] sm:$0xff] }
  0x2d   : > { %368 = vst.msk [vmem:[#allocation2 + $0x110] sm:$0xff] %vm332_vm1, %v6899_v20 }
  0x2e   : > { %370 = vst.msk [vmem:[#allocation2 + $0x120] sm:$0xff] %vm332_vm1, %v6899_v20 }
  0x2f   : > { %371 = vst.msk [vmem:[#allocation2 + $0x128] sm:$0xff] %vm332_vm1, %v6899_v20 }
  0x30   : > { %373 = vst.msk [vmem:[#allocation2 + $0x138] sm:$0xff] %vm332_vm1, %v6899_v20 }
  0x31   : > { %374 = vst.msk [vmem:[#allocation2 + $0x140] sm:$0xff] %vm332_vm1, %v6899_v20 }
  0x32   : > { %376 = vst.msk [vmem:[#allocation2 + $0x150] sm:$0xff] %vm332_vm1, %v6899_v20 }
  0x33   : > { %377 = vst.msk [vmem:[#allocation2 + $0x158] sm:$0xff] %vm332_vm1, %v6899_v20 }
  0x34   : > { %6640 = vmatmul.msk.f32.gmra.mxu0 %vm426_vm0, %v391_v8  ;;  %6665 = vmatmul.msk.f32.gmra.mxu2 %vm426_vm0, %v416_v10  ;;  %379 = vst.msk [vmem:[#allocation2 + $0x168] sm:$0xff] %vm332_vm1, %v6899_v20 }
  0x35   : > { %380 = vst.msk [vmem:[#allocation2 + $0x170] sm:$0xff] %vm332_vm1, %v6899_v20 }
  0x36   : > { %382 = vst.msk [vmem:[#allocation2 + $0x180] sm:$0xff] %vm332_vm1, %v6899_v20 }
  0x37   : > { %383 = vst.msk [vmem:[#allocation2 + $0x188] sm:$0xff] %vm332_vm1, %v6899_v20 }
  0x38   : > { %385 = vst.msk [vmem:[#allocation2 + $0x198] sm:$0xff] %vm332_vm1, %v6899_v20 }
  0x39   : > { %386 = vst.msk [vmem:[#allocation2 + $0x1a0] sm:$0xff] %vm332_vm1, %v6899_v20 }
  0x3a   : > { %336 = vst.msk [vmem:[#allocation2 + $0x10] sm:$0x3] %vm335_vm2, %v6899_v20 }
  0x3b   : > { %339 = vst.msk [vmem:[#allocation2 + $0x28] sm:$0x3] %vm335_vm2, %v6899_v20 }
  0x3c   : > { %6641 = vmatmul.msk.f32.gmra.mxu0 %vm426_vm0, %v392_v9  ;;  %6666 = vmatmul.msk.f32.gmra.mxu2 %vm426_vm0, %v417_v12  ;;  %342 = vst.msk [vmem:[#allocation2 + $0x40] sm:$0x3] %vm335_vm2, %v6899_v20 }
  0x3d   : > { %345 = vst.msk [vmem:[#allocation2 + $0x58] sm:$0x3] %vm335_vm2, %v6899_v20 }
  0x3e   : > { %348 = vst.msk [vmem:[#allocation2 + $0x70] sm:$0x3] %vm335_vm2, %v6899_v20 }
  0x3f   : > { %351 = vst.msk [vmem:[#allocation2 + $0x88] sm:$0x3] %vm335_vm2, %v6899_v20 }
  0x40   : > { %354 = vst.msk [vmem:[#allocation2 + $0xa0] sm:$0x3] %vm335_vm2, %v6899_v20 }
  0x41   : > { %v766_v29 = vld [vmem:[#allocation2 + $0x9] sm:$0xff]  ;;  %357 = vst.msk [vmem:[#allocation2 + $0xb8] sm:$0x3] %vm335_vm2, %v6899_v20 }
  0x42   : > { %831 = vrot.lane.b32.xlu0 %v766_v29, %s6900_s10  ;;  %360 = vst.msk [vmem:[#allocation2 + $0xd0] sm:$0x3] %vm335_vm2, %v6899_v20  ;;  %v959_v34 = vld [vmem:[#allocation2 + $0xa] sm:$0xff] }
  0x43   : > { %363 = vst.msk [vmem:[#allocation2 + $0xe8] sm:$0x3] %vm335_vm2, %v6899_v20 }
  0x44   : > { %6642 = vmatmul.msk.f32.gmra.mxu0 %vm426_vm0, %v393_v11  ;;  %6667 = vmatmul.msk.f32.gmra.mxu2 %vm426_vm0, %v418_v17  ;;  %366 = vst.msk [vmem:[#allocation2 + $0x100] sm:$0x3] %vm335_vm2, %v6899_v20 }
  0x45   : > { %369 = vst.msk [vmem:[#allocation2 + $0x118] sm:$0x3] %vm335_vm2, %v6899_v20 }
  0x46   : > { %372 = vst.msk [vmem:[#allocation2 + $0x130] sm:$0x3] %vm335_vm2, %v6899_v20 }
  0x47   : > { %375 = vst.msk [vmem:[#allocation2 + $0x148] sm:$0x3] %vm335_vm2, %v6899_v20 }
  0x48   : > { %378 = vst.msk [vmem:[#allocation2 + $0x160] sm:$0x3] %vm335_vm2, %v6899_v20 }
  0x49   : > { %381 = vst.msk [vmem:[#allocation2 + $0x178] sm:$0x3] %vm335_vm2, %v6899_v20 }
  0x4a   : > { %1024 = vrot.lane.b32.xlu0 %v959_v34, %s6901_s15  ;;  %384 = vst.msk [vmem:[#allocation2 + $0x190] sm:$0x3] %vm335_vm2, %v6899_v20  ;;  %v411_v34 = vld [vmem:[%s7017_s30 + $0xb8] sm:$0xff] }
  0x4b   : > { %387 = vst.msk [vmem:[#allocation2 + $0x1a8] sm:$0x3] %vm335_vm2, %v6899_v20 }
  0x4c   : > { %6643 = vmatmul.msk.f32.gmra.mxu0 %vm426_vm0, %v394_v13  ;;  %6668 = vmatmul.msk.f32.gmra.mxu2 %vm426_vm0, %v419_v19  ;;  %v409_v19 = vld [vmem:[%s7017_s30 + $0xa8] sm:$0xff] }
  0x54   : > { %6644 = vmatmul.msk.f32.gmra.mxu0 %vm426_vm0, %v395_v14 }
  0x5c   : > { %6645 = vmatmul.msk.f32.gmra.mxu0 %vm426_vm0, %v396_v15 }
  0x64   : > { %6646 = vmatmul.msk.f32.gmra.mxu0 %vm426_vm0, %v397_v16 }
  0x6c   : > { %6647 = vmatmul.msk.f32.gmra.mxu0 %vm426_vm0, %v398_v18 }
  0x74   : > { %6648 = vmatmul.msk.f32.gmra.mxu0 %vm426_vm0, %v399_v21 }
  0x7c   : > { %6649 = vmatmul.msk.f32.gmra.mxu0 %vm426_vm0, %v400_v23 }
  0x84   : > { %6650 = vmatmul.msk.f32.gmra.mxu0 %vm426_vm0, %v401_v24 }
  0x8c   : > { %6651 = vmatmul.msk.f32.gmra.mxu0 %vm426_vm0, %v402_v26 }
  0x94   : > { %6652 = vmatmul.msk.f32.gmra.mxu0 %vm426_vm0, %v403_v27 }
  0x99   : > { %v540_v30 = vpop.f32.mrf.mxu0 }
  0x9a   : > { %v541_v32 = vadd.f32 %v7156_v28, %v540_v30 }
  0x9c   : > { %v636_v33 = vmax.f32 %v541_v32, 0.0  ;;  %6653 = vmatmul.msk.f32.gmra.mxu0 %vm426_vm0, %v404_v31 }
  0x9e   : > { %669 = vst.msk [vmem:[#allocation2 + $0x19] sm:$0xff] %vm332_vm1, %v636_v33 }
  0x9f   : > { %v615_v35 = vpop.f32.mrf.mxu2 }
  0xa0   : > { %v616_v36 = vadd.f32 %v7156_v28, %v615_v35 }
  0xa1   : > { %v543_v37 = vpop.f32.mrf.mxu0 }
  0xa2   : > { %v661_v39 = vmax.f32 %v616_v36, 0.0  ;;  %v544_v40 = vadd.f32 %v7156_v28, %v543_v37  ;;  %v2180_v37 = vld [vmem:[%s11300_s3 + $0x118] sm:$0xff] }
  0xa3   : > { %6758 = vmatpush.msra.mxu3 %v2180_v37 }
  0xa4   : > { %694 = vst.msk [vmem:[#allocation2 + $0x141] sm:$0xff] %vm332_vm1, %v661_v39  ;;  %v637_v41 = vmax.f32 %v544_v40, 0.0  ;;  %6654 = vmatmul.msk.f32.gmra.mxu0 %vm426_vm0, %v405_v38 }
  0xa5   : > { %v767_v42 = vld [vmem:[#allocation2 + $0x19] sm:$0xff] }
  0xa6   : > { %v1151_v43 = vld [vmem:[#allocation2 + $0x18] sm:$0xff]  ;;  %670 = vst.msk [vmem:[#allocation2 + $0x21] sm:$0xff] %vm332_vm1, %v637_v41  ;;  %833 = vrot.lane.b32.xlu1 %v767_v42, %s6900_s10 }
  0xa7   : > { %v618_v44 = vpop.f32.mrf.mxu2  ;;  %735 = vst.msk [vmem:[#allocation3 + $0x30] sm:$0xff] %vm332_vm1, %v1151_v43 }
  0xa8   : > { %v619_v45 = vadd.f32 %v7156_v28, %v618_v44  ;;  %1376 = vst.msk [vmem:[#allocation3 + $0x8] sm:$0xff] %vm332_vm1, %v767_v42 }
  0xa9   : > { %v546_v46 = vpop.f32.mrf.mxu0 }
  0xaa   : > { %v547_v47 = vadd.f32 %v7156_v28, %v546_v46  ;;  %v662_v49 = vmax.f32 %v619_v45, 0.0  ;;  %v412_v45 = vld [vmem:[%s7017_s30 + $0xc0] sm:$0xff]  ;;  %v2178_v46 = vld [vmem:[%s11300_s3 + $0x108] sm:$0xff] }
  0xab   : > { %v985_v50 = vld [vmem:[#allocation2 + $0x142] sm:$0xff] }
  0xac   : > { %v792_v51 = vld [vmem:[#allocation2 + $0x141] sm:$0xff]  ;;  %v638_v52 = vmax.f32 %v547_v47, 0.0  ;;  %1076 = vrot.lane.b32.xlu2 %v985_v50, %s6901_s15  ;;  %695 = vst.msk [vmem:[#allocation2 + $0x151] sm:$0xff] %vm332_vm1, %v662_v49  ;;  %6655 = vmatmul.msk.f32.gmra.mxu0 %vm426_vm0, %v406_v48 }
  0xad   : > { %883 = vrot.lane.b32.xlu0 %v792_v51, %s6900_s10  ;;  %v1152_v53 = vld [vmem:[#allocation2 + $0x20] sm:$0xff]  ;;  %1401 = vst.msk [vmem:[#allocation3 + $0x260] sm:$0xff] %vm332_vm1, %v792_v51 }
  0xae   : > { %671 = vst.msk [vmem:[#allocation2 + $0x31] sm:$0xff] %vm332_vm1, %v638_v52  ;;  %1215 = vrot.lane.b32.xlu1 %v1151_v43, %s6902_s22  ;;  %v768_v54 = vld [vmem:[#allocation2 + $0x21] sm:$0xff]  ;;  %v2179_v43 = vld [vmem:[%s11300_s3 + $0x110] sm:$0xff] }
  0xaf   : > { %v2008_v55 = vld [vmem:[#allocation2 + $0x142] sm:$0xff]  ;;  %v621_v56 = vpop.f32.mrf.mxu2  ;;  %736 = vst.msk [vmem:[#allocation3 + $0x48] sm:$0xff] %vm332_vm1, %v1152_v53  ;;  %v1408_v63 = vld [vmem:[#allocation2 + $0x1a] sm:$0xff]  ;;  %6759 = vmatpush.msra.mxu3 %v2179_v43 }
  0xb0   : > { %v622_v57 = vadd.f32 %v7156_v28, %v621_v56  ;;  %1377 = vst.msk [vmem:[#allocation3 + $0x20] sm:$0xff] %vm332_vm1, %v768_v54  ;;  %v7208_v59 = vld [vmem:[#allocation2 + $0x22] sm:$0xff] }
  0xb1   : > { %v549_v58 = vpop.f32.mrf.mxu0  ;;  %2040 = vst.msk [vmem:[#allocation3 + $0x238] sm:$0xff] %vm332_vm1, %v2008_v55  ;;  %6760 = vmatpush.msra.mxu3 %v2178_v46  ;;  %v2146_v46 = vld [vmem:[%s11300_s3 + $0x8] sm:$0xff] }
  0xb2   : > { %v550_v60 = vadd.f32 %v7156_v28, %v549_v58  ;;  %v663_v62 = vmax.f32 %v622_v57, 0.0  ;;  %v701_v58 = vld [vmem:[#allocation2] sm:$0xff] }
  0xb3   : > { %v1177_v1 = vld [vmem:[#allocation2 + $0x150] sm:$0xff]  ;;  %733 = vst.msk [vmem:[#allocation3] sm:$0xff] %vm332_vm1, %v701_v58 }
  0xb4   : > { %v639_v0 = vmax.f32 %v550_v60, 0.0  ;;  %1028 = vrot.lane.b32.xlu2 %v7208_v59, %s6901_s15  ;;  %696 = vst.msk [vmem:[#allocation2 + $0x159] sm:$0xff] %vm332_vm1, %v663_v62  ;;  %6656 = vmatmul.msk.f32.gmra.mxu0 %vm426_vm0, %v407_v61  ;;  %v7221_v3 = vld [vmem:[#allocation2 + $0x151] sm:$0xff]  ;;  %v830_v60 = vpop.permute.xlu0 %829 }
  0xb5   : > { %1472 = vrot.lane.b32.xlu0 %v1408_v63, %s6900_s10  ;;  %761 = vst.msk [vmem:[#allocation3 + $0x2a0] sm:$0xff] %vm332_vm1, %v1177_v1  ;;  %v1153_v2 = vld [vmem:[#allocation2 + $0x30] sm:$0xff] }
  0xb6   : > { %672 = vst.msk [vmem:[#allocation2 + $0x39] sm:$0xff] %vm332_vm1, %v639_v0  ;;  %1522 = vrot.lane.b32.xlu1 %v985_v50, %s6900_s10  ;;  %v769_v4 = vld [vmem:[#allocation2 + $0x31] sm:$0xff]  ;;  %v2177_v50 = vld [vmem:[%s11300_s3 + $0x100] sm:$0xff] }
  0xb7   : > { %737 = vst.msk [vmem:[#allocation3 + $0x60] sm:$0xff] %vm332_vm1, %v1153_v2  ;;  %v624_v14 = vpop.f32.mrf.mxu2  ;;  %6761 = vmatpush.msra.mxu3 %v2177_v50  ;;  %v2145_v50 = vld [vmem:[%s11300_s3] sm:$0xff] }
  0xb8   : > { %1402 = vst.msk [vmem:[#allocation3 + $0x278] sm:$0xff] %vm332_vm1, %v7221_v3  ;;  %v625_v17 = vadd.f32 %v7156_v28, %v624_v14 }
  0xb9   : > { %v552_v5 = vpop.f32.mrf.mxu0  ;;  %1378 = vst.msk [vmem:[#allocation3 + $0x38] sm:$0xff] %vm332_vm1, %v769_v4 }
  0xba   : > { %v553_v6 = vadd.f32 %v7156_v28, %v552_v5  ;;  %v664_v20 = vmax.f32 %v625_v17, 0.0  ;;  %926 = vst.msk [vmem:[#allocation3] sm:$0xff] %vm925_vm3, %v830_v60 }
  0xbb   : > { %v794_v8 = vld [vmem:[#allocation2 + $0x159] sm:$0xff] }
  0xbc   : > { %v640_v9 = vmax.f32 %v553_v6, 0.0  ;;  %1217 = vrot.lane.b32.xlu2 %v1152_v53, %s6902_s22  ;;  %v7231_v10 = vld [vmem:[#allocation2 + $0x158] sm:$0xff]  ;;  %1403 = vst.msk [vmem:[#allocation3 + $0x290] sm:$0xff] %vm332_vm1, %v794_v8  ;;  %6657 = vmatmul.msk.f32.gmra.mxu0 %vm426_vm0, %v408_v7  ;;  %v702_v7 = vld [vmem:[#allocation2 + $0x8] sm:$0xff] }
  0xbd   : > { %1267 = vrot.lane.b32.xlu0 %v1177_v1, %s6902_s22  ;;  %v7234_v11 = vld [vmem:[#allocation2 + $0x32] sm:$0xff]  ;;  %762 = vst.msk [vmem:[#allocation3 + $0x2b8] sm:$0xff] %vm332_vm1, %v7231_v10  ;;  %v7249_v16 = vld [vmem:[#allocation2 + $0x15a] sm:$0xff] }
  0xbe   : > { %2017 = vst.msk [vmem:[#allocation3 + $0x10] sm:$0xff] %vm332_vm1, %v7234_v11  ;;  %835 = vrot.lane.b32.xlu1 %v768_v54, %s6900_s10  ;;  %v7242_v12 = vld [vmem:[#allocation2 + $0x38] sm:$0xff] }
  0xbf   : > { %673 = vst.msk [vmem:[#allocation2 + $0x49] sm:$0xff] %vm332_vm1, %v640_v9  ;;  %v7245_v13 = vld [vmem:[#allocation2 + $0x152] sm:$0xff]  ;;  %v627_v26 = vpop.f32.mrf.mxu2  ;;  %v1986_v41 = vld [vmem:[#allocation2 + $0x3a] sm:$0xff] }
  0xc0   : > { %738 = vst.msk [vmem:[#allocation3 + $0x78] sm:$0xff] %vm332_vm1, %v7242_v12  ;;  %v7264_v22 = vld [vmem:[#allocation2 + $0x39] sm:$0xff]  ;;  %v628_v27 = vadd.f32 %v7156_v28, %v627_v26 }
  0xc1   : > { %v555_v15 = vpop.f32.mrf.mxu0  ;;  %2041 = vst.msk [vmem:[#allocation3 + $0x250] sm:$0xff] %vm332_vm1, %v7245_v13  ;;  %v1411_v54 = vld [vmem:[#allocation2 + $0x3a] sm:$0xff] }
  0xc2   : > { %v556_v18 = vadd.f32 %v7156_v28, %v555_v15  ;;  %2042 = vst.msk [vmem:[#allocation3 + $0x268] sm:$0xff] %vm332_vm1, %v7249_v16  ;;  %v665_v31 = vmax.f32 %v628_v27, 0.0  ;;  %v2152_v27 = vld [vmem:[%s11300_s3 + $0x38] sm:$0xff] }
  0xc3   : > { %697 = vst.msk [vmem:[#allocation2 + $0x169] sm:$0xff] %vm332_vm1, %v664_v20  ;;  %v2155_v20 = vld [vmem:[%s11300_s3 + $0x50] sm:$0xff] }
  0xc4   : > { %v641_v21 = vmax.f32 %v556_v18, 0.0  ;;  %837 = vrot.lane.b32.xlu2 %v769_v4, %s6900_s10  ;;  %6658 = vmatmul.msk.f32.gmra.mxu0 %vm426_vm0, %v409_v19  ;;  %1379 = vst.msk [vmem:[#allocation3 + $0x50] sm:$0xff] %vm332_vm1, %v7264_v22  ;;  %v2159_v4 = vld [vmem:[%s11300_s3 + $0x70] sm:$0xff]  ;;  %v2156_v18 = vld [vmem:[%s11300_s3 + $0x58] sm:$0xff] }
  0xc5   : > { %1219 = vrot.lane.b32.xlu0 %v1153_v2, %s6902_s22  ;;  %698 = vst.msk [vmem:[#allocation2 + $0x171] sm:$0xff] %vm332_vm1, %v665_v31 }
  0xc6   : > { %674 = vst.msk [vmem:[#allocation2 + $0x51] sm:$0xff] %vm332_vm1, %v641_v21  ;;  %1026 = vrot.lane.b32.xlu1 %v1408_v63, %s6901_s15  ;;  %v7303_v40 = vld [vmem:[#allocation2 + $0x49] sm:$0xff] }
  0xc7   : > { %1380 = vst.msk [vmem:[#allocation3 + $0x68] sm:$0xff] %vm332_vm1, %v7303_v40  ;;  %v7324_v48 = vld [vmem:[#allocation2 + $0x48] sm:$0xff]  ;;  %v630_v61 = vpop.f32.mrf.mxu2 }
  0xc8   : > { %2018 = vst.msk [vmem:[#allocation3 + $0x28] sm:$0xff] %vm332_vm1, %v1986_v41  ;;  %v631_v62 = vadd.f32 %v7156_v28, %v630_v61 }
  0xc9   : > { %v558_v23 = vpop.f32.mrf.mxu0  ;;  %739 = vst.msk [vmem:[#allocation3 + $0x90] sm:$0xff] %vm332_vm1, %v7324_v48 }
  0xca   : > { %v559_v24 = vadd.f32 %v7156_v28, %v558_v23  ;;  %v7274_v30 = vld [vmem:[#allocation2 + $0x169] sm:$0xff]  ;;  %v666_v1 = vmax.f32 %v631_v62, 0.0  ;;  %734 = vst.msk [vmem:[#allocation3 + $0x18] sm:$0xff] %vm332_vm1, %v702_v7 }
  0xcb   : > { %1404 = vst.msk [vmem:[#allocation3 + $0x2a8] sm:$0xff] %vm332_vm1, %v7274_v30  ;;  %v7288_v36 = vld [vmem:[#allocation2 + $0x168] sm:$0xff] }
  0xcc   : > { %v642_v29 = vmax.f32 %v559_v24, 0.0  ;;  %1665 = vrot.lane.b32.xlu2 %v1153_v2, %s6901_s15  ;;  %6659 = vmatmul.msk.f32.gmra.mxu0 %vm426_vm0, %v410_v25  ;;  %763 = vst.msk [vmem:[#allocation3 + $0x2d0] sm:$0xff] %vm332_vm1, %v7288_v36  ;;  %v7299_v38 = vld [vmem:[#allocation2 + $0x170] sm:$0xff]  ;;  %v2160_v2 = vld [vmem:[%s11300_s3 + $0x78] sm:$0xff]  ;;  %v2154_v23 = vld [vmem:[%s11300_s3 + $0x48] sm:$0xff] }
  0xcd   : > { %1078 = vrot.lane.b32.xlu0 %v7245_v13, %s6901_s15  ;;  %v7301_v39 = vld [vmem:[#allocation2 + $0x16a] sm:$0xff]  ;;  %764 = vst.msk [vmem:[#allocation3 + $0x2e8] sm:$0xff] %vm332_vm1, %v7299_v38  ;;  %v7345_v55 = vld [vmem:[#allocation2 + $0x172] sm:$0xff]  ;;  %2281 = vmatpush.msra.mxu1 %v2160_v2  ;;  %v2153_v25 = vld [vmem:[%s11300_s3 + $0x40] sm:$0xff] }
  0xce   : > { %675 = vst.msk [vmem:[#allocation2 + $0x61] sm:$0xff] %vm332_vm1, %v642_v29  ;;  %1474 = vrot.lane.b32.xlu1 %v7208_v59, %s6900_s10  ;;  %v7340_v52 = vld [vmem:[#allocation2 + $0x171] sm:$0xff]  ;;  %6742 = vmatpush.msrb.mxu2 %v2160_v2 }
  0xcf   : > { %2043 = vst.msk [vmem:[#allocation3 + $0x280] sm:$0xff] %vm332_vm1, %v7301_v39  ;;  %v7358_v59 = vld [vmem:[#allocation2 + $0x50] sm:$0xff]  ;;  %2282 = vmatpush.msra.mxu1 %v2159_v4 }
  0xd0   : > { %1405 = vst.msk [vmem:[#allocation3 + $0x2c0] sm:$0xff] %vm332_vm1, %v7340_v52  ;;  %6743 = vmatpush.msrb.mxu2 %v2159_v4  ;;  %v7388_v9 = vld [vmem:[#allocation2 + $0x51] sm:$0xff] }
  0xd1   : > { %v561_v32 = vpop.f32.mrf.mxu0  ;;  %2044 = vst.msk [vmem:[#allocation3 + $0x298] sm:$0xff] %vm332_vm1, %v7345_v55  ;;  %v1987_v14 = vld [vmem:[#allocation2 + $0x4a] sm:$0xff]  ;;  %v1988_v21 = vld [vmem:[#allocation2 + $0x52] sm:$0xff] }
  0xd2   : > { %v562_v33 = vadd.f32 %v7156_v28, %v561_v32  ;;  %740 = vst.msk [vmem:[#allocation3 + $0xa8] sm:$0xff] %vm332_vm1, %v7358_v59  ;;  %v964_v2 = vld [vmem:[#allocation2 + $0x4a] sm:$0xff] }
  0xd3   : > { %699 = vst.msk [vmem:[#allocation2 + $0x181] sm:$0xff] %vm332_vm1, %v666_v1 }
  0xd4   : > { %v643_v35 = vmax.f32 %v562_v33, 0.0  ;;  %887 = vrot.lane.b32.xlu2 %v794_v8, %s6900_s10  ;;  %6660 = vmatmul.msk.f32.gmra.mxu0 %vm426_vm0, %v411_v34  ;;  %v2158_v8 = vld [vmem:[%s11300_s3 + $0x68] sm:$0xff]  ;;  %1381 = vst.msk [vmem:[#allocation3 + $0x80] sm:$0xff] %vm332_vm1, %v7388_v9 }
  0xd5   : > { %1526 = vrot.lane.b32.xlu0 %v7249_v16, %s6900_s10  ;;  %2283 = vmatpush.msra.mxu1 %v2158_v8  ;;  %2019 = vst.msk [vmem:[#allocation3 + $0x40] sm:$0xff] %vm332_vm1, %v1987_v14  ;;  %v2150_v34 = vld [vmem:[%s11300_s3 + $0x28] sm:$0xff] }
  0xd6   : > { %676 = vst.msk [vmem:[#allocation2 + $0x69] sm:$0xff] %vm332_vm1, %v643_v35  ;;  %885 = vrot.lane.b32.xlu1 %v7221_v3, %s6900_s10  ;;  %6744 = vmatpush.msrb.mxu2 %v2158_v8  ;;  %v2149_v35 = vld [vmem:[%s11300_s3 + $0x20] sm:$0xff] }
  0xd7   : > { %2020 = vst.msk [vmem:[#allocation3 + $0x58] sm:$0xff] %vm332_vm1, %v1988_v21  ;;  %v7467_v43 = vld [vmem:[#allocation2 + $0x61] sm:$0xff] }
  0xd8   : > { %1382 = vst.msk [vmem:[#allocation3 + $0x98] sm:$0xff] %vm332_vm1, %v7467_v43 }
  0xd9   : > { %v564_v42 = vpop.f32.mrf.mxu0 }
  0xda   : > { %v565_v44 = vadd.f32 %v7156_v28, %v564_v42  ;;  %v2147_v42 = vld [vmem:[%s11300_s3 + $0x10] sm:$0xff] }
  0xdc   : > { %v644_v47 = vmax.f32 %v565_v44, 0.0  ;;  %1524 = vrot.lane.b32.xlu2 %v7245_v13, %s6900_s10  ;;  %6661 = vmatmul.msk.f32.gmra.mxu0 %vm426_vm0, %v412_v45  ;;  %v1374_v44 = vld [vmem:[#allocation2 + $0x181] sm:$0xff] }
  0xdd   : > { %1030 = vrot.lane.b32.xlu0 %v7234_v11, %s6901_s15  ;;  %v7326_v49 = vld [vmem:[#allocation2 + $0x62] sm:$0xff]  ;;  %v7334_v51 = vld [vmem:[#allocation2 + $0x6a] sm:$0xff]  ;;  %1406 = vst.msk [vmem:[#allocation3 + $0x2d8] sm:$0xff] %vm332_vm1, %v1374_v44 }
  0xde   : > { %2021 = vst.msk [vmem:[#allocation3 + $0x70] sm:$0xff] %vm332_vm1, %v7326_v49  ;;  %1080 = vrot.lane.b32.xlu1 %v7249_v16, %s6901_s15 }
  0xdf   : > { %2022 = vst.msk [vmem:[#allocation3 + $0x88] sm:$0xff] %vm332_vm1, %v7334_v51 }
  0xe0   : > { %677 = vst.msk [vmem:[#allocation2 + $0x79] sm:$0xff] %vm332_vm1, %v644_v47  ;;  %v7480_v47 = vld [vmem:[#allocation2 + $0x60] sm:$0xff] }
  0xe1   : > { %v567_v53 = vpop.f32.mrf.mxu0  ;;  %741 = vst.msk [vmem:[#allocation3 + $0xc0] sm:$0xff] %vm332_vm1, %v7480_v47 }
  0xe2   : > { %v568_v56 = vadd.f32 %v7156_v28, %v567_v53  ;;  %v832_v53 = vpop.permute.xlu0 %831 }
  0xe3   : > { %927 = vst.msk [vmem:[#allocation3 + $0x18] sm:$0xff] %vm925_vm3, %v832_v53 }
  0xe4   : > { %v645_v57 = vmax.f32 %v568_v56, 0.0  ;;  %839 = vrot.lane.b32.xlu2 %v7264_v22, %s6900_s10  ;;  %v1023_v22 = vpop.permute.xlu2 %1022  ;;  %v774_v56 = vld [vmem:[#allocation2 + $0x69] sm:$0xff] }
  0xe5   : > { %1478 = vrot.lane.b32.xlu0 %v1411_v54, %s6900_s10  ;;  %1119 = vst.msk [vmem:[#allocation3] sm:$0xff] %vm1118_vm4, %v1023_v22 }
  0xe6   : > { %678 = vst.msk [vmem:[#allocation2 + $0x81] sm:$0xff] %vm332_vm1, %v645_v57  ;;  %1269 = vrot.lane.b32.xlu1 %v7231_v10, %s6902_s22  ;;  %v633_v10 = vpop.f32.mrf.mxu2 }
  0xe7   : > { %v634_v13 = vadd.f32 %v7156_v28, %v633_v10  ;;  %1383 = vst.msk [vmem:[#allocation3 + $0xb0] sm:$0xff] %vm332_vm1, %v774_v56  ;;  %v7527_v10 = vld [vmem:[#allocation2 + $0x78] sm:$0xff] }
  0xe8   : > { %743 = vst.msk [vmem:[#allocation3 + $0xf0] sm:$0xff] %vm332_vm1, %v7527_v10 }
  0xe9   : > { %v570_v63 = vpop.f32.mrf.mxu0  ;;  %v667_v17 = vmax.f32 %v634_v13, 0.0  ;;  %v1181_v13 = vld [vmem:[#allocation2 + $0x180] sm:$0xff] }
  0xea   : > { %v571_v0 = vadd.f32 %v7156_v28, %v570_v63 }
  0xeb   : > { %700 = vst.msk [vmem:[#allocation2 + $0x189] sm:$0xff] %vm332_vm1, %v667_v17 }
  0xec   : > { %v646_v3 = vmax.f32 %v571_v0, 0.0  ;;  %1476 = vrot.lane.b32.xlu2 %v7234_v11, %s6900_s10  ;;  %v2157_v11 = vld [vmem:[%s11300_s3 + $0x60] sm:$0xff]  ;;  %v1025_v0 = vpop.permute.xlu0 %1024 }
  0xed   : > { %889 = vrot.lane.b32.xlu0 %v7274_v30, %s6900_s10  ;;  %v7377_v5 = vld [vmem:[#allocation2 + $0x7a] sm:$0xff]  ;;  %v7379_v6 = vld [vmem:[#allocation2 + $0x82] sm:$0xff]  ;;  %2284 = vmatpush.msra.mxu1 %v2157_v11  ;;  %v2151_v30 = vld [vmem:[%s11300_s3 + $0x30] sm:$0xff]  ;;  %1120 = vst.msk [vmem:[#allocation3 + $0x18] sm:$0xff] %vm1118_vm4, %v1025_v0 }
  0xee   : > { %2023 = vst.msk [vmem:[#allocation3 + $0xa0] sm:$0xff] %vm332_vm1, %v7377_v5  ;;  %1032 = vrot.lane.b32.xlu1 %v1411_v54, %s6901_s15  ;;  %6745 = vmatpush.msrb.mxu2 %v2157_v11 }
  0xef   : > { %679 = vst.msk [vmem:[#allocation2 + $0x91] sm:$0xff] %vm332_vm1, %v646_v3  ;;  %2285 = vmatpush.msra.mxu1 %v2156_v18 }
  0xf0   : > { %2024 = vst.msk [vmem:[#allocation3 + $0xb8] sm:$0xff] %vm332_vm1, %v7379_v6  ;;  %6746 = vmatpush.msrb.mxu2 %v2156_v18 }
  0xf1   : > { %v573_v15 = vpop.f32.mrf.mxu0  ;;  %2286 = vmatpush.msra.mxu1 %v2155_v20 }
  0xf2   : > { %v574_v16 = vadd.f32 %v7156_v28, %v573_v15  ;;  %6747 = vmatpush.msrb.mxu2 %v2155_v20  ;;  %v7435_v31 = vld [vmem:[#allocation2 + $0x182] sm:$0xff]  ;;  %v7510_v63 = vld [vmem:[#allocation2 + $0x18a] sm:$0xff] }
  0xf3   : > { %2287 = vmatpush.msra.mxu1 %v2154_v23  ;;  %2045 = vst.msk [vmem:[#allocation3 + $0x2b0] sm:$0xff] %vm332_vm1, %v7435_v31  ;;  %v1375_v4 = vld [vmem:[#allocation2 + $0x189] sm:$0xff] }
  0xf4   : > { %v647_v19 = vmax.f32 %v574_v16, 0.0  ;;  %1271 = vrot.lane.b32.xlu2 %v7288_v36, %s6902_s22  ;;  %6748 = vmatpush.msrb.mxu2 %v2154_v23  ;;  %2046 = vst.msk [vmem:[#allocation3 + $0x2c8] sm:$0xff] %vm332_vm1, %v7510_v63 }
  0xf5   : > { %841 = vrot.lane.b32.xlu0 %v7303_v40, %s6900_s10  ;;  %2288 = vmatpush.msra.mxu1 %v2153_v25  ;;  %v2148_v40 = vld [vmem:[%s11300_s3 + $0x18] sm:$0xff]  ;;  %1407 = vst.msk [vmem:[#allocation3 + $0x2f0] sm:$0xff] %vm332_vm1, %v1375_v4 }
  0xf6   : > { %680 = vst.msk [vmem:[#allocation2 + $0x99] sm:$0xff] %vm332_vm1, %v647_v19  ;;  %1221 = vrot.lane.b32.xlu1 %v7242_v12, %s6902_s22  ;;  %6749 = vmatpush.msrb.mxu2 %v2153_v25 }
  0xf7   : > { %v2072_v24 = vld [vmem:[#allocation3 + $0xb8] sm:$0xff]  ;;  %2289 = vmatpush.msra.mxu1 %v2152_v27 }
  0xf8   : > { %6676 = vmatmul.msk.f32.vlgmr.msra.gmra.mxu3 %vm332_vm1, %v2072_v24  ;;  %6750 = vmatpush.msrb.mxu2 %v2152_v27 }
  0xf9   : > { %v576_v12 = vpop.f32.mrf.mxu0  ;;  %2290 = vmatpush.msra.mxu1 %v2151_v30 }
  0xfa   : > { %v577_v26 = vadd.f32 %v7156_v28, %v576_v12  ;;  %6751 = vmatpush.msrb.mxu2 %v2151_v30 }
  0xfb   : > { %2291 = vmatpush.msra.mxu1 %v2150_v34 }
  0xfc   : > { %v648_v29 = vmax.f32 %v577_v26, 0.0  ;;  %1223 = vrot.lane.b32.xlu2 %v7324_v48, %s6902_s22  ;;  %6752 = vmatpush.msrb.mxu2 %v2150_v34  ;;  %v7482_v48 = vld [vmem:[#allocation2 + $0x68] sm:$0xff] }
  0xfd   : > { %1084 = vrot.lane.b32.xlu0 %v7345_v55, %s6901_s15  ;;  %v7437_v32 = vld [vmem:[#allocation2 + $0x92] sm:$0xff]  ;;  %v7439_v33 = vld [vmem:[#allocation2 + $0x9a] sm:$0xff]  ;;  %2292 = vmatpush.msra.mxu1 %v2149_v35  ;;  %742 = vst.msk [vmem:[#allocation3 + $0xd8] sm:$0xff] %vm332_vm1, %v7482_v48 }
  0xfe   : > { %681 = vst.msk [vmem:[#allocation2 + $0xa9] sm:$0xff] %vm332_vm1, %v648_v29  ;;  %891 = vrot.lane.b32.xlu1 %v7340_v52, %s6900_s10  ;;  %6753 = vmatpush.msrb.mxu2 %v2149_v35  ;;  %v965_v52 = vld [vmem:[#allocation2 + $0x52] sm:$0xff]  ;;  %v1182_v35 = vld [vmem:[#allocation2 + $0x188] sm:$0xff] }
  0xff   : > { %2025 = vst.msk [vmem:[#allocation3 + $0xd0] sm:$0xff] %vm332_vm1, %v7437_v32  ;;  %2293 = vmatpush.msra.mxu1 %v2148_v40  ;;  %v7561_v29 = vld [vmem:[#allocation2 + $0x79] sm:$0xff] }
 0x100   : > { %2026 = vst.msk [vmem:[#allocation3 + $0xe8] sm:$0xff] %vm332_vm1, %v7439_v33  ;;  %6754 = vmatpush.msrb.mxu2 %v2148_v40 }
 0x101   : > { %v579_v36 = vpop.f32.mrf.mxu0  ;;  %2294 = vmatpush.msra.mxu1 %v2147_v42  ;;  %1384 = vst.msk [vmem:[#allocation3 + $0xc8] sm:$0xff] %vm332_vm1, %v7561_v29 }
 0x102   : > { %v580_v37 = vadd.f32 %v7156_v28, %v579_v36  ;;  %6755 = vmatpush.msrb.mxu2 %v2147_v42  ;;  %v7568_v36 = vld [vmem:[#allocation2 + $0x81] sm:$0xff] }
 0x103   : > { %2295 = vmatpush.msra.mxu1 %v2146_v46  ;;  %1385 = vst.msk [vmem:[#allocation3 + $0xe0] sm:$0xff] %vm332_vm1, %v7568_v36 }
 0x104   : > { %v649_v41 = vmax.f32 %v580_v37, 0.0  ;;  %1082 = vrot.lane.b32.xlu2 %v7301_v39, %s6901_s15  ;;  %6756 = vmatpush.msrb.mxu2 %v2146_v46 }
 0x105   : > { %1273 = vrot.lane.b32.xlu0 %v7299_v38, %s6902_s22  ;;  %2296 = vmatpush.msra.mxu1 %v2145_v50 }
 0x106   : > { %682 = vst.msk [vmem:[#allocation2 + $0xb1] sm:$0xff] %vm332_vm1, %v649_v41  ;;  %v7472_v45 = vpop.permute.xlu2 %1076  ;;  %v2075_v38 = vld [vmem:[#allocation3 + $0xd0] sm:$0xff]  ;;  %1528 = vrot.lane.b32.xlu1 %v7301_v39, %s6900_s10  ;;  %6757 = vmatpush.msrb.mxu2 %v2145_v50 }
 0x107   : > { %6677 = vmatmul.msk.f32.gmra.mxu3 %vm332_vm1, %v2075_v38  ;;  %v2078_v58 = vld [vmem:[#allocation3 + $0xe8] sm:$0xff] }
 0x109   : > { %v582_v39 = vpop.f32.mrf.mxu0 }
 0x10a   : > { %v583_v54 = vadd.f32 %v7156_v28, %v582_v39  ;;  %v777_v39 = vld [vmem:[#allocation2 + $0x91] sm:$0xff] }
 0x10b   : > { %1386 = vst.msk [vmem:[#allocation3 + $0xf8] sm:$0xff] %vm332_vm1, %v777_v39 }
 0x10c   : > { %v650_v57 = vmax.f32 %v583_v54, 0.0  ;;  %1530 = vrot.lane.b32.xlu2 %v7345_v55, %s6900_s10 }
 0x10d   : > { %1036 = vrot.lane.b32.xlu0 %v965_v52, %s6901_s15  ;;  %v7498_v60 = vld [vmem:[#allocation2 + $0xaa] sm:$0xff]  ;;  %v7500_v61 = vld [vmem:[#allocation2 + $0xb2] sm:$0xff] }
 0x10e   : > { %683 = vst.msk [vmem:[#allocation2 + $0xc1] sm:$0xff] %vm332_vm1, %v650_v57  ;;  %v7503_v62 = vpop.permute.xlu2 %1028  ;;  %843 = vrot.lane.b32.xlu1 %v7388_v9, %s6900_s10 }
 0x10f   : > { %6678 = vmatmul.msk.f32.gmra.mxu3 %vm332_vm1, %v2078_v58  ;;  %2027 = vst.msk [vmem:[#allocation3 + $0x100] sm:$0xff] %vm332_vm1, %v7498_v60 }
 0x110   : > { %2028 = vst.msk [vmem:[#allocation3 + $0x118] sm:$0xff] %vm332_vm1, %v7500_v61 }
 0x111   : > { %v585_v55 = vpop.f32.mrf.mxu0 }
 0x112   : > { %v586_v1 = vadd.f32 %v7156_v28, %v585_v55 }
 0x114   : > { %v651_v3 = vmax.f32 %v586_v1, 0.0  ;;  %1034 = vrot.lane.b32.xlu2 %v964_v2, %s6901_s15 }
 0x115   : > { %1225 = vrot.lane.b32.xlu0 %v7358_v59, %s6902_s22 }
 0x116   : > { %684 = vst.msk [vmem:[#allocation2 + $0xc9] sm:$0xff] %vm332_vm1, %v651_v3  ;;  %v2081_v7 = vld [vmem:[#allocation3 + $0x100] sm:$0xff]  ;;  %v1218_v8 = vpop.permute.xlu2 %1217  ;;  %1480 = vrot.lane.b32.xlu1 %v964_v2, %s6900_s10 }
 0x117   : > { %6679 = vmatmul.msk.f32.gmra.mxu3 %vm332_vm1, %v2081_v7  ;;  %1313 = vst.msk [vmem:[#allocation3 + $0x18] sm:$0xff] %vm1311_vm5, %v1218_v8  ;;  %v2084_v15 = vld [vmem:[#allocation3 + $0x118] sm:$0xff] }
 0x118   : > { %v834_v9 = vpop.permute.xlu1 %833 }
 0x119   : > { %928 = vst.msk [vmem:[#allocation3 + $0x30] sm:$0xff] %vm925_vm3, %v834_v9  ;;  %v588_v59 = vpop.f32.mrf.mxu0 }
 0x11a   : > { %v589_v11 = vadd.f32 %v7156_v28, %v588_v59 }
 0x11c   : > { %v652_v14 = vmax.f32 %v589_v11, 0.0  ;;  %1482 = vrot.lane.b32.xlu2 %v965_v52, %s6900_s10 }
 0x11d   : > { %1532 = vrot.lane.b32.xlu0 %v7435_v31, %s6900_s10  ;;  %v7535_v16 = vld [vmem:[#allocation2 + $0xc2] sm:$0xff]  ;;  %v7543_v19 = vld [vmem:[#allocation2 + $0xca] sm:$0xff] }
 0x11e   : > { %685 = vst.msk [vmem:[#allocation2 + $0xd9] sm:$0xff] %vm332_vm1, %v652_v14  ;;  %v838_v18 = vpop.permute.xlu2 %837  ;;  %1275 = vrot.lane.b32.xlu1 %v1181_v13, %s6902_s22  ;;  %v7563_v31 = vld [vmem:[#allocation2 + $0x80] sm:$0xff]  ;;  %v2052_v38 = vld [vmem:[#allocation3 + $0x18] sm:$0xff] }
 0x11f   : > { %v7538_v17 = vpop.permute.xlu0 %883  ;;  %6680 = vmatmul.msk.f32.gmra.mxu3 %vm332_vm1, %v2084_v15  ;;  %930 = vst.msk [vmem:[#allocation3 + $0x60] sm:$0xff] %vm925_vm3, %v838_v18 }
 0x120   : > { %v1216_v20 = vpop.permute.xlu1 %1215  ;;  %2029 = vst.msk [vmem:[#allocation3 + $0x130] sm:$0xff] %vm332_vm1, %v7535_v16 }
 0x121   : > { %1312 = vst.msk [vmem:[#allocation3] sm:$0xff] %vm1311_vm5, %v1216_v20  ;;  %v591_v21 = vpop.f32.mrf.mxu0  ;;  %v780_v20 = vld [vmem:[#allocation2 + $0xb1] sm:$0xff] }
 0x122   : > { %v592_v22 = vadd.f32 %v7156_v28, %v591_v21  ;;  %2030 = vst.msk [vmem:[#allocation3 + $0x148] sm:$0xff] %vm332_vm1, %v7543_v19 }
 0x123   : > { %744 = vst.msk [vmem:[#allocation3 + $0x108] sm:$0xff] %vm332_vm1, %v7563_v31 }
 0x124   : > { %v653_v23 = vmax.f32 %v592_v22, 0.0  ;;  %845 = vrot.lane.b32.xlu2 %v7467_v43, %s6900_s10  ;;  %1389 = vst.msk [vmem:[#allocation3 + $0x140] sm:$0xff] %vm332_vm1, %v780_v20  ;;  %v7657_v22 = vld [vmem:[#allocation2 + $0xa9] sm:$0xff] }
 0x125   : > { %847 = vrot.lane.b32.xlu0 %v774_v56, %s6900_s10  ;;  %1388 = vst.msk [vmem:[#allocation3 + $0x128] sm:$0xff] %vm332_vm1, %v7657_v22 }
 0x126   : > { %686 = vst.msk [vmem:[#allocation2 + $0xe1] sm:$0xff] %vm332_vm1, %v653_v23  ;;  %v1666_v25 = vpop.permute.xlu2 %1665  ;;  %1227 = vrot.lane.b32.xlu1 %v7480_v47, %s6902_s22 }
 0x127   : > { %v1473_v24 = vpop.permute.xlu0 %1472  ;;  %v2087_v12 = vld [vmem:[#allocation3 + $0x130] sm:$0xff] }
 0x128   : > { %1568 = vst.msk [vmem:[#allocation3 + $0x8] sm:$0xff] %vm925_vm3, %v1473_v24  ;;  %6681 = vmatmul.msk.f32.gmra.mxu3 %vm332_vm1, %v2087_v12  ;;  %v1523_v26 = vpop.permute.xlu1 %1522  ;;  %v2049_v27 = vld [vmem:[#allocation3] sm:$0xff] }
 0x129   : > { %1761 = vst.msk [vmem:[#allocation3 + $0x8] sm:$0xff] %vm1118_vm4, %v1666_v25  ;;  %2297 = vmatmul.f32.vlgmr.msra.gmra.mxu1 %v2049_v27  ;;  %v594_v30 = vpop.f32.mrf.mxu0  ;;  %v2090_v40 = vld [vmem:[#allocation3 + $0x148] sm:$0xff]  ;;  %v7672_v27 = vld [vmem:[#allocation2 + $0xa8] sm:$0xff] }
 0x12a   : > { %1593 = vst.msk [vmem:[#allocation3 + $0x260] sm:$0xff] %vm925_vm3, %v1523_v26  ;;  %v595_v34 = vadd.f32 %v7156_v28, %v594_v30 }
 0x12b   : > { %747 = vst.msk [vmem:[#allocation3 + $0x150] sm:$0xff] %vm332_vm1, %v7672_v27 }
 0x12c   : > { %1277 = vrot.lane.b32.xlu2 %v1182_v35, %s6902_s22  ;;  %v654_v37 = vmax.f32 %v595_v34, 0.0  ;;  %v7683_v34 = vld [vmem:[#allocation2 + $0xb0] sm:$0xff] }
 0x12d   : > { %1484 = vrot.lane.b32.xlu0 %v7326_v49, %s6900_s10  ;;  %v7577_v41 = vld [vmem:[#allocation2 + $0xda] sm:$0xff]  ;;  %v7588_v46 = vld [vmem:[#allocation2 + $0xe2] sm:$0xff]  ;;  %748 = vst.msk [vmem:[#allocation3 + $0x168] sm:$0xff] %vm332_vm1, %v7683_v34 }
 0x12e   : > { %v888_v43 = vpop.permute.xlu2 %887  ;;  %1534 = vrot.lane.b32.xlu1 %v7510_v63, %s6900_s10  ;;  %2031 = vst.msk [vmem:[#allocation3 + $0x160] sm:$0xff] %vm332_vm1, %v7577_v41  ;;  %v7610_v63 = vld [vmem:[#allocation2 + $0x98] sm:$0xff] }
 0x12f   : > { %v7579_v42 = vpop.permute.xlu0 %1267  ;;  %687 = vst.msk [vmem:[#allocation2 + $0xf1] sm:$0xff] %vm332_vm1, %v654_v37  ;;  %v7694_v37 = vld [vmem:[#allocation2 + $0xc0] sm:$0xff] }
 0x130   : > { %6682 = vmatmul.msk.f32.gmra.mxu3 %vm332_vm1, %v2090_v40  ;;  %955 = vst.msk [vmem:[#allocation3 + $0x2b8] sm:$0xff] %vm925_vm3, %v888_v43  ;;  %v836_v44 = vpop.permute.xlu1 %835 }
 0x131   : > { %929 = vst.msk [vmem:[#allocation3 + $0x48] sm:$0xff] %vm925_vm3, %v836_v44  ;;  %2300 = vmatmul.f32.gmra.mxu1 %v2052_v38  ;;  %v597_v47 = vpop.f32.mrf.mxu0  ;;  %v6823_v44 = vld [vmem:[%s11299_s2] ss:$0 sm:$0xff] }
 0x132   : > { %1122 = vst.msk [vmem:[#allocation3 + $0x48] sm:$0xff] %vm1118_vm4, %v7503_v62  ;;  %v598_v50 = vadd.f32 %v7156_v28, %v597_v47  ;;  %v7608_v62 = vld [vmem:[#allocation2 + $0x90] sm:$0xff] }
 0x133   : > { %2032 = vst.msk [vmem:[#allocation3 + $0x178] sm:$0xff] %vm332_vm1, %v7588_v46 }
 0x134   : > { %1040 = vrot.lane.b32.xlu2 %v7334_v51, %s6901_s15  ;;  %v655_v52 = vmax.f32 %v598_v50, 0.0  ;;  %745 = vst.msk [vmem:[#allocation3 + $0x120] sm:$0xff] %vm332_vm1, %v7608_v62 }
 0x135   : > { %1231 = vrot.lane.b32.xlu0 %v7527_v10, %s6902_s22  ;;  %v2093_v53 = vld [vmem:[#allocation3 + $0x160] sm:$0xff]  ;;  %746 = vst.msk [vmem:[#allocation3 + $0x138] sm:$0xff] %vm332_vm1, %v7610_v63 }
 0x136   : > { %v1525_v56 = vpop.permute.xlu2 %1524  ;;  %1038 = vrot.lane.b32.xlu1 %v7326_v49, %s6901_s15  ;;  %688 = vst.msk [vmem:[#allocation2 + $0xf9] sm:$0xff] %vm332_vm1, %v655_v52 }
 0x137   : > { %v1220_v54 = vpop.permute.xlu0 %1219  ;;  %1594 = vst.msk [vmem:[#allocation3 + $0x278] sm:$0xff] %vm925_vm3, %v1525_v56 }
 0x138   : > { %6683 = vmatmul.msk.f32.gmra.mxu3 %vm332_vm1, %v2093_v53  ;;  %v1027_v57 = vpop.permute.xlu1 %1026  ;;  %749 = vst.msk [vmem:[#allocation3 + $0x180] sm:$0xff] %vm332_vm1, %v7694_v37 }
 0x139   : > { %1121 = vst.msk [vmem:[#allocation3 + $0x30] sm:$0xff] %vm1118_vm4, %v1027_v57  ;;  %v600_v58 = vpop.f32.mrf.mxu0  ;;  %v7724_v57 = vld [vmem:[#allocation2 + $0xc9] sm:$0xff] }
 0x13a   : > { %1314 = vst.msk [vmem:[#allocation3 + $0x30] sm:$0xff] %vm1311_vm5, %v1220_v54  ;;  %v601_v55 = vadd.f32 %v7156_v28, %v600_v58  ;;  %v2096_v0 = vld [vmem:[#allocation3 + $0x178] sm:$0xff] }
 0x13b   : > { %1391 = vst.msk [vmem:[#allocation3 + $0x170] sm:$0xff] %vm332_vm1, %v7724_v57 }
 0x13c   : > { %1229 = vrot.lane.b32.xlu2 %v7482_v48, %s6902_s22  ;;  %v656_v49 = vmax.f32 %v601_v55, 0.0 }
 0x13d   : > { %1042 = vrot.lane.b32.xlu0 %v7377_v5, %s6901_s15  ;;  %v7624_v3 = vld [vmem:[#allocation2 + $0xf2] sm:$0xff]  ;;  %v7628_v48 = vld [vmem:[#allocation2 + $0xfa] sm:$0xff] }
 0x13e   : > { %v840_v2 = vpop.permute.xlu2 %839  ;;  %1486 = vrot.lane.b32.xlu1 %v7334_v51, %s6900_s10  ;;  %689 = vst.msk [vmem:[#allocation2 + $0x109] sm:$0xff] %vm332_vm1, %v656_v49  ;;  %v7633_v51 = vld [vmem:[#allocation2 + $0x99] sm:$0xff] }
 0x13f   : > { %v1079_v1 = vpop.permute.xlu0 %1078  ;;  %931 = vst.msk [vmem:[#allocation3 + $0x78] sm:$0xff] %vm925_vm3, %v840_v2 }
 0x140   : > { %6684 = vmatmul.msk.f32.gmra.mxu3 %vm332_vm1, %v2096_v0  ;;  %v1475_v4 = vpop.permute.xlu1 %1474  ;;  %2033 = vst.msk [vmem:[#allocation3 + $0x190] sm:$0xff] %vm332_vm1, %v7624_v3 }
 0x141   : > { %1569 = vst.msk [vmem:[#allocation3 + $0x20] sm:$0xff] %vm925_vm3, %v1475_v4  ;;  %v2055_v7 = vld [vmem:[#allocation3 + $0x30] sm:$0xff]  ;;  %v603_v8 = vpop.f32.mrf.mxu0 }
 0x142   : > { %2303 = vmatmul.f32.gmra.mxu1 %v2055_v7  ;;  %v604_v9 = vadd.f32 %v7156_v28, %v603_v8  ;;  %2034 = vst.msk [vmem:[#allocation3 + $0x1a8] sm:$0xff] %vm332_vm1, %v7628_v48  ;;  %v781_v7 = vld [vmem:[#allocation2 + $0xc1] sm:$0xff]  ;;  %v783_v8 = vld [vmem:[#allocation2 + $0xd9] sm:$0xff] }
 0x143   : > { %1387 = vst.msk [vmem:[#allocation3 + $0x110] sm:$0xff] %vm332_vm1, %v7633_v51 }
 0x144   : > { %851 = vrot.lane.b32.xlu2 %v7568_v36, %s6900_s10  ;;  %v657_v59 = vmax.f32 %v604_v9, 0.0  ;;  %1390 = vst.msk [vmem:[#allocation3 + $0x158] sm:$0xff] %vm332_vm1, %v781_v7  ;;  %v7766_v9 = vld [vmem:[#allocation2 + $0xd8] sm:$0xff] }
 0x145   : > { %1490 = vrot.lane.b32.xlu0 %v7379_v6, %s6900_s10  ;;  %1392 = vst.msk [vmem:[#allocation3 + $0x188] sm:$0xff] %vm332_vm1, %v783_v8 }
 0x146   : > { %v1477_v11 = vpop.permute.xlu2 %1476  ;;  %849 = vrot.lane.b32.xlu1 %v7561_v29, %s6900_s10  ;;  %690 = vst.msk [vmem:[#allocation2 + $0x111] sm:$0xff] %vm332_vm1, %v657_v59 }
 0x147   : > { %v1527_v10 = vpop.permute.xlu0 %1526  ;;  %v2099_v14 = vld [vmem:[#allocation3 + $0x190] sm:$0xff]  ;;  %1570 = vst.msk [vmem:[#allocation3 + $0x38] sm:$0xff] %vm925_vm3, %v1477_v11 }
 0x148   : > { %1595 = vst.msk [vmem:[#allocation3 + $0x290] sm:$0xff] %vm925_vm3, %v1527_v10  ;;  %v886_v13 = vpop.permute.xlu1 %885  ;;  %6685 = vmatmul.msk.f32.gmra.mxu3 %vm332_vm1, %v2099_v14  ;;  %v7777_v14 = vld [vmem:[#allocation2 + $0xe0] sm:$0xff] }
 0x149   : > { %954 = vst.msk [vmem:[#allocation3 + $0x2a0] sm:$0xff] %vm925_vm3, %v886_v13  ;;  %v606_v15 = vpop.f32.mrf.mxu0  ;;  %v2102_v25 = vld [vmem:[#allocation3 + $0x1a8] sm:$0xff] }
 0x14a   : > { %1147 = vst.msk [vmem:[#allocation3 + $0x2a0] sm:$0xff] %vm1118_vm4, %v1079_v1  ;;  %v607_v18 = vadd.f32 %v7156_v28, %v606_v15 }
 0x14b   : > { %751 = vst.msk [vmem:[#allocation3 + $0x1b0] sm:$0xff] %vm332_vm1, %v7766_v9 }
 0x14c   : > { %1488 = vrot.lane.b32.xlu2 %v7377_v5, %s6900_s10  ;;  %v658_v21 = vmax.f32 %v607_v18, 0.0  ;;  %752 = vst.msk [vmem:[#allocation3 + $0x1c8] sm:$0xff] %vm332_vm1, %v7777_v14 }
 0x14d   : > { %853 = vrot.lane.b32.xlu0 %v777_v39, %s6900_s10  ;;  %v7665_v5 = vld [vmem:[#allocation2 + $0x10a] sm:$0xff]  ;;  %v7668_v26 = vld [vmem:[#allocation2 + $0x112] sm:$0xff] }
 0x14e   : > { %v1272_v24 = vpop.permute.xlu2 %1271  ;;  %1044 = vrot.lane.b32.xlu1 %v7379_v6, %s6901_s15  ;;  %691 = vst.msk [vmem:[#allocation2 + $0x121] sm:$0xff] %vm332_vm1, %v658_v21  ;;  %v2120_v21 = vld [vmem:[#allocation3 + $0x238] sm:$0xff] }
 0x14f   : > { %v1031_v23 = vpop.permute.xlu0 %1030  ;;  %1340 = vst.msk [vmem:[#allocation3 + $0x2a0] sm:$0xff] %vm1311_vm5, %v1272_v24 }
 0x150   : > { %1123 = vst.msk [vmem:[#allocation3 + $0x60] sm:$0xff] %vm1118_vm4, %v1031_v23  ;;  %v1081_v12 = vpop.permute.xlu1 %1080  ;;  %6686 = vmatmul.msk.f32.gmra.mxu3 %vm332_vm1, %v2102_v25  ;;  %v7797_v23 = vld [vmem:[#allocation2 + $0xf9] sm:$0xff] }
 0x151   : > { %1148 = vst.msk [vmem:[#allocation3 + $0x2b8] sm:$0xff] %vm1118_vm4, %v1081_v12  ;;  %v609_v6 = vpop.f32.mrf.mxu0  ;;  %v2123_v12 = vld [vmem:[#allocation3 + $0x250] sm:$0xff] }
 0x152   : > { %v610_v29 = vadd.f32 %v7156_v28, %v609_v6  ;;  %2035 = vst.msk [vmem:[#allocation3 + $0x1c0] sm:$0xff] %vm332_vm1, %v7665_v5  ;;  %v7811_v6 = vld [vmem:[#allocation2 + $0xf1] sm:$0xff] }
 0x153   : > { %2036 = vst.msk [vmem:[#allocation3 + $0x1d8] sm:$0xff] %vm332_vm1, %v7668_v26 }
 0x154   : > { %1235 = vrot.lane.b32.xlu2 %v7608_v62, %s6902_s22  ;;  %v659_v30 = vmax.f32 %v610_v29, 0.0  ;;  %1395 = vst.msk [vmem:[#allocation3 + $0x1d0] sm:$0xff] %vm332_vm1, %v7797_v23 }
 0x155   : > { %1048 = vrot.lane.b32.xlu0 %v7439_v33, %s6901_s15  ;;  %1394 = vst.msk [vmem:[#allocation3 + $0x1b8] sm:$0xff] %vm332_vm1, %v7811_v6 }
 0x156   : > { %v1224_v28 = vpop.permute.xlu2 %1223  ;;  %1233 = vrot.lane.b32.xlu1 %v7563_v31, %s6902_s22  ;;  %692 = vst.msk [vmem:[#allocation2 + $0x129] sm:$0xff] %vm332_vm1, %v659_v30 }
 0x157   : > { %v1479_v35 = vpop.permute.xlu0 %1478  ;;  %1316 = vst.msk [vmem:[#allocation3 + $0x60] sm:$0xff] %vm1311_vm5, %v1224_v28 }
 0x158   : > { %1571 = vst.msk [vmem:[#allocation3 + $0x50] sm:$0xff] %vm925_vm3, %v1479_v35  ;;  %v1270_v36 = vpop.permute.xlu1 %1269 }
 0x159   : > { %v2105_v40 = vld [vmem:[#allocation3 + $0x1c0] sm:$0xff]  ;;  %v612_v43 = vpop.f32.mrf.mxu0 }
 0x15a   : > { %6687 = vmatmul.msk.f32.gmra.mxu3 %vm332_vm1, %v2105_v40  ;;  %v613_v38 = vadd.f32 %v6823_v44, %v612_v43  ;;  %v2108_v52 = vld [vmem:[#allocation3 + $0x1d8] sm:$0xff] }
 0x15b   : > { %v7826_v40 = vld [vmem:[#allocation2 + $0x108] sm:$0xff] }
 0x15c   : > { %1046 = vrot.lane.b32.xlu2 %v7437_v32, %s6901_s15  ;;  %v660_v47 = vmax.f32 %v613_v38, 0.0  ;;  %755 = vst.msk [vmem:[#allocation3 + $0x210] sm:$0xff] %vm332_vm1, %v7826_v40 }
 0x15d   : > { %1237 = vrot.lane.b32.xlu0 %v7610_v63, %s6902_s22  ;;  %v7710_v54 = vld [vmem:[#allocation2 + $0x122] sm:$0xff]  ;;  %v7713_v56 = vld [vmem:[#allocation2 + $0x12a] sm:$0xff] }
 0x15e   : > { %v1083_v39 = vpop.permute.xlu2 %1082  ;;  %855 = vrot.lane.b32.xlu1 %v7633_v51, %s6900_s10  ;;  %693 = vst.msk [vmem:[#allocation2 + $0x139] sm:$0xff] %vm332_vm1, %v660_v47  ;;  %v2061_v15 = vld [vmem:[#allocation3 + $0x60] sm:$0xff] }
 0x15f   : > { %v890_v50 = vpop.permute.xlu0 %889  ;;  %2037 = vst.msk [vmem:[#allocation3 + $0x1f0] sm:$0xff] %vm332_vm1, %v7710_v54  ;;  %v2129_v47 = vld [vmem:[#allocation3 + $0x280] sm:$0xff] }
 0x160   : > { %956 = vst.msk [vmem:[#allocation3 + $0x2d0] sm:$0xff] %vm925_vm3, %v890_v50  ;;  %v1033_v53 = vpop.permute.xlu1 %1032 }
 0x161   : > { %1149 = vst.msk [vmem:[#allocation3 + $0x2d0] sm:$0xff] %vm1118_vm4, %v1083_v39 }
 0x162   : > { %1124 = vst.msk [vmem:[#allocation3 + $0x78] sm:$0xff] %vm1118_vm4, %v1033_v53  ;;  %6688 = vmatmul.msk.f32.gmra.mxu3 %vm332_vm1, %v2108_v52 }
 0x163   : > { %2038 = vst.msk [vmem:[#allocation3 + $0x208] sm:$0xff] %vm332_vm1, %v7713_v56 }
 0x164   : > { %1494 = vrot.lane.b32.xlu2 %v7439_v33, %s6900_s10 }
 0x165   : > { %859 = vrot.lane.b32.xlu0 %v780_v20, %s6900_s10  ;;  %v7728_v58 = vld [vmem:[#allocation2 + $0x140] sm:$0xff] }
 0x166   : > { %v1531_v49 = vpop.permute.xlu2 %1530  ;;  %1492 = vrot.lane.b32.xlu1 %v7437_v32, %s6900_s10  ;;  %760 = vst.msk [vmem:[#allocation3 + $0x288] sm:$0xff] %vm332_vm1, %v7728_v58  ;;  %v2111_v0 = vld [vmem:[#allocation3 + $0x1f0] sm:$0xff]  ;;  %v7749_v32 = vld [vmem:[#allocation2 + $0xc8] sm:$0xff] }
 0x167   : > { %v842_v55 = vpop.permute.xlu0 %841  ;;  %953 = vst.msk [vmem:[#allocation3 + $0x288] sm:$0xff] %vm925_vm3, %v7538_v17  ;;  %v7741_v1 = vld [vmem:[#allocation2 + $0x13a] sm:$0xff] }
 0x168   : > { %v1222_v33 = vpop.permute.xlu1 %1221  ;;  %1146 = vst.msk [vmem:[#allocation3 + $0x288] sm:$0xff] %vm1118_vm4, %v7472_v45 }
 0x169   : > { %1339 = vst.msk [vmem:[#allocation3 + $0x288] sm:$0xff] %vm1311_vm5, %v1270_v36  ;;  %v2126_v36 = vld [vmem:[#allocation3 + $0x268] sm:$0xff] }
 0x16a   : > { %6689 = vmatmul.msk.f32.gmra.mxu3 %vm332_vm1, %v2111_v0  ;;  %932 = vst.msk [vmem:[#allocation3 + $0x90] sm:$0xff] %vm925_vm3, %v842_v55  ;;  %v2114_v2 = vld [vmem:[#allocation3 + $0x208] sm:$0xff]  ;;  %v7864_v0 = vld [vmem:[#allocation2 + $0x109] sm:$0xff] }
 0x16b   : > { %1597 = vst.msk [vmem:[#allocation3 + $0x2c0] sm:$0xff] %vm925_vm3, %v1531_v49  ;;  %v7857_v55 = vld [vmem:[#allocation2 + $0x111] sm:$0xff] }
 0x16c   : > { %857 = vrot.lane.b32.xlu2 %v7657_v22, %s6900_s10  ;;  %1315 = vst.msk [vmem:[#allocation3 + $0x48] sm:$0xff] %vm1311_vm5, %v1222_v33  ;;  %v7791_v22 = vld [vmem:[#allocation2 + $0xe1] sm:$0xff] }
 0x16d   : > { %1496 = vrot.lane.b32.xlu0 %v7498_v60, %s6900_s10  ;;  %2039 = vst.msk [vmem:[#allocation3 + $0x220] sm:$0xff] %vm332_vm1, %v7741_v1 }
 0x16e   : > { %v1035_v17 = vpop.permute.xlu2 %1034  ;;  %1239 = vrot.lane.b32.xlu1 %v7672_v27, %s6902_s22  ;;  %750 = vst.msk [vmem:[#allocation3 + $0x198] sm:$0xff] %vm332_vm1, %v7749_v32 }
 0x16f   : > { %v1085_v45 = vpop.permute.xlu0 %1084  ;;  %1125 = vst.msk [vmem:[#allocation3 + $0x90] sm:$0xff] %vm1118_vm4, %v1035_v17  ;;  %v2135_v17 = vld [vmem:[#allocation3 + $0x2b0] sm:$0xff] }
 0x170   : > { %v892_v4 = vpop.permute.xlu1 %891  ;;  %1393 = vst.msk [vmem:[#allocation3 + $0x1a0] sm:$0xff] %vm332_vm1, %v7791_v22 }
 0x171   : > { %957 = vst.msk [vmem:[#allocation3 + $0x2e8] sm:$0xff] %vm925_vm3, %v892_v4 }
 0x172   : > { %1150 = vst.msk [vmem:[#allocation3 + $0x2e8] sm:$0xff] %vm1118_vm4, %v1085_v45  ;;  %6690 = vmatmul.msk.f32.gmra.mxu3 %vm332_vm1, %v2114_v2 }
 0x173   : > { %v2058_v51 = vld [vmem:[#allocation3 + $0x48] sm:$0xff]  ;;  %1397 = vst.msk [vmem:[#allocation3 + $0x200] sm:$0xff] %vm332_vm1, %v7857_v55 }
 0x174   : > { %1052 = vrot.lane.b32.xlu2 %v7500_v61, %s6901_s15  ;;  %2306 = vmatmul.f32.gmra.mxu1 %v2058_v51  ;;  %v2117_v13 = vld [vmem:[#allocation3 + $0x220] sm:$0xff]  ;;  %1396 = vst.msk [vmem:[#allocation3 + $0x1e8] sm:$0xff] %vm332_vm1, %v7864_v0 }
 0x175   : > { %1243 = vrot.lane.b32.xlu0 %v7694_v37, %s6902_s22 }
 0x176   : > { %v1483_v10 = vpop.permute.xlu2 %1482  ;;  %1050 = vrot.lane.b32.xlu1 %v7498_v60, %s6901_s15 }
 0x177   : > { %v1274_v59 = vpop.permute.xlu0 %1273  ;;  %1573 = vst.msk [vmem:[#allocation3 + $0x80] sm:$0xff] %vm925_vm3, %v1483_v10  ;;  %v7891_v10 = vld [vmem:[#allocation2 + $0x120] sm:$0xff] }
 0x178   : > { %1341 = vst.msk [vmem:[#allocation3 + $0x2b8] sm:$0xff] %vm1311_vm5, %v1274_v59  ;;  %v1529_v11 = vpop.permute.xlu1 %1528  ;;  %v2138_v59 = vld [vmem:[#allocation3 + $0x2c8] sm:$0xff] }
 0x179   : > { %1596 = vst.msk [vmem:[#allocation3 + $0x2a8] sm:$0xff] %vm925_vm3, %v1529_v11 }
 0x17a   : > { %6691 = vmatmul.msk.f32.gmra.mxu3 %vm332_vm1, %v2117_v13  ;;  %757 = vst.msk [vmem:[#allocation3 + $0x240] sm:$0xff] %vm332_vm1, %v7891_v10 }
 0x17c   : > { %1241 = vrot.lane.b32.xlu2 %v7683_v34, %s6902_s22  ;;  %2309 = vmatmul.f32.gmra.mxu1 %v2061_v15 }
 0x17d   : > { %1054 = vrot.lane.b32.xlu0 %v7535_v16, %s6901_s15 }
 0x17e   : > { %v846_v18 = vpop.permute.xlu2 %845  ;;  %1498 = vrot.lane.b32.xlu1 %v7500_v61, %s6900_s10 }
 0x17f   : > { %v1037_v60 = vpop.permute.xlu0 %1036  ;;  %934 = vst.msk [vmem:[#allocation3 + $0xc0] sm:$0xff] %vm925_vm3, %v846_v18 }
 0x180   : > { %v844_v20 = vpop.permute.xlu1 %843 }
 0x181   : > { %933 = vst.msk [vmem:[#allocation3 + $0xa8] sm:$0xff] %vm925_vm3, %v844_v20 }
 0x182   : > { %1126 = vst.msk [vmem:[#allocation3 + $0xa8] sm:$0xff] %vm1118_vm4, %v1037_v60  ;;  %6692 = vmatmul.msk.f32.gmra.mxu3 %vm332_vm1, %v2120_v21  ;;  %v7905_v60 = vld [vmem:[#allocation2 + $0x128] sm:$0xff] }
 0x183   : > { %758 = vst.msk [vmem:[#allocation3 + $0x258] sm:$0xff] %vm332_vm1, %v7905_v60  ;;  %v7913_v21 = vld [vmem:[#allocation2 + $0x129] sm:$0xff] }
 0x184   : > { %863 = vrot.lane.b32.xlu2 %v7724_v57, %s6900_s10  ;;  %v2132_v57 = vld [vmem:[#allocation3 + $0x298] sm:$0xff]  ;;  %1399 = vst.msk [vmem:[#allocation3 + $0x230] sm:$0xff] %vm332_vm1, %v7913_v21 }
 0x185   : > { %1502 = vrot.lane.b32.xlu0 %v7543_v19, %s6900_s10 }
 0x186   : > { %v1278_v24 = vpop.permute.xlu2 %1277  ;;  %861 = vrot.lane.b32.xlu1 %v781_v7, %s6900_s10  ;;  %v7879_v7 = vld [vmem:[#allocation2 + $0x121] sm:$0xff] }
 0x187   : > { %v1226_v61 = vpop.permute.xlu0 %1225  ;;  %1343 = vst.msk [vmem:[#allocation3 + $0x2e8] sm:$0xff] %vm1311_vm5, %v1278_v24 }
 0x188   : > { %1317 = vst.msk [vmem:[#allocation3 + $0x78] sm:$0xff] %vm1311_vm5, %v1226_v61  ;;  %v1481_v25 = vpop.permute.xlu1 %1480 }
 0x189   : > { %1572 = vst.msk [vmem:[#allocation3 + $0x68] sm:$0xff] %vm925_vm3, %v1481_v25 }
 0x18a   : > { %6693 = vmatmul.msk.f32.gmra.mxu3 %vm332_vm1, %v2123_v12  ;;  %1398 = vst.msk [vmem:[#allocation3 + $0x218] sm:$0xff] %vm332_vm1, %v7879_v7 }
 0x18c   : > { %1500 = vrot.lane.b32.xlu2 %v7535_v16, %s6900_s10  ;;  %v7820_v16 = vld [vmem:[#allocation2 + $0xf0] sm:$0xff] }
 0x18d   : > { %865 = vrot.lane.b32.xlu0 %v783_v8, %s6900_s10  ;;  %753 = vst.msk [vmem:[#allocation3 + $0x1e0] sm:$0xff] %vm332_vm1, %v7820_v16 }
 0x18e   : > { %v1041_v30 = vpop.permute.xlu2 %1040  ;;  %1056 = vrot.lane.b32.xlu1 %v7543_v19, %s6901_s15  ;;  %v7830_v19 = vld [vmem:[#allocation2 + $0xf8] sm:$0xff] }
 0x18f   : > { %v1533_v29 = vpop.permute.xlu0 %1532  ;;  %v2064_v35 = vld [vmem:[#allocation3 + $0x78] sm:$0xff]  ;;  %754 = vst.msk [vmem:[#allocation3 + $0x1f8] sm:$0xff] %vm332_vm1, %v7830_v19 }
 0x190   : > { %1598 = vst.msk [vmem:[#allocation3 + $0x2d8] sm:$0xff] %vm925_vm3, %v1533_v29  ;;  %2312 = vmatmul.f32.gmra.mxu1 %v2064_v35  ;;  %v1276_v28 = vpop.permute.xlu1 %1275  ;;  %v7934_v29 = vld [vmem:[#allocation2 + $0x139] sm:$0xff] }
 0x191   : > { %1342 = vst.msk [vmem:[#allocation3 + $0x2d0] sm:$0xff] %vm1311_vm5, %v1276_v28 }
 0x192   : > { %6694 = vmatmul.msk.f32.gmra.mxu3 %vm332_vm1, %v2126_v36  ;;  %1400 = vst.msk [vmem:[#allocation3 + $0x248] sm:$0xff] %vm332_vm1, %v7934_v29 }
 0x194   : > { %1247 = vrot.lane.b32.xlu2 %v7766_v9, %s6902_s22 }
 0x195   : > { %1060 = vrot.lane.b32.xlu0 %v7588_v46, %s6901_s15 }
 0x196   : > { %v1230_v44 = vpop.permute.xlu2 %1229  ;;  %1245 = vrot.lane.b32.xlu1 %v7749_v32, %s6902_s22 }
 0x197   : > { %v848_v43 = vpop.permute.xlu0 %847  ;;  %1319 = vst.msk [vmem:[#allocation3 + $0xa8] sm:$0xff] %vm1311_vm5, %v1230_v44 }
 0x198   : > { %935 = vst.msk [vmem:[#allocation3 + $0xd8] sm:$0xff] %vm925_vm3, %v848_v43  ;;  %v1228_v38 = vpop.permute.xlu1 %1227 }
 0x199   : > { %1128 = vst.msk [vmem:[#allocation3 + $0xd8] sm:$0xff] %vm1118_vm4, %v1041_v30 }
 0x19a   : > { %1318 = vst.msk [vmem:[#allocation3 + $0x90] sm:$0xff] %vm1311_vm5, %v1228_v38  ;;  %6695 = vmatmul.msk.f32.gmra.mxu3 %vm332_vm1, %v2129_v47 }
 0x19c   : > { %1058 = vrot.lane.b32.xlu2 %v7577_v41, %s6901_s15 }
 0x19d   : > { %1249 = vrot.lane.b32.xlu0 %v7777_v14, %s6902_s22 }
 0x19e   : > { %v852_v39 = vpop.permute.xlu2 %851  ;;  %867 = vrot.lane.b32.xlu1 %v7791_v22, %s6900_s10 }
 0x19f   : > { %v1485_v50 = vpop.permute.xlu0 %1484  ;;  %937 = vst.msk [vmem:[#allocation3 + $0x108] sm:$0xff] %vm925_vm3, %v852_v39 }
 0x1a0   : > { %1574 = vst.msk [vmem:[#allocation3 + $0x98] sm:$0xff] %vm925_vm3, %v1485_v50  ;;  %v1535_v52 = vpop.permute.xlu1 %1534 }
 0x1a1   : > { %1599 = vst.msk [vmem:[#allocation3 + $0x2f0] sm:$0xff] %vm925_vm3, %v1535_v52  ;;  %v2067_v53 = vld [vmem:[#allocation3 + $0x90] sm:$0xff] }
 0x1a2   : > { %2315 = vmatmul.f32.gmra.mxu1 %v2067_v53  ;;  %6696 = vmatmul.msk.f32.gmra.mxu3 %vm332_vm1, %v2132_v57 }
 0x1a4   : > { %1506 = vrot.lane.b32.xlu2 %v7588_v46, %s6900_s10  ;;  %v2070_v46 = vld [vmem:[#allocation3 + $0xa8] sm:$0xff] }
 0x1a5   : > { %871 = vrot.lane.b32.xlu0 %v7797_v23, %s6900_s10 }
 0x1a6   : > { %v1489_v33 = vpop.permute.xlu2 %1488  ;;  %1504 = vrot.lane.b32.xlu1 %v7577_v41, %s6900_s10  ;;  %v7875_v41 = vld [vmem:[#allocation2 + $0x110] sm:$0xff] }
 0x1a7   : > { %v1232_v49 = vpop.permute.xlu0 %1231  ;;  %1576 = vst.msk [vmem:[#allocation3 + $0xc8] sm:$0xff] %vm925_vm3, %v1489_v33 }
 0x1a8   : > { %v1039_v45 = vpop.permute.xlu1 %1038  ;;  %756 = vst.msk [vmem:[#allocation3 + $0x228] sm:$0xff] %vm332_vm1, %v7875_v41 }
 0x1a9   : > { %1127 = vst.msk [vmem:[#allocation3 + $0xc0] sm:$0xff] %vm1118_vm4, %v1039_v45 }
 0x1aa   : > { %1320 = vst.msk [vmem:[#allocation3 + $0xc0] sm:$0xff] %vm1311_vm5, %v1232_v49  ;;  %2318 = vmatmul.f32.gmra.mxu1 %v2070_v46  ;;  %6697 = vmatmul.msk.f32.gmra.mxu3 %vm332_vm1, %v2135_v17  ;;  %v1602_v49 = vld [vmem:[#allocation2 + $0x38] sm:$0xff]  ;;  %v1605_v46 = vld [vmem:[#allocation2 + $0x60] sm:$0xff] }
 0x1ac   : > { %869 = vrot.lane.b32.xlu2 %v7811_v6, %s6900_s10 }
 0x1ad   : > { %1508 = vrot.lane.b32.xlu0 %v7624_v3, %s6900_s10 }
 0x1ae   : > { %v1236_v4 = vpop.permute.xlu2 %1235  ;;  %1251 = vrot.lane.b32.xlu1 %v7820_v16, %s6902_s22 }
 0x1af   : > { %v1043_v2 = vpop.permute.xlu0 %1042 }
 0x1b0   : > { %v1487_v8 = vpop.permute.xlu1 %1486 }
 0x1b1   : > { %1575 = vst.msk [vmem:[#allocation3 + $0xb0] sm:$0xff] %vm925_vm3, %v1487_v8  ;;  %v2073_v51 = vld [vmem:[#allocation3 + $0xc0] sm:$0xff] }
 0x1b2   : > { %2321 = vmatmul.f32.gmra.mxu1 %v2073_v51  ;;  %6698 = vmatmul.msk.f32.gmra.mxu3 %vm332_vm1, %v2138_v59  ;;  %v1604_v8 = vld [vmem:[#allocation2 + $0x50] sm:$0xff] }
 0x1b4   : > { %1064 = vrot.lane.b32.xlu2 %v7628_v48, %s6901_s15 }
 0x1b5   : > { %1255 = vrot.lane.b32.xlu0 %v7826_v40, %s6902_s22 }
 0x1b6   : > { %v1047_v13 = vpop.permute.xlu2 %1046  ;;  %1062 = vrot.lane.b32.xlu1 %v7624_v3, %s6901_s15 }
 0x1b7   : > { %v1491_v11 = vpop.permute.xlu0 %1490 }
 0x1b8   : > { %1577 = vst.msk [vmem:[#allocation3 + $0xe0] sm:$0xff] %vm925_vm3, %v1491_v11  ;;  %v850_v15 = vpop.permute.xlu1 %849 }
 0x1b9   : > { %936 = vst.msk [vmem:[#allocation3 + $0xf0] sm:$0xff] %vm925_vm3, %v850_v15 }
 0x1ba   : > { %1129 = vst.msk [vmem:[#allocation3 + $0xf0] sm:$0xff] %vm1118_vm4, %v1043_v2 }
 0x1bb   : > { %1322 = vst.msk [vmem:[#allocation3 + $0xf0] sm:$0xff] %vm1311_vm5, %v1236_v4 }
 0x1bc   : > { %1253 = vrot.lane.b32.xlu2 %v7830_v19, %s6902_s22 }
 0x1bd   : > { %1066 = vrot.lane.b32.xlu0 %v7665_v5, %s6901_s15 }
 0x1be   : > { %v1495_v18 = vpop.permute.xlu2 %1494  ;;  %1510 = vrot.lane.b32.xlu1 %v7628_v48, %s6900_s10 }
 0x1bf   : > { %v854_v3 = vpop.permute.xlu0 %853  ;;  %1579 = vst.msk [vmem:[#allocation3 + $0x110] sm:$0xff] %vm925_vm3, %v1495_v18 }
 0x1c0   : > { %938 = vst.msk [vmem:[#allocation3 + $0x120] sm:$0xff] %vm925_vm3, %v854_v3  ;;  %v1045_v20 = vpop.permute.xlu1 %1044 }
 0x1c1   : > { %1131 = vst.msk [vmem:[#allocation3 + $0x120] sm:$0xff] %vm1118_vm4, %v1047_v13  ;;  %v1607_v13 = vld [vmem:[#allocation2 + $0x78] sm:$0xff] }
 0x1c2   : > { %1130 = vst.msk [vmem:[#allocation3 + $0x108] sm:$0xff] %vm1118_vm4, %v1045_v20  ;;  %v2079_v43 = vld [vmem:[#allocation3 + $0xf0] sm:$0xff] }
 0x1c4   : > { %875 = vrot.lane.b32.xlu2 %v7857_v55, %s6900_s10 }
 0x1c5   : > { %1514 = vrot.lane.b32.xlu0 %v7668_v26, %s6900_s10 }
 0x1c6   : > { %v858_v61 = vpop.permute.xlu2 %857  ;;  %873 = vrot.lane.b32.xlu1 %v7864_v0, %s6900_s10 }
 0x1c7   : > { %v1049_v48 = vpop.permute.xlu0 %1048  ;;  %940 = vst.msk [vmem:[#allocation3 + $0x150] sm:$0xff] %vm925_vm3, %v858_v61 }
 0x1c8   : > { %v1234_v24 = vpop.permute.xlu1 %1233 }
 0x1c9   : > { %1321 = vst.msk [vmem:[#allocation3 + $0xd8] sm:$0xff] %vm1311_vm5, %v1234_v24 }
 0x1cc   : > { %1512 = vrot.lane.b32.xlu2 %v7665_v5, %s6900_s10  ;;  %v7944_v5 = vld [vmem:[#allocation2 + $0x138] sm:$0xff] }
 0x1cd   : > { %877 = vrot.lane.b32.xlu0 %v7879_v7, %s6900_s10  ;;  %759 = vst.msk [vmem:[#allocation3 + $0x270] sm:$0xff] %vm332_vm1, %v7944_v5 }
 0x1ce   : > { %v1053_v12 = vpop.permute.xlu2 %1052  ;;  %1068 = vrot.lane.b32.xlu1 %v7668_v26, %s6901_s15 }
 0x1cf   : > { %v1238_v25 = vpop.permute.xlu0 %1237 }
 0x1d0   : > { %1323 = vst.msk [vmem:[#allocation3 + $0x108] sm:$0xff] %vm1311_vm5, %v1238_v25  ;;  %v856_v30 = vpop.permute.xlu1 %855  ;;  %v2076_v35 = vld [vmem:[#allocation3 + $0xd8] sm:$0xff] }
 0x1d1   : > { %939 = vst.msk [vmem:[#allocation3 + $0x138] sm:$0xff] %vm925_vm3, %v856_v30  ;;  %2324 = vmatmul.f32.gmra.mxu1 %v2076_v35  ;;  %v1626_v30 = vld [vmem:[#allocation2 + $0x158] sm:$0xff] }
 0x1d2   : > { %1132 = vst.msk [vmem:[#allocation3 + $0x138] sm:$0xff] %vm1118_vm4, %v1049_v48 }
 0x1d4   : > { %1259 = vrot.lane.b32.xlu2 %v7891_v10, %s6902_s22 }
 0x1d5   : > { %1072 = vrot.lane.b32.xlu0 %v7713_v56, %s6901_s15 }
 0x1d6   : > { %v1242_v28 = vpop.permute.xlu2 %1241  ;;  %1257 = vrot.lane.b32.xlu1 %v7875_v41, %s6902_s22 }
 0x1d7   : > { %v860_v26 = vpop.permute.xlu0 %859  ;;  %1325 = vst.msk [vmem:[#allocation3 + $0x138] sm:$0xff] %vm1311_vm5, %v1242_v28  ;;  %v2082_v50 = vld [vmem:[#allocation3 + $0x108] sm:$0xff]  ;;  %v1625_v28 = vld [vmem:[#allocation2 + $0x150] sm:$0xff] }
 0x1d8   : > { %941 = vst.msk [vmem:[#allocation3 + $0x168] sm:$0xff] %vm925_vm3, %v860_v26  ;;  %v1493_v36 = vpop.permute.xlu1 %1492  ;;  %v1629_v26 = vld [vmem:[#allocation2 + $0x180] sm:$0xff] }
 0x1d9   : > { %1134 = vst.msk [vmem:[#allocation3 + $0x168] sm:$0xff] %vm1118_vm4, %v1053_v12  ;;  %2327 = vmatmul.f32.gmra.mxu1 %v2079_v43 }
 0x1da   : > { %1578 = vst.msk [vmem:[#allocation3 + $0xf8] sm:$0xff] %vm925_vm3, %v1493_v36  ;;  %v1624_v36 = vld [vmem:[#allocation2 + $0x140] sm:$0xff] }
 0x1dc   : > { %1070 = vrot.lane.b32.xlu2 %v7710_v54, %s6901_s15 }
 0x1dd   : > { %1261 = vrot.lane.b32.xlu0 %v7905_v60, %s6902_s22 }
 0x1de   : > { %879 = vrot.lane.b32.xlu1 %v7913_v21, %s6900_s10  ;;  %v864_v38 = vpop.permute.xlu2 %863  ;;  %v2088_v45 = vld [vmem:[#allocation3 + $0x138] sm:$0xff] }
 0x1df   : > { %v1497_v44 = vpop.permute.xlu0 %1496  ;;  %943 = vst.msk [vmem:[#allocation3 + $0x198] sm:$0xff] %vm925_vm3, %v864_v38  ;;  %v8049_v38 = vld [vmem:[#allocation2 + $0x1a0] sm:$0xff] }
 0x1e0   : > { %1580 = vst.msk [vmem:[#allocation3 + $0x128] sm:$0xff] %vm925_vm3, %v1497_v44  ;;  %v1240_v47 = vpop.permute.xlu1 %1239 }
 0x1e1   : > { %1324 = vst.msk [vmem:[#allocation3 + $0x120] sm:$0xff] %vm1311_vm5, %v1240_v47  ;;  %2330 = vmatmul.f32.gmra.mxu1 %v2082_v50  ;;  %v1628_v47 = vld [vmem:[#allocation2 + $0x170] sm:$0xff]  ;;  %v1627_v50 = vld [vmem:[#allocation2 + $0x168] sm:$0xff] }
 0x1e4   : > { %1518 = vrot.lane.b32.xlu2 %v7713_v56, %s6900_s10 }
 0x1e5   : > { %1520 = vrot.lane.b32.xlu0 %v7741_v1, %s6900_s10 }
 0x1e6   : > { %1516 = vrot.lane.b32.xlu1 %v7710_v54, %s6900_s10  ;;  %v1501_v52 = vpop.permute.xlu2 %1500 }
 0x1e7   : > { %v1244_v39 = vpop.permute.xlu0 %1243  ;;  %1582 = vst.msk [vmem:[#allocation3 + $0x158] sm:$0xff] %vm925_vm3, %v1501_v52 }
 0x1e8   : > { %v1051_v53 = vpop.permute.xlu1 %1050  ;;  %v2085_v57 = vld [vmem:[#allocation3 + $0x120] sm:$0xff] }
 0x1e9   : > { %1133 = vst.msk [vmem:[#allocation3 + $0x150] sm:$0xff] %vm1118_vm4, %v1051_v53  ;;  %2333 = vmatmul.f32.gmra.mxu1 %v2085_v57  ;;  %v8060_v57 = vld [vmem:[#allocation2 + $0x198] sm:$0xff] }
 0x1ea   : > { %1326 = vst.msk [vmem:[#allocation3 + $0x150] sm:$0xff] %vm1311_vm5, %v1244_v39 }
 0x1ec   : > { %881 = vrot.lane.b32.xlu2 %v7934_v29, %s6900_s10 }
 0x1ed   : > { %1667 = vrot.lane.b32.xlu0 %v1602_v49, %s6901_s15  ;;  %v1795_v49 = vld [vmem:[#allocation2 + $0x49] sm:$0xff] }
 0x1ee   : > { %1074 = vrot.lane.b32.xlu1 %v7741_v1, %s6901_s15  ;;  %v1248_v54 = vpop.permute.xlu2 %1247 }
 0x1ef   : > { %v1055_v56 = vpop.permute.xlu0 %1054 }
 0x1f0   : > { %v1499_v33 = vpop.permute.xlu1 %1498 }
 0x1f1   : > { %1581 = vst.msk [vmem:[#allocation3 + $0x140] sm:$0xff] %vm925_vm3, %v1499_v33  ;;  %2336 = vmatmul.f32.gmra.mxu1 %v2088_v45  ;;  %v2091_v2 = vld [vmem:[#allocation3 + $0x150] sm:$0xff] }
 0x1f4   : > { %1265 = vrot.lane.b32.xlu2 %v7728_v58, %s6902_s22  ;;  %v1603_v58 = vld [vmem:[#allocation2 + $0x48] sm:$0xff] }
 0x1f5   : > { %1673 = vrot.lane.b32.xlu0 %v1605_v46, %s6901_s15  ;;  %v1798_v46 = vld [vmem:[#allocation2 + $0x69] sm:$0xff] }
 0x1f6   : > { %1263 = vrot.lane.b32.xlu1 %v7944_v5, %s6902_s22  ;;  %v1059_v1 = vpop.permute.xlu2 %1058 }
 0x1f7   : > { %v1503_v17 = vpop.permute.xlu0 %1502 }
 0x1f8   : > { %1583 = vst.msk [vmem:[#allocation3 + $0x170] sm:$0xff] %vm925_vm3, %v1503_v17  ;;  %v862_v4 = vpop.permute.xlu1 %861  ;;  %v1794_v17 = vld [vmem:[#allocation2 + $0x39] sm:$0xff] }
 0x1f9   : > { %942 = vst.msk [vmem:[#allocation3 + $0x180] sm:$0xff] %vm925_vm3, %v862_v4  ;;  %2339 = vmatmul.f32.gmra.mxu1 %v2091_v2  ;;  %v1793_v2 = vld [vmem:[#allocation2 + $0x31] sm:$0xff] }
 0x1fa   : > { %1135 = vst.msk [vmem:[#allocation3 + $0x180] sm:$0xff] %vm1118_vm4, %v1055_v56  ;;  %v1630_v56 = vld [vmem:[#allocation2 + $0x188] sm:$0xff] }
 0x1fb   : > { %1328 = vst.msk [vmem:[#allocation3 + $0x180] sm:$0xff] %vm1311_vm5, %v1248_v54 }
 0x1fc   : > { %1671 = vrot.lane.b32.xlu2 %v1604_v8, %s6901_s15 }
 0x1fd   : > { %1679 = vrot.lane.b32.xlu0 %v7563_v31, %s6901_s15  ;;  %v1606_v31 = vld [vmem:[#allocation2 + $0x68] sm:$0xff] }
 0x1fe   : > { %1669 = vrot.lane.b32.xlu1 %v1603_v58, %s6901_s15  ;;  %v1507_v59 = vpop.permute.xlu2 %1506 }
 0x1ff   : > { %v866_v51 = vpop.permute.xlu0 %865  ;;  %1585 = vst.msk [vmem:[#allocation3 + $0x1a0] sm:$0xff] %vm925_vm3, %v1507_v59  ;;  %v1797_v59 = vld [vmem:[#allocation2 + $0x61] sm:$0xff] }
 0x200   : > { %944 = vst.msk [vmem:[#allocation3 + $0x1b0] sm:$0xff] %vm925_vm3, %v866_v51  ;;  %v1057_v11 = vpop.permute.xlu1 %1056  ;;  %v1801_v51 = vld [vmem:[#allocation2 + $0x91] sm:$0xff] }
 0x201   : > { %1137 = vst.msk [vmem:[#allocation3 + $0x1b0] sm:$0xff] %vm1118_vm4, %v1059_v1 }
 0x202   : > { %1136 = vst.msk [vmem:[#allocation3 + $0x198] sm:$0xff] %vm1118_vm4, %v1057_v11  ;;  %v2097_v24 = vld [vmem:[#allocation3 + $0x180] sm:$0xff] }
 0x203   : > { %v1796_v11 = vld [vmem:[#allocation2 + $0x51] sm:$0xff] }
 0x204   : > { %1677 = vrot.lane.b32.xlu2 %v1607_v13, %s6901_s15 }
 0x205   : > { %1685 = vrot.lane.b32.xlu0 %v7672_v27, %s6901_s15 }
 0x206   : > { %1675 = vrot.lane.b32.xlu1 %v1606_v31, %s6901_s15  ;;  %v870_v3 = vpop.permute.xlu2 %869 }
 0x207   : > { %v1061_v15 = vpop.permute.xlu0 %1060  ;;  %946 = vst.msk [vmem:[#allocation3 + $0x1e0] sm:$0xff] %vm925_vm3, %v870_v3 }
 0x208   : > { %v1246_v18 = vpop.permute.xlu1 %1245 }
 0x209   : > { %1327 = vst.msk [vmem:[#allocation3 + $0x168] sm:$0xff] %vm1311_vm5, %v1246_v18 }
 0x20c   : > { %1683 = vrot.lane.b32.xlu2 %v7610_v63, %s6901_s15 }
 0x20d   : > { %1691 = vrot.lane.b32.xlu0 %v7749_v32, %s6901_s15 }
 0x20e   : > { %1681 = vrot.lane.b32.xlu1 %v7608_v62, %s6901_s15  ;;  %v1065_v27 = vpop.permute.xlu2 %1064 }
 0x20f   : > { %v1250_v20 = vpop.permute.xlu0 %1249 }
 0x210   : > { %1329 = vst.msk [vmem:[#allocation3 + $0x198] sm:$0xff] %vm1311_vm5, %v1250_v20  ;;  %v868_v48 = vpop.permute.xlu1 %867  ;;  %v2094_v61 = vld [vmem:[#allocation3 + $0x168] sm:$0xff] }
 0x211   : > { %945 = vst.msk [vmem:[#allocation3 + $0x1c8] sm:$0xff] %vm925_vm3, %v868_v48  ;;  %2342 = vmatmul.f32.gmra.mxu1 %v2094_v61  ;;  %v1804_v20 = vld [vmem:[#allocation2 + $0xb1] sm:$0xff]  ;;  %v1799_v48 = vld [vmem:[#allocation2 + $0x79] sm:$0xff] }
 0x212   : > { %1138 = vst.msk [vmem:[#allocation3 + $0x1c8] sm:$0xff] %vm1118_vm4, %v1061_v15 }
 0x214   : > { %1689 = vrot.lane.b32.xlu2 %v7694_v37, %s6901_s15 }
 0x215   : > { %1697 = vrot.lane.b32.xlu0 %v7820_v16, %s6901_s15 }
 0x216   : > { %1687 = vrot.lane.b32.xlu1 %v7683_v34, %s6901_s15  ;;  %v1254_v62 = vpop.permute.xlu2 %1253 }
 0x217   : > { %v872_v63 = vpop.permute.xlu0 %871  ;;  %1331 = vst.msk [vmem:[#allocation3 + $0x1c8] sm:$0xff] %vm1311_vm5, %v1254_v62  ;;  %v2100_v25 = vld [vmem:[#allocation3 + $0x198] sm:$0xff] }
 0x218   : > { %947 = vst.msk [vmem:[#allocation3 + $0x1f8] sm:$0xff] %vm925_vm3, %v872_v63  ;;  %v1505_v32 = vpop.permute.xlu1 %1504 }
 0x219   : > { %1140 = vst.msk [vmem:[#allocation3 + $0x1f8] sm:$0xff] %vm1118_vm4, %v1065_v27  ;;  %2345 = vmatmul.f32.gmra.mxu1 %v2097_v24  ;;  %v1800_v27 = vld [vmem:[#allocation2 + $0x81] sm:$0xff]  ;;  %v1807_v24 = vld [vmem:[#allocation2 + $0xd9] sm:$0xff] }
 0x21a   : > { %1584 = vst.msk [vmem:[#allocation3 + $0x188] sm:$0xff] %vm925_vm3, %v1505_v32  ;;  %v2176_v32 = vld [vmem:[%s11300_s3 + $0xf8] sm:$0xff] }
 0x21b   : > { %2394 = vmatpush.msra.mxu2 %v2176_v32  ;;  %v6825_v32 = vld [vmem:[%s11300_s3 + $0x110] sm:$0xff] }
 0x21c   : > { %1695 = vrot.lane.b32.xlu2 %v7777_v14, %s6901_s15 }
 0x21d   : > { %1703 = vrot.lane.b32.xlu0 %v7875_v41, %s6901_s15 }
 0x21e   : > { %1693 = vrot.lane.b32.xlu1 %v7766_v9, %s6901_s15  ;;  %v876_v34 = vpop.permute.xlu2 %875 }
 0x21f   : > { %v1509_v37 = vpop.permute.xlu0 %1508  ;;  %949 = vst.msk [vmem:[#allocation3 + $0x228] sm:$0xff] %vm925_vm3, %v876_v34  ;;  %v2175_v34 = vld [vmem:[%s11300_s3 + $0xf0] sm:$0xff] }
 0x220   : > { %1586 = vst.msk [vmem:[#allocation3 + $0x1b8] sm:$0xff] %vm925_vm3, %v1509_v37  ;;  %v1252_v16 = vpop.permute.xlu1 %1251  ;;  %v1803_v37 = vld [vmem:[#allocation2 + $0xa9] sm:$0xff]  ;;  %2395 = vmatpush.msra.mxu2 %v2175_v34 }
 0x221   : > { %1330 = vst.msk [vmem:[#allocation3 + $0x1b0] sm:$0xff] %vm1311_vm5, %v1252_v16  ;;  %2348 = vmatmul.f32.gmra.mxu1 %v2100_v25  ;;  %v1802_v16 = vld [vmem:[#allocation2 + $0x99] sm:$0xff]  ;;  %v6826_v34 = vld [vmem:[%s11300_s3 + $0x108] sm:$0xff] }
 0x224   : > { %1701 = vrot.lane.b32.xlu2 %v7826_v40, %s6901_s15 }
 0x225   : > { %1709 = vrot.lane.b32.xlu0 %v7944_v5, %s6901_s15  ;;  %v2106_v5 = vld [vmem:[#allocation3 + $0x1c8] sm:$0xff] }
 0x226   : > { %1699 = vrot.lane.b32.xlu1 %v7830_v19, %s6901_s15  ;;  %v1513_v9 = vpop.permute.xlu2 %1512 }
 0x227   : > { %v1256_v14 = vpop.permute.xlu0 %1255  ;;  %1588 = vst.msk [vmem:[#allocation3 + $0x1e8] sm:$0xff] %vm925_vm3, %v1513_v9  ;;  %v2174_v9 = vld [vmem:[%s11300_s3 + $0xe8] sm:$0xff] }
 0x228   : > { %v1063_v41 = vpop.permute.xlu1 %1062  ;;  %v2103_v12 = vld [vmem:[#allocation3 + $0x1b0] sm:$0xff]  ;;  %2396 = vmatpush.msra.mxu2 %v2174_v9 }
 0x229   : > { %1139 = vst.msk [vmem:[#allocation3 + $0x1e0] sm:$0xff] %vm1118_vm4, %v1063_v41  ;;  %2351 = vmatmul.f32.gmra.mxu1 %v2103_v12  ;;  %v1806_v41 = vld [vmem:[#allocation2 + $0xc9] sm:$0xff]  ;;  %v1805_v12 = vld [vmem:[#allocation2 + $0xc1] sm:$0xff] }
 0x22a   : > { %1332 = vst.msk [vmem:[#allocation3 + $0x1e0] sm:$0xff] %vm1311_vm5, %v1256_v14 }
 0x22c   : > { %1707 = vrot.lane.b32.xlu2 %v7905_v60, %s6901_s15 }
 0x22d   : > { %1715 = vrot.lane.b32.xlu0 %v1626_v30, %s6901_s15 }
 0x22e   : > { %1705 = vrot.lane.b32.xlu1 %v7891_v10, %s6901_s15  ;;  %v1260_v19 = vpop.permute.xlu2 %1259 }
 0x22f   : > { %v1067_v40 = vpop.permute.xlu0 %1066 }
 0x230   : > { %v1511_v35 = vpop.permute.xlu1 %1510 }
 0x231   : > { %1587 = vst.msk [vmem:[#allocation3 + $0x1d0] sm:$0xff] %vm925_vm3, %v1511_v35  ;;  %2354 = vmatmul.f32.gmra.mxu1 %v2106_v5  ;;  %v2109_v60 = vld [vmem:[#allocation3 + $0x1e0] sm:$0xff]  ;;  %v2173_v5 = vld [vmem:[%s11300_s3 + $0xe0] sm:$0xff] }
 0x232   : > { %2397 = vmatpush.msra.mxu2 %v2173_v5 }
 0x234   : > { %1713 = vrot.lane.b32.xlu2 %v1625_v28, %s6901_s15 }
 0x235   : > { %1721 = vrot.lane.b32.xlu0 %v1629_v26, %s6901_s15 }
 0x236   : > { %1711 = vrot.lane.b32.xlu1 %v1624_v36, %s6901_s15  ;;  %v1071_v10 = vpop.permute.xlu2 %1070 }
 0x237   : > { %v1515_v43 = vpop.permute.xlu0 %1514 }
 0x238   : > { %1589 = vst.msk [vmem:[#allocation3 + $0x200] sm:$0xff] %vm925_vm3, %v1515_v43  ;;  %v874_v44 = vpop.permute.xlu1 %873 }
 0x239   : > { %948 = vst.msk [vmem:[#allocation3 + $0x210] sm:$0xff] %vm925_vm3, %v874_v44  ;;  %2357 = vmatmul.f32.gmra.mxu1 %v2109_v60  ;;  %v2171_v60 = vld [vmem:[%s11300_s3 + $0xd0] sm:$0xff] }
 0x23a   : > { %1141 = vst.msk [vmem:[#allocation3 + $0x210] sm:$0xff] %vm1118_vm4, %v1067_v40 }
 0x23b   : > { %1334 = vst.msk [vmem:[#allocation3 + $0x210] sm:$0xff] %vm1311_vm5, %v1260_v19 }
 0x23c   : > { %1719 = vrot.lane.b32.xlu2 %v1628_v47, %s6901_s15 }
 0x23d   : > { %1727 = vrot.lane.b32.xlu0 %v8049_v38, %s6901_s15 }
 0x23e   : > { %1717 = vrot.lane.b32.xlu1 %v1627_v50, %s6901_s15  ;;  %v1519_v52 = vpop.permute.xlu2 %1518  ;;  %v2169_v50 = vld [vmem:[%s11300_s3 + $0xc0] sm:$0xff] }
 0x23f   : > { %v878_v39 = vpop.permute.xlu0 %877  ;;  %1591 = vst.msk [vmem:[#allocation3 + $0x230] sm:$0xff] %vm925_vm3, %v1519_v52 }
 0x240   : > { %950 = vst.msk [vmem:[#allocation3 + $0x240] sm:$0xff] %vm925_vm3, %v878_v39  ;;  %v1069_v53 = vpop.permute.xlu1 %1068 }
 0x241   : > { %1143 = vst.msk [vmem:[#allocation3 + $0x240] sm:$0xff] %vm1118_vm4, %v1071_v10 }
 0x242   : > { %1142 = vst.msk [vmem:[#allocation3 + $0x228] sm:$0xff] %vm1118_vm4, %v1069_v53  ;;  %v2115_v18 = vld [vmem:[#allocation3 + $0x210] sm:$0xff] }
 0x244   : > { %1725 = vrot.lane.b32.xlu2 %v8060_v57, %s6901_s15 }
 0x245   : > { %1861 = vrot.lane.b32.xlu0 %v1795_v49, %s6902_s22  ;;  %v2130_v49 = vld [vmem:[#allocation3 + $0x288] sm:$0xff] }
 0x246   : > { %1723 = vrot.lane.b32.xlu1 %v1630_v56, %s6901_s15  ;;  %v882_v33 = vpop.permute.xlu2 %881  ;;  %v2167_v56 = vld [vmem:[%s11300_s3 + $0xb0] sm:$0xff] }
 0x247   : > { %v1073_v54 = vpop.permute.xlu0 %1072  ;;  %952 = vst.msk [vmem:[#allocation3 + $0x270] sm:$0xff] %vm925_vm3, %v882_v33  ;;  %v1817_v33 = vld [vmem:[#allocation2 + $0x151] sm:$0xff] }
 0x248   : > { %v1258_v45 = vpop.permute.xlu1 %1257 }
 0x249   : > { %1333 = vst.msk [vmem:[#allocation3 + $0x1f8] sm:$0xff] %vm1311_vm5, %v1258_v45 }
 0x24c   : > { %1859 = vrot.lane.b32.xlu2 %v1794_v17, %s6902_s22 }
 0x24d   : > { %1867 = vrot.lane.b32.xlu0 %v1798_v46, %s6902_s22 }
 0x24e   : > { %1857 = vrot.lane.b32.xlu1 %v1793_v2, %s6902_s22  ;;  %v1266_v4 = vpop.permute.xlu2 %1265  ;;  %v2133_v2 = vld [vmem:[#allocation3 + $0x2a0] sm:$0xff] }
 0x24f   : > { %v1262_v1 = vpop.permute.xlu0 %1261 }
 0x250   : > { %1335 = vst.msk [vmem:[#allocation3 + $0x228] sm:$0xff] %vm1311_vm5, %v1262_v1  ;;  %v880_v8 = vpop.permute.xlu1 %879  ;;  %v2112_v58 = vld [vmem:[#allocation3 + $0x1f8] sm:$0xff]  ;;  %v2165_v1 = vld [vmem:[%s11300_s3 + $0xa0] sm:$0xff] }
 0x251   : > { %951 = vst.msk [vmem:[#allocation3 + $0x258] sm:$0xff] %vm925_vm3, %v880_v8  ;;  %2360 = vmatmul.f32.gmra.mxu1 %v2112_v58  ;;  %v1820_v8 = vld [vmem:[#allocation2 + $0x171] sm:$0xff] }
 0x252   : > { %1144 = vst.msk [vmem:[#allocation3 + $0x258] sm:$0xff] %vm1118_vm4, %v1073_v54  ;;  %v1818_v54 = vld [vmem:[#allocation2 + $0x159] sm:$0xff] }
 0x253   : > { %1337 = vst.msk [vmem:[#allocation3 + $0x258] sm:$0xff] %vm1311_vm5, %v1266_v4  ;;  %v1821_v4 = vld [vmem:[#allocation2 + $0x181] sm:$0xff] }
 0x254   : > { %1865 = vrot.lane.b32.xlu2 %v1797_v59, %s6902_s22 }
 0x255   : > { %1873 = vrot.lane.b32.xlu0 %v1801_v51, %s6902_s22 }
 0x256   : > { %1863 = vrot.lane.b32.xlu1 %v1796_v11, %s6902_s22  ;;  %v1672_v15 = vpop.permute.xlu2 %1671  ;;  %v2136_v11 = vld [vmem:[#allocation3 + $0x2b8] sm:$0xff] }
 0x257   : > { %v1521_v13 = vpop.permute.xlu0 %1520  ;;  %v2118_v31 = vld [vmem:[#allocation3 + $0x228] sm:$0xff]  ;;  %1764 = vst.msk [vmem:[#allocation3 + $0x50] sm:$0xff] %vm1118_vm4, %v1672_v15 }
 0x258   : > { %1592 = vst.msk [vmem:[#allocation3 + $0x248] sm:$0xff] %vm925_vm3, %v1521_v13  ;;  %2366 = vmatmul.f32.vlgmr.msrb.gmra.mxu2 %v2118_v31  ;;  %v1517_v3 = vpop.permute.xlu1 %1516  ;;  %v2164_v13 = vld [vmem:[%s11300_s3 + $0x98] sm:$0xff]  ;;  %v2163_v31 = vld [vmem:[%s11300_s3 + $0x90] sm:$0xff] }
 0x259   : > { %1590 = vst.msk [vmem:[#allocation3 + $0x218] sm:$0xff] %vm925_vm3, %v1517_v3  ;;  %2363 = vmatmul.f32.gmra.mxu1 %v2115_v18 }
 0x25a   : > { %v2124_v43 = vld [vmem:[#allocation3 + $0x258] sm:$0xff] }
 0x25c   : > { %1871 = vrot.lane.b32.xlu2 %v1800_v27, %s6902_s22  ;;  %v2162_v27 = vld [vmem:[%s11300_s3 + $0x88] sm:$0xff] }
 0x25d   : > { %1879 = vrot.lane.b32.xlu0 %v1804_v20, %s6902_s22  ;;  %v2139_v20 = vld [vmem:[#allocation3 + $0x2d0] sm:$0xff] }
 0x25e   : > { %1869 = vrot.lane.b32.xlu1 %v1799_v48, %s6902_s22  ;;  %v1678_v63 = vpop.permute.xlu2 %1677  ;;  %v2161_v48 = vld [vmem:[%s11300_s3 + $0x80] sm:$0xff] }
 0x25f   : > { %v1668_v61 = vpop.permute.xlu0 %1667  ;;  %1767 = vst.msk [vmem:[#allocation3 + $0x98] sm:$0xff] %vm1118_vm4, %v1678_v63 }
 0x260   : > { %1762 = vst.msk [vmem:[#allocation3 + $0x20] sm:$0xff] %vm1118_vm4, %v1668_v61  ;;  %v1075_v62 = vpop.permute.xlu1 %1074  ;;  %v6824_v61 = vld [vmem:[%s11300_s3 + $0x118] sm:$0xff] }
 0x261   : > { %1145 = vst.msk [vmem:[#allocation3 + $0x270] sm:$0xff] %vm1118_vm4, %v1075_v62 }
 0x262   : > { %1338 = vst.msk [vmem:[#allocation3 + $0x270] sm:$0xff] %vm1311_vm5, %v7579_v42 }
 0x264   : > { %1877 = vrot.lane.b32.xlu2 %v1803_v37, %s6902_s22  ;;  %v2142_v37 = vld [vmem:[#allocation3 + $0x2e8] sm:$0xff] }
 0x265   : > { %1885 = vrot.lane.b32.xlu0 %v1807_v24, %s6902_s22 }
 0x266   : > { %1875 = vrot.lane.b32.xlu1 %v1802_v16, %s6902_s22  ;;  %v1684_v14 = vpop.permute.xlu2 %1683  ;;  %v6827_v16 = vld [vmem:[%s11300_s3 + $0x100] sm:$0xff] }
 0x267   : > { %v1674_v25 = vpop.permute.xlu0 %1673  ;;  %1770 = vst.msk [vmem:[#allocation3 + $0xe0] sm:$0xff] %vm1118_vm4, %v1684_v14 }
 0x268   : > { %1765 = vst.msk [vmem:[#allocation3 + $0x68] sm:$0xff] %vm1118_vm4, %v1674_v25  ;;  %v1264_v42 = vpop.permute.xlu1 %1263 }
 0x269   : > { %1336 = vst.msk [vmem:[#allocation3 + $0x240] sm:$0xff] %vm1311_vm5, %v1264_v42  ;;  %v2127_v47 = vld [vmem:[#allocation3 + $0x270] sm:$0xff] }
 0x26c   : > { %1883 = vrot.lane.b32.xlu2 %v1806_v41, %s6902_s22 }
 0x26d   : > { %1891 = vrot.lane.b32.xlu0 %v7797_v23, %s6902_s22  ;;  %v2172_v23 = vld [vmem:[%s11300_s3 + $0xd8] sm:$0xff] }
 0x26e   : > { %1881 = vrot.lane.b32.xlu1 %v1805_v12, %s6902_s22  ;;  %v1690_v40 = vpop.permute.xlu2 %1689  ;;  %2398 = vmatpush.msra.mxu2 %v2172_v23 }
 0x26f   : > { %v1680_v30 = vpop.permute.xlu0 %1679  ;;  %1773 = vst.msk [vmem:[#allocation3 + $0x128] sm:$0xff] %vm1118_vm4, %v1690_v40 }
 0x270   : > { %1768 = vst.msk [vmem:[#allocation3 + $0xb0] sm:$0xff] %vm1118_vm4, %v1680_v30  ;;  %v1670_v19 = vpop.permute.xlu1 %1669  ;;  %v2121_v35 = vld [vmem:[#allocation3 + $0x240] sm:$0xff]  ;;  %2399 = vmatpush.msra.mxu2 %v2171_v60 }
 0x271   : > { %1763 = vst.msk [vmem:[#allocation3 + $0x38] sm:$0xff] %vm1118_vm4, %v1670_v19  ;;  %2369 = vmatmul.f32.gmra.mxu2 %v2121_v35 }
 0x274   : > { %1889 = vrot.lane.b32.xlu2 %v7811_v6, %s6902_s22  ;;  %v2170_v6 = vld [vmem:[%s11300_s3 + $0xc8] sm:$0xff] }
 0x275   : > { %1897 = vrot.lane.b32.xlu0 %v7879_v7, %s6902_s22  ;;  %2400 = vmatpush.msra.mxu2 %v2170_v6 }
 0x276   : > { %1887 = vrot.lane.b32.xlu1 %v7791_v22, %s6902_s22  ;;  %v1696_v28 = vpop.permute.xlu2 %1695  ;;  %v1816_v22 = vld [vmem:[#allocation2 + $0x141] sm:$0xff] }
 0x277   : > { %v1686_v26 = vpop.permute.xlu0 %1685  ;;  %1776 = vst.msk [vmem:[#allocation3 + $0x170] sm:$0xff] %vm1118_vm4, %v1696_v28  ;;  %2401 = vmatpush.msra.mxu2 %v2169_v50 }
 0x278   : > { %1771 = vst.msk [vmem:[#allocation3 + $0xf8] sm:$0xff] %vm1118_vm4, %v1686_v26  ;;  %v1676_v36 = vpop.permute.xlu1 %1675 }
 0x279   : > { %1766 = vst.msk [vmem:[#allocation3 + $0x80] sm:$0xff] %vm1118_vm4, %v1676_v36  ;;  %2372 = vmatmul.f32.gmra.mxu2 %v2124_v43 }
 0x27c   : > { %1895 = vrot.lane.b32.xlu2 %v7857_v55, %s6902_s22  ;;  %v2168_v55 = vld [vmem:[%s11300_s3 + $0xb8] sm:$0xff] }
 0x27d   : > { %1903 = vrot.lane.b32.xlu0 %v1816_v22, %s6902_s22  ;;  %2402 = vmatpush.msra.mxu2 %v2168_v55 }
 0x27e   : > { %1893 = vrot.lane.b32.xlu1 %v7864_v0, %s6902_s22  ;;  %v1702_v10 = vpop.permute.xlu2 %1701  ;;  %v1819_v0 = vld [vmem:[#allocation2 + $0x169] sm:$0xff] }
 0x27f   : > { %v1692_v7 = vpop.permute.xlu0 %1691  ;;  %1779 = vst.msk [vmem:[#allocation3 + $0x1b8] sm:$0xff] %vm1118_vm4, %v1702_v10  ;;  %2403 = vmatpush.msra.mxu2 %v2167_v56 }
 0x280   : > { %1774 = vst.msk [vmem:[#allocation3 + $0x140] sm:$0xff] %vm1118_vm4, %v1692_v7  ;;  %v1682_v44 = vpop.permute.xlu1 %1681 }
 0x281   : > { %1769 = vst.msk [vmem:[#allocation3 + $0xc8] sm:$0xff] %vm1118_vm4, %v1682_v44  ;;  %2375 = vmatmul.f32.gmra.mxu2 %v2127_v47 }
 0x284   : > { %1901 = vrot.lane.b32.xlu2 %v7934_v29, %s6902_s22  ;;  %v2166_v29 = vld [vmem:[%s11300_s3 + $0xa8] sm:$0xff] }
 0x285   : > { %1909 = vrot.lane.b32.xlu0 %v1819_v0, %s6902_s22  ;;  %2404 = vmatpush.msra.mxu2 %v2166_v29 }
 0x286   : > { %1899 = vrot.lane.b32.xlu1 %v7913_v21, %s6902_s22  ;;  %v1708_v52 = vpop.permute.xlu2 %1707  ;;  %v1822_v21 = vld [vmem:[#allocation2 + $0x189] sm:$0xff] }
 0x287   : > { %v1698_v39 = vpop.permute.xlu0 %1697  ;;  %1782 = vst.msk [vmem:[#allocation3 + $0x200] sm:$0xff] %vm1118_vm4, %v1708_v52  ;;  %2405 = vmatpush.msra.mxu2 %v2165_v1 }
 0x288   : > { %1777 = vst.msk [vmem:[#allocation3 + $0x188] sm:$0xff] %vm1118_vm4, %v1698_v39  ;;  %v1688_v53 = vpop.permute.xlu1 %1687 }
 0x289   : > { %1772 = vst.msk [vmem:[#allocation3 + $0x110] sm:$0xff] %vm1118_vm4, %v1688_v53  ;;  %2378 = vmatmul.f32.gmra.mxu2 %v2130_v49 }
 0x28a   : > { %2406 = vmatpush.msra.mxu2 %v2164_v13 }
 0x28c   : > { %1907 = vrot.lane.b32.xlu2 %v1818_v54, %s6902_s22  ;;  %2407 = vmatpush.msra.mxu2 %v2163_v31  ;;  %v1823_v31 = vld [vmem:[#allocation2 + $0x199] sm:$0xff] }
 0x28d   : > { %1915 = vrot.lane.b32.xlu0 %v1822_v21, %s6902_s22 }
 0x28e   : > { %1905 = vrot.lane.b32.xlu1 %v1817_v33, %s6902_s22  ;;  %v1714_v46 = vpop.permute.xlu2 %1713  ;;  %2408 = vmatpush.msra.mxu2 %v2162_v27  ;;  %v8250_v27 = vpop.f32.mrf.mxu1 }
 0x28f   : > { %v1704_v45 = vpop.permute.xlu0 %1703  ;;  %1785 = vst.msk [vmem:[#allocation3 + $0x248] sm:$0xff] %vm1118_vm4, %v1714_v46 }
 0x290   : > { %1780 = vst.msk [vmem:[#allocation3 + $0x1d0] sm:$0xff] %vm1118_vm4, %v1704_v45  ;;  %v1694_v17 = vpop.permute.xlu1 %1693  ;;  %2409 = vmatpush.msra.mxu2 %v2161_v48 }
 0x291   : > { %1775 = vst.msk [vmem:[#allocation3 + $0x158] sm:$0xff] %vm1118_vm4, %v1694_v17  ;;  %2381 = vmatmul.f32.gmra.mxu2 %v2133_v2 }
 0x292   : > { %2519 = vmatpush.msrb.mxu2 %v6824_v61 }
 0x294   : > { %1913 = vrot.lane.b32.xlu2 %v1821_v4, %s6902_s22  ;;  %2520 = vmatpush.msrb.mxu2 %v6825_v32 }
 0x296   : > { %1911 = vrot.lane.b32.xlu1 %v1820_v8, %s6902_s22  ;;  %v1720_v51 = vpop.permute.xlu2 %1719  ;;  %2521 = vmatpush.msrb.mxu2 %v6826_v34 }
 0x297   : > { %v1710_v58 = vpop.permute.xlu0 %1709  ;;  %1788 = vst.msk [vmem:[#allocation3 + $0x290] sm:$0xff] %vm1118_vm4, %v1720_v51 }
 0x298   : > { %1783 = vst.msk [vmem:[#allocation3 + $0x218] sm:$0xff] %vm1118_vm4, %v1710_v58  ;;  %v1700_v59 = vpop.permute.xlu1 %1699  ;;  %2522 = vmatpush.msrb.mxu2 %v6827_v16 }
 0x299   : > { %1778 = vst.msk [vmem:[#allocation3 + $0x1a0] sm:$0xff] %vm1118_vm4, %v1700_v59  ;;  %2384 = vmatmul.f32.gmra.mxu2 %v2136_v11 }
 0x29e   : > { %v1726_v3 = vpop.permute.xlu2 %1725  ;;  %1917 = vrot.lane.b32.xlu1 %v1823_v31, %s6902_s22 }
 0x29f   : > { %v1716_v15 = vpop.permute.xlu0 %1715  ;;  %1791 = vst.msk [vmem:[#allocation3 + $0x2d8] sm:$0xff] %vm1118_vm4, %v1726_v3 }
 0x2a0   : > { %1786 = vst.msk [vmem:[#allocation3 + $0x260] sm:$0xff] %vm1118_vm4, %v1716_v15  ;;  %v1706_v18 = vpop.permute.xlu1 %1705 }
 0x2a1   : > { %1781 = vst.msk [vmem:[#allocation3 + $0x1e8] sm:$0xff] %vm1118_vm4, %v1706_v18  ;;  %2387 = vmatmul.f32.gmra.mxu2 %v2139_v20 }
 0x2a6   : > { %v1860_v62 = vpop.permute.xlu2 %1859 }
 0x2a7   : > { %v1722_v63 = vpop.permute.xlu0 %1721  ;;  %1954 = vst.msk [vmem:[#allocation3 + $0x20] sm:$0xff] %vm1311_vm5, %v1860_v62  ;;  %v8254_v62 = vpop.f32.mrf.mxu1 }
 0x2a8   : > { %1789 = vst.msk [vmem:[#allocation3 + $0x2a8] sm:$0xff] %vm1118_vm4, %v1722_v63  ;;  %v1712_v24 = vpop.permute.xlu1 %1711 }
 0x2a9   : > { %1784 = vst.msk [vmem:[#allocation3 + $0x230] sm:$0xff] %vm1118_vm4, %v1712_v24  ;;  %2390 = vmatmul.f32.gmra.mxu2 %v2142_v37  ;;  %v1824_v24 = vld [vmem:[#allocation2 + $0x1a1] sm:$0xff] }
 0x2aa   : > { %1919 = vrot.lane.b32.xlu2 %v1824_v24, %s6902_s22 }
 0x2ae   : > { %v1866_v14 = vpop.permute.xlu2 %1865  ;;  %v2053_v60 = vld [vmem:[#allocation3 + $0x20] sm:$0xff] }
 0x2af   : > { %v1728_v25 = vpop.permute.xlu0 %1727  ;;  %1957 = vst.msk [vmem:[#allocation3 + $0x68] sm:$0xff] %vm1311_vm5, %v1866_v14  ;;  %v8259_v34 = vpop.f32.mrf.mxu1 }
 0x2b0   : > { %1792 = vst.msk [vmem:[#allocation3 + $0x2f0] sm:$0xff] %vm1118_vm4, %v1728_v25  ;;  %v1718_v42 = vpop.permute.xlu1 %1717 }
 0x2b1   : > { %1787 = vst.msk [vmem:[#allocation3 + $0x278] sm:$0xff] %vm1118_vm4, %v1718_v42 }
 0x2b6   : > { %v1872_v41 = vpop.permute.xlu2 %1871  ;;  %v2062_v53 = vld [vmem:[#allocation3 + $0x68] sm:$0xff] }
 0x2b7   : > { %v1862_v9 = vpop.permute.xlu0 %1861  ;;  %1960 = vst.msk [vmem:[#allocation3 + $0xb0] sm:$0xff] %vm1311_vm5, %v1872_v41  ;;  %v8263_v14 = vpop.f32.mrf.mxu1 }
 0x2b8   : > { %1955 = vst.msk [vmem:[#allocation3 + $0x38] sm:$0xff] %vm1311_vm5, %v1862_v9  ;;  %v1724_v12 = vpop.permute.xlu1 %1723 }
 0x2b9   : > { %1790 = vst.msk [vmem:[#allocation3 + $0x2c0] sm:$0xff] %vm1118_vm4, %v1724_v12 }
 0x2be   : > { %v1878_v40 = vpop.permute.xlu2 %1877  ;;  %v2071_v4 = vld [vmem:[#allocation3 + $0xb0] sm:$0xff] }
 0x2bf   : > { %v1868_v30 = vpop.permute.xlu0 %1867  ;;  %1963 = vst.msk [vmem:[#allocation3 + $0xf8] sm:$0xff] %vm1311_vm5, %v1878_v40  ;;  %v2056_v10 = vld [vmem:[#allocation3 + $0x38] sm:$0xff]  ;;  %v8267_v41 = vpop.f32.mrf.mxu1 }
 0x2c0   : > { %1958 = vst.msk [vmem:[#allocation3 + $0x80] sm:$0xff] %vm1311_vm5, %v1868_v30  ;;  %v1858_v19 = vpop.permute.xlu1 %1857  ;;  %v2545_v30 = vpop.f32.mrf.mxu3 }
 0x2c1   : > { %1953 = vst.msk [vmem:[#allocation3 + $0x8] sm:$0xff] %vm1311_vm5, %v1858_v19  ;;  %v2748_v19 = vld [vmem:[#allocation2 + $0x1] sm:$0xff] }
 0x2c2   : > { %2812 = vrot.lane.b32.xlu0 %v2748_v19, %s6900_s10 }
 0x2c6   : > { %v1884_v5 = vpop.permute.xlu2 %1883  ;;  %v2080_v13 = vld [vmem:[#allocation3 + $0xf8] sm:$0xff] }
 0x2c7   : > { %v1874_v35 = vpop.permute.xlu0 %1873  ;;  %1966 = vst.msk [vmem:[#allocation3 + $0x140] sm:$0xff] %vm1311_vm5, %v1884_v5  ;;  %v2065_v21 = vld [vmem:[#allocation3 + $0x80] sm:$0xff] }
 0x2c8   : > { %1961 = vst.msk [vmem:[#allocation3 + $0xc8] sm:$0xff] %vm1311_vm5, %v1874_v35  ;;  %v1864_v23 = vpop.permute.xlu1 %1863  ;;  %v2050_v26 = vld [vmem:[#allocation3 + $0x8] sm:$0xff]  ;;  %v8272_v35 = vpop.f32.mrf.mxu1 }
 0x2c9   : > { %1956 = vst.msk [vmem:[#allocation3 + $0x50] sm:$0xff] %vm1311_vm5, %v1864_v23  ;;  %2410 = vmatmul.f32.vlgmr.msra.gmra.mxu2 %v2050_v26  ;;  %v2548_v23 = vpop.f32.mrf.mxu3 }
 0x2ce   : > { %v1890_v36 = vpop.permute.xlu2 %1889  ;;  %v2089_v61 = vld [vmem:[#allocation3 + $0x140] sm:$0xff] }
 0x2cf   : > { %v1880_v28 = vpop.permute.xlu0 %1879  ;;  %1969 = vst.msk [vmem:[#allocation3 + $0x188] sm:$0xff] %vm1311_vm5, %v1890_v36  ;;  %v2074_v51 = vld [vmem:[#allocation3 + $0xc8] sm:$0xff]  ;;  %v2940_v36 = vld [vmem:[#allocation2 + $0x2] sm:$0xff] }
 0x2d0   : > { %1964 = vst.msk [vmem:[#allocation3 + $0x110] sm:$0xff] %vm1311_vm5, %v1880_v28  ;;  %v1870_v43 = vpop.permute.xlu1 %1869  ;;  %v2059_v55 = vld [vmem:[#allocation3 + $0x50] sm:$0xff]  ;;  %v2941_v28 = vld [vmem:[#allocation2 + $0xa] sm:$0xff]  ;;  %3004 = vrot.lane.b32.xlu2 %v2940_v36, %s6901_s15 }
 0x2d1   : > { %1959 = vst.msk [vmem:[#allocation3 + $0x98] sm:$0xff] %vm1311_vm5, %v1870_v43  ;;  %2413 = vmatmul.f32.gmra.mxu2 %v2053_v60  ;;  %3006 = vrot.lane.b32.xlu0 %v2941_v28, %s6901_s15  ;;  %v8278_v43 = vpop.f32.mrf.mxu1  ;;  %v2015_v36 = vld [vmem:[#allocation2 + $0x19a] sm:$0xff] }
 0x2d2   : > { %2047 = vst.msk [vmem:[#allocation3 + $0x2e0] sm:$0xff] %vm332_vm1, %v2015_v36 }
 0x2d6   : > { %v1896_v22 = vpop.permute.xlu2 %1895  ;;  %v2098_v25 = vld [vmem:[#allocation3 + $0x188] sm:$0xff] }
 0x2d7   : > { %v1886_v6 = vpop.permute.xlu0 %1885  ;;  %1972 = vst.msk [vmem:[#allocation3 + $0x1d0] sm:$0xff] %vm1311_vm5, %v1896_v22  ;;  %v2083_v3 = vld [vmem:[#allocation3 + $0x110] sm:$0xff]  ;;  %v2551_v22 = vpop.f32.mrf.mxu3 }
 0x2d8   : > { %1967 = vst.msk [vmem:[#allocation3 + $0x158] sm:$0xff] %vm1311_vm5, %v1886_v6  ;;  %v1876_v7 = vpop.permute.xlu1 %1875  ;;  %v2068_v46 = vld [vmem:[#allocation3 + $0x98] sm:$0xff]  ;;  %3704 = vrot.lane.b32.xlu2 %v8060_v57, %s6901_s15 }
 0x2d9   : > { %1962 = vst.msk [vmem:[#allocation3 + $0xe0] sm:$0xff] %vm1311_vm5, %v1876_v7  ;;  %2416 = vmatmul.f32.gmra.mxu2 %v2056_v10  ;;  %3706 = vrot.lane.b32.xlu0 %v8049_v38, %s6901_s15  ;;  %v2749_v7 = vld [vmem:[#allocation2 + $0x9] sm:$0xff] }
 0x2da   : > { %2814 = vrot.lane.b32.xlu1 %v2749_v7, %s6900_s10 }
 0x2db   : > { %v8232_v54 = vpop.f32.mrf.mxu2 }
 0x2de   : > { %v1902_v47 = vpop.permute.xlu2 %1901  ;;  %v2107_v26 = vld [vmem:[#allocation3 + $0x1d0] sm:$0xff] }
 0x2df   : > { %v1892_v44 = vpop.permute.xlu0 %1891  ;;  %1975 = vst.msk [vmem:[#allocation3 + $0x218] sm:$0xff] %vm1311_vm5, %v1902_v47  ;;  %v2092_v63 = vld [vmem:[#allocation3 + $0x158] sm:$0xff] }
 0x2e0   : > { %1970 = vst.msk [vmem:[#allocation3 + $0x1a0] sm:$0xff] %vm1311_vm5, %v1892_v44  ;;  %v1882_v50 = vpop.permute.xlu1 %1881  ;;  %v2077_v59 = vld [vmem:[#allocation3 + $0xe0] sm:$0xff]  ;;  %v2319_v44 = vpop.f32.mrf.mxu1 }
 0x2e1   : > { %1965 = vst.msk [vmem:[#allocation3 + $0x128] sm:$0xff] %vm1311_vm5, %v1882_v50  ;;  %2419 = vmatmul.f32.gmra.mxu2 %v2059_v55  ;;  %v8289_v50 = vpop.f32.mrf.mxu3 }
 0x2e6   : > { %v1908_v39 = vpop.permute.xlu2 %1907 }
 0x2e7   : > { %v1898_v0 = vpop.permute.xlu0 %1897  ;;  %1978 = vst.msk [vmem:[#allocation3 + $0x260] sm:$0xff] %vm1311_vm5, %v1908_v39  ;;  %v2101_v9 = vld [vmem:[#allocation3 + $0x1a0] sm:$0xff]  ;;  %v2116_v39 = vld [vmem:[#allocation3 + $0x218] sm:$0xff] }
 0x2e8   : > { %1973 = vst.msk [vmem:[#allocation3 + $0x1e8] sm:$0xff] %vm1311_vm5, %v1898_v0  ;;  %v1888_v52 = vpop.permute.xlu1 %1887  ;;  %v2086_v20 = vld [vmem:[#allocation3 + $0x128] sm:$0xff]  ;;  %v2322_v0 = vpop.f32.mrf.mxu1 }
 0x2e9   : > { %1968 = vst.msk [vmem:[#allocation3 + $0x170] sm:$0xff] %vm1311_vm5, %v1888_v52  ;;  %2422 = vmatmul.f32.gmra.mxu2 %v2062_v53  ;;  %v8295_v53 = vpop.f32.mrf.mxu3 }
 0x2ee   : > { %v1914_v56 = vpop.permute.xlu2 %1913 }
 0x2ef   : > { %v1904_v49 = vpop.permute.xlu0 %1903  ;;  %1981 = vst.msk [vmem:[#allocation3 + $0x2a8] sm:$0xff] %vm1311_vm5, %v1914_v56  ;;  %v2110_v6 = vld [vmem:[#allocation3 + $0x1e8] sm:$0xff] }
 0x2f0   : > { %1976 = vst.msk [vmem:[#allocation3 + $0x230] sm:$0xff] %vm1311_vm5, %v1904_v49  ;;  %v1894_v29 = vpop.permute.xlu1 %1893  ;;  %v2095_v37 = vld [vmem:[#allocation3 + $0x170] sm:$0xff]  ;;  %v2325_v38 = vpop.f32.mrf.mxu1 }
 0x2f1   : > { %1971 = vst.msk [vmem:[#allocation3 + $0x1b8] sm:$0xff] %vm1311_vm5, %v1894_v29  ;;  %2425 = vmatmul.f32.gmra.mxu2 %v2065_v21  ;;  %v8300_v49 = vld [vmem:[%s11301_s4] ss:$0 sm:$0xff] }
 0x2f2   : > { %v2320_v56 = vadd.f32 %v8300_v49, %v2319_v44  ;;  %v2326_v24 = vadd.f32 %v8300_v49, %v2325_v38 }
 0x2f4   : > { %v8236_v17 = vpop.f32.mrf.mxu2 }
 0x2f7   : > { %v1910_v33 = vpop.permute.xlu0 %1909  ;;  %v2119_v57 = vld [vmem:[#allocation3 + $0x230] sm:$0xff] }
 0x2f8   : > { %1979 = vst.msk [vmem:[#allocation3 + $0x278] sm:$0xff] %vm1311_vm5, %v1910_v33  ;;  %v1900_v45 = vpop.permute.xlu1 %1899  ;;  %v2104_v40 = vld [vmem:[#allocation3 + $0x1b8] sm:$0xff]  ;;  %v2328_v33 = vpop.f32.mrf.mxu1 }
 0x2f9   : > { %1974 = vst.msk [vmem:[#allocation3 + $0x200] sm:$0xff] %vm1311_vm5, %v1900_v45  ;;  %2428 = vmatmul.f32.gmra.mxu2 %v2068_v46  ;;  %v8303_v46 = vpop.f32.mrf.mxu3 }
 0x2fc   : > { %v8240_v8 = vpop.f32.mrf.mxu2 }
 0x2ff   : > { %v1916_v2 = vpop.permute.xlu0 %1915  ;;  %v2128_v19 = vld [vmem:[#allocation3 + $0x278] sm:$0xff] }
 0x300   : > { %1982 = vst.msk [vmem:[#allocation3 + $0x2c0] sm:$0xff] %vm1311_vm5, %v1916_v2  ;;  %v1906_v1 = vpop.permute.xlu1 %1905  ;;  %v2113_v47 = vld [vmem:[#allocation3 + $0x200] sm:$0xff]  ;;  %v2331_v31 = vpop.f32.mrf.mxu1 }
 0x301   : > { %1977 = vst.msk [vmem:[#allocation3 + $0x248] sm:$0xff] %vm1311_vm5, %v1906_v1  ;;  %2431 = vmatmul.f32.gmra.mxu2 %v2071_v4  ;;  %v2323_v4 = vadd.f32 %v8300_v49, %v2322_v0 }
 0x304   : > { %v8243_v11 = vpop.f32.mrf.mxu2  ;;  %v1920_v44 = vpop.permute.xlu2 %1919 }
 0x305   : > { %1984 = vst.msk [vmem:[#allocation3 + $0x2f0] sm:$0xff] %vm1311_vm5, %v1920_v44 }
 0x308   : > { %v1912_v58 = vpop.permute.xlu1 %1911  ;;  %v2122_v2 = vld [vmem:[#allocation3 + $0x248] sm:$0xff]  ;;  %v2334_v7 = vpop.f32.mrf.mxu1 }
 0x309   : > { %1980 = vst.msk [vmem:[#allocation3 + $0x290] sm:$0xff] %vm1311_vm5, %v1912_v58  ;;  %2434 = vmatmul.f32.gmra.mxu2 %v2074_v51 }
 0x30c   : > { %v8246_v15 = vpop.f32.mrf.mxu2 }
 0x310   : > { %v2131_v38 = vld [vmem:[#allocation3 + $0x290] sm:$0xff] }
 0x311   : > { %2437 = vmatmul.f32.gmra.mxu2 %v2077_v59 }
 0x314   : > { %v8248_v18 = vpop.f32.mrf.mxu2 }
 0x319   : > { %2440 = vmatmul.f32.gmra.mxu2 %v2080_v13  ;;  %v2125_v13 = vld [vmem:[#allocation3 + $0x260] sm:$0xff] }
 0x31c   : > { %v8252_v48 = vpop.f32.mrf.mxu2 }
 0x321   : > { %2443 = vmatmul.f32.gmra.mxu2 %v2083_v3 }
 0x324   : > { %v8256_v32 = vpop.f32.mrf.mxu2 }
 0x329   : > { %2446 = vmatmul.f32.gmra.mxu2 %v2086_v20  ;;  %v8307_v20 = vpop.f32.mrf.mxu3 }
 0x32c   : > { %v8261_v16 = vpop.f32.mrf.mxu2 }
 0x331   : > { %2449 = vmatmul.f32.gmra.mxu2 %v2089_v61 }
 0x339   : > { %2452 = vmatmul.f32.gmra.mxu2 %v2092_v63 }
 0x341   : > { %2455 = vmatmul.f32.gmra.mxu2 %v2095_v37  ;;  %v1918_v37 = vpop.permute.xlu1 %1917 }
 0x342   : > { %1983 = vst.msk [vmem:[#allocation3 + $0x2d8] sm:$0xff] %vm1311_vm5, %v1918_v37 }
 0x349   : > { %2458 = vmatmul.f32.gmra.mxu2 %v2098_v25 }
 0x34c   : > { %v8265_v42 = vpop.f32.mrf.mxu2 }
 0x351   : > { %2461 = vmatmul.f32.gmra.mxu2 %v2101_v9  ;;  %v8315_v9 = vld [vmem:[#allocation3 + $0x88] sm:$0xff] }
 0x354   : > { %v8269_v12 = vpop.f32.mrf.mxu2 }
 0x359   : > { %2464 = vmatmul.f32.gmra.mxu2 %v2104_v40 }
 0x35c   : > { %v8274_v5 = vpop.f32.mrf.mxu2 }
 0x361   : > { %2467 = vmatmul.f32.gmra.mxu2 %v2107_v26 }
 0x364   : > { %v8280_v60 = vpop.f32.mrf.mxu2 }
 0x369   : > { %2470 = vmatmul.f32.gmra.mxu2 %v2110_v6  ;;  %v2329_v6 = vadd.f32 %v8300_v49, %v2328_v33  ;;  %v2016_v33 = vld [vmem:[#allocation2 + $0x1a2] sm:$0xff] }
 0x36a   : > { %2048 = vst.msk [vmem:[#allocation3 + $0x2f8] sm:$0xff] %vm332_vm1, %v2016_v33 }
 0x36c   : > { %v8286_v10 = vpop.f32.mrf.mxu2 }
 0x371   : > { %2473 = vmatmul.f32.gmra.mxu2 %v2113_v47  ;;  %v8323_v47 = vpop.f32.mrf.mxu3 }
 0x374   : > { %v8291_v55 = vpop.f32.mrf.mxu2 }
 0x379   : > { %2476 = vmatmul.f32.gmra.mxu2 %v2116_v39 }
 0x37c   : > { %v8293_v52 = vpop.f32.mrf.mxu2 }
 0x381   : > { %2479 = vmatmul.f32.gmra.mxu2 %v2119_v57 }
 0x384   : > { %v2432_v29 = vpop.f32.mrf.mxu2 }
 0x385   : > { %v2433_v21 = vadd.f32 %v2432_v29, %v2320_v56  ;;  %v2332_v29 = vadd.f32 %v8300_v49, %v2331_v31  ;;  %v2134_v31 = vld [vmem:[#allocation3 + $0x2a8] sm:$0xff] }
 0x387   : > { %v2546_v45 = vadd.f32 %v2545_v30, %v2433_v21 }
 0x389   : > { %v2627_v1 = vmax.f32 %v2546_v45, 0.0  ;;  %2482 = vmatmul.f32.gmra.mxu2 %v2122_v2  ;;  %v2141_v2 = vld [vmem:[#allocation3 + $0x2e0] sm:$0xff] }
 0x38a   : > { %6699 = vmatmul.msk.f32.gmra.mxu3 %vm332_vm1, %v2141_v2  ;;  %4026 = vst.msk [vmem:[#allocation3 + $0x2e0] sm:$0xff] %vm332_vm1, %v2015_v36 }
 0x38b   : > { %2659 = vst.msk [vmem:[#allocation2 + $0x69] sm:$0xff] %vm332_vm1, %v2627_v1  ;;  %v2337_v1 = vpop.f32.mrf.mxu1 }
 0x38c   : > { %v2435_v58 = vpop.f32.mrf.mxu2 }
 0x38d   : > { %v2436_v51 = vadd.f32 %v2435_v58, %v2323_v4  ;;  %v8341_v58 = vld [vmem:[#allocation3 + $0xa0] sm:$0xff] }
 0x38f   : > { %v2549_v59 = vadd.f32 %v2548_v23, %v2436_v51  ;;  %v8343_v51 = vpop.f32.mrf.mxu3 }
 0x391   : > { %v2628_v3 = vmax.f32 %v2549_v59, 0.0  ;;  %2485 = vmatmul.f32.gmra.mxu2 %v2125_v13 }
 0x392   : > { %v3395_v61 = vld [vmem:[#allocation2 + $0x6a] sm:$0xff] }
 0x393   : > { %v2757_v63 = vld [vmem:[#allocation2 + $0x69] sm:$0xff]  ;;  %2660 = vst.msk [vmem:[#allocation2 + $0x79] sm:$0xff] %vm332_vm1, %v2628_v3  ;;  %3466 = vrot.lane.b32.xlu1 %v3395_v61, %s6900_s10  ;;  %3022 = vrot.lane.b32.xlu2 %v3395_v61, %s6901_s15 }
 0x394   : > { %2830 = vrot.lane.b32.xlu0 %v2757_v63, %s6900_s10  ;;  %v2438_v25 = vpop.f32.mrf.mxu2  ;;  %4001 = vst.msk [vmem:[#allocation3 + $0x88] sm:$0xff] %vm332_vm1, %v3395_v61 }
 0x395   : > { %v2439_v30 = vadd.f32 %v2438_v25, %v2326_v24  ;;  %3363 = vst.msk [vmem:[#allocation3 + $0xb0] sm:$0xff] %vm332_vm1, %v2757_v63  ;;  %v2335_v24 = vadd.f32 %v8300_v49, %v2334_v7 }
 0x397   : > { %v2552_v40 = vadd.f32 %v2551_v22, %v2439_v30  ;;  %v2340_v30 = vpop.f32.mrf.mxu1 }
 0x399   : > { %v2629_v23 = vmax.f32 %v2552_v40, 0.0  ;;  %2488 = vmatmul.f32.gmra.mxu2 %v2128_v19 }
 0x39a   : > { %v2758_v26 = vld [vmem:[#allocation2 + $0x79] sm:$0xff] }
 0x39b   : > { %v3586_v28 = vld [vmem:[#allocation2 + $0x78] sm:$0xff]  ;;  %2661 = vst.msk [vmem:[#allocation2 + $0x81] sm:$0xff] %vm332_vm1, %v2629_v23  ;;  %2832 = vrot.lane.b32.xlu1 %v2758_v26, %s6900_s10  ;;  %v8364_v23 = vpop.f32.mrf.mxu3 }
 0x39c   : > { %3656 = vrot.lane.b32.xlu2 %v3586_v28, %s6901_s15  ;;  %3846 = vrot.lane.b32.xlu0 %v2757_v63, %s6902_s22  ;;  %v2441_v22 = vpop.f32.mrf.mxu2  ;;  %3364 = vst.msk [vmem:[#allocation3 + $0xc8] sm:$0xff] %vm332_vm1, %v2758_v26 }
 0x39d   : > { %v2442_v0 = vadd.f32 %v2441_v22, %v2329_v6  ;;  %2726 = vst.msk [vmem:[#allocation3 + $0xf0] sm:$0xff] %vm332_vm1, %v3586_v28  ;;  %v2338_v6 = vadd.f32 %v8300_v49, %v2337_v1  ;;  %v2143_v1 = vld [vmem:[#allocation3 + $0x2f0] sm:$0xff] }
 0x39f   : > { %v2555_v39 = vadd.f32 %v8289_v50, %v2442_v0  ;;  %v2343_v0 = vpop.f32.mrf.mxu1 }
 0x3a1   : > { %v2630_v57 = vmax.f32 %v2555_v39, 0.0  ;;  %2491 = vmatmul.f32.gmra.mxu2 %v2131_v38  ;;  %v2140_v38 = vld [vmem:[#allocation3 + $0x2d8] sm:$0xff] }
 0x3a2   : > { %v2759_v56 = vld [vmem:[#allocation2 + $0x81] sm:$0xff] }
 0x3a3   : > { %2662 = vst.msk [vmem:[#allocation2 + $0x91] sm:$0xff] %vm332_vm1, %v2630_v57  ;;  %3848 = vrot.lane.b32.xlu1 %v2758_v26, %s6902_s22  ;;  %v3396_v21 = vld [vmem:[#allocation2 + $0x7a] sm:$0xff]  ;;  %v3971_v59 = vld [vmem:[#allocation2 + $0x82] sm:$0xff]  ;;  %v2137_v26 = vld [vmem:[#allocation3 + $0x2c0] sm:$0xff] }
 0x3a4   : > { %2834 = vrot.lane.b32.xlu2 %v2759_v56, %s6900_s10  ;;  %3212 = vrot.lane.b32.xlu0 %v3586_v28, %s6902_s22  ;;  %v2444_v45 = vpop.f32.mrf.mxu2  ;;  %v8336_v50 = vld [vmem:[#allocation2 + $0x80] sm:$0xff]  ;;  %4002 = vst.msk [vmem:[#allocation3 + $0xa0] sm:$0xff] %vm332_vm1, %v3396_v21 }
 0x3a5   : > { %v2445_v4 = vadd.f32 %v2444_v45, %v2332_v29  ;;  %2727 = vst.msk [vmem:[#allocation3 + $0x108] sm:$0xff] %vm332_vm1, %v8336_v50  ;;  %v2951_v61 = vld [vmem:[#allocation2 + $0x82] sm:$0xff]  ;;  %v8383_v29 = vpop.f32.mrf.mxu3  ;;  %v2341_v45 = vadd.f32 %v8300_v49, %v2340_v30 }
 0x3a6   : > { %3365 = vst.msk [vmem:[#allocation3 + $0xe0] sm:$0xff] %vm332_vm1, %v2759_v56 }
 0x3a7   : > { %v2558_v13 = vadd.f32 %v8295_v53, %v2445_v4  ;;  %4003 = vst.msk [vmem:[#allocation3 + $0xb8] sm:$0xff] %vm332_vm1, %v3971_v59  ;;  %v2144_v53 = vld [vmem:[#allocation3 + $0x2f8] sm:$0xff]  ;;  %v2346_v4 = vpop.f32.mrf.mxu1 }
 0x3a8   : > { %4027 = vst.msk [vmem:[#allocation3 + $0x2f8] sm:$0xff] %vm332_vm1, %v2016_v33  ;;  %6700 = vmatmul.msk.f32.gmra.mxu3 %vm332_vm1, %v2144_v53 }
 0x3a9   : > { %v2631_v3 = vmax.f32 %v2558_v13, 0.0  ;;  %2494 = vmatmul.f32.gmra.mxu2 %v2134_v31 }
 0x3aa   : > { %v3588_v63 = vld [vmem:[#allocation2 + $0x90] sm:$0xff] }
 0x3ab   : > { %2663 = vst.msk [vmem:[#allocation2 + $0x99] sm:$0xff] %vm332_vm1, %v2631_v3  ;;  %3026 = vrot.lane.b32.xlu1 %v2951_v61, %s6901_s15  ;;  %v8355_v37 = vld [vmem:[#allocation2 + $0x91] sm:$0xff] }
 0x3ac   : > { %3468 = vrot.lane.b32.xlu2 %v3396_v21, %s6900_s10  ;;  %3024 = vrot.lane.b32.xlu0 %v3396_v21, %s6901_s15  ;;  %v2447_v25 = vpop.f32.mrf.mxu2  ;;  %2728 = vst.msk [vmem:[#allocation3 + $0x120] sm:$0xff] %vm332_vm1, %v3588_v63 }
 0x3ad   : > { %v2448_v40 = vadd.f32 %v2447_v25, %v2335_v24  ;;  %3366 = vst.msk [vmem:[#allocation3 + $0xf8] sm:$0xff] %vm332_vm1, %v8355_v37  ;;  %v8409_v24 = vpop.f32.mrf.mxu3 }
 0x3af   : > { %v2561_v19 = vadd.f32 %v8303_v46, %v2448_v40  ;;  %v2051_v40 = vld [vmem:[#allocation3 + $0x10] sm:$0xff] }
 0x3b1   : > { %v2632_v28 = vmax.f32 %v2561_v19, 0.0  ;;  %2497 = vmatmul.f32.gmra.mxu2 %v2137_v26  ;;  %v2349_v19 = vpop.f32.mrf.mxu1 }
 0x3b2   : > { %v8366_v36 = vld [vmem:[#allocation2 + $0x99] sm:$0xff] }
 0x3b3   : > { %2664 = vst.msk [vmem:[#allocation2 + $0xa9] sm:$0xff] %vm332_vm1, %v2632_v28  ;;  %3214 = vrot.lane.b32.xlu1 %v8336_v50, %s6902_s22  ;;  %v8373_v7 = vld [vmem:[#allocation2 + $0x98] sm:$0xff] }
 0x3b4   : > { %3850 = vrot.lane.b32.xlu2 %v2759_v56, %s6902_s22  ;;  %v3972_v44 = vld [vmem:[#allocation2 + $0x92] sm:$0xff]  ;;  %3470 = vrot.lane.b32.xlu0 %v2951_v61, %s6900_s10  ;;  %v2450_v46 = vpop.f32.mrf.mxu2  ;;  %3367 = vst.msk [vmem:[#allocation3 + $0x110] sm:$0xff] %vm332_vm1, %v8366_v36  ;;  %v3973_v22 = vld [vmem:[#allocation2 + $0x9a] sm:$0xff]  ;;  %v2344_v61 = vadd.f32 %v8300_v49, %v2343_v0 }
 0x3b5   : > { %v2451_v39 = vadd.f32 %v2450_v46, %v2338_v6  ;;  %2729 = vst.msk [vmem:[#allocation3 + $0x138] sm:$0xff] %vm332_vm1, %v8373_v7  ;;  %v2952_v31 = vld [vmem:[#allocation2 + $0x92] sm:$0xff]  ;;  %v3399_v28 = vld [vmem:[#allocation2 + $0x9a] sm:$0xff]  ;;  %v2347_v46 = vadd.f32 %v8300_v49, %v2346_v4  ;;  %v8435_v0 = vpop.f32.mrf.mxu3  ;;  %v3005_v4 = vpop.permute.xlu2 %3004 }
 0x3b6   : > { %4004 = vst.msk [vmem:[#allocation3 + $0xd0] sm:$0xff] %vm332_vm1, %v3972_v44 }
 0x3b7   : > { %v2564_v57 = vadd.f32 %v8307_v20, %v2451_v39  ;;  %4005 = vst.msk [vmem:[#allocation3 + $0xe8] sm:$0xff] %vm332_vm1, %v3973_v22 }
 0x3b9   : > { %v2633_v56 = vmax.f32 %v2564_v57, 0.0  ;;  %2500 = vmatmul.f32.gmra.mxu2 %v2140_v38  ;;  %v2054_v38 = vld [vmem:[#allocation3 + $0x28] sm:$0xff] }
 0x3ba   : > { %v8385_v21 = vld [vmem:[#allocation2 + $0xa8] sm:$0xff] }
 0x3bb   : > { %v8387_v33 = vld [vmem:[#allocation2 + $0xa9] sm:$0xff]  ;;  %2665 = vst.msk [vmem:[#allocation2 + $0xb1] sm:$0xff] %vm332_vm1, %v2633_v56  ;;  %3660 = vrot.lane.b32.xlu1 %v3588_v63, %s6901_s15  ;;  %v2350_v56 = vadd.f32 %v8300_v49, %v2349_v19 }
 0x3bc   : > { %3216 = vrot.lane.b32.xlu2 %v3588_v63, %s6902_s22  ;;  %3658 = vrot.lane.b32.xlu0 %v8336_v50, %s6901_s15  ;;  %v2453_v20 = vpop.f32.mrf.mxu2  ;;  %2730 = vst.msk [vmem:[#allocation3 + $0x150] sm:$0xff] %vm332_vm1, %v8385_v21 }
 0x3bd   : > { %v2454_v2 = vadd.f32 %v2453_v20, %v2341_v45  ;;  %3368 = vst.msk [vmem:[#allocation3 + $0x128] sm:$0xff] %vm332_vm1, %v8387_v33  ;;  %v2352_v45 = vpop.f32.mrf.mxu1 }
 0x3bf   : > { %v2567_v59 = vadd.f32 %v8323_v47, %v2454_v2 }
 0x3c1   : > { %v2634_v13 = vmax.f32 %v2567_v59, 0.0  ;;  %2503 = vmatmul.f32.gmra.mxu2 %v2143_v1 }
 0x3c2   : > { %v8400_v3 = vld [vmem:[#allocation2 + $0xb1] sm:$0xff] }
 0x3c3   : > { %2666 = vst.msk [vmem:[#allocation2 + $0xc1] sm:$0xff] %vm332_vm1, %v2634_v13  ;;  %2838 = vrot.lane.b32.xlu1 %v8366_v36, %s6900_s10  ;;  %v8407_v50 = vld [vmem:[#allocation2 + $0xb0] sm:$0xff] }
 0x3c4   : > { %3028 = vrot.lane.b32.xlu2 %v2952_v31, %s6901_s15  ;;  %v3974_v63 = vld [vmem:[#allocation2 + $0xaa] sm:$0xff]  ;;  %2836 = vrot.lane.b32.xlu0 %v8355_v37, %s6900_s10  ;;  %v2456_v47 = vpop.f32.mrf.mxu2  ;;  %3369 = vst.msk [vmem:[#allocation3 + $0x140] sm:$0xff] %vm332_vm1, %v8400_v3  ;;  %v3975_v53 = vld [vmem:[#allocation2 + $0xb2] sm:$0xff] }
 0x3c5   : > { %v2457_v25 = vadd.f32 %v2456_v47, %v2344_v61  ;;  %2731 = vst.msk [vmem:[#allocation3 + $0x168] sm:$0xff] %vm332_vm1, %v8407_v50  ;;  %v8460_v61 = vpop.f32.mrf.mxu3  ;;  %v2355_v19 = vpop.f32.mrf.mxu1 }
 0x3c6   : > { %4006 = vst.msk [vmem:[#allocation3 + $0x100] sm:$0xff] %vm332_vm1, %v3974_v63  ;;  %v2057_v63 = vld [vmem:[#allocation3 + $0x40] sm:$0xff] }
 0x3c7   : > { %v2570_v30 = vadd.f32 %v8343_v51, %v2457_v25  ;;  %4007 = vst.msk [vmem:[#allocation3 + $0x118] sm:$0xff] %vm332_vm1, %v3975_v53  ;;  %v2353_v25 = vadd.f32 %v8300_v49, %v2352_v45 }
 0x3c9   : > { %v2635_v26 = vmax.f32 %v2570_v30, 0.0  ;;  %6669 = vmatmul.msk.f32.vlgmr.msrb.gmra.mxu2 %vm332_vm1, %v2051_v40 }
 0x3ca   : > { %v8421_v6 = vld [vmem:[#allocation2 + $0xc1] sm:$0xff] }
 0x3cb   : > { %v8423_v44 = vld [vmem:[#allocation2 + $0xc0] sm:$0xff]  ;;  %2667 = vst.msk [vmem:[#allocation2 + $0xc9] sm:$0xff] %vm332_vm1, %v2635_v26  ;;  %3472 = vrot.lane.b32.xlu1 %v2952_v31, %s6900_s10 }
 0x3cc   : > { %3474 = vrot.lane.b32.xlu2 %v3399_v28, %s6900_s10  ;;  %3852 = vrot.lane.b32.xlu0 %v8355_v37, %s6902_s22  ;;  %v2459_v51 = vpop.f32.mrf.mxu2  ;;  %3370 = vst.msk [vmem:[#allocation3 + $0x158] sm:$0xff] %vm332_vm1, %v8421_v6  ;;  %v2684_v37 = vld [vmem:[#allocation2] sm:$0xff] }
 0x3cd   : > { %v2460_v22 = vadd.f32 %v2459_v51, %v2347_v46  ;;  %2732 = vst.msk [vmem:[#allocation3 + $0x180] sm:$0xff] %vm332_vm1, %v8423_v44  ;;  %v8487_v51 = vpop.f32.mrf.mxu3 }
 0x3ce   : > { %2716 = vst.msk [vmem:[#allocation3] sm:$0xff] %vm332_vm1, %v2684_v37 }
 0x3cf   : > { %v2573_v39 = vadd.f32 %v8364_v23, %v2460_v22  ;;  %v2813_v23 = vpop.permute.xlu0 %2812  ;;  %v2954_v22 = vld [vmem:[#allocation2 + $0xaa] sm:$0xff] }
 0x3d0   : > { %2908 = vst.msk [vmem:[#allocation3] sm:$0xff] %vm925_vm3, %v2813_v23  ;;  %v2358_v23 = vpop.f32.mrf.mxu1 }
 0x3d1   : > { %v2636_v57 = vmax.f32 %v2573_v39, 0.0  ;;  %6670 = vmatmul.msk.f32.gmra.mxu2 %vm332_vm1, %v2054_v38  ;;  %3100 = vst.msk [vmem:[#allocation3] sm:$0xff] %vm1118_vm4, %v3005_v4  ;;  %v8494_v39 = vpop.permute.xlu2 %3704  ;;  %v2685_v38 = vld [vmem:[#allocation2 + $0x8] sm:$0xff] }
 0x3d2   : > { %v8447_v2 = vld [vmem:[#allocation2 + $0xc8] sm:$0xff]  ;;  %2717 = vst.msk [vmem:[#allocation3 + $0x18] sm:$0xff] %vm332_vm1, %v2685_v38 }
 0x3d3   : > { %2668 = vst.msk [vmem:[#allocation2 + $0xd9] sm:$0xff] %vm332_vm1, %v2636_v57  ;;  %3854 = vrot.lane.b32.xlu1 %v8366_v36, %s6902_s22  ;;  %v8450_v59 = vld [vmem:[#allocation2 + $0xc9] sm:$0xff] }
 0x3d4   : > { %3662 = vrot.lane.b32.xlu2 %v8373_v7, %s6901_s15  ;;  %3030 = vrot.lane.b32.xlu0 %v3399_v28, %s6901_s15  ;;  %v2462_v20 = vpop.f32.mrf.mxu2  ;;  %v8453_v36 = vld [vmem:[#allocation2 + $0xc2] sm:$0xff]  ;;  %v8456_v31 = vld [vmem:[#allocation2 + $0xca] sm:$0xff]  ;;  %2733 = vst.msk [vmem:[#allocation3 + $0x198] sm:$0xff] %vm332_vm1, %v8447_v2 }
 0x3d5   : > { %v2463_v1 = vadd.f32 %v2462_v20, %v2350_v56  ;;  %3371 = vst.msk [vmem:[#allocation3 + $0x170] sm:$0xff] %vm332_vm1, %v8450_v59  ;;  %v2060_v28 = vld [vmem:[#allocation3 + $0x58] sm:$0xff] }
 0x3d6   : > { %4008 = vst.msk [vmem:[#allocation3 + $0x130] sm:$0xff] %vm332_vm1, %v8453_v36 }
 0x3d7   : > { %v2576_v13 = vadd.f32 %v8383_v29, %v2463_v1  ;;  %4009 = vst.msk [vmem:[#allocation3 + $0x148] sm:$0xff] %vm332_vm1, %v8456_v31  ;;  %v3007_v37 = vpop.permute.xlu0 %3006 }
 0x3d9   : > { %v2637_v47 = vmax.f32 %v2576_v13, 0.0  ;;  %6671 = vmatmul.msk.f32.gmra.mxu2 %vm332_vm1, %v2057_v63  ;;  %v3401_v63 = vld [vmem:[#allocation2 + $0xb2] sm:$0xff] }
 0x3da   : > { %v8467_v53 = vld [vmem:[#allocation2 + $0xd8] sm:$0xff] }
 0x3db   : > { %v8469_v29 = vld [vmem:[#allocation2 + $0xd9] sm:$0xff]  ;;  %2669 = vst.msk [vmem:[#allocation2 + $0xe1] sm:$0xff] %vm332_vm1, %v2637_v47  ;;  %3220 = vrot.lane.b32.xlu1 %v8385_v21, %s6902_s22 }
 0x3dc   : > { %2840 = vrot.lane.b32.xlu2 %v8387_v33, %s6900_s10  ;;  %3218 = vrot.lane.b32.xlu0 %v8373_v7, %s6902_s22  ;;  %v2465_v30 = vpop.f32.mrf.mxu2  ;;  %2734 = vst.msk [vmem:[#allocation3 + $0x1b0] sm:$0xff] %vm332_vm1, %v8467_v53  ;;  %v2356_v7 = vadd.f32 %v8300_v49, %v2355_v19 }
 0x3dd   : > { %v2466_v40 = vadd.f32 %v2465_v30, %v2353_v25  ;;  %3372 = vst.msk [vmem:[#allocation3 + $0x188] sm:$0xff] %vm332_vm1, %v8469_v29  ;;  %v2590_v30 = vpop.f32.mrf.mxu3 }
 0x3df   : > { %v2579_v26 = vadd.f32 %v8409_v24, %v2466_v40  ;;  %v2815_v24 = vpop.permute.xlu1 %2814 }
 0x3e0   : > { %2909 = vst.msk [vmem:[#allocation3 + $0x18] sm:$0xff] %vm925_vm3, %v2815_v24 }
 0x3e1   : > { %v2638_v46 = vmax.f32 %v2579_v26, 0.0  ;;  %6672 = vmatmul.msk.f32.gmra.mxu2 %vm332_vm1, %v2060_v28  ;;  %3101 = vst.msk [vmem:[#allocation3 + $0x18] sm:$0xff] %vm1118_vm4, %v3007_v37  ;;  %v2361_v28 = vpop.f32.mrf.mxu1 }
 0x3e2   : > { %v8499_v56 = vld [vmem:[#allocation2 + $0xe1] sm:$0xff]  ;;  %v2362_v24 = vadd.f32 %v8300_v49, %v2361_v28 }
 0x3e3   : > { %2670 = vst.msk [vmem:[#allocation2 + $0xf1] sm:$0xff] %vm332_vm1, %v2638_v46  ;;  %3032 = vrot.lane.b32.xlu1 %v2954_v22, %s6901_s15  ;;  %v8502_v20 = vld [vmem:[#allocation2 + $0xe0] sm:$0xff] }
 0x3e4   : > { %3856 = vrot.lane.b32.xlu2 %v8387_v33, %s6902_s22  ;;  %3664 = vrot.lane.b32.xlu0 %v8385_v21, %s6901_s15  ;;  %v2468_v57 = vpop.f32.mrf.mxu2  ;;  %v8505_v33 = vld [vmem:[#allocation2 + $0xda] sm:$0xff]  ;;  %v8508_v4 = vld [vmem:[#allocation2 + $0xe2] sm:$0xff]  ;;  %3373 = vst.msk [vmem:[#allocation3 + $0x1a0] sm:$0xff] %vm332_vm1, %v8499_v56 }
 0x3e5   : > { %v2469_v45 = vadd.f32 %v2468_v57, %v2356_v7  ;;  %v2063_v21 = vld [vmem:[#allocation3 + $0x70] sm:$0xff]  ;;  %2735 = vst.msk [vmem:[#allocation3 + $0x1c8] sm:$0xff] %vm332_vm1, %v8502_v20 }
 0x3e6   : > { %4010 = vst.msk [vmem:[#allocation3 + $0x160] sm:$0xff] %vm332_vm1, %v8505_v33 }
 0x3e7   : > { %v2582_v1 = vadd.f32 %v8435_v0, %v2469_v45  ;;  %4011 = vst.msk [vmem:[#allocation3 + $0x178] sm:$0xff] %vm332_vm1, %v8508_v4  ;;  %v2359_v0 = vadd.f32 %v8300_v49, %v2358_v23 }
 0x3e9   : > { %v2639_v13 = vmax.f32 %v2582_v1, 0.0  ;;  %6673 = vmatmul.msk.f32.gmra.mxu2 %vm332_vm1, %v2063_v21  ;;  %v2593_v1 = vpop.f32.mrf.mxu3 }
 0x3ea   : > { %v8517_v47 = vld [vmem:[#allocation2 + $0xf0] sm:$0xff] }
 0x3eb   : > { %v8519_v25 = vld [vmem:[#allocation2 + $0xf1] sm:$0xff]  ;;  %2671 = vst.msk [vmem:[#allocation2 + $0xf9] sm:$0xff] %vm332_vm1, %v2639_v13  ;;  %3478 = vrot.lane.b32.xlu1 %v3401_v63, %s6900_s10 }
 0x3ec   : > { %3034 = vrot.lane.b32.xlu2 %v3401_v63, %s6901_s15  ;;  %2842 = vrot.lane.b32.xlu0 %v8400_v3, %s6900_s10  ;;  %v2471_v40 = vpop.f32.mrf.mxu2  ;;  %2736 = vst.msk [vmem:[#allocation3 + $0x1e0] sm:$0xff] %vm332_vm1, %v8517_v47 }
 0x3ed   : > { %v2472_v19 = vadd.f32 %v2471_v40, %v2359_v0  ;;  %v8531_v26 = vpop.permute.xlu2 %3022  ;;  %3374 = vst.msk [vmem:[#allocation3 + $0x1b8] sm:$0xff] %vm332_vm1, %v8519_v25  ;;  %v8578_v40 = vpop.permute.xlu0 %3706 }
 0x3ef   : > { %v2585_v46 = vadd.f32 %v8460_v61, %v2472_v19 }
 0x3f1   : > { %v2640_v7 = vmax.f32 %v2585_v46, 0.0  ;;  %6674 = vmatmul.msk.f32.gmra.mxu2 %vm332_vm1, %v8315_v9  ;;  %v2596_v46 = vpop.f32.mrf.mxu3 }
 0x3f2   : > { %v8538_v38 = vld [vmem:[#allocation2 + $0xf9] sm:$0xff] }
 0x3f3   : > { %2672 = vst.msk [vmem:[#allocation2 + $0x109] sm:$0xff] %vm332_vm1, %v2640_v7  ;;  %3666 = vrot.lane.b32.xlu1 %v8407_v50, %s6901_s15  ;;  %v8546_v57 = vld [vmem:[#allocation2 + $0xf2] sm:$0xff]  ;;  %v8551_v9 = vld [vmem:[#allocation2 + $0xfa] sm:$0xff] }
 0x3f4   : > { %3222 = vrot.lane.b32.xlu2 %v8407_v50, %s6902_s22  ;;  %v8548_v45 = vld [vmem:[#allocation2 + $0xf8] sm:$0xff]  ;;  %3476 = vrot.lane.b32.xlu0 %v2954_v22, %s6900_s10  ;;  %v2474_v61 = vpop.f32.mrf.mxu2  ;;  %3375 = vst.msk [vmem:[#allocation3 + $0x1d0] sm:$0xff] %vm332_vm1, %v8538_v38  ;;  %v2364_v22 = vpop.f32.mrf.mxu1 }
 0x3f5   : > { %v2475_v37 = vadd.f32 %v2474_v61, %v2362_v24  ;;  %2737 = vst.msk [vmem:[#allocation3 + $0x1f8] sm:$0xff] %vm332_vm1, %v8548_v45  ;;  %v2365_v0 = vadd.f32 %v8300_v49, %v2364_v22 }
 0x3f6   : > { %v8555_v23 = vpop.permute.xlu2 %3656  ;;  %4012 = vst.msk [vmem:[#allocation3 + $0x190] sm:$0xff] %vm332_vm1, %v8546_v57 }
 0x3f7   : > { %v2588_v50 = vadd.f32 %v8487_v51, %v2475_v37  ;;  %4013 = vst.msk [vmem:[#allocation3 + $0x1a8] sm:$0xff] %vm332_vm1, %v8551_v9 }
 0x3f9   : > { %v2641_v21 = vmax.f32 %v2588_v50, 0.0  ;;  %6675 = vmatmul.msk.f32.gmra.mxu2 %vm332_vm1, %v8341_v58 }
 0x3fa   : > { %v8566_v13 = vld [vmem:[#allocation2 + $0x109] sm:$0xff] }
 0x3fb   : > { %v8568_v63 = vld [vmem:[#allocation2 + $0x108] sm:$0xff]  ;;  %2673 = vst.msk [vmem:[#allocation2 + $0x111] sm:$0xff] %vm332_vm1, %v2641_v21  ;;  %2844 = vrot.lane.b32.xlu1 %v8421_v6, %s6900_s10 }
 0x3fc   : > { %3668 = vrot.lane.b32.xlu2 %v8423_v44, %s6901_s15  ;;  %3858 = vrot.lane.b32.xlu0 %v8400_v3, %s6902_s22  ;;  %v2477_v51 = vpop.f32.mrf.mxu2  ;;  %3376 = vst.msk [vmem:[#allocation3 + $0x1e8] sm:$0xff] %vm332_vm1, %v8566_v13  ;;  %v2368_v3 = vadd.f32 %v8300_v49, %v8232_v54 }
 0x3fd   : > { %v2478_v58 = vadd.f32 %v2477_v51, %v2365_v0  ;;  %2738 = vst.msk [vmem:[#allocation3 + $0x210] sm:$0xff] %vm332_vm1, %v8568_v63  ;;  %v2599_v51 = vpop.f32.mrf.mxu3 }
 0x3fe   : > { %v2835_v19 = vpop.permute.xlu2 %2834 }
 0x3ff   : > { %2919 = vst.msk [vmem:[#allocation3 + $0x108] sm:$0xff] %vm925_vm3, %v2835_v19  ;;  %v2591_v28 = vadd.f32 %v2590_v30, %v2478_v58 }
 0x401   : > { %v2642_v7 = vmax.f32 %v2591_v28, 0.0  ;;  %v2371_v28 = vadd.f32 %v8300_v49, %v8236_v17 }
 0x402   : > { %v8585_v24 = vld [vmem:[#allocation2 + $0x111] sm:$0xff] }
 0x403   : > { %2674 = vst.msk [vmem:[#allocation2 + $0x121] sm:$0xff] %vm332_vm1, %v2642_v7  ;;  %3860 = vrot.lane.b32.xlu1 %v8421_v6, %s6902_s22  ;;  %v8594_v61 = vld [vmem:[#allocation2 + $0x110] sm:$0xff] }
 0x404   : > { %2846 = vrot.lane.b32.xlu2 %v8450_v59, %s6900_s10  ;;  %3224 = vrot.lane.b32.xlu0 %v8423_v44, %s6902_s22  ;;  %v2480_v30 = vpop.f32.mrf.mxu2  ;;  %2739 = vst.msk [vmem:[#allocation3 + $0x228] sm:$0xff] %vm332_vm1, %v8594_v61  ;;  %v8600_v22 = vld [vmem:[#allocation2 + $0x10a] sm:$0xff]  ;;  %v8607_v21 = vld [vmem:[#allocation2 + $0x112] sm:$0xff] }
 0x405   : > { %v2481_v37 = vadd.f32 %v2480_v30, %v2368_v3  ;;  %v3467_v50 = vpop.permute.xlu1 %3466  ;;  %3377 = vst.msk [vmem:[#allocation3 + $0x200] sm:$0xff] %vm332_vm1, %v8585_v24 }
 0x406   : > { %v3469_v54 = vpop.permute.xlu2 %3468  ;;  %3555 = vst.msk [vmem:[#allocation3 + $0xb0] sm:$0xff] %vm925_vm3, %v3467_v50  ;;  %v8605_v6 = vpop.permute.xlu0 %2830 }
 0x407   : > { %v2594_v0 = vadd.f32 %v2593_v1, %v2481_v37  ;;  %3556 = vst.msk [vmem:[#allocation3 + $0xc8] sm:$0xff] %vm925_vm3, %v3469_v54 }
 0x408   : > { %4014 = vst.msk [vmem:[#allocation3 + $0x1c0] sm:$0xff] %vm332_vm1, %v8600_v22 }
 0x409   : > { %v2643_v44 = vmax.f32 %v2594_v0, 0.0  ;;  %4015 = vst.msk [vmem:[#allocation3 + $0x1d8] sm:$0xff] %vm332_vm1, %v8607_v21 }
 0x40a   : > { %v8614_v58 = vld [vmem:[#allocation2 + $0x120] sm:$0xff] }
 0x40b   : > { %v8616_v19 = vld [vmem:[#allocation2 + $0x121] sm:$0xff]  ;;  %2675 = vst.msk [vmem:[#allocation2 + $0x129] sm:$0xff] %vm332_vm1, %v2643_v44  ;;  %3038 = vrot.lane.b32.xlu1 %v8456_v31, %s6901_s15 }
 0x40c   : > { %3480 = vrot.lane.b32.xlu2 %v8453_v36, %s6900_s10  ;;  %3036 = vrot.lane.b32.xlu0 %v8453_v36, %s6901_s15  ;;  %v2483_v1 = vpop.f32.mrf.mxu2  ;;  %2740 = vst.msk [vmem:[#allocation3 + $0x240] sm:$0xff] %vm332_vm1, %v8614_v58  ;;  %v2374_v36 = vadd.f32 %v8300_v49, %v8240_v8 }
 0x40d   : > { %v2484_v7 = vadd.f32 %v2483_v1, %v2371_v28  ;;  %v2833_v3 = vpop.permute.xlu1 %2832  ;;  %3378 = vst.msk [vmem:[#allocation3 + $0x218] sm:$0xff] %vm332_vm1, %v8616_v19  ;;  %v2602_v28 = vpop.f32.mrf.mxu3 }
 0x40e   : > { %v8629_v30 = vpop.permute.xlu2 %3850  ;;  %2918 = vst.msk [vmem:[#allocation3 + $0xf0] sm:$0xff] %vm925_vm3, %v2833_v3  ;;  %v8634_v17 = vpop.permute.xlu0 %3846 }
 0x40f   : > { %11309 = vst [vmem:[#allocation8_spill] sm:$0xff] %v8634_v17  ;;  %v2597_v37 = vadd.f32 %v2596_v46, %v2484_v7 }
 0x411   : > { %v2644_v50 = vmax.f32 %v2597_v37, 0.0 }
 0x412   : > { %v8636_v54 = vld [vmem:[#allocation2 + $0x129] sm:$0xff] }
 0x413   : > { %2676 = vst.msk [vmem:[#allocation2 + $0x139] sm:$0xff] %vm332_vm1, %v2644_v50  ;;  %3226 = vrot.lane.b32.xlu1 %v8447_v2, %s6902_s22  ;;  %v8645_v0 = vld [vmem:[#allocation2 + $0x122] sm:$0xff]  ;;  %v8651_v1 = vld [vmem:[#allocation2 + $0x12a] sm:$0xff] }
 0x414   : > { %3862 = vrot.lane.b32.xlu2 %v8450_v59, %s6902_s22  ;;  %v8647_v44 = vld [vmem:[#allocation2 + $0x128] sm:$0xff]  ;;  %3482 = vrot.lane.b32.xlu0 %v8456_v31, %s6900_s10  ;;  %v2486_v46 = vpop.f32.mrf.mxu2  ;;  %3379 = vst.msk [vmem:[#allocation3 + $0x230] sm:$0xff] %vm332_vm1, %v8636_v54 }
 0x415   : > { %v2487_v8 = vadd.f32 %v2486_v46, %v2374_v36  ;;  %v8655_v7 = vpop.permute.xlu1 %3848  ;;  %2741 = vst.msk [vmem:[#allocation3 + $0x258] sm:$0xff] %vm332_vm1, %v8647_v44  ;;  %v2377_v36 = vadd.f32 %v8300_v49, %v8243_v11  ;;  %v2605_v11 = vpop.f32.mrf.mxu3 }
 0x416   : > { %11310 = vst [vmem:[#allocation9_spill] sm:$0xff] %v8655_v7  ;;  %v3217_v3 = vpop.permute.xlu2 %3216  ;;  %v8659_v59 = vpop.permute.xlu0 %3212 }
 0x417   : > { %11311 = vst [vmem:[#allocation10_spill] sm:$0xff] %v8659_v59  ;;  %v2600_v37 = vadd.f32 %v2599_v51, %v2487_v8 }
 0x418   : > { %4016 = vst.msk [vmem:[#allocation3 + $0x1f0] sm:$0xff] %vm332_vm1, %v8645_v0 }
 0x419   : > { %4017 = vst.msk [vmem:[#allocation3 + $0x208] sm:$0xff] %vm332_vm1, %v8651_v1  ;;  %v2645_v31 = vmax.f32 %v2600_v37, 0.0 }
 0x41a   : > { %v8665_v50 = vld [vmem:[#allocation2 + $0x138] sm:$0xff] }
 0x41b   : > { %v8667_v17 = vld [vmem:[#allocation2 + $0x139] sm:$0xff]  ;;  %2677 = vst.msk [vmem:[#allocation2 + $0x141] sm:$0xff] %vm332_vm1, %v2645_v31  ;;  %3672 = vrot.lane.b32.xlu1 %v8467_v53, %s6901_s15 }
 0x41c   : > { %3228 = vrot.lane.b32.xlu2 %v8467_v53, %s6902_s22  ;;  %3670 = vrot.lane.b32.xlu0 %v8447_v2, %s6901_s15  ;;  %v2489_v51 = vpop.f32.mrf.mxu2  ;;  %2742 = vst.msk [vmem:[#allocation3 + $0x270] sm:$0xff] %vm332_vm1, %v8665_v50 }
 0x41d   : > { %v2490_v46 = vadd.f32 %v2489_v51, %v2377_v36  ;;  %v3027_v8 = vpop.permute.xlu1 %3026  ;;  %3380 = vst.msk [vmem:[#allocation3 + $0x248] sm:$0xff] %vm332_vm1, %v8667_v17  ;;  %v2380_v36 = vadd.f32 %v8300_v49, %v8246_v15 }
 0x41e   : > { %v8680_v37 = vpop.permute.xlu2 %3028  ;;  %3111 = vst.msk [vmem:[#allocation3 + $0x108] sm:$0xff] %vm1118_vm4, %v3027_v8  ;;  %v3025_v31 = vpop.permute.xlu0 %3024 }
 0x41f   : > { %v2603_v59 = vadd.f32 %v2602_v28, %v2490_v46  ;;  %3110 = vst.msk [vmem:[#allocation3 + $0xf0] sm:$0xff] %vm1118_vm4, %v3025_v31 }
 0x420   : > { %3302 = vst.msk [vmem:[#allocation3 + $0xf0] sm:$0xff] %vm1311_vm5, %v3217_v3 }
 0x421   : > { %v2646_v2 = vmax.f32 %v2603_v59, 0.0 }
 0x422   : > { %v8687_v53 = vld [vmem:[#allocation2 + $0x141] sm:$0xff] }
 0x423   : > { %2678 = vst.msk [vmem:[#allocation2 + $0x151] sm:$0xff] %vm332_vm1, %v2646_v2  ;;  %2850 = vrot.lane.b32.xlu1 %v8499_v56, %s6900_s10  ;;  %v8696_v51 = vld [vmem:[#allocation2 + $0x140] sm:$0xff] }
 0x424   : > { %3040 = vrot.lane.b32.xlu2 %v8505_v33, %s6901_s15  ;;  %2848 = vrot.lane.b32.xlu0 %v8469_v29, %s6900_s10  ;;  %v2492_v28 = vpop.f32.mrf.mxu2  ;;  %3381 = vst.msk [vmem:[#allocation3 + $0x260] sm:$0xff] %vm332_vm1, %v8687_v53  ;;  %v8704_v46 = vld [vmem:[#allocation2 + $0x13a] sm:$0xff]  ;;  %v8709_v8 = vld [vmem:[#allocation2 + $0x142] sm:$0xff]  ;;  %v2608_v29 = vpop.f32.mrf.mxu3 }
 0x425   : > { %v2493_v3 = vadd.f32 %v2492_v28, %v2380_v36  ;;  %v8702_v59 = vpop.permute.xlu1 %3214  ;;  %2743 = vst.msk [vmem:[#allocation3 + $0x288] sm:$0xff] %vm332_vm1, %v8696_v51 }
 0x426   : > { %v3475_v15 = vpop.permute.xlu2 %3474  ;;  %v3471_v56 = vpop.permute.xlu0 %3470  ;;  %4018 = vst.msk [vmem:[#allocation3 + $0x220] sm:$0xff] %vm332_vm1, %v8704_v46 }
 0x427   : > { %3559 = vst.msk [vmem:[#allocation3 + $0x110] sm:$0xff] %vm925_vm3, %v3475_v15  ;;  %v2606_v31 = vadd.f32 %v2605_v11, %v2493_v3  ;;  %v2383_v15 = vadd.f32 %v8300_v49, %v8248_v18 }
 0x428   : > { %3557 = vst.msk [vmem:[#allocation3 + $0xe0] sm:$0xff] %vm925_vm3, %v3471_v56 }
 0x429   : > { %v2647_v2 = vmax.f32 %v2606_v31, 0.0  ;;  %4019 = vst.msk [vmem:[#allocation3 + $0x238] sm:$0xff] %vm332_vm1, %v8709_v8 }
 0x42a   : > { %v8716_v36 = vld [vmem:[#allocation2 + $0x151] sm:$0xff] }
 0x42b   : > { %v8718_v28 = vld [vmem:[#allocation2 + $0x150] sm:$0xff]  ;;  %2679 = vst.msk [vmem:[#allocation2 + $0x159] sm:$0xff] %vm332_vm1, %v2647_v2  ;;  %3484 = vrot.lane.b32.xlu1 %v8505_v33, %s6900_s10 }
 0x42c   : > { %3486 = vrot.lane.b32.xlu2 %v8508_v4, %s6900_s10  ;;  %3042 = vrot.lane.b32.xlu0 %v8508_v4, %s6901_s15  ;;  %v2495_v11 = vpop.f32.mrf.mxu2  ;;  %3382 = vst.msk [vmem:[#allocation3 + $0x278] sm:$0xff] %vm332_vm1, %v8716_v36  ;;  %v2611_v4 = vpop.f32.mrf.mxu3 }
 0x42d   : > { %v2496_v3 = vadd.f32 %v2495_v11, %v2383_v15  ;;  %v3661_v56 = vpop.permute.xlu1 %3660  ;;  %2744 = vst.msk [vmem:[#allocation3 + $0x2a0] sm:$0xff] %vm332_vm1, %v8718_v28  ;;  %v2386_v15 = vadd.f32 %v8300_v49, %v8252_v48 }
 0x42e   : > { %v3663_v31 = vpop.permute.xlu2 %3662  ;;  %3748 = vst.msk [vmem:[#allocation3 + $0xc8] sm:$0xff] %vm1118_vm4, %v3661_v56  ;;  %v3659_v18 = vpop.permute.xlu0 %3658 }
 0x42f   : > { %v2609_v33 = vadd.f32 %v2608_v29, %v2496_v3  ;;  %3749 = vst.msk [vmem:[#allocation3 + $0xe0] sm:$0xff] %vm1118_vm4, %v3663_v31 }
 0x430   : > { %3747 = vst.msk [vmem:[#allocation3 + $0xb0] sm:$0xff] %vm1118_vm4, %v3659_v18 }
 0x431   : > { %v2648_v2 = vmax.f32 %v2609_v33, 0.0  ;;  %3939 = vst.msk [vmem:[#allocation3 + $0xb0] sm:$0xff] %vm1311_vm5, %v8629_v30 }
 0x432   : > { %v8738_v7 = vld [vmem:[#allocation2 + $0x159] sm:$0xff] }
 0x433   : > { %2680 = vst.msk [vmem:[#allocation2 + $0x169] sm:$0xff] %vm332_vm1, %v2648_v2  ;;  %3232 = vrot.lane.b32.xlu1 %v8517_v47, %s6902_s22  ;;  %v8747_v29 = vld [vmem:[#allocation2 + $0x158] sm:$0xff] }
 0x434   : > { %3674 = vrot.lane.b32.xlu2 %v8502_v20, %s6901_s15  ;;  %3230 = vrot.lane.b32.xlu0 %v8502_v20, %s6902_s22  ;;  %v2498_v30 = vpop.f32.mrf.mxu2  ;;  %2745 = vst.msk [vmem:[#allocation3 + $0x2b8] sm:$0xff] %vm332_vm1, %v8747_v29  ;;  %v8757_v18 = vld [vmem:[#allocation2 + $0x152] sm:$0xff]  ;;  %v2614_v33 = vpop.f32.mrf.mxu3 }
 0x435   : > { %v2499_v11 = vadd.f32 %v2498_v30, %v2386_v15  ;;  %v2839_v3 = vpop.permute.xlu1 %2838  ;;  %3383 = vst.msk [vmem:[#allocation3 + $0x290] sm:$0xff] %vm332_vm1, %v8738_v7 }
 0x436   : > { %v2841_v48 = vpop.permute.xlu2 %2840  ;;  %2921 = vst.msk [vmem:[#allocation3 + $0x138] sm:$0xff] %vm925_vm3, %v2839_v3  ;;  %v2837_v56 = vpop.permute.xlu0 %2836 }
 0x437   : > { %v2612_v31 = vadd.f32 %v2611_v4, %v2499_v11  ;;  %2922 = vst.msk [vmem:[#allocation3 + $0x150] sm:$0xff] %vm925_vm3, %v2841_v48  ;;  %v2389_v4 = vadd.f32 %v8300_v49, %v8256_v32  ;;  %v8781_v32 = vld [vmem:[#allocation2 + $0x15a] sm:$0xff] }
 0x438   : > { %2920 = vst.msk [vmem:[#allocation3 + $0x120] sm:$0xff] %vm925_vm3, %v2837_v56 }
 0x439   : > { %v2649_v20 = vmax.f32 %v2612_v31, 0.0  ;;  %3112 = vst.msk [vmem:[#allocation3 + $0x120] sm:$0xff] %vm1118_vm4, %v8680_v37  ;;  %v2392_v31 = vadd.f32 %v8300_v49, %v8261_v16 }
 0x43a   : > { %v8762_v2 = vld [vmem:[#allocation2 + $0x168] sm:$0xff]  ;;  %4020 = vst.msk [vmem:[#allocation3 + $0x250] sm:$0xff] %vm332_vm1, %v8757_v18 }
 0x43b   : > { %v8764_v15 = vld [vmem:[#allocation2 + $0x169] sm:$0xff]  ;;  %2681 = vst.msk [vmem:[#allocation2 + $0x171] sm:$0xff] %vm332_vm1, %v2649_v20  ;;  %3044 = vrot.lane.b32.xlu1 %v8546_v57, %s6901_s15 }
 0x43c   : > { %2852 = vrot.lane.b32.xlu2 %v8519_v25, %s6900_s10  ;;  %3676 = vrot.lane.b32.xlu0 %v8517_v47, %s6901_s15  ;;  %v2501_v37 = vpop.f32.mrf.mxu2  ;;  %2746 = vst.msk [vmem:[#allocation3 + $0x2d0] sm:$0xff] %vm332_vm1, %v8762_v2 }
 0x43d   : > { %v2502_v30 = vadd.f32 %v2501_v37, %v2389_v4  ;;  %v3473_v11 = vpop.permute.xlu1 %3472  ;;  %3384 = vst.msk [vmem:[#allocation3 + $0x2a8] sm:$0xff] %vm332_vm1, %v8764_v15  ;;  %v2617_v4 = vpop.f32.mrf.mxu3 }
 0x43e   : > { %v8779_v3 = vpop.permute.xlu2 %3856  ;;  %3558 = vst.msk [vmem:[#allocation3 + $0xf8] sm:$0xff] %vm925_vm3, %v3473_v11  ;;  %v3853_v48 = vpop.permute.xlu0 %3852 }
 0x43f   : > { %3940 = vst.msk [vmem:[#allocation3 + $0xc8] sm:$0xff] %vm1311_vm5, %v3853_v48  ;;  %v2615_v25 = vadd.f32 %v2614_v33, %v2502_v30 }
 0x440   : > { %4021 = vst.msk [vmem:[#allocation3 + $0x268] sm:$0xff] %vm332_vm1, %v8781_v32 }
 0x441   : > { %v2650_v47 = vmax.f32 %v2615_v25, 0.0  ;;  %v2299_v25 = vadd.f32 %v8300_v49, %v8250_v27 }
 0x442   : > { %v8789_v56 = vld [vmem:[#allocation2 + $0x171] sm:$0xff] }
 0x443   : > { %2682 = vst.msk [vmem:[#allocation2 + $0x181] sm:$0xff] %vm332_vm1, %v2650_v47  ;;  %3490 = vrot.lane.b32.xlu1 %v8551_v9, %s6900_s10  ;;  %v8798_v20 = vld [vmem:[#allocation2 + $0x170] sm:$0xff] }
 0x444   : > { %3046 = vrot.lane.b32.xlu2 %v8551_v9, %s6901_s15  ;;  %2854 = vrot.lane.b32.xlu0 %v8538_v38, %s6900_s10  ;;  %v2504_v33 = vpop.f32.mrf.mxu2  ;;  %3385 = vst.msk [vmem:[#allocation3 + $0x2c0] sm:$0xff] %vm332_vm1, %v8789_v56  ;;  %v8806_v11 = vld [vmem:[#allocation2 + $0x16a] sm:$0xff]  ;;  %v8811_v48 = vld [vmem:[#allocation2 + $0x172] sm:$0xff] }
 0x445   : > { %v2505_v37 = vadd.f32 %v2504_v33, %v2392_v31  ;;  %v3855_v16 = vpop.permute.xlu1 %3854  ;;  %2747 = vst.msk [vmem:[#allocation3 + $0x2e8] sm:$0xff] %vm332_vm1, %v8798_v20  ;;  %v2412_v33 = vadd.f32 %v8265_v42, %v2299_v25 }
 0x446   : > { %v8804_v30 = vpop.permute.xlu2 %3034  ;;  %3941 = vst.msk [vmem:[#allocation3 + $0xe0] sm:$0xff] %vm1311_vm5, %v3855_v16  ;;  %v3031_v9 = vpop.permute.xlu0 %3030 }
 0x447   : > { %3113 = vst.msk [vmem:[#allocation3 + $0x138] sm:$0xff] %vm1118_vm4, %v3031_v9  ;;  %v2618_v38 = vadd.f32 %v2617_v4, %v2505_v37  ;;  %v4159_v9 = vld [vmem:[%s11302_s5 + $0x118] sm:$0xff] }
 0x448   : > { %4022 = vst.msk [vmem:[#allocation3 + $0x280] sm:$0xff] %vm332_vm1, %v8806_v11  ;;  %4498 = vmatpush.msrb.mxu1 %v4159_v9  ;;  %6762 = vmatpush.msra.mxu2 %v4159_v9 }
 0x449   : > { %v2651_v47 = vmax.f32 %v2618_v38, 0.0  ;;  %4023 = vst.msk [vmem:[#allocation3 + $0x298] sm:$0xff] %vm332_vm1, %v8811_v48 }
 0x44a   : > { %v8820_v31 = vld [vmem:[#allocation2 + $0x181] sm:$0xff] }
 0x44b   : > { %2683 = vst.msk [vmem:[#allocation2 + $0x189] sm:$0xff] %vm332_vm1, %v2651_v47  ;;  %3678 = vrot.lane.b32.xlu1 %v8548_v45, %s6901_s15 }
 0x44c   : > { %3234 = vrot.lane.b32.xlu2 %v8548_v45, %s6902_s22  ;;  %3488 = vrot.lane.b32.xlu0 %v8546_v57, %s6900_s10  ;;  %v2524_v27 = vpop.f32.mrf.mxu2  ;;  %3386 = vst.msk [vmem:[#allocation3 + $0x2d8] sm:$0xff] %vm332_vm1, %v8820_v31  ;;  %v8838_v45 = vld [vmem:[%s11301_s4] ss:$0 sm:$0xff] }
 0x44d   : > { %v2525_v49 = vadd.f32 %v2524_v27, %v2412_v33  ;;  %v3221_v4 = vpop.permute.xlu1 %3220  ;;  %v2302_v57 = vadd.f32 %v8838_v45, %v8254_v62 }
 0x44e   : > { %v3223_v37 = vpop.permute.xlu2 %3222  ;;  %3304 = vst.msk [vmem:[#allocation3 + $0x120] sm:$0xff] %vm1311_vm5, %v3221_v4  ;;  %v3219_v42 = vpop.permute.xlu0 %3218 }
 0x44f   : > { %v2620_v16 = vmax.f32 %v2525_v49, 0.0  ;;  %3305 = vst.msk [vmem:[#allocation3 + $0x138] sm:$0xff] %vm1311_vm5, %v3223_v37  ;;  %v2415_v47 = vadd.f32 %v8269_v12, %v2302_v57  ;;  %v4157_v57 = vld [vmem:[%s11302_s5 + $0x108] sm:$0xff] }
 0x450   : > { %3303 = vst.msk [vmem:[#allocation3 + $0x108] sm:$0xff] %vm1311_vm5, %v3219_v42  ;;  %v2305_v42 = vadd.f32 %v8838_v45, %v8259_v34  ;;  %v4156_v34 = vld [vmem:[%s11302_s5 + $0x100] sm:$0xff] }
 0x451   : > { %2652 = vst.msk [vmem:[#allocation2 + $0x19] sm:$0xff] %vm332_vm1, %v2620_v16  ;;  %v4158_v16 = vld [vmem:[%s11302_s5 + $0x110] sm:$0xff] }
 0x452   : > { %v8846_v38 = vld [vmem:[#allocation2 + $0x18a] sm:$0xff]  ;;  %v8848_v25 = vld [vmem:[#allocation2 + $0x182] sm:$0xff]  ;;  %4499 = vmatpush.msrb.mxu1 %v4158_v16  ;;  %6763 = vmatpush.msra.mxu2 %v4158_v16 }
 0x453   : > { %2856 = vrot.lane.b32.xlu1 %v8566_v13, %s6900_s10  ;;  %v8855_v62 = vld [vmem:[#allocation2 + $0x189] sm:$0xff]  ;;  %4024 = vst.msk [vmem:[#allocation3 + $0x2b0] sm:$0xff] %vm332_vm1, %v8848_v25 }
 0x454   : > { %3680 = vrot.lane.b32.xlu2 %v8568_v63, %s6901_s15  ;;  %3236 = vrot.lane.b32.xlu0 %v8568_v63, %s6902_s22  ;;  %v2527_v33 = vpop.f32.mrf.mxu2  ;;  %3387 = vst.msk [vmem:[#allocation3 + $0x2f0] sm:$0xff] %vm332_vm1, %v8855_v62 }
 0x455   : > { %v2528_v27 = vadd.f32 %v2527_v33, %v2415_v47  ;;  %v3033_v12 = vpop.permute.xlu1 %3032  ;;  %4025 = vst.msk [vmem:[#allocation3 + $0x2c8] sm:$0xff] %vm332_vm1, %v8846_v38  ;;  %4500 = vmatpush.msrb.mxu1 %v4157_v57  ;;  %6764 = vmatpush.msra.mxu2 %v4157_v57 }
 0x456   : > { %v3669_v49 = vpop.permute.xlu2 %3668  ;;  %3114 = vst.msk [vmem:[#allocation3 + $0x150] sm:$0xff] %vm1118_vm4, %v3033_v12  ;;  %v3665_v13 = vpop.permute.xlu0 %3664  ;;  %v2308_v12 = vadd.f32 %v8838_v45, %v8263_v14 }
 0x457   : > { %v2621_v4 = vmax.f32 %v2528_v27, 0.0  ;;  %3750 = vst.msk [vmem:[#allocation3 + $0xf8] sm:$0xff] %vm1118_vm4, %v3665_v13  ;;  %4501 = vmatpush.msrb.mxu1 %v4156_v34  ;;  %6765 = vmatpush.msra.mxu2 %v4156_v34 }
 0x458   : > { %3942 = vst.msk [vmem:[#allocation3 + $0xf8] sm:$0xff] %vm1311_vm5, %v8779_v3  ;;  %v8869_v63 = vld [vmem:[#allocation2 + $0x19] sm:$0xff]  ;;  %v2418_v3 = vadd.f32 %v8274_v5, %v2305_v42  ;;  %v2421_v42 = vadd.f32 %v8280_v60, %v2308_v12 }
 0x459   : > { %v8871_v37 = vld [vmem:[#allocation2 + $0x18] sm:$0xff]  ;;  %2653 = vst.msk [vmem:[#allocation2 + $0x21] sm:$0xff] %vm332_vm1, %v2621_v4 }
 0x45a   : > { %2718 = vst.msk [vmem:[#allocation3 + $0x30] sm:$0xff] %vm332_vm1, %v8871_v37 }
 0x45b   : > { %3050 = vrot.lane.b32.xlu1 %v8607_v21, %s6901_s15  ;;  %3356 = vst.msk [vmem:[#allocation3 + $0x8] sm:$0xff] %vm332_vm1, %v8869_v63 }
 0x45c   : > { %2858 = vrot.lane.b32.xlu2 %v8585_v24, %s6900_s10  ;;  %3048 = vrot.lane.b32.xlu0 %v8600_v22, %s6901_s15  ;;  %v2530_v9 = vpop.f32.mrf.mxu2 }
 0x45d   : > { %v2531_v47 = vadd.f32 %v2530_v9, %v2418_v3  ;;  %v3479_v5 = vpop.permute.xlu1 %3478 }
 0x45e   : > { %v2847_v33 = vpop.permute.xlu2 %2846  ;;  %3561 = vst.msk [vmem:[#allocation3 + $0x140] sm:$0xff] %vm925_vm3, %v3479_v5  ;;  %v2843_v27 = vpop.permute.xlu0 %2842 }
 0x45f   : > { %v2622_v24 = vmax.f32 %v2531_v47, 0.0  ;;  %2925 = vst.msk [vmem:[#allocation3 + $0x198] sm:$0xff] %vm925_vm3, %v2847_v33 }
 0x460   : > { %2923 = vst.msk [vmem:[#allocation3 + $0x168] sm:$0xff] %vm925_vm3, %v2843_v27  ;;  %v8902_v13 = vld [vmem:[#allocation2 + $0x21] sm:$0xff] }
 0x461   : > { %2654 = vst.msk [vmem:[#allocation2 + $0x31] sm:$0xff] %vm332_vm1, %v2622_v24  ;;  %v8904_v4 = vld [vmem:[#allocation2 + $0x20] sm:$0xff] }
 0x462   : > { %3115 = vst.msk [vmem:[#allocation3 + $0x168] sm:$0xff] %vm1118_vm4, %v8804_v30 }
 0x463   : > { %3238 = vrot.lane.b32.xlu1 %v8594_v61, %s6902_s22  ;;  %2719 = vst.msk [vmem:[#allocation3 + $0x48] sm:$0xff] %vm332_vm1, %v8904_v4 }
 0x464   : > { %3492 = vrot.lane.b32.xlu2 %v8600_v22, %s6900_s10  ;;  %3494 = vrot.lane.b32.xlu0 %v8607_v21, %s6900_s10  ;;  %v2533_v14 = vpop.f32.mrf.mxu2  ;;  %3357 = vst.msk [vmem:[#allocation3 + $0x20] sm:$0xff] %vm332_vm1, %v8902_v13  ;;  %v2311_v21 = vadd.f32 %v8838_v45, %v8267_v41 }
 0x465   : > { %v2534_v16 = vadd.f32 %v2533_v14, %v2421_v42  ;;  %v3667_v30 = vpop.permute.xlu1 %3666 }
 0x466   : > { %v3481_v57 = vpop.permute.xlu2 %3480  ;;  %3751 = vst.msk [vmem:[#allocation3 + $0x110] sm:$0xff] %vm1118_vm4, %v3667_v30  ;;  %v3477_v60 = vpop.permute.xlu0 %3476  ;;  %v2424_v9 = vadd.f32 %v8286_v10, %v2311_v21 }
 0x467   : > { %v2623_v3 = vmax.f32 %v2534_v16, 0.0  ;;  %3562 = vst.msk [vmem:[#allocation3 + $0x158] sm:$0xff] %vm925_vm3, %v3481_v57 }
 0x468   : > { %3560 = vst.msk [vmem:[#allocation3 + $0x128] sm:$0xff] %vm925_vm3, %v3477_v60  ;;  %v8922_v22 = vld [vmem:[#allocation2 + $0x31] sm:$0xff] }
 0x469   : > { %2655 = vst.msk [vmem:[#allocation2 + $0x39] sm:$0xff] %vm332_vm1, %v2623_v3  ;;  %v8927_v34 = vld [vmem:[#allocation2 + $0x30] sm:$0xff] }
 0x46a   : > { %3752 = vst.msk [vmem:[#allocation3 + $0x128] sm:$0xff] %vm1118_vm4, %v3669_v49 }
 0x46b   : > { %3684 = vrot.lane.b32.xlu1 %v8614_v58, %s6901_s15  ;;  %3358 = vst.msk [vmem:[#allocation3 + $0x38] sm:$0xff] %vm332_vm1, %v8922_v22 }
 0x46c   : > { %3240 = vrot.lane.b32.xlu2 %v8614_v58, %s6902_s22  ;;  %3682 = vrot.lane.b32.xlu0 %v8594_v61, %s6901_s15  ;;  %v2536_v41 = vpop.f32.mrf.mxu2  ;;  %2720 = vst.msk [vmem:[#allocation3 + $0x60] sm:$0xff] %vm332_vm1, %v8927_v34  ;;  %v2314_v61 = vadd.f32 %v8838_v45, %v8272_v35 }
 0x46d   : > { %v2537_v47 = vadd.f32 %v2536_v41, %v2424_v9  ;;  %v2845_v49 = vpop.permute.xlu1 %2844 }
 0x46e   : > { %v8941_v5 = vpop.permute.xlu2 %3862  ;;  %2924 = vst.msk [vmem:[#allocation3 + $0x180] sm:$0xff] %vm925_vm3, %v2845_v49  ;;  %v3859_v10 = vpop.permute.xlu0 %3858  ;;  %v2427_v42 = vadd.f32 %v8291_v55, %v2314_v61 }
 0x46f   : > { %v2624_v33 = vmax.f32 %v2537_v47, 0.0  ;;  %3943 = vst.msk [vmem:[#allocation3 + $0x110] sm:$0xff] %vm1311_vm5, %v3859_v10 }
 0x470   : > { %v8945_v58 = vld [vmem:[#allocation2 + $0x32] sm:$0xff]  ;;  %v8947_v27 = vld [vmem:[#allocation2 + $0x3a] sm:$0xff] }
 0x471   : > { %2656 = vst.msk [vmem:[#allocation2 + $0x49] sm:$0xff] %vm332_vm1, %v2624_v33  ;;  %v8952_v24 = vld [vmem:[#allocation2 + $0x38] sm:$0xff] }
 0x472   : > { %3996 = vst.msk [vmem:[#allocation3 + $0x10] sm:$0xff] %vm332_vm1, %v8945_v58  ;;  %v8956_v12 = vld [vmem:[#allocation2 + $0x39] sm:$0xff] }
 0x473   : > { %2862 = vrot.lane.b32.xlu1 %v8636_v54, %s6900_s10  ;;  %3997 = vst.msk [vmem:[#allocation3 + $0x28] sm:$0xff] %vm332_vm1, %v8947_v27 }
 0x474   : > { %3052 = vrot.lane.b32.xlu2 %v8645_v0, %s6901_s15  ;;  %2860 = vrot.lane.b32.xlu0 %v8616_v19, %s6900_s10  ;;  %v2539_v35 = vpop.f32.mrf.mxu2  ;;  %2721 = vst.msk [vmem:[#allocation3 + $0x78] sm:$0xff] %vm332_vm1, %v8952_v24  ;;  %v2317_v19 = vadd.f32 %v8838_v45, %v8278_v43 }
 0x475   : > { %v2540_v14 = vadd.f32 %v2539_v35, %v2427_v42  ;;  %v3861_v16 = vpop.permute.xlu1 %3860  ;;  %3359 = vst.msk [vmem:[#allocation3 + $0x50] sm:$0xff] %vm332_vm1, %v8956_v12 }
 0x476   : > { %v3229_v30 = vpop.permute.xlu2 %3228  ;;  %3944 = vst.msk [vmem:[#allocation3 + $0x128] sm:$0xff] %vm1311_vm5, %v3861_v16  ;;  %v3225_v55 = vpop.permute.xlu0 %3224  ;;  %v2430_v21 = vadd.f32 %v8293_v52, %v2317_v19 }
 0x477   : > { %v2625_v54 = vmax.f32 %v2540_v14, 0.0  ;;  %3306 = vst.msk [vmem:[#allocation3 + $0x150] sm:$0xff] %vm1311_vm5, %v3225_v55 }
 0x478   : > { %v8973_v57 = vld [vmem:[#allocation2 + $0x48] sm:$0xff] }
 0x479   : > { %v8975_v60 = vld [vmem:[#allocation2 + $0x49] sm:$0xff]  ;;  %2657 = vst.msk [vmem:[#allocation2 + $0x51] sm:$0xff] %vm332_vm1, %v2625_v54  ;;  %v4030_v3 = vld [vmem:[#allocation3 + $0x10] sm:$0xff] }
 0x47a   : > { %6701 = vmatmul.msk.f32.vlgmr.msrb.gmra.mxu1 %vm332_vm1, %v4030_v3  ;;  %2722 = vst.msk [vmem:[#allocation3 + $0x90] sm:$0xff] %vm332_vm1, %v8973_v57  ;;  %v4033_v10 = vld [vmem:[#allocation3 + $0x28] sm:$0xff] }
 0x47b   : > { %3496 = vrot.lane.b32.xlu1 %v8645_v0, %s6900_s10  ;;  %3360 = vst.msk [vmem:[#allocation3 + $0x68] sm:$0xff] %vm332_vm1, %v8975_v60 }
 0x47c   : > { %3498 = vrot.lane.b32.xlu2 %v8651_v1, %s6900_s10  ;;  %3054 = vrot.lane.b32.xlu0 %v8651_v1, %s6901_s15  ;;  %v2542_v43 = vpop.f32.mrf.mxu2 }
 0x47d   : > { %v2543_v45 = vadd.f32 %v2542_v43, %v2430_v21  ;;  %v3039_v9 = vpop.permute.xlu1 %3038  ;;  %v4045_v21 = vld [vmem:[#allocation3 + $0x88] sm:$0xff] }
 0x47e   : > { %v3041_v41 = vpop.permute.xlu2 %3040  ;;  %3117 = vst.msk [vmem:[#allocation3 + $0x198] sm:$0xff] %vm1118_vm4, %v3039_v9  ;;  %v3037_v47 = vpop.permute.xlu0 %3036 }
 0x47f   : > { %v2626_v52 = vmax.f32 %v2543_v45, 0.0  ;;  %3116 = vst.msk [vmem:[#allocation3 + $0x180] sm:$0xff] %vm1118_vm4, %v3037_v47  ;;  %v4155_v45 = vld [vmem:[%s11302_s5 + $0xf8] sm:$0xff] }
 0x480   : > { %3308 = vst.msk [vmem:[#allocation3 + $0x180] sm:$0xff] %vm1311_vm5, %v3229_v30  ;;  %v8995_v0 = vld [vmem:[#allocation2 + $0x4a] sm:$0xff]  ;;  %v8997_v49 = vld [vmem:[#allocation2 + $0x52] sm:$0xff]  ;;  %4373 = vmatpush.msrb.mxu3 %v4155_v45  ;;  %v4066_v45 = vld [vmem:[#allocation3 + $0x130] sm:$0xff] }
 0x481   : > { %2658 = vst.msk [vmem:[#allocation2 + $0x61] sm:$0xff] %vm332_vm1, %v2626_v52  ;;  %v9000_v1 = vld [vmem:[#allocation2 + $0x51] sm:$0xff]  ;;  %v4051_v52 = vld [vmem:[#allocation3 + $0xb8] sm:$0xff] }
 0x482   : > { %6702 = vmatmul.msk.f32.gmra.mxu1 %vm332_vm1, %v4033_v10  ;;  %3998 = vst.msk [vmem:[#allocation3 + $0x40] sm:$0xff] %vm332_vm1, %v8995_v0  ;;  %v9005_v33 = vld [vmem:[#allocation2 + $0x50] sm:$0xff] }
 0x483   : > { %3244 = vrot.lane.b32.xlu1 %v8665_v50, %s6902_s22  ;;  %3999 = vst.msk [vmem:[#allocation3 + $0x58] sm:$0xff] %vm332_vm1, %v8997_v49 }
 0x484   : > { %3686 = vrot.lane.b32.xlu2 %v8647_v44, %s6901_s15  ;;  %3242 = vrot.lane.b32.xlu0 %v8647_v44, %s6902_s22  ;;  %3361 = vst.msk [vmem:[#allocation3 + $0x80] sm:$0xff] %vm332_vm1, %v9000_v1 }
 0x485   : > { %v3227_v61 = vpop.permute.xlu1 %3226  ;;  %2723 = vst.msk [vmem:[#allocation3 + $0xa8] sm:$0xff] %vm332_vm1, %v9005_v33 }
 0x486   : > { %v3487_v42 = vpop.permute.xlu2 %3486  ;;  %3307 = vst.msk [vmem:[#allocation3 + $0x168] sm:$0xff] %vm1311_vm5, %v3227_v61  ;;  %v3483_v35 = vpop.permute.xlu0 %3482 }
 0x487   : > { %3565 = vst.msk [vmem:[#allocation3 + $0x1a0] sm:$0xff] %vm925_vm3, %v3487_v42 }
 0x488   : > { %3563 = vst.msk [vmem:[#allocation3 + $0x170] sm:$0xff] %vm925_vm3, %v3483_v35  ;;  %v9022_v14 = vld [vmem:[#allocation2 + $0x62] sm:$0xff] }
 0x489   : > { %v9024_v16 = vld [vmem:[#allocation2 + $0x61] sm:$0xff]  ;;  %v4036_v44 = vld [vmem:[#allocation3 + $0x40] sm:$0xff]  ;;  %4000 = vst.msk [vmem:[#allocation3 + $0x70] sm:$0xff] %vm332_vm1, %v9022_v14 }
 0x48a   : > { %v9028_v30 = vld [vmem:[#allocation2 + $0x68] sm:$0xff]  ;;  %v9030_v55 = vld [vmem:[#allocation2 + $0x60] sm:$0xff]  ;;  %6703 = vmatmul.msk.f32.gmra.mxu1 %vm332_vm1, %v4036_v44  ;;  %3362 = vst.msk [vmem:[#allocation3 + $0x98] sm:$0xff] %vm332_vm1, %v9024_v16 }
 0x48b   : > { %2724 = vst.msk [vmem:[#allocation3 + $0xc0] sm:$0xff] %vm332_vm1, %v9030_v55  ;;  %3056 = vrot.lane.b32.xlu1 %v8704_v46, %s6901_s15 }
 0x48c   : > { %2864 = vrot.lane.b32.xlu2 %v8667_v17, %s6900_s10  ;;  %3688 = vrot.lane.b32.xlu0 %v8665_v50, %s6901_s15  ;;  %2725 = vst.msk [vmem:[#allocation3 + $0xd8] sm:$0xff] %vm332_vm1, %v9028_v30  ;;  %v4039_v17 = vld [vmem:[#allocation3 + $0x58] sm:$0xff] }
 0x48d   : > { %v3673_v54 = vpop.permute.xlu1 %3672  ;;  %2917 = vst.msk [vmem:[#allocation3 + $0xd8] sm:$0xff] %vm925_vm3, %v8605_v6 }
 0x48e   : > { %v3675_v19 = vpop.permute.xlu2 %3674  ;;  %3754 = vst.msk [vmem:[#allocation3 + $0x158] sm:$0xff] %vm1118_vm4, %v3673_v54  ;;  %v3671_v3 = vpop.permute.xlu0 %3670 }
 0x48f   : > { %3755 = vst.msk [vmem:[#allocation3 + $0x170] sm:$0xff] %vm1118_vm4, %v3675_v19  ;;  %v4153_v19 = vld [vmem:[%s11302_s5 + $0xe8] sm:$0xff] }
 0x490   : > { %3753 = vst.msk [vmem:[#allocation3 + $0x140] sm:$0xff] %vm1118_vm4, %v3671_v3  ;;  %v4057_v3 = vld [vmem:[#allocation3 + $0xe8] sm:$0xff] }
 0x491   : > { %3945 = vst.msk [vmem:[#allocation3 + $0x140] sm:$0xff] %vm1311_vm5, %v8941_v5 }
 0x492   : > { %6704 = vmatmul.msk.f32.gmra.mxu1 %vm332_vm1, %v4039_v17  ;;  %3109 = vst.msk [vmem:[#allocation3 + $0xd8] sm:$0xff] %vm1118_vm4, %v8531_v26  ;;  %v4042_v26 = vld [vmem:[#allocation3 + $0x70] sm:$0xff] }
 0x493   : > { %3502 = vrot.lane.b32.xlu1 %v8709_v8, %s6900_s10  ;;  %3301 = vst.msk [vmem:[#allocation3 + $0xd8] sm:$0xff] %vm1311_vm5, %v8702_v59 }
 0x494   : > { %3058 = vrot.lane.b32.xlu2 %v8709_v8, %s6901_s15  ;;  %2866 = vrot.lane.b32.xlu0 %v8687_v53, %s6900_s10 }
 0x495   : > { %v2851_v6 = vpop.permute.xlu1 %2850 }
 0x496   : > { %v2853_v50 = vpop.permute.xlu2 %2852  ;;  %2927 = vst.msk [vmem:[#allocation3 + $0x1c8] sm:$0xff] %vm925_vm3, %v2851_v6  ;;  %v2849_v5 = vpop.permute.xlu0 %2848 }
 0x497   : > { %2928 = vst.msk [vmem:[#allocation3 + $0x1e0] sm:$0xff] %vm925_vm3, %v2853_v50  ;;  %v4060_v50 = vld [vmem:[#allocation3 + $0x100] sm:$0xff] }
 0x498   : > { %2926 = vst.msk [vmem:[#allocation3 + $0x1b0] sm:$0xff] %vm925_vm3, %v2849_v5  ;;  %v4152_v5 = vld [vmem:[%s11302_s5 + $0xe0] sm:$0xff] }
 0x499   : > { %3118 = vst.msk [vmem:[#allocation3 + $0x1b0] sm:$0xff] %vm1118_vm4, %v3041_v41 }
 0x49a   : > { %6705 = vmatmul.msk.f32.gmra.mxu1 %vm332_vm1, %v4042_v26 }
 0x49b   : > { %3690 = vrot.lane.b32.xlu1 %v8696_v51, %s6901_s15 }
 0x49c   : > { %3246 = vrot.lane.b32.xlu2 %v8696_v51, %s6902_s22  ;;  %3500 = vrot.lane.b32.xlu0 %v8704_v46, %s6900_s10 }
 0x49d   : > { %v3485_v53 = vpop.permute.xlu1 %3484 }
 0x49e   : > { %v3047_v59 = vpop.permute.xlu2 %3046  ;;  %3564 = vst.msk [vmem:[#allocation3 + $0x188] sm:$0xff] %vm925_vm3, %v3485_v53  ;;  %v3043_v8 = vpop.permute.xlu0 %3042 }
 0x49f   : > { %3119 = vst.msk [vmem:[#allocation3 + $0x1c8] sm:$0xff] %vm1118_vm4, %v3043_v8  ;;  %v3162_v8 = vld [vmem:[#allocation2 + $0x180] sm:$0xff] }
 0x4a2   : > { %6706 = vmatmul.msk.f32.gmra.mxu1 %vm332_vm1, %v4045_v21 }
 0x4a3   : > { %2868 = vrot.lane.b32.xlu1 %v8716_v36, %s6900_s10  ;;  %v4048_v36 = vld [vmem:[#allocation3 + $0xa0] sm:$0xff] }
 0x4a4   : > { %3692 = vrot.lane.b32.xlu2 %v8718_v28, %s6901_s15  ;;  %3248 = vrot.lane.b32.xlu0 %v8718_v28, %s6902_s22  ;;  %v4139_v28 = vld [vmem:[%s11302_s5 + $0x78] sm:$0xff] }
 0x4a5   : > { %v3233_v51 = vpop.permute.xlu1 %3232  ;;  %4260 = vmatpush.msrb.mxu0 %v4139_v28 }
 0x4a6   : > { %v3235_v46 = vpop.permute.xlu2 %3234  ;;  %3310 = vst.msk [vmem:[#allocation3 + $0x1b0] sm:$0xff] %vm1311_vm5, %v3233_v51  ;;  %v3231_v43 = vpop.permute.xlu0 %3230 }
 0x4a7   : > { %3311 = vst.msk [vmem:[#allocation3 + $0x1c8] sm:$0xff] %vm1311_vm5, %v3235_v46 }
 0x4a8   : > { %3309 = vst.msk [vmem:[#allocation3 + $0x198] sm:$0xff] %vm1311_vm5, %v3231_v43  ;;  %v4151_v43 = vld [vmem:[%s11302_s5 + $0xd8] sm:$0xff] }
 0x4aa   : > { %6707 = vmatmul.msk.f32.gmra.mxu1 %vm332_vm1, %v4048_v36  ;;  %v3163_v36 = vld [vmem:[#allocation2 + $0x188] sm:$0xff] }
 0x4ab   : > { %3062 = vrot.lane.b32.xlu1 %v8781_v32, %s6901_s15 }
 0x4ac   : > { %2870 = vrot.lane.b32.xlu2 %v8738_v7, %s6900_s10  ;;  %3060 = vrot.lane.b32.xlu0 %v8757_v18, %s6901_s15  ;;  %v4154_v7 = vld [vmem:[%s11302_s5 + $0xf0] sm:$0xff] }
 0x4ad   : > { %v3045_v9 = vpop.permute.xlu1 %3044  ;;  %4374 = vmatpush.msrb.mxu3 %v4154_v7 }
 0x4ae   : > { %v3681_v41 = vpop.permute.xlu2 %3680  ;;  %3120 = vst.msk [vmem:[#allocation3 + $0x1e0] sm:$0xff] %vm1118_vm4, %v3045_v9  ;;  %v3677_v47 = vpop.permute.xlu0 %3676 }
 0x4af   : > { %3756 = vst.msk [vmem:[#allocation3 + $0x188] sm:$0xff] %vm1118_vm4, %v3677_v47  ;;  %4375 = vmatpush.msrb.mxu3 %v4153_v19  ;;  %v4069_v47 = vld [vmem:[#allocation3 + $0x148] sm:$0xff] }
 0x4b1   : > { %4376 = vmatpush.msrb.mxu3 %v4152_v5  ;;  %v4132_v5 = vld [vmem:[%s11302_s5 + $0x40] sm:$0xff] }
 0x4b2   : > { %6708 = vmatmul.msk.f32.gmra.mxu1 %vm332_vm1, %v4051_v52 }
 0x4b3   : > { %3250 = vrot.lane.b32.xlu1 %v8747_v29, %s6902_s22  ;;  %4377 = vmatpush.msrb.mxu3 %v4151_v43 }
 0x4b4   : > { %3504 = vrot.lane.b32.xlu2 %v8757_v18, %s6900_s10  ;;  %3506 = vrot.lane.b32.xlu0 %v8781_v32, %s6900_s10  ;;  %v4138_v18 = vld [vmem:[%s11302_s5 + $0x70] sm:$0xff]  ;;  %v4054_v32 = vld [vmem:[#allocation3 + $0xd0] sm:$0xff] }
 0x4b5   : > { %v3491_v10 = vpop.permute.xlu1 %3490  ;;  %4261 = vmatpush.msrb.mxu0 %v4138_v18 }
 0x4b6   : > { %v2859_v61 = vpop.permute.xlu2 %2858  ;;  %3567 = vst.msk [vmem:[#allocation3 + $0x1d0] sm:$0xff] %vm925_vm3, %v3491_v10  ;;  %v2855_v42 = vpop.permute.xlu0 %2854  ;;  %v4072_v10 = vld [vmem:[#allocation3 + $0x160] sm:$0xff] }
 0x4b7   : > { %2931 = vst.msk [vmem:[#allocation3 + $0x228] sm:$0xff] %vm925_vm3, %v2859_v61  ;;  %v4150_v61 = vld [vmem:[%s11302_s5 + $0xd0] sm:$0xff] }
 0x4b8   : > { %2929 = vst.msk [vmem:[#allocation3 + $0x1f8] sm:$0xff] %vm925_vm3, %v2855_v42  ;;  %4378 = vmatpush.msrb.mxu3 %v4150_v61 }
 0x4b9   : > { %3121 = vst.msk [vmem:[#allocation3 + $0x1f8] sm:$0xff] %vm1118_vm4, %v3047_v59 }
 0x4ba   : > { %6709 = vmatmul.msk.f32.gmra.mxu1 %vm332_vm1, %v4054_v32 }
 0x4bb   : > { %3696 = vrot.lane.b32.xlu1 %v8762_v2, %s6901_s15 }
 0x4bc   : > { %3252 = vrot.lane.b32.xlu2 %v8762_v2, %s6902_s22  ;;  %3694 = vrot.lane.b32.xlu0 %v8747_v29, %s6901_s15  ;;  %v4137_v29 = vld [vmem:[%s11302_s5 + $0x68] sm:$0xff] }
 0x4bd   : > { %v3679_v35 = vpop.permute.xlu1 %3678  ;;  %4262 = vmatpush.msrb.mxu0 %v4137_v29  ;;  %v4078_v29 = vld [vmem:[#allocation3 + $0x190] sm:$0xff] }
 0x4be   : > { %v3493_v44 = vpop.permute.xlu2 %3492  ;;  %3757 = vst.msk [vmem:[#allocation3 + $0x1a0] sm:$0xff] %vm1118_vm4, %v3679_v35  ;;  %v3489_v54 = vpop.permute.xlu0 %3488  ;;  %v4075_v35 = vld [vmem:[#allocation3 + $0x178] sm:$0xff] }
 0x4bf   : > { %3568 = vst.msk [vmem:[#allocation3 + $0x1e8] sm:$0xff] %vm925_vm3, %v3493_v44  ;;  %v2942_v44 = vld [vmem:[#allocation2 + $0x1a] sm:$0xff] }
 0x4c0   : > { %3566 = vst.msk [vmem:[#allocation3 + $0x1b8] sm:$0xff] %vm925_vm3, %v3489_v54 }
 0x4c1   : > { %3758 = vst.msk [vmem:[#allocation3 + $0x1b8] sm:$0xff] %vm1118_vm4, %v3681_v41 }
 0x4c2   : > { %6710 = vmatmul.msk.f32.gmra.mxu1 %vm332_vm1, %v4057_v3  ;;  %v4133_v3 = vld [vmem:[%s11302_s5 + $0x48] sm:$0xff] }
 0x4c3   : > { %2874 = vrot.lane.b32.xlu1 %v8789_v56, %s6900_s10 }
 0x4c4   : > { %3064 = vrot.lane.b32.xlu2 %v8806_v11, %s6901_s15  ;;  %2872 = vrot.lane.b32.xlu0 %v8764_v15, %s6900_s10 }
 0x4c5   : > { %v2857_v2 = vpop.permute.xlu1 %2856 }
 0x4c6   : > { %v3241_v17 = vpop.permute.xlu2 %3240  ;;  %2930 = vst.msk [vmem:[#allocation3 + $0x210] sm:$0xff] %vm925_vm3, %v2857_v2  ;;  %v3237_v6 = vpop.permute.xlu0 %3236 }
 0x4c7   : > { %3312 = vst.msk [vmem:[#allocation3 + $0x1e0] sm:$0xff] %vm1311_vm5, %v3237_v6  ;;  %v4148_v6 = vld [vmem:[%s11302_s5 + $0xc0] sm:$0xff] }
 0x4ca   : > { %6711 = vmatmul.msk.f32.gmra.mxu1 %vm332_vm1, %v4060_v50  ;;  %v4081_v50 = vld [vmem:[#allocation3 + $0x1a8] sm:$0xff] }
 0x4cb   : > { %3508 = vrot.lane.b32.xlu1 %v8806_v11, %s6900_s10  ;;  %v4136_v11 = vld [vmem:[%s11302_s5 + $0x60] sm:$0xff] }
 0x4cc   : > { %3510 = vrot.lane.b32.xlu2 %v8811_v48, %s6900_s10  ;;  %3066 = vrot.lane.b32.xlu0 %v8811_v48, %s6901_s15  ;;  %v4063_v48 = vld [vmem:[#allocation3 + $0x118] sm:$0xff] }
 0x4cd   : > { %v3051_v26 = vpop.permute.xlu1 %3050  ;;  %4263 = vmatpush.msrb.mxu0 %v4136_v11  ;;  %v4147_v11 = vld [vmem:[%s11302_s5 + $0xb8] sm:$0xff] }
 0x4ce   : > { %v3053_v53 = vpop.permute.xlu2 %3052  ;;  %3123 = vst.msk [vmem:[#allocation3 + $0x228] sm:$0xff] %vm1118_vm4, %v3051_v26  ;;  %v3049_v59 = vpop.permute.xlu0 %3048 }
 0x4cf   : > { %3122 = vst.msk [vmem:[#allocation3 + $0x210] sm:$0xff] %vm1118_vm4, %v3049_v59  ;;  %v4084_v59 = vld [vmem:[#allocation3 + $0x1c0] sm:$0xff] }
 0x4d0   : > { %3314 = vst.msk [vmem:[#allocation3 + $0x210] sm:$0xff] %vm1311_vm5, %v3241_v17 }
 0x4d2   : > { %6712 = vmatmul.msk.f32.gmra.mxu1 %vm332_vm1, %v4063_v48 }
 0x4d3   : > { %3256 = vrot.lane.b32.xlu1 %v3162_v8, %s6902_s22 }
 0x4d4   : > { %3698 = vrot.lane.b32.xlu2 %v8798_v20, %s6901_s15  ;;  %3254 = vrot.lane.b32.xlu0 %v8798_v20, %s6902_s22  ;;  %v4135_v20 = vld [vmem:[%s11302_s5 + $0x58] sm:$0xff] }
 0x4d5   : > { %v3239_v21 = vpop.permute.xlu1 %3238  ;;  %4264 = vmatpush.msrb.mxu0 %v4135_v20 }
 0x4d6   : > { %v3499_v51 = vpop.permute.xlu2 %3498  ;;  %3313 = vst.msk [vmem:[#allocation3 + $0x1f8] sm:$0xff] %vm1311_vm5, %v3239_v21  ;;  %v3495_v46 = vpop.permute.xlu0 %3494 }
 0x4d7   : > { %3571 = vst.msk [vmem:[#allocation3 + $0x230] sm:$0xff] %vm925_vm3, %v3499_v51 }
 0x4d8   : > { %3569 = vst.msk [vmem:[#allocation3 + $0x200] sm:$0xff] %vm925_vm3, %v3495_v46 }
 0x4da   : > { %6713 = vmatmul.msk.f32.gmra.mxu1 %vm332_vm1, %v4066_v45  ;;  %v4146_v45 = vld [vmem:[%s11302_s5 + $0xb0] sm:$0xff] }
 0x4db   : > { %3514 = vrot.lane.b32.xlu1 %v8846_v38, %s6900_s10 }
 0x4dc   : > { %3258 = vrot.lane.b32.xlu2 %v3163_v36, %s6902_s22  ;;  %3700 = vrot.lane.b32.xlu0 %v3162_v8, %s6901_s15 }
 0x4dd   : > { %v3685_v28 = vpop.permute.xlu1 %3684 }
 0x4de   : > { %v3687_v9 = vpop.permute.xlu2 %3686  ;;  %3760 = vst.msk [vmem:[#allocation3 + $0x1e8] sm:$0xff] %vm1118_vm4, %v3685_v28  ;;  %v3683_v41 = vpop.permute.xlu0 %3682 }
 0x4df   : > { %3761 = vst.msk [vmem:[#allocation3 + $0x200] sm:$0xff] %vm1118_vm4, %v3687_v9  ;;  %v4093_v9 = vld [vmem:[#allocation3 + $0x208] sm:$0xff] }
 0x4e0   : > { %3759 = vst.msk [vmem:[#allocation3 + $0x1d0] sm:$0xff] %vm1118_vm4, %v3683_v41 }
 0x4e2   : > { %6714 = vmatmul.msk.f32.gmra.mxu1 %vm332_vm1, %v4069_v47 }
 0x4e3   : > { %3702 = vrot.lane.b32.xlu1 %v3163_v36, %s6901_s15  ;;  %v4090_v36 = vld [vmem:[#allocation3 + $0x1f0] sm:$0xff] }
 0x4e4   : > { %2816 = vrot.lane.b32.xlu2 %v8869_v63, %s6900_s10  ;;  %3512 = vrot.lane.b32.xlu0 %v8848_v25, %s6900_s10  ;;  %v2943_v63 = vld [vmem:[#allocation2 + $0x22] sm:$0xff]  ;;  %v4134_v25 = vld [vmem:[%s11302_s5 + $0x50] sm:$0xff] }
 0x4e5   : > { %v2863_v38 = vpop.permute.xlu1 %2862  ;;  %4265 = vmatpush.msrb.mxu0 %v4134_v25  ;;  %v4144_v25 = vld [vmem:[%s11302_s5 + $0xa0] sm:$0xff] }
 0x4e6   : > { %v2865_v52 = vpop.permute.xlu2 %2864  ;;  %2933 = vst.msk [vmem:[#allocation3 + $0x258] sm:$0xff] %vm925_vm3, %v2863_v38  ;;  %v2861_v7 = vpop.permute.xlu0 %2860 }
 0x4e7   : > { %2934 = vst.msk [vmem:[#allocation3 + $0x270] sm:$0xff] %vm925_vm3, %v2865_v52  ;;  %4266 = vmatpush.msrb.mxu0 %v4133_v3  ;;  %v4129_v52 = vld [vmem:[%s11302_s5 + $0x28] sm:$0xff] }
 0x4e8   : > { %2932 = vst.msk [vmem:[#allocation3 + $0x240] sm:$0xff] %vm925_vm3, %v2861_v7  ;;  %v4125_v3 = vld [vmem:[%s11302_s5 + $0x8] sm:$0xff] }
 0x4e9   : > { %3124 = vst.msk [vmem:[#allocation3 + $0x240] sm:$0xff] %vm1118_vm4, %v3053_v53  ;;  %4267 = vmatpush.msrb.mxu0 %v4132_v5  ;;  %v3786_v5 = vld [vmem:[#allocation2 + $0xd9] sm:$0xff] }
 0x4ea   : > { %6715 = vmatmul.msk.f32.gmra.mxu1 %vm332_vm1, %v4072_v10 }
 0x4eb   : > { %3196 = vrot.lane.b32.xlu1 %v8871_v37, %s6902_s22  ;;  %v4149_v37 = vld [vmem:[%s11302_s5 + $0xc8] sm:$0xff] }
 0x4ec   : > { %3010 = vrot.lane.b32.xlu2 %v2943_v63, %s6901_s15  ;;  %2818 = vrot.lane.b32.xlu0 %v8902_v13, %s6900_s10 }
 0x4ed   : > { %v3497_v42 = vpop.permute.xlu1 %3496  ;;  %4379 = vmatpush.msrb.mxu3 %v4149_v37 }
 0x4ee   : > { %v3059_v18 = vpop.permute.xlu2 %3058  ;;  %3570 = vst.msk [vmem:[#allocation3 + $0x218] sm:$0xff] %vm925_vm3, %v3497_v42  ;;  %v3055_v32 = vpop.permute.xlu0 %3054 }
 0x4ef   : > { %3125 = vst.msk [vmem:[#allocation3 + $0x258] sm:$0xff] %vm1118_vm4, %v3055_v32  ;;  %4380 = vmatpush.msrb.mxu3 %v4148_v6 }
 0x4f1   : > { %4381 = vmatpush.msrb.mxu3 %v4147_v11  ;;  %v3789_v11 = vld [vmem:[#allocation2 + $0xf9] sm:$0xff] }
 0x4f2   : > { %6716 = vmatmul.msk.f32.gmra.mxu1 %vm332_vm1, %v4075_v35  ;;  %v4102_v35 = vld [vmem:[#allocation3 + $0x250] sm:$0xff] }
 0x4f3   : > { %3008 = vrot.lane.b32.xlu1 %v2942_v44, %s6901_s15  ;;  %4382 = vmatpush.msrb.mxu3 %v4146_v45 }
 0x4f4   : > { %3198 = vrot.lane.b32.xlu2 %v8904_v4, %s6902_s22  ;;  %3452 = vrot.lane.b32.xlu0 %v2942_v44, %s6900_s10 }
 0x4f5   : > { %v3245_v13 = vpop.permute.xlu1 %3244 }
 0x4f6   : > { %v3247_v54 = vpop.permute.xlu2 %3246  ;;  %3316 = vst.msk [vmem:[#allocation3 + $0x240] sm:$0xff] %vm1311_vm5, %v3245_v13  ;;  %v3243_v19 = vpop.permute.xlu0 %3242 }
 0x4f7   : > { %3317 = vst.msk [vmem:[#allocation3 + $0x258] sm:$0xff] %vm1311_vm5, %v3247_v54  ;;  %v9313_v61 = vpop.f32.mrf.mxu1  ;;  %v4127_v54 = vld [vmem:[%s11302_s5 + $0x18] sm:$0xff] }
 0x4f8   : > { %3315 = vst.msk [vmem:[#allocation3 + $0x228] sm:$0xff] %vm1311_vm5, %v3243_v19  ;;  %v4126_v19 = vld [vmem:[%s11302_s5 + $0x10] sm:$0xff] }
 0x4fa   : > { %6717 = vmatmul.msk.f32.gmra.mxu1 %vm332_vm1, %v4078_v29 }
 0x4fb   : > { %3454 = vrot.lane.b32.xlu1 %v2943_v63, %s6900_s10  ;;  %v4099_v63 = vld [vmem:[#allocation3 + $0x238] sm:$0xff] }
 0x4fc   : > { %3644 = vrot.lane.b32.xlu2 %v8927_v34, %s6901_s15  ;;  %3200 = vrot.lane.b32.xlu0 %v8927_v34, %s6902_s22 }
 0x4fd   : > { %v3057_v4 = vpop.permute.xlu1 %3056 }
 0x4fe   : > { %v3693_v2 = vpop.permute.xlu2 %3692  ;;  %3126 = vst.msk [vmem:[#allocation3 + $0x270] sm:$0xff] %vm1118_vm4, %v3057_v4  ;;  %v3689_v17 = vpop.permute.xlu0 %3688 }
 0x4ff   : > { %3762 = vst.msk [vmem:[#allocation3 + $0x218] sm:$0xff] %vm1118_vm4, %v3689_v17  ;;  %v9332_v44 = vpop.f32.mrf.mxu1  ;;  %v4124_v17 = vld [vmem:[%s11302_s5] sm:$0xff] }
 0x502   : > { %6718 = vmatmul.msk.f32.gmra.mxu1 %vm332_vm1, %v4081_v50  ;;  %v4142_v50 = vld [vmem:[%s11302_s5 + $0x90] sm:$0xff] }
 0x503   : > { %2820 = vrot.lane.b32.xlu1 %v8922_v22, %s6900_s10 }
 0x504   : > { %2822 = vrot.lane.b32.xlu2 %v8956_v12, %s6900_s10  ;;  %3012 = vrot.lane.b32.xlu0 %v8945_v58, %s6901_s15 }
 0x505   : > { %v3503_v34 = vpop.permute.xlu1 %3502 }
 0x506   : > { %v2871_v26 = vpop.permute.xlu2 %2870  ;;  %3573 = vst.msk [vmem:[#allocation3 + $0x260] sm:$0xff] %vm925_vm3, %v3503_v34  ;;  %v2867_v53 = vpop.permute.xlu0 %2866 }
 0x507   : > { %2937 = vst.msk [vmem:[#allocation3 + $0x2b8] sm:$0xff] %vm925_vm3, %v2871_v26  ;;  %v9362_v29 = vpop.f32.mrf.mxu1 }
 0x508   : > { %2935 = vst.msk [vmem:[#allocation3 + $0x288] sm:$0xff] %vm925_vm3, %v2867_v53 }
 0x509   : > { %3127 = vst.msk [vmem:[#allocation3 + $0x288] sm:$0xff] %vm1118_vm4, %v3059_v18 }
 0x50a   : > { %6719 = vmatmul.msk.f32.gmra.mxu1 %vm332_vm1, %v4084_v59 }
 0x50b   : > { %3836 = vrot.lane.b32.xlu1 %v8922_v22, %s6902_s22  ;;  %v4087_v22 = vld [vmem:[#allocation3 + $0x1d8] sm:$0xff] }
 0x50c   : > { %3456 = vrot.lane.b32.xlu2 %v8945_v58, %s6900_s10  ;;  %3458 = vrot.lane.b32.xlu0 %v8947_v27, %s6900_s10  ;;  %v4131_v58 = vld [vmem:[%s11302_s5 + $0x38] sm:$0xff] }
 0x50d   : > { %v3691_v48 = vpop.permute.xlu1 %3690  ;;  %4268 = vmatpush.msrb.mxu0 %v4131_v58  ;;  %v4141_v58 = vld [vmem:[%s11302_s5 + $0x88] sm:$0xff] }
 0x50e   : > { %v3505_v8 = vpop.permute.xlu2 %3504  ;;  %3763 = vst.msk [vmem:[#allocation3 + $0x230] sm:$0xff] %vm1118_vm4, %v3691_v48  ;;  %v3501_v21 = vpop.permute.xlu0 %3500 }
 0x50f   : > { %3574 = vst.msk [vmem:[#allocation3 + $0x278] sm:$0xff] %vm925_vm3, %v3505_v8  ;;  %v9380_v53 = vpop.f32.mrf.mxu1 }
 0x510   : > { %3572 = vst.msk [vmem:[#allocation3 + $0x248] sm:$0xff] %vm925_vm3, %v3501_v21 }
 0x511   : > { %3764 = vst.msk [vmem:[#allocation3 + $0x248] sm:$0xff] %vm1118_vm4, %v3693_v2 }
 0x512   : > { %6720 = vmatmul.msk.f32.gmra.mxu1 %vm332_vm1, %v4087_v22  ;;  %v4114_v22 = vld [vmem:[#allocation3 + $0x2b0] sm:$0xff] }
 0x513   : > { %3014 = vrot.lane.b32.xlu1 %v8947_v27, %s6901_s15  ;;  %v4130_v27 = vld [vmem:[%s11302_s5 + $0x30] sm:$0xff] }
 0x514   : > { %3838 = vrot.lane.b32.xlu2 %v8956_v12, %s6902_s22  ;;  %3646 = vrot.lane.b32.xlu0 %v8952_v24, %s6901_s15 }
 0x515   : > { %v2869_v51 = vpop.permute.xlu1 %2868  ;;  %4269 = vmatpush.msrb.mxu0 %v4130_v27  ;;  %v4117_v27 = vld [vmem:[#allocation3 + $0x2c8] sm:$0xff] }
 0x516   : > { %v3253_v46 = vpop.permute.xlu2 %3252  ;;  %2936 = vst.msk [vmem:[#allocation3 + $0x2a0] sm:$0xff] %vm925_vm3, %v2869_v51  ;;  %v3249_v43 = vpop.permute.xlu0 %3248  ;;  %v3787_v51 = vld [vmem:[#allocation2 + $0xe1] sm:$0xff] }
 0x517   : > { %3318 = vst.msk [vmem:[#allocation3 + $0x270] sm:$0xff] %vm1311_vm5, %v3249_v43  ;;  %4270 = vmatpush.msrb.mxu0 %v4129_v52  ;;  %v9394_v21 = vpop.f32.mrf.mxu1  ;;  %v3797_v52 = vld [vmem:[#allocation2 + $0x159] sm:$0xff] }
 0x51a   : > { %6721 = vmatmul.msk.f32.gmra.mxu1 %vm332_vm1, %v4090_v36  ;;  %v4140_v36 = vld [vmem:[%s11302_s5 + $0x80] sm:$0xff] }
 0x51b   : > { %3202 = vrot.lane.b32.xlu1 %v8952_v24, %s6902_s22  ;;  %v4145_v24 = vld [vmem:[%s11302_s5 + $0xa8] sm:$0xff] }
 0x51c   : > { %3204 = vrot.lane.b32.xlu2 %v8973_v57, %s6902_s22  ;;  %2824 = vrot.lane.b32.xlu0 %v8975_v60, %s6900_s10 }
 0x51d   : > { %v3063_v12 = vpop.permute.xlu1 %3062  ;;  %4383 = vmatpush.msrb.mxu3 %v4145_v24 }
 0x51e   : > { %v3065_v20 = vpop.permute.xlu2 %3064  ;;  %3129 = vst.msk [vmem:[#allocation3 + $0x2b8] sm:$0xff] %vm1118_vm4, %v3063_v12  ;;  %v3061_v28 = vpop.permute.xlu0 %3060 }
 0x51f   : > { %3128 = vst.msk [vmem:[#allocation3 + $0x2a0] sm:$0xff] %vm1118_vm4, %v3061_v28  ;;  %4384 = vmatpush.msrb.mxu3 %v4144_v25  ;;  %v9412_v12 = vpop.f32.mrf.mxu1  ;;  %v3790_v28 = vld [vmem:[#allocation2 + $0x109] sm:$0xff]  ;;  %v3796_v25 = vld [vmem:[#allocation2 + $0x151] sm:$0xff] }
 0x520   : > { %3320 = vst.msk [vmem:[#allocation3 + $0x2a0] sm:$0xff] %vm1311_vm5, %v3253_v46  ;;  %v3792_v46 = vld [vmem:[#allocation2 + $0x121] sm:$0xff] }
 0x522   : > { %6722 = vmatmul.msk.f32.gmra.mxu1 %vm332_vm1, %v4093_v9  ;;  %v3795_v9 = vld [vmem:[#allocation2 + $0x141] sm:$0xff] }
 0x523   : > { %3648 = vrot.lane.b32.xlu1 %v8973_v57, %s6901_s15  ;;  %v4096_v57 = vld [vmem:[#allocation3 + $0x220] sm:$0xff] }
 0x524   : > { %3016 = vrot.lane.b32.xlu2 %v8995_v0, %s6901_s15  ;;  %3840 = vrot.lane.b32.xlu0 %v8975_v60, %s6902_s22 }
 0x525   : > { %v3251_v41 = vpop.permute.xlu1 %3250 }
 0x526   : > { %v3511_v47 = vpop.permute.xlu2 %3510  ;;  %3319 = vst.msk [vmem:[#allocation3 + $0x288] sm:$0xff] %vm1311_vm5, %v3251_v41  ;;  %v3507_v38 = vpop.permute.xlu0 %3506 }
 0x527   : > { %3577 = vst.msk [vmem:[#allocation3 + $0x2c0] sm:$0xff] %vm925_vm3, %v3511_v47 }
 0x528   : > { %3575 = vst.msk [vmem:[#allocation3 + $0x290] sm:$0xff] %vm925_vm3, %v3507_v38 }
 0x52a   : > { %6723 = vmatmul.msk.f32.gmra.mxu1 %vm332_vm1, %v4096_v57  ;;  %v3793_v57 = vld [vmem:[#allocation2 + $0x129] sm:$0xff] }
 0x52b   : > { %2826 = vrot.lane.b32.xlu1 %v9000_v1, %s6900_s10 }
 0x52c   : > { %3462 = vrot.lane.b32.xlu2 %v8997_v49, %s6900_s10  ;;  %3018 = vrot.lane.b32.xlu0 %v8997_v49, %s6901_s15  ;;  %v4128_v49 = vld [vmem:[%s11302_s5 + $0x20] sm:$0xff] }
 0x52d   : > { %v3697_v60 = vpop.permute.xlu1 %3696  ;;  %4271 = vmatpush.msrb.mxu0 %v4128_v49 }
 0x52e   : > { %v3699_v7 = vpop.permute.xlu2 %3698  ;;  %3766 = vst.msk [vmem:[#allocation3 + $0x278] sm:$0xff] %vm1118_vm4, %v3697_v60  ;;  %v3695_v10 = vpop.permute.xlu0 %3694 }
 0x52f   : > { %3767 = vst.msk [vmem:[#allocation3 + $0x290] sm:$0xff] %vm1118_vm4, %v3699_v7  ;;  %4272 = vmatpush.msrb.mxu0 %v4127_v54 }
 0x530   : > { %3765 = vst.msk [vmem:[#allocation3 + $0x260] sm:$0xff] %vm1118_vm4, %v3695_v10 }
 0x531   : > { %4273 = vmatpush.msrb.mxu0 %v4126_v19 }
 0x532   : > { %6724 = vmatmul.msk.f32.gmra.mxu1 %vm332_vm1, %v4099_v63 }
 0x533   : > { %3460 = vrot.lane.b32.xlu1 %v8995_v0, %s6900_s10  ;;  %v4143_v0 = vld [vmem:[%s11302_s5 + $0x98] sm:$0xff]  ;;  %4274 = vmatpush.msrb.mxu0 %v4125_v3 }
 0x534   : > { %3650 = vrot.lane.b32.xlu2 %v9005_v33, %s6901_s15  ;;  %3206 = vrot.lane.b32.xlu0 %v9005_v33, %s6902_s22 }
 0x535   : > { %v2875_v42 = vpop.permute.xlu1 %2874  ;;  %4385 = vmatpush.msrb.mxu3 %v4143_v0  ;;  %4275 = vmatpush.msrb.mxu0 %v4124_v17 }
 0x536   : > { %v3259_v18 = vpop.permute.xlu2 %3258  ;;  %2939 = vst.msk [vmem:[#allocation3 + $0x2e8] sm:$0xff] %vm925_vm3, %v2875_v42  ;;  %v2873_v32 = vpop.permute.xlu0 %2872 }
 0x537   : > { %2938 = vst.msk [vmem:[#allocation3 + $0x2d0] sm:$0xff] %vm925_vm3, %v2873_v32  ;;  %4386 = vmatpush.msrb.mxu3 %v4142_v50 }
 0x538   : > { %3130 = vst.msk [vmem:[#allocation3 + $0x2d0] sm:$0xff] %vm1118_vm4, %v3065_v20  ;;  %v3794_v20 = vld [vmem:[#allocation2 + $0x139] sm:$0xff] }
 0x539   : > { %4387 = vmatpush.msrb.mxu3 %v4141_v58 }
 0x53a   : > { %6725 = vmatmul.msk.f32.gmra.mxu1 %vm332_vm1, %v4102_v35 }
 0x53b   : > { %3842 = vrot.lane.b32.xlu1 %v9000_v1, %s6902_s22  ;;  %v4105_v1 = vld [vmem:[#allocation3 + $0x268] sm:$0xff]  ;;  %4388 = vmatpush.msrb.mxu3 %v4140_v36 }
 0x53c   : > { %2828 = vrot.lane.b32.xlu2 %v9024_v16, %s6900_s10  ;;  %3464 = vrot.lane.b32.xlu0 %v9022_v14, %s6900_s10  ;;  %s6567_s10 = sshll.u32 %s6564_s8, 4  ;;  %s6568_s10 = int_to_ptr.hbm [resolvable:$true] %s6567_s10 }
 0x53d   : > { %v3509_v33 = vpop.permute.xlu1 %3508  ;;  %s6849_s30 = sshra.s32 %s6568_s10, 4  ;;  %s6850_s30 = int_to_ptr.hbm [resolvable:$true] %s6849_s30 }
 0x53e   : > { %v2817_v37 = vpop.permute.xlu2 %2816  ;;  %3576 = vst.msk [vmem:[#allocation3 + $0x2a8] sm:$0xff] %vm925_vm3, %v3509_v33  ;;  %v3067_v13 = vpop.permute.xlu0 %3066  ;;  %s6851_s17 = scalar_lea.hbm %s6850_s30, 16  ;;  %p6856_p0 = scmp.lt.s32.totalorder %s6850_s30, %s11306_s9 }
 0x53f   : > { %2910 = vst.msk [vmem:[#allocation3 + $0x30] sm:$0xff] %vm925_vm3, %v2817_v37  ;;  %p6852_p11 = scmp.ne.s32.totalorder %s6850_s30, %s6851_s17  ;;  %p6857_p1 = scmp.lt.s32.totalorder %s6855_s25, %s6851_s17 }
 0x540   : > { %3131 = vst.msk [vmem:[#allocation3 + $0x2e8] sm:$0xff] %vm1118_vm4, %v3067_v13 }
 0x541   : > { %3323 = vst.msk [vmem:[#allocation3 + $0x2e8] sm:$0xff] %vm1311_vm5, %v3259_v18  ;;  %p6853_p12 = pnand %p6852_p11, %p6996_p5  ;;  %p6858_p2 = por %p6857_p1, %p6856_p0 }
 0x542   : > { %6726 = vmatmul.msk.f32.gmra.mxu1 %vm332_vm1, %v4105_v1 }
 0x543   : > { %3020 = vrot.lane.b32.xlu1 %v9022_v14, %s6901_s15  ;;  %v4108_v14 = vld [vmem:[#allocation3 + $0x280] sm:$0xff]  ;;  %p6854_p13 = pneg %p6853_p12 }
 0x544   : > { %3210 = vrot.lane.b32.xlu2 %v9028_v30, %s6902_s22  ;;  %3652 = vrot.lane.b32.xlu0 %v9030_v55, %s6901_s15 }
 0x545   : > { %v3257_v4 = vpop.permute.xlu1 %3256  ;;  %p6859_p3 = pnand %p6858_p2, %p6854_p13 }
 0x546   : > { %v3011_v2 = vpop.permute.xlu2 %3010  ;;  %3322 = vst.msk [vmem:[#allocation3 + $0x2d0] sm:$0xff] %vm1311_vm5, %v3257_v4  ;;  %v3255_v6 = vpop.permute.xlu0 %3254 }
 0x547   : > { %3321 = vst.msk [vmem:[#allocation3 + $0x2b8] sm:$0xff] %vm1311_vm5, %v3255_v6 }
 0x54a   : > { %6727 = vmatmul.msk.f32.gmra.mxu1 %vm332_vm1, %v4108_v14 }
 0x54b   : > { %3208 = vrot.lane.b32.xlu1 %v9030_v55, %s6902_s22  ;;  %v3788_v55 = vld [vmem:[#allocation2 + $0xf1] sm:$0xff] }
 0x54c   : > { %3844 = vrot.lane.b32.xlu2 %v9024_v16, %s6902_s22  ;;  %3864 = vrot.lane.b32.xlu0 %v3786_v5, %s6902_s22  ;;  %v4111_v16 = vld [vmem:[#allocation3 + $0x298] sm:$0xff] }
 0x54d   : > { %v3515_v34 = vpop.permute.xlu1 %3514 }
 0x54e   : > { %v3199_v26 = vpop.permute.xlu2 %3198  ;;  %3579 = vst.msk [vmem:[#allocation3 + $0x2f0] sm:$0xff] %vm925_vm3, %v3515_v34  ;;  %v3701_v59 = vpop.permute.xlu0 %3700 }
 0x54f   : > { %3771 = vst.msk [vmem:[#allocation3 + $0x2f0] sm:$0xff] %vm1118_vm4, %v8578_v40 }
 0x550   : > { %3293 = vst.msk [vmem:[#allocation3 + $0x18] sm:$0xff] %vm1311_vm5, %v3199_v26 }
 0x551   : > { %3768 = vst.msk [vmem:[#allocation3 + $0x2a8] sm:$0xff] %vm1118_vm4, %v3701_v59 }
 0x552   : > { %6728 = vmatmul.msk.f32.gmra.mxu1 %vm332_vm1, %v4111_v16 }
 0x553   : > { %3654 = vrot.lane.b32.xlu1 %v9028_v30, %s6901_s15  ;;  %v3791_v30 = vld [vmem:[#allocation2 + $0x111] sm:$0xff] }
 0x554   : > { %3868 = vrot.lane.b32.xlu2 %v3788_v55, %s6902_s22  ;;  %3870 = vrot.lane.b32.xlu0 %v3789_v11, %s6902_s22 }
 0x555   : > { %v3703_v48 = vpop.permute.xlu1 %3702 }
 0x556   : > { %v3645_v8 = vpop.permute.xlu2 %3644  ;;  %3769 = vst.msk [vmem:[#allocation3 + $0x2c0] sm:$0xff] %vm1118_vm4, %v3703_v48  ;;  %v3513_v40 = vpop.permute.xlu0 %3512 }
 0x557   : > { %3578 = vst.msk [vmem:[#allocation3 + $0x2d8] sm:$0xff] %vm925_vm3, %v3513_v40  ;;  %v4031_v10 = vld [vmem:[#allocation3 + $0x18] sm:$0xff] }
 0x558   : > { %3770 = vst.msk [vmem:[#allocation3 + $0x2d8] sm:$0xff] %vm1118_vm4, %v8494_v39 }
 0x55a   : > { %6729 = vmatmul.msk.f32.gmra.mxu1 %vm332_vm1, %v4114_v22 }
 0x55b   : > { %3866 = vrot.lane.b32.xlu1 %v3787_v51, %s6902_s22  ;;  %v3802_v51 = vld [vmem:[#allocation2 + $0x199] sm:$0xff] }
 0x55c   : > { %3874 = vrot.lane.b32.xlu2 %v3791_v30, %s6902_s22  ;;  %3876 = vrot.lane.b32.xlu0 %v3792_v46, %s6902_s22  ;;  %v11313_v46 = vld [vmem:[#allocation10_spill] sm:$0xff] }
 0x55d   : > { %v3197_v43 = vpop.permute.xlu1 %3196 }
 0x55e   : > { %v2823_v45 = vpop.permute.xlu2 %2822  ;;  %3292 = vst.msk [vmem:[#allocation3] sm:$0xff] %vm1311_vm5, %v3197_v43  ;;  %v2819_v39 = vpop.permute.xlu0 %2818 }
 0x55f   : > { %2911 = vst.msk [vmem:[#allocation3 + $0x48] sm:$0xff] %vm925_vm3, %v2819_v39 }
 0x560   : > { %3103 = vst.msk [vmem:[#allocation3 + $0x48] sm:$0xff] %vm1118_vm4, %v3011_v2 }
 0x561   : > { %2913 = vst.msk [vmem:[#allocation3 + $0x78] sm:$0xff] %vm925_vm3, %v2823_v45 }
 0x562   : > { %6730 = vmatmul.msk.f32.gmra.mxu1 %vm332_vm1, %v4117_v27 }
 0x563   : > { %3872 = vrot.lane.b32.xlu1 %v3790_v28, %s6902_s22 }
 0x564   : > { %3880 = vrot.lane.b32.xlu2 %v3794_v20, %s6902_s22  ;;  %3882 = vrot.lane.b32.xlu0 %v3795_v9, %s6902_s22  ;;  %v11314_v9 = vld [vmem:[#allocation8_spill] sm:$0xff] }
 0x565   : > { %v3009_v24 = vpop.permute.xlu1 %3008  ;;  %v4028_v47 = vld [vmem:[#allocation3] sm:$0xff] }
 0x566   : > { %v3457_v41 = vpop.permute.xlu2 %3456  ;;  %3102 = vst.msk [vmem:[#allocation3 + $0x30] sm:$0xff] %vm1118_vm4, %v3009_v24  ;;  %v3453_v38 = vpop.permute.xlu0 %3452  ;;  %4276 = vmatmul.f32.vlgmr.msrb.gmra.mxu0 %v4028_v47  ;;  %v3803_v24 = vld [vmem:[#allocation2 + $0x1a1] sm:$0xff] }
 0x567   : > { %3548 = vst.msk [vmem:[#allocation3 + $0x8] sm:$0xff] %vm925_vm3, %v3453_v38 }
 0x568   : > { %3740 = vst.msk [vmem:[#allocation3 + $0x8] sm:$0xff] %vm1118_vm4, %v3645_v8  ;;  %v11312_v8 = vld [vmem:[#allocation9_spill] sm:$0xff] }
 0x569   : > { %3550 = vst.msk [vmem:[#allocation3 + $0x38] sm:$0xff] %vm925_vm3, %v3457_v41 }
 0x56b   : > { %3878 = vrot.lane.b32.xlu1 %v3793_v57, %s6902_s22 }
 0x56c   : > { %3886 = vrot.lane.b32.xlu2 %v3797_v52, %s6902_s22  ;;  %3888 = vrot.lane.b32.xlu0 %v8764_v15, %s6902_s22 }
 0x56d   : > { %v3455_v60 = vpop.permute.xlu1 %3454 }
 0x56e   : > { %v3839_v7 = vpop.permute.xlu2 %3838  ;;  %3549 = vst.msk [vmem:[#allocation3 + $0x20] sm:$0xff] %vm925_vm3, %v3455_v60  ;;  %v3201_v63 = vpop.permute.xlu0 %3200  ;;  %4279 = vmatmul.f32.gmra.mxu0 %v4031_v10 }
 0x56f   : > { %3294 = vst.msk [vmem:[#allocation3 + $0x30] sm:$0xff] %vm1311_vm5, %v3201_v63 }
 0x573   : > { %3884 = vrot.lane.b32.xlu1 %v3796_v25, %s6902_s22 }
 0x574   : > { %3892 = vrot.lane.b32.xlu2 %v8820_v31, %s6902_s22  ;;  %3894 = vrot.lane.b32.xlu0 %v8855_v62, %s6902_s22 }
 0x575   : > { %v2821_v15 = vpop.permute.xlu1 %2820 }
 0x576   : > { %v3205_v49 = vpop.permute.xlu2 %3204  ;;  %v3013_v42 = vpop.permute.xlu0 %3012  ;;  %2912 = vst.msk [vmem:[#allocation3 + $0x60] sm:$0xff] %vm925_vm3, %v2821_v15  ;;  %v4034_v18 = vld [vmem:[#allocation3 + $0x30] sm:$0xff]  ;;  %v4055_v15 = vld [vmem:[#allocation3 + $0xd8] sm:$0xff] }
 0x577   : > { %3104 = vst.msk [vmem:[#allocation3 + $0x60] sm:$0xff] %vm1118_vm4, %v3013_v42  ;;  %4282 = vmatmul.f32.gmra.mxu0 %v4034_v18  ;;  %v4050_v42 = vld [vmem:[#allocation3 + $0xb0] sm:$0xff]  ;;  %v4664_v18 = vld [vmem:[#allocation2 + $0x8] sm:$0xff] }
 0x578   : > { %3296 = vst.msk [vmem:[#allocation3 + $0x60] sm:$0xff] %vm1311_vm5, %v3205_v49 }
 0x57b   : > { %3890 = vrot.lane.b32.xlu1 %v8789_v56, %s6902_s22 }
 0x57c   : > { %3898 = vrot.lane.b32.xlu2 %v3803_v24, %s6902_s22 }
 0x57d   : > { %v3837_v32 = vpop.permute.xlu1 %3836 }
 0x57e   : > { %v3017_v31 = vpop.permute.xlu2 %3016  ;;  %v3459_v35 = vpop.permute.xlu0 %3458  ;;  %3932 = vst.msk [vmem:[#allocation3 + $0x8] sm:$0xff] %vm1311_vm5, %v3837_v32 }
 0x57f   : > { %3551 = vst.msk [vmem:[#allocation3 + $0x50] sm:$0xff] %vm925_vm3, %v3459_v35  ;;  %v4040_v5 = vld [vmem:[#allocation3 + $0x60] sm:$0xff] }
 0x583   : > { %3896 = vrot.lane.b32.xlu1 %v3802_v51, %s6902_s22  ;;  %s6565_s22 = sshll.u32 %s326_s27, 4  ;;  %s6566_s22 = int_to_ptr.vmem [resolvable:$true] %s6565_s22 }
 0x585   : > { %v3015_v0 = vpop.permute.xlu1 %3014  ;;  %v4029_v33 = vld [vmem:[#allocation3 + $0x8] sm:$0xff] }
 0x586   : > { %v3463_v62 = vpop.permute.xlu2 %3462  ;;  %v3647_v37 = vpop.permute.xlu0 %3646  ;;  %4389 = vmatmul.f32.vlgmr.msrb.gmra.mxu3 %v4029_v33  ;;  %3105 = vst.msk [vmem:[#allocation3 + $0x78] sm:$0xff] %vm1118_vm4, %v3015_v0  ;;  %v4058_v33 = vld [vmem:[#allocation3 + $0xf0] sm:$0xff] }
 0x587   : > { %3553 = vst.msk [vmem:[#allocation3 + $0x80] sm:$0xff] %vm925_vm3, %v3463_v62 }
 0x588   : > { %3741 = vst.msk [vmem:[#allocation3 + $0x20] sm:$0xff] %vm1118_vm4, %v3647_v37  ;;  %v4053_v37 = vld [vmem:[#allocation3 + $0xc8] sm:$0xff] }
 0x589   : > { %3933 = vst.msk [vmem:[#allocation3 + $0x20] sm:$0xff] %vm1311_vm5, %v3839_v7 }
 0x58d   : > { %v3203_v13 = vpop.permute.xlu1 %3202 }
 0x58e   : > { %v3651_v56 = vpop.permute.xlu2 %3650  ;;  %v2825_v1 = vpop.permute.xlu0 %2824  ;;  %3295 = vst.msk [vmem:[#allocation3 + $0x48] sm:$0xff] %vm1311_vm5, %v3203_v13  ;;  %v4061_v13 = vld [vmem:[#allocation3 + $0x108] sm:$0xff] }
 0x58f   : > { %3743 = vst.msk [vmem:[#allocation3 + $0x50] sm:$0xff] %vm1118_vm4, %v3651_v56 }
 0x590   : > { %2914 = vst.msk [vmem:[#allocation3 + $0x90] sm:$0xff] %vm925_vm3, %v2825_v1  ;;  %v4032_v54 = vld [vmem:[#allocation3 + $0x20] sm:$0xff] }
 0x591   : > { %3106 = vst.msk [vmem:[#allocation3 + $0x90] sm:$0xff] %vm1118_vm4, %v3017_v31  ;;  %4392 = vmatmul.f32.gmra.mxu3 %v4032_v54  ;;  %v9489_v31 = vld [vmem:[%s11304_s7] ss:$0 sm:$0xff]  ;;  %v4056_v1 = vld [vmem:[#allocation3 + $0xe0] sm:$0xff] }
 0x592   : > { %v4698_v32 = vmul.f32 %v9489_v31, %v4664_v18  ;;  %v4663_v54 = vld [vmem:[#allocation2] sm:$0xff] }
 0x593   : > { %v9541_v18 = vld [vmem:[%s11304_s7 + $0x3] ss:$0 sm:$0xff] }
 0x594   : > { %v4732_v62 = vsel %vm332_vm1, %v4698_v32, 0.0 }
 0x595   : > { %v3649_v3 = vpop.permute.xlu1 %3648  ;;  %v4037_v2 = vld [vmem:[#allocation3 + $0x48] sm:$0xff] }
 0x596   : > { %v2829_v19 = vpop.permute.xlu2 %2828  ;;  %v3841_v4 = vpop.permute.xlu0 %3840  ;;  %3742 = vst.msk [vmem:[#allocation3 + $0x38] sm:$0xff] %vm1118_vm4, %v3649_v3  ;;  %4285 = vmatmul.f32.gmra.mxu0 %v4037_v2  ;;  %v9499_v3 = vld [vmem:[%s11304_s7 + $0x1] ss:$0 sm:$0xff] }
 0x597   : > { %2916 = vst.msk [vmem:[#allocation3 + $0xc0] sm:$0xff] %vm925_vm3, %v2829_v19  ;;  %v4857_v19 = vld [vmem:[#allocation2 + $0x1] sm:$0xff] }
 0x598   : > { %3934 = vst.msk [vmem:[#allocation3 + $0x38] sm:$0xff] %vm1311_vm5, %v3841_v4  ;;  %v4697_v4 = vmul.f32 %v9489_v31, %v4663_v54  ;;  %v4891_v2 = vmul.f32 %v9499_v3, %v4857_v19 }
 0x59d   : > { %v2827_v6 = vpop.permute.xlu1 %2826 }
 0x59e   : > { %v3211_v17 = vpop.permute.xlu2 %3210  ;;  %v3019_v14 = vpop.permute.xlu0 %3018  ;;  %2915 = vst.msk [vmem:[#allocation3 + $0xa8] sm:$0xff] %vm925_vm3, %v2827_v6  ;;  %4288 = vmatmul.f32.gmra.mxu0 %v4040_v5  ;;  %v4923_v6 = vsel %vm332_vm1, %v4891_v2, 0.0  ;;  %v4858_v5 = vld [vmem:[#allocation2 + $0x9] sm:$0xff] }
 0x59f   : > { %3107 = vst.msk [vmem:[#allocation3 + $0xa8] sm:$0xff] %vm1118_vm4, %v3019_v14  ;;  %v4035_v50 = vld [vmem:[#allocation3 + $0x38] sm:$0xff]  ;;  %v4064_v14 = vld [vmem:[#allocation3 + $0x120] sm:$0xff] }
 0x5a0   : > { %3299 = vst.msk [vmem:[#allocation3 + $0xa8] sm:$0xff] %vm1311_vm5, %v3211_v17  ;;  %4395 = vmatmul.f32.gmra.mxu3 %v4035_v50  ;;  %v4729_v17 = vsel %vm332_vm1, %v4697_v4, 0.0  ;;  %v4059_v50 = vld [vmem:[#allocation3 + $0xf8] sm:$0xff] }
 0x5a1   : > { %4730 = vadd.xlane.f32.xlu0 %v4729_v17 }
 0x5a5   : > { %v3461_v26 = vpop.permute.xlu1 %3460 }
 0x5a6   : > { %v3845_v34 = vpop.permute.xlu2 %3844  ;;  %v3207_v59 = vpop.permute.xlu0 %3206  ;;  %3552 = vst.msk [vmem:[#allocation3 + $0x68] sm:$0xff] %vm925_vm3, %v3461_v26  ;;  %v9508_v26 = vld [vmem:[%s11304_s7 + $0x2] ss:$0 sm:$0xff] }
 0x5a7   : > { %3297 = vst.msk [vmem:[#allocation3 + $0x78] sm:$0xff] %vm1311_vm5, %v3207_v59  ;;  %v4049_v52 = vld [vmem:[#allocation3 + $0xa8] sm:$0xff]  ;;  %v4892_v59 = vmul.f32 %v9499_v3, %v4858_v5 }
 0x5ad   : > { %v3843_v55 = vpop.permute.xlu1 %3842  ;;  %4733 = vadd.xlane.f32.xlu1 %v4732_v62 }
 0x5ae   : > { %v3869_v16 = vpop.permute.xlu2 %3868  ;;  %v3465_v11 = vpop.permute.xlu0 %3464  ;;  %v4043_v48 = vld [vmem:[#allocation3 + $0x78] sm:$0xff]  ;;  %3935 = vst.msk [vmem:[#allocation3 + $0x50] sm:$0xff] %vm1311_vm5, %v3843_v55 }
 0x5af   : > { %3948 = vst.msk [vmem:[#allocation3 + $0x188] sm:$0xff] %vm1311_vm5, %v3869_v16  ;;  %4291 = vmatmul.f32.gmra.mxu0 %v4043_v48  ;;  %v5052_v16 = vld [vmem:[#allocation2 + $0xa] sm:$0xff]  ;;  %v4926_v48 = vsel %vm332_vm1, %v4892_v59, 0.0 }
 0x5b0   : > { %3554 = vst.msk [vmem:[#allocation3 + $0x98] sm:$0xff] %vm925_vm3, %v3465_v11  ;;  %v5086_v11 = vmul.f32 %v9508_v26, %v5052_v16  ;;  %4927 = vadd.xlane.f32.xlu2 %v4926_v48 }
 0x5b1   : > { %3746 = vst.msk [vmem:[#allocation3 + $0x98] sm:$0xff] %vm1118_vm4, %v8555_v23 }
 0x5b2   : > { %3938 = vst.msk [vmem:[#allocation3 + $0x98] sm:$0xff] %vm1311_vm5, %v11312_v8 }
 0x5b5   : > { %v3021_v58 = vpop.permute.xlu1 %3020  ;;  %v4038_v30 = vld [vmem:[#allocation3 + $0x50] sm:$0xff]  ;;  %4924 = vadd.xlane.f32.xlu1 %v4923_v6 }
 0x5b6   : > { %v3875_v40 = vpop.permute.xlu2 %3874  ;;  %v3653_v22 = vpop.permute.xlu0 %3652  ;;  %3108 = vst.msk [vmem:[#allocation3 + $0xc0] sm:$0xff] %vm1118_vm4, %v3021_v58  ;;  %4398 = vmatmul.f32.gmra.mxu3 %v4038_v30  ;;  %v4067_v58 = vld [vmem:[#allocation3 + $0x138] sm:$0xff]  ;;  %v9519_v30 = vld [vmem:[%s11303_s6] ss:$0 sm:$0xff]  ;;  %v4077_v59 = vld [vmem:[#allocation3 + $0x188] sm:$0xff] }
 0x5b7   : > { %3951 = vst.msk [vmem:[#allocation3 + $0x1d0] sm:$0xff] %vm1311_vm5, %v3875_v40  ;;  %v5120_v40 = vsel %vm332_vm1, %v5086_v11, 0.0 }
 0x5b8   : > { %3744 = vst.msk [vmem:[#allocation3 + $0x68] sm:$0xff] %vm1118_vm4, %v3653_v22  ;;  %v4062_v22 = vld [vmem:[#allocation3 + $0x110] sm:$0xff] }
 0x5b9   : > { %3936 = vst.msk [vmem:[#allocation3 + $0x68] sm:$0xff] %vm1311_vm5, %v3845_v34  ;;  %v4047_v63 = vld [vmem:[#allocation3 + $0x98] sm:$0xff] }
 0x5ba   : > { %3300 = vst.msk [vmem:[#allocation3 + $0xc0] sm:$0xff] %vm1311_vm5, %v11313_v46  ;;  %v5051_v34 = vld [vmem:[#allocation2 + $0x2] sm:$0xff] }
 0x5bb   : > { %v5085_v55 = vmul.f32 %v9508_v26, %v5051_v34  ;;  %v4070_v46 = vld [vmem:[#allocation3 + $0x150] sm:$0xff] }
 0x5bd   : > { %v3209_v43 = vpop.permute.xlu1 %3208  ;;  %v5117_v8 = vsel %vm332_vm1, %v5085_v55, 0.0  ;;  %5121 = vadd.xlane.f32.xlu1 %v5120_v40  ;;  %v9556_v40 = vpop.f32.mrf.mxu1 }
 0x5be   : > { %v3881_v23 = vpop.permute.xlu2 %3880  ;;  %v3865_v45 = vpop.permute.xlu0 %3864  ;;  %3298 = vst.msk [vmem:[#allocation3 + $0x90] sm:$0xff] %vm1311_vm5, %v3209_v43  ;;  %5118 = vadd.xlane.f32.xlu0 %v5117_v8  ;;  %v4065_v43 = vld [vmem:[#allocation3 + $0x128] sm:$0xff] }
 0x5bf   : > { %3954 = vst.msk [vmem:[#allocation3 + $0x218] sm:$0xff] %vm1311_vm5, %v3881_v23 }
 0x5c0   : > { %3946 = vst.msk [vmem:[#allocation3 + $0x158] sm:$0xff] %vm1311_vm5, %v3865_v45  ;;  %v4041_v39 = vld [vmem:[#allocation3 + $0x68] sm:$0xff] }
 0x5c1   : > { %4401 = vmatmul.f32.gmra.mxu3 %v4041_v39  ;;  %v4052_v10 = vld [vmem:[#allocation3 + $0xc0] sm:$0xff] }
 0x5c5   : > { %v3655_v27 = vpop.permute.xlu1 %3654  ;;  %v4046_v28 = vld [vmem:[#allocation3 + $0x90] sm:$0xff] }
 0x5c6   : > { %v3887_v36 = vpop.permute.xlu2 %3886  ;;  %v3871_v20 = vpop.permute.xlu0 %3870  ;;  %3745 = vst.msk [vmem:[#allocation3 + $0x80] sm:$0xff] %vm1118_vm4, %v3655_v27  ;;  %4294 = vmatmul.f32.gmra.mxu0 %v4046_v28  ;;  %v4073_v28 = vld [vmem:[#allocation3 + $0x168] sm:$0xff] }
 0x5c7   : > { %3957 = vst.msk [vmem:[#allocation3 + $0x260] sm:$0xff] %vm1311_vm5, %v3887_v36 }
 0x5c8   : > { %3949 = vst.msk [vmem:[#allocation3 + $0x1a0] sm:$0xff] %vm1311_vm5, %v3871_v20 }
 0x5c9   : > { %3937 = vst.msk [vmem:[#allocation3 + $0x80] sm:$0xff] %vm1311_vm5, %v11314_v9  ;;  %v4068_v9 = vld [vmem:[#allocation3 + $0x140] sm:$0xff] }
 0x5cd   : > { %v3867_v47 = vpop.permute.xlu1 %3866 }
 0x5ce   : > { %v3893_v41 = vpop.permute.xlu2 %3892  ;;  %v3877_v38 = vpop.permute.xlu0 %3876  ;;  %3947 = vst.msk [vmem:[#allocation3 + $0x170] sm:$0xff] %vm1311_vm5, %v3867_v47  ;;  %4297 = vmatmul.f32.gmra.mxu0 %v4049_v52 }
 0x5cf   : > { %3960 = vst.msk [vmem:[#allocation3 + $0x2a8] sm:$0xff] %vm1311_vm5, %v3893_v41 }
 0x5d0   : > { %3952 = vst.msk [vmem:[#allocation3 + $0x1e8] sm:$0xff] %vm1311_vm5, %v3877_v38  ;;  %v4044_v57 = vld [vmem:[#allocation3 + $0x80] sm:$0xff]  ;;  %v9528_v38 = vld [vmem:[%s11304_s7 + $0x4] ss:$0 sm:$0xff] }
 0x5d1   : > { %4404 = vmatmul.f32.gmra.mxu3 %v4044_v57 }
 0x5d5   : > { %v3873_v60 = vpop.permute.xlu1 %3872 }
 0x5d6   : > { %v3883_v7 = vpop.permute.xlu0 %3882  ;;  %3950 = vst.msk [vmem:[#allocation3 + $0x1b8] sm:$0xff] %vm1311_vm5, %v3873_v60  ;;  %4300 = vmatmul.f32.gmra.mxu0 %v4052_v10  ;;  %v4071_v10 = vld [vmem:[#allocation3 + $0x158] sm:$0xff] }
 0x5d7   : > { %3955 = vst.msk [vmem:[#allocation3 + $0x230] sm:$0xff] %vm1311_vm5, %v3883_v7 }
 0x5d9   : > { %4407 = vmatmul.f32.gmra.mxu3 %v4047_v63 }
 0x5dd   : > { %v3879_v25 = vpop.permute.xlu1 %3878 }
 0x5de   : > { %v3889_v49 = vpop.permute.xlu0 %3888  ;;  %3953 = vst.msk [vmem:[#allocation3 + $0x200] sm:$0xff] %vm1311_vm5, %v3879_v25  ;;  %4303 = vmatmul.f32.gmra.mxu0 %v4055_v15 }
 0x5df   : > { %3958 = vst.msk [vmem:[#allocation3 + $0x278] sm:$0xff] %vm1311_vm5, %v3889_v49 }
 0x5e1   : > { %4410 = vmatmul.f32.gmra.mxu3 %v4050_v42 }
 0x5e3   : > { %v4277_v51 = vpop.f32.mrf.mxu0 }
 0x5e4   : > { %v4278_v23 = vadd.f32 %v9519_v30, %v4277_v51  ;;  %v3899_v51 = vpop.permute.xlu2 %3898 }
 0x5e5   : > { %v3885_v35 = vpop.permute.xlu1 %3884  ;;  %3963 = vst.msk [vmem:[#allocation3 + $0x2f0] sm:$0xff] %vm1311_vm5, %v3899_v51 }
 0x5e6   : > { %v3895_v0 = vpop.permute.xlu0 %3894  ;;  %3956 = vst.msk [vmem:[#allocation3 + $0x248] sm:$0xff] %vm1311_vm5, %v3885_v35  ;;  %4306 = vmatmul.f32.gmra.mxu0 %v4058_v33  ;;  %v4079_v35 = vld [vmem:[#allocation3 + $0x198] sm:$0xff] }
 0x5e7   : > { %3961 = vst.msk [vmem:[#allocation3 + $0x2c0] sm:$0xff] %vm1311_vm5, %v3895_v0  ;;  %v4074_v0 = vld [vmem:[#allocation3 + $0x170] sm:$0xff] }
 0x5e9   : > { %4413 = vmatmul.f32.gmra.mxu3 %v4053_v37 }
 0x5eb   : > { %v4280_v20 = vpop.f32.mrf.mxu0 }
 0x5ec   : > { %v4281_v24 = vadd.f32 %v9519_v30, %v4280_v20 }
 0x5ed   : > { %v3891_v56 = vpop.permute.xlu1 %3890 }
 0x5ee   : > { %3959 = vst.msk [vmem:[#allocation3 + $0x290] sm:$0xff] %vm1311_vm5, %v3891_v56  ;;  %4309 = vmatmul.f32.gmra.mxu0 %v4061_v13 }
 0x5f1   : > { %4416 = vmatmul.f32.gmra.mxu3 %v4056_v1 }
 0x5f4   : > { %v4283_v32 = vpop.f32.mrf.mxu0 }
 0x5f5   : > { %v4284_v56 = vadd.f32 %v9519_v30, %v4283_v32 }
 0x5f6   : > { %4312 = vmatmul.f32.gmra.mxu0 %v4064_v14 }
 0x5f9   : > { %4419 = vmatmul.f32.gmra.mxu3 %v4059_v50  ;;  %v4082_v50 = vld [vmem:[#allocation3 + $0x1b0] sm:$0xff] }
 0x5fe   : > { %4315 = vmatmul.f32.gmra.mxu0 %v4067_v58 }
 0x601   : > { %4422 = vmatmul.f32.gmra.mxu3 %v4062_v22  ;;  %v4080_v22 = vld [vmem:[#allocation3 + $0x1a0] sm:$0xff] }
 0x606   : > { %4318 = vmatmul.f32.gmra.mxu0 %v4070_v46 }
 0x609   : > { %4425 = vmatmul.f32.gmra.mxu3 %v4065_v43  ;;  %v4390_v45 = vpop.f32.mrf.mxu3 }
 0x60a   : > { %v4391_v39 = vadd.f32 %v4390_v45, %v4278_v23 }
 0x60c   : > { %v4504_v36 = vadd.f32 %v9313_v61, %v4391_v39  ;;  %v4076_v61 = vld [vmem:[#allocation3 + $0x180] sm:$0xff] }
 0x60e   : > { %v4599_v27 = vmax.f32 %v4504_v36, 0.0  ;;  %4321 = vmatmul.f32.gmra.mxu0 %v4073_v28  ;;  %v9565_v28 = vpop.f32.mrf.mxu1 }
 0x610   : > { %4631 = vst.msk [vmem:[#allocation2 + $0x19] sm:$0xff] %vm332_vm1, %v4599_v27 }
 0x611   : > { %4428 = vmatmul.f32.gmra.mxu3 %v4068_v9  ;;  %v4088_v9 = vld [vmem:[#allocation3 + $0x1e0] sm:$0xff] }
 0x613   : > { %v4286_v55 = vpop.f32.mrf.mxu0 }
 0x614   : > { %v4393_v41 = vpop.f32.mrf.mxu3 }
 0x615   : > { %v4394_v47 = vadd.f32 %v4393_v41, %v4281_v24  ;;  %v4083_v41 = vld [vmem:[#allocation3 + $0x1b8] sm:$0xff] }
 0x616   : > { %4324 = vmatmul.f32.gmra.mxu0 %v4076_v61  ;;  %v4287_v61 = vadd.f32 %v9519_v30, %v4286_v55  ;;  %v4092_v55 = vld [vmem:[#allocation3 + $0x200] sm:$0xff] }
 0x617   : > { %v4507_v52 = vadd.f32 %v9332_v44, %v4394_v47  ;;  %v5439_v57 = vld [vmem:[#allocation2 + $0x19] sm:$0xff] }
 0x618   : > { %v4665_v60 = vld [vmem:[#allocation2 + $0x18] sm:$0xff]  ;;  %v5473_v63 = vmul.f32 %v9528_v38, %v5439_v57  ;;  %v4893_v25 = vmul.f32 %v9499_v3, %v5439_v57 }
 0x619   : > { %v4600_v7 = vmax.f32 %v4507_v52, 0.0  ;;  %v4699_v49 = vmul.f32 %v9489_v31, %v4665_v60  ;;  %4431 = vmatmul.f32.gmra.mxu3 %v4071_v10  ;;  %v5279_v62 = vmul.f32 %v9541_v18, %v4665_v60 }
 0x61a   : > { %v5505_v15 = vsel %vm332_vm1, %v5473_v63, 0.0  ;;  %v4929_v42 = vsel %vm332_vm1, %v4893_v25, 0.0  ;;  %v4091_v63 = vld [vmem:[#allocation3 + $0x1f8] sm:$0xff] }
 0x61b   : > { %4632 = vst.msk [vmem:[#allocation2 + $0x21] sm:$0xff] %vm332_vm1, %v4600_v7  ;;  %v4735_v44 = vsel %vm332_vm1, %v4699_v49, 0.0  ;;  %5506 = vadd.xlane.f32.xlu1 %v5505_v15  ;;  %4930 = vadd.xlane.f32.xlu0 %v4929_v42  ;;  %v5311_v19 = vsel %vm332_vm1, %v5279_v62, 0.0  ;;  %v4289_v27 = vpop.f32.mrf.mxu0  ;;  %v4086_v15 = vld [vmem:[#allocation3 + $0x1d0] sm:$0xff]  ;;  %v9574_v42 = vpop.f32.mrf.mxu1 }
 0x61c   : > { %4736 = vadd.xlane.f32.xlu2 %v4735_v44 }
 0x61e   : > { %4327 = vmatmul.f32.gmra.mxu0 %v4079_v35  ;;  %v4290_v35 = vadd.f32 %v9519_v30, %v4289_v27  ;;  %v4100_v27 = vld [vmem:[#allocation3 + $0x240] sm:$0xff] }
 0x621   : > { %4434 = vmatmul.f32.gmra.mxu3 %v4074_v0 }
 0x622   : > { %v4860_v33 = vld [vmem:[#allocation2 + $0x21] sm:$0xff] }
 0x623   : > { %v5054_v37 = vld [vmem:[#allocation2 + $0x22] sm:$0xff]  ;;  %v4894_v13 = vmul.f32 %v9499_v3, %v4860_v33  ;;  %v4396_v54 = vpop.f32.mrf.mxu3  ;;  %v5053_v8 = vld [vmem:[#allocation2 + $0x1a] sm:$0xff]  ;;  %v5474_v24 = vmul.f32 %v9528_v38, %v4860_v33 }
 0x624   : > { %v5088_v1 = vmul.f32 %v9508_v26, %v5054_v37  ;;  %v4397_v4 = vadd.f32 %v4396_v54, %v4284_v56  ;;  %5312 = vadd.xlane.f32.xlu2 %v5311_v19  ;;  %v4666_v6 = vld [vmem:[#allocation2 + $0x20] sm:$0xff]  ;;  %v5087_v58 = vmul.f32 %v9508_v26, %v5053_v8 }
 0x625   : > { %v4932_v2 = vsel %vm332_vm1, %v4894_v13, 0.0  ;;  %v4700_v5 = vmul.f32 %v9489_v31, %v4666_v6  ;;  %v5280_v16 = vmul.f32 %v9541_v18, %v4666_v6  ;;  %v5508_v52 = vsel %vm332_vm1, %v5474_v24, 0.0  ;;  %v4094_v37 = vld [vmem:[#allocation3 + $0x210] sm:$0xff] }
 0x626   : > { %v5126_v17 = vsel %vm332_vm1, %v5088_v1, 0.0  ;;  %4933 = vadd.xlane.f32.xlu1 %v4932_v2  ;;  %v4510_v14 = vadd.f32 %v9362_v29, %v4397_v4  ;;  %4330 = vmatmul.f32.gmra.mxu0 %v4082_v50  ;;  %v4085_v29 = vld [vmem:[#allocation3 + $0x1c8] sm:$0xff]  ;;  %v5123_v45 = vsel %vm332_vm1, %v5087_v58, 0.0  ;;  %v9580_v1 = vpop.f32.mrf.mxu1  ;;  %v3897_v2 = vpop.permute.xlu1 %3896 }
 0x627   : > { %5127 = vadd.xlane.f32.xlu0 %v5126_v17  ;;  %v4738_v11 = vsel %vm332_vm1, %v4700_v5, 0.0  ;;  %v5314_v48 = vsel %vm332_vm1, %v5280_v16, 0.0  ;;  %3962 = vst.msk [vmem:[#allocation3 + $0x2d8] sm:$0xff] %vm1311_vm5, %v3897_v2 }
 0x628   : > { %v4601_v34 = vmax.f32 %v4510_v14, 0.0 }
 0x629   : > { %4437 = vmatmul.f32.gmra.mxu3 %v4077_v59  ;;  %v4097_v59 = vld [vmem:[#allocation3 + $0x228] sm:$0xff] }
 0x62a   : > { %4633 = vst.msk [vmem:[#allocation2 + $0x31] sm:$0xff] %vm332_vm1, %v4601_v34 }
 0x62c   : > { %4739 = vadd.xlane.f32.xlu2 %v4738_v11  ;;  %v4292_v60 = vpop.f32.mrf.mxu0 }
 0x62d   : > { %v4293_v8 = vadd.f32 %v9519_v30, %v4292_v60 }
 0x62e   : > { %4333 = vmatmul.f32.gmra.mxu0 %v4085_v29  ;;  %v9594_v51 = vpop.f32.mrf.mxu1 }
 0x62f   : > { %5315 = vadd.xlane.f32.xlu0 %v5314_v48 }
 0x631   : > { %4440 = vmatmul.f32.gmra.mxu3 %v4080_v22  ;;  %v5247_v46 = vld [vmem:[#allocation2 + $0x30] sm:$0xff] }
 0x632   : > { %v5281_v23 = vmul.f32 %v9541_v18, %v5247_v46  ;;  %v4701_v43 = vmul.f32 %v9489_v31, %v5247_v46  ;;  %v5441_v20 = vld [vmem:[#allocation2 + $0x31] sm:$0xff] }
 0x633   : > { %v5475_v47 = vmul.f32 %v9528_v38, %v5441_v20  ;;  %v4895_v25 = vmul.f32 %v9499_v3, %v5441_v20  ;;  %v4095_v20 = vld [vmem:[#allocation3 + $0x218] sm:$0xff] }
 0x634   : > { %5124 = vadd.xlane.f32.xlu2 %v5123_v45  ;;  %v5317_v39 = vsel %vm332_vm1, %v5281_v23, 0.0  ;;  %v4741_v36 = vsel %vm332_vm1, %v4701_v43, 0.0 }
 0x635   : > { %5318 = vadd.xlane.f32.xlu1 %v5317_v39  ;;  %v5511_v57 = vsel %vm332_vm1, %v5475_v47, 0.0  ;;  %v4935_v32 = vsel %vm332_vm1, %v4895_v25, 0.0 }
 0x636   : > { %4336 = vmatmul.f32.gmra.mxu0 %v4088_v9 }
 0x637   : > { %4742 = vadd.xlane.f32.xlu0 %v4741_v36 }
 0x639   : > { %4443 = vmatmul.f32.gmra.mxu3 %v4083_v41  ;;  %v4399_v7 = vpop.f32.mrf.mxu3 }
 0x63a   : > { %v4400_v10 = vadd.f32 %v4399_v7, %v4287_v61  ;;  %v9608_v7 = vpop.f32.mrf.mxu1 }
 0x63c   : > { %5509 = vadd.xlane.f32.xlu2 %v5508_v52  ;;  %v4513_v49 = vadd.f32 %v9380_v53, %v4400_v10  ;;  %v4089_v53 = vld [vmem:[#allocation3 + $0x1e8] sm:$0xff] }
 0x63e   : > { %4339 = vmatmul.f32.gmra.mxu0 %v4091_v63  ;;  %v4602_v44 = vmax.f32 %v4513_v49, 0.0  ;;  %v4103_v63 = vld [vmem:[#allocation3 + $0x258] sm:$0xff]  ;;  %v4098_v49 = vld [vmem:[#allocation3 + $0x230] sm:$0xff] }
 0x63f   : > { %5512 = vadd.xlane.f32.xlu0 %v5511_v57 }
 0x640   : > { %4634 = vst.msk [vmem:[#allocation2 + $0x39] sm:$0xff] %vm332_vm1, %v4602_v44 }
 0x641   : > { %4446 = vmatmul.f32.gmra.mxu3 %v4086_v15 }
 0x643   : > { %v4295_v0 = vpop.f32.mrf.mxu0 }
 0x644   : > { %4936 = vadd.xlane.f32.xlu2 %v4935_v32  ;;  %v4402_v62 = vpop.f32.mrf.mxu3  ;;  %v4296_v47 = vadd.f32 %v9519_v30, %v4295_v0 }
 0x645   : > { %v4403_v33 = vadd.f32 %v4402_v62, %v4290_v35 }
 0x646   : > { %4342 = vmatmul.f32.gmra.mxu0 %v4094_v37 }
 0x647   : > { %v4516_v56 = vadd.f32 %v9394_v21, %v4403_v33  ;;  %v5056_v54 = vld [vmem:[#allocation2 + $0x3a] sm:$0xff]  ;;  %v5055_v16 = vld [vmem:[#allocation2 + $0x32] sm:$0xff] }
 0x648   : > { %v4668_v19 = vld [vmem:[#allocation2 + $0x38] sm:$0xff]  ;;  %v5090_v17 = vmul.f32 %v9508_v26, %v5056_v54  ;;  %v5089_v48 = vmul.f32 %v9508_v26, %v5055_v16 }
 0x649   : > { %4449 = vmatmul.f32.gmra.mxu3 %v4089_v53  ;;  %v4603_v13 = vmax.f32 %v4516_v56, 0.0  ;;  %v4862_v4 = vld [vmem:[#allocation2 + $0x39] sm:$0xff]  ;;  %v4702_v6 = vmul.f32 %v9489_v31, %v4668_v19  ;;  %v5282_v11 = vmul.f32 %v9541_v18, %v4668_v19 }
 0x64a   : > { %v4896_v14 = vmul.f32 %v9499_v3, %v4862_v4  ;;  %v5132_v21 = vsel %vm332_vm1, %v5090_v17, 0.0  ;;  %v5129_v45 = vsel %vm332_vm1, %v5089_v48, 0.0  ;;  %v5476_v24 = vmul.f32 %v9528_v38, %v4862_v4  ;;  %v4106_v4 = vld [vmem:[#allocation3 + $0x270] sm:$0xff] }
 0x64b   : > { %4635 = vst.msk [vmem:[#allocation2 + $0x49] sm:$0xff] %vm332_vm1, %v4603_v13  ;;  %v4298_v50 = vpop.f32.mrf.mxu0  ;;  %v4744_v5 = vsel %vm332_vm1, %v4702_v6, 0.0  ;;  %v5320_v43 = vsel %vm332_vm1, %v5282_v11, 0.0  ;;  %v4101_v6 = vld [vmem:[#allocation3 + $0x248] sm:$0xff] }
 0x64c   : > { %v4938_v34 = vsel %vm332_vm1, %v4896_v14, 0.0  ;;  %5133 = vadd.xlane.f32.xlu2 %v5132_v21  ;;  %4745 = vadd.xlane.f32.xlu1 %v4744_v5  ;;  %v4299_v62 = vadd.f32 %v9519_v30, %v4298_v50  ;;  %v9622_v14 = vpop.f32.mrf.mxu1 }
 0x64d   : > { %4939 = vadd.xlane.f32.xlu0 %v4938_v34 }
 0x64e   : > { %4345 = vmatmul.f32.gmra.mxu0 %v4097_v59 }
 0x651   : > { %4452 = vmatmul.f32.gmra.mxu3 %v4092_v55 }
 0x652   : > { %v5249_v29 = vld [vmem:[#allocation2 + $0x48] sm:$0xff] }
 0x653   : > { %v5283_v22 = vmul.f32 %v9541_v18, %v5249_v29  ;;  %v4301_v23 = vpop.f32.mrf.mxu0  ;;  %v4703_v41 = vmul.f32 %v9489_v31, %v5249_v29  ;;  %v4863_v25 = vld [vmem:[#allocation2 + $0x49] sm:$0xff] }
 0x654   : > { %v4405_v58 = vpop.f32.mrf.mxu3  ;;  %5321 = vadd.xlane.f32.xlu2 %v5320_v43  ;;  %5130 = vadd.xlane.f32.xlu1 %v5129_v45  ;;  %v4897_v44 = vmul.f32 %v9499_v3, %v4863_v25  ;;  %v5477_v32 = vmul.f32 %v9528_v38, %v4863_v25  ;;  %v4302_v59 = vadd.f32 %v9519_v30, %v4301_v23 }
 0x655   : > { %v4406_v46 = vadd.f32 %v4405_v58, %v4293_v8  ;;  %v5323_v39 = vsel %vm332_vm1, %v5283_v22, 0.0  ;;  %v4747_v60 = vsel %vm332_vm1, %v4703_v41, 0.0  ;;  %v4109_v58 = vld [vmem:[#allocation3 + $0x288] sm:$0xff] }
 0x656   : > { %5324 = vadd.xlane.f32.xlu0 %v5323_v39  ;;  %4348 = vmatmul.f32.gmra.mxu0 %v4100_v27  ;;  %v4941_v53 = vsel %vm332_vm1, %v4897_v44, 0.0  ;;  %v5517_v13 = vsel %vm332_vm1, %v5477_v32, 0.0 }
 0x657   : > { %v4519_v36 = vadd.f32 %v9412_v12, %v4406_v46  ;;  %v5514_v12 = vsel %vm332_vm1, %v5476_v24, 0.0  ;;  %v4104_v46 = vld [vmem:[#allocation3 + $0x260] sm:$0xff] }
 0x659   : > { %v4604_v9 = vmax.f32 %v4519_v36, 0.0  ;;  %4455 = vmatmul.f32.gmra.mxu3 %v4095_v20  ;;  %v9638_v36 = vpop.f32.mrf.mxu1 }
 0x65b   : > { %4636 = vst.msk [vmem:[#allocation2 + $0x51] sm:$0xff] %vm332_vm1, %v4604_v9  ;;  %v9604_v57 = vpop.f32.mrf.mxu0 }
 0x65c   : > { %v4408_v52 = vpop.f32.mrf.mxu3  ;;  %5515 = vadd.xlane.f32.xlu1 %v5514_v12  ;;  %4748 = vadd.xlane.f32.xlu2 %v4747_v60  ;;  %v4305_v27 = vadd.f32 %v9519_v30, %v9604_v57  ;;  %v4112_v12 = vld [vmem:[#allocation3 + $0x2a0] sm:$0xff]  ;;  %v4107_v60 = vld [vmem:[#allocation3 + $0x278] sm:$0xff] }
 0x65d   : > { %v4409_v61 = vadd.f32 %v4408_v52, %v4296_v47 }
 0x65e   : > { %4351 = vmatmul.f32.gmra.mxu0 %v4103_v63 }
 0x65f   : > { %v4522_v10 = vadd.f32 %v9556_v40, %v4409_v61 }
 0x661   : > { %v4605_v15 = vmax.f32 %v4522_v10, 0.0  ;;  %4458 = vmatmul.f32.gmra.mxu3 %v4098_v49  ;;  %v9655_v44 = vpop.f32.mrf.mxu1 }
 0x662   : > { %v4670_v35 = vld [vmem:[#allocation2 + $0x50] sm:$0xff] }
 0x663   : > { %4637 = vst.msk [vmem:[#allocation2 + $0x61] sm:$0xff] %vm332_vm1, %v4605_v15  ;;  %v4704_v0 = vmul.f32 %v9489_v31, %v4670_v35  ;;  %v9616_v37 = vpop.f32.mrf.mxu0  ;;  %v5057_v54 = vld [vmem:[#allocation2 + $0x4a] sm:$0xff]  ;;  %v5058_v2 = vld [vmem:[#allocation2 + $0x52] sm:$0xff]  ;;  %v5284_v45 = vmul.f32 %v9541_v18, %v4670_v35 }
 0x664   : > { %v4411_v40 = vpop.f32.mrf.mxu3  ;;  %4942 = vadd.xlane.f32.xlu1 %v4941_v53  ;;  %5518 = vadd.xlane.f32.xlu2 %v5517_v13  ;;  %v4864_v17 = vld [vmem:[#allocation2 + $0x51] sm:$0xff]  ;;  %v5091_v21 = vmul.f32 %v9508_v26, %v5057_v54  ;;  %v5092_v5 = vmul.f32 %v9508_v26, %v5058_v2  ;;  %v4308_v15 = vadd.f32 %v9519_v30, %v9616_v37  ;;  %v4115_v37 = vld [vmem:[#allocation3 + $0x2b8] sm:$0xff]  ;;  %v4110_v13 = vld [vmem:[#allocation3 + $0x290] sm:$0xff] }
 0x665   : > { %v4412_v33 = vadd.f32 %v4411_v40, %v4299_v62  ;;  %v4750_v56 = vsel %vm332_vm1, %v4704_v0, 0.0  ;;  %v4898_v34 = vmul.f32 %v9499_v3, %v4864_v17  ;;  %v5478_v43 = vmul.f32 %v9528_v38, %v4864_v17 }
 0x666   : > { %4751 = vadd.xlane.f32.xlu0 %v4750_v56  ;;  %4354 = vmatmul.f32.gmra.mxu0 %v4106_v4  ;;  %v5135_v11 = vsel %vm332_vm1, %v5091_v21, 0.0  ;;  %v5138_v48 = vsel %vm332_vm1, %v5092_v5, 0.0  ;;  %v5326_v41 = vsel %vm332_vm1, %v5284_v45, 0.0 }
 0x667   : > { %v4525_v19 = vadd.f32 %v9565_v28, %v4412_v33  ;;  %v4944_v8 = vsel %vm332_vm1, %v4898_v34, 0.0  ;;  %v5520_v24 = vsel %vm332_vm1, %v5478_v43, 0.0 }
 0x669   : > { %v4606_v50 = vmax.f32 %v4525_v19, 0.0  ;;  %4461 = vmatmul.f32.gmra.mxu3 %v4101_v6  ;;  %v4120_v6 = vld [vmem:[#allocation3 + $0x2e0] sm:$0xff] }
 0x66a   : > { %v5251_v22 = vld [vmem:[#allocation2 + $0x60] sm:$0xff]  ;;  %6731 = vmatmul.msk.f32.gmra.mxu1 %vm332_vm1, %v4120_v6 }
 0x66b   : > { %4638 = vst.msk [vmem:[#allocation2 + $0x69] sm:$0xff] %vm332_vm1, %v4606_v50  ;;  %v9629_v55 = vpop.f32.mrf.mxu0  ;;  %v5285_v39 = vmul.f32 %v9541_v18, %v5251_v22  ;;  %v4865_v52 = vld [vmem:[#allocation2 + $0x61] sm:$0xff]  ;;  %v4705_v25 = vmul.f32 %v9489_v31, %v5251_v22 }
 0x66c   : > { %v4414_v28 = vpop.f32.mrf.mxu3  ;;  %5139 = vadd.xlane.f32.xlu1 %v5138_v48  ;;  %4945 = vadd.xlane.f32.xlu2 %v4944_v8  ;;  %v4899_v63 = vmul.f32 %v9499_v3, %v4865_v52  ;;  %v5479_v4 = vmul.f32 %v9528_v38, %v4865_v52  ;;  %v4311_v17 = vadd.f32 %v9519_v30, %v9629_v55  ;;  %v4123_v50 = vld [vmem:[#allocation3 + $0x2f8] sm:$0xff]  ;;  %v4118_v8 = vld [vmem:[#allocation3 + $0x2d0] sm:$0xff] }
 0x66d   : > { %v4415_v16 = vadd.f32 %v4414_v28, %v4302_v59  ;;  %v5329_v47 = vsel %vm332_vm1, %v5285_v39, 0.0  ;;  %v4753_v0 = vsel %vm332_vm1, %v4705_v25, 0.0  ;;  %6732 = vmatmul.msk.f32.vlgmr.msra.gmra.mxu2 %vm332_vm1, %v4123_v50  ;;  %v9676_v28 = vpop.xlane.xlu2 %4927 }
 0x66e   : > { %5136 = vadd.xlane.f32.xlu0 %v5135_v11  ;;  %4357 = vmatmul.f32.gmra.mxu0 %v4109_v58  ;;  %v4947_v62 = vsel %vm332_vm1, %v4899_v63, 0.0  ;;  %11315 = vst [vmem:[#allocation9_spill] sm:$0xff] %v9676_v28  ;;  %v9680_v11 = vpop.f32.mrf.mxu1  ;;  %v4113_v58 = vld [vmem:[#allocation3 + $0x2a8] sm:$0xff] }
 0x66f   : > { %v4528_v29 = vadd.f32 %v9574_v42, %v4415_v16  ;;  %v5523_v16 = vsel %vm332_vm1, %v5479_v4, 0.0 }
 0x671   : > { %v4607_v23 = vmax.f32 %v4528_v29, 0.0  ;;  %4464 = vmatmul.f32.gmra.mxu3 %v4104_v46 }
 0x672   : > { %v4672_v57 = vld [vmem:[#allocation2 + $0x68] sm:$0xff] }
 0x673   : > { %4639 = vst.msk [vmem:[#allocation2 + $0x79] sm:$0xff] %vm332_vm1, %v4607_v23  ;;  %v9643_v9 = vpop.f32.mrf.mxu0  ;;  %v4706_v49 = vmul.f32 %v9489_v31, %v4672_v57  ;;  %v5060_v33 = vld [vmem:[#allocation2 + $0x6a] sm:$0xff]  ;;  %v5059_v53 = vld [vmem:[#allocation2 + $0x62] sm:$0xff]  ;;  %v5286_v46 = vmul.f32 %v9541_v18, %v4672_v57  ;;  %v9684_v23 = vpop.xlane.xlu1 %4733 }
 0x674   : > { %v4417_v42 = vpop.f32.mrf.mxu3  ;;  %5327 = vadd.xlane.f32.xlu1 %v5326_v41  ;;  %5330 = vadd.xlane.f32.xlu2 %v5329_v47  ;;  %v5094_v19 = vmul.f32 %v9508_v26, %v5060_v33  ;;  %v5093_v2 = vmul.f32 %v9508_v26, %v5059_v53  ;;  %v4866_v29 = vld [vmem:[#allocation2 + $0x69] sm:$0xff]  ;;  %11316 = vst [vmem:[#allocation10_spill] sm:$0xff] %v9684_v23 }
 0x675   : > { %v4418_v20 = vadd.f32 %v4417_v42, %v4305_v27  ;;  %v4756_v40 = vsel %vm332_vm1, %v4706_v49, 0.0  ;;  %v4900_v43 = vmul.f32 %v9499_v3, %v4866_v29  ;;  %v5480_v45 = vmul.f32 %v9528_v38, %v4866_v29 }
 0x676   : > { %5521 = vadd.xlane.f32.xlu0 %v5520_v24  ;;  %4360 = vmatmul.f32.gmra.mxu0 %v4112_v12  ;;  %v5144_v59 = vsel %vm332_vm1, %v5094_v19, 0.0  ;;  %v5141_v55 = vsel %vm332_vm1, %v5093_v2, 0.0  ;;  %v4314_v39 = vadd.f32 %v9519_v30, %v9643_v9  ;;  %v5332_v24 = vsel %vm332_vm1, %v5286_v46, 0.0  ;;  %v4121_v12 = vld [vmem:[#allocation3 + $0x2e8] sm:$0xff]  ;;  %v4119_v19 = vld [vmem:[#allocation3 + $0x2d8] sm:$0xff]  ;;  %v4122_v46 = vld [vmem:[#allocation3 + $0x2f0] sm:$0xff] }
 0x677   : > { %v4531_v61 = vadd.f32 %v9580_v1, %v4418_v20  ;;  %v4950_v41 = vsel %vm332_vm1, %v4900_v43, 0.0  ;;  %v5526_v47 = vsel %vm332_vm1, %v5480_v45, 0.0 }
 0x679   : > { %v4608_v10 = vmax.f32 %v4531_v61, 0.0  ;;  %4467 = vmatmul.f32.gmra.mxu3 %v4107_v60  ;;  %v4116_v60 = vld [vmem:[#allocation3 + $0x2c0] sm:$0xff] }
 0x67a   : > { %v5253_v52 = vld [vmem:[#allocation2 + $0x78] sm:$0xff] }
 0x67b   : > { %4640 = vst.msk [vmem:[#allocation2 + $0x81] sm:$0xff] %vm332_vm1, %v4608_v10  ;;  %v9657_v35 = vpop.f32.mrf.mxu0  ;;  %v4867_v57 = vld [vmem:[#allocation2 + $0x79] sm:$0xff]  ;;  %v9701_v10 = vpop.f32.mrf.mxu1  ;;  %v4707_v25 = vmul.f32 %v9489_v31, %v5253_v52  ;;  %v5287_v49 = vmul.f32 %v9541_v18, %v5253_v52 }
 0x67c   : > { %v4420_v1 = vpop.f32.mrf.mxu3  ;;  %4754 = vadd.xlane.f32.xlu1 %v4753_v0  ;;  %4757 = vadd.xlane.f32.xlu2 %v4756_v40  ;;  %v5481_v2 = vmul.f32 %v9528_v38, %v4867_v57 }
 0x67d   : > { %v4421_v32 = vadd.f32 %v4420_v1, %v4308_v15  ;;  %v4901_v15 = vmul.f32 %v9499_v3, %v4867_v57  ;;  %v9709_v1 = vpop.xlane.xlu1 %4924  ;;  %v4759_v40 = vsel %vm332_vm1, %v4707_v25, 0.0  ;;  %v5335_v33 = vsel %vm332_vm1, %v5287_v49, 0.0 }
 0x67e   : > { %4948 = vadd.xlane.f32.xlu0 %v4947_v62  ;;  %4363 = vmatmul.f32.gmra.mxu0 %v4115_v37 }
 0x67f   : > { %v4534_v56 = vadd.f32 %v9594_v51, %v4421_v32  ;;  %v9669_v51 = vpop.xlane.xlu0 %4730 }
 0x681   : > { %v4609_v54 = vmax.f32 %v4534_v56, 0.0  ;;  %4470 = vmatmul.f32.gmra.mxu3 %v4110_v13  ;;  %v4953_v56 = vsel %vm332_vm1, %v4901_v15, 0.0 }
 0x682   : > { %v4674_v13 = vld [vmem:[#allocation2 + $0x80] sm:$0xff] }
 0x683   : > { %4641 = vst.msk [vmem:[#allocation2 + $0x91] sm:$0xff] %vm332_vm1, %v4609_v54  ;;  %v9673_v34 = vpop.f32.mrf.mxu0  ;;  %v5062_v54 = vld [vmem:[#allocation2 + $0x82] sm:$0xff]  ;;  %v9722_v50 = vpop.f32.mrf.mxu1 }
 0x684   : > { %v4423_v21 = vpop.f32.mrf.mxu3  ;;  %5524 = vadd.xlane.f32.xlu1 %v5523_v16  ;;  %5142 = vadd.xlane.f32.xlu2 %v5141_v55  ;;  %v5096_v6 = vmul.f32 %v9508_v26, %v5062_v54  ;;  %v5529_v16 = vsel %vm332_vm1, %v5481_v2, 0.0  ;;  %v4868_v29 = vld [vmem:[#allocation2 + $0x81] sm:$0xff] }
 0x685   : > { %v4424_v5 = vadd.f32 %v4423_v21, %v4311_v17  ;;  %v4708_v17 = vmul.f32 %v9489_v31, %v4674_v13  ;;  %v9728_v55 = vpop.xlane.xlu1 %5121 }
 0x686   : > { %5145 = vadd.xlane.f32.xlu0 %v5144_v59  ;;  %4366 = vmatmul.f32.gmra.mxu0 %v4118_v8  ;;  %11321 = vst [vmem:[#allocation14_spill] sm:$0xff] %v9728_v55  ;;  %v5150_v8 = vsel %vm332_vm1, %v5096_v6, 0.0 }
 0x687   : > { %v4537_v48 = vadd.f32 %v9608_v7, %v4424_v5  ;;  %v9691_v27 = vpop.xlane.xlu0 %5118 }
 0x688   : > { %11317 = vst [vmem:[#allocation8_spill] sm:$0xff] %v9691_v27 }
 0x689   : > { %v4610_v22 = vmax.f32 %v4537_v48, 0.0  ;;  %4473 = vmatmul.f32.gmra.mxu3 %v4113_v58  ;;  %v4762_v48 = vsel %vm332_vm1, %v4708_v17, 0.0 }
 0x68a   : > { %v4869_v17 = vld [vmem:[#allocation2 + $0x91] sm:$0xff] }
 0x68b   : > { %4642 = vst.msk [vmem:[#allocation2 + $0x99] sm:$0xff] %vm332_vm1, %v4610_v22  ;;  %v9693_v20 = vpop.f32.mrf.mxu0  ;;  %v5061_v22 = vld [vmem:[#allocation2 + $0x7a] sm:$0xff] }
 0x68c   : > { %v4426_v7 = vpop.f32.mrf.mxu3  ;;  %4951 = vadd.xlane.f32.xlu1 %v4950_v41  ;;  %5527 = vadd.xlane.f32.xlu2 %v5526_v47  ;;  %v9743_v41 = vpop.f32.mrf.mxu1 }
 0x68d   : > { %v4427_v42 = vadd.f32 %v4426_v7, %v4314_v39  ;;  %v4902_v39 = vmul.f32 %v9499_v3, %v4868_v29  ;;  %v5095_v7 = vmul.f32 %v9508_v26, %v5061_v22 }
 0x68e   : > { %5333 = vadd.xlane.f32.xlu0 %v5332_v24  ;;  %4369 = vmatmul.f32.gmra.mxu0 %v4121_v12  ;;  %v4323_v24 = vadd.f32 %v9519_v30, %v9693_v20  ;;  %v9751_v25 = vpop.xlane.xlu1 %5506 }
 0x68f   : > { %v4540_v61 = vadd.f32 %v9622_v14, %v4427_v42  ;;  %v9699_v9 = vpop.xlane.xlu2 %4736  ;;  %v4317_v14 = vadd.f32 %v9519_v30, %v9657_v35  ;;  %v9714_v37 = vpop.xlane.xlu0 %4930  ;;  %v5288_v42 = vmul.f32 %v9541_v18, %v4674_v13  ;;  %v5147_v12 = vsel %vm332_vm1, %v5095_v7, 0.0  ;;  %11325 = vst [vmem:[#allocation18_spill] sm:$0xff] %v9751_v25 }
 0x690   : > { %11318 = vst [vmem:[#allocation11_spill] sm:$0xff] %v9699_v9 }
 0x691   : > { %v4611_v63 = vmax.f32 %v4540_v61, 0.0  ;;  %4476 = vmatmul.f32.gmra.mxu3 %v4116_v60  ;;  %11319 = vst [vmem:[#allocation12_spill] sm:$0xff] %v9714_v37  ;;  %v4956_v61 = vsel %vm332_vm1, %v4902_v39, 0.0  ;;  %v5338_v57 = vsel %vm332_vm1, %v5288_v42, 0.0  ;;  %v4675_v60 = vld [vmem:[#allocation2 + $0x90] sm:$0xff] }
 0x692   : > { %v5289_v15 = vmul.f32 %v9541_v18, %v4675_v60  ;;  %v4870_v7 = vld [vmem:[#allocation2 + $0x99] sm:$0xff] }
 0x693   : > { %4643 = vst.msk [vmem:[#allocation2 + $0xa9] sm:$0xff] %vm332_vm1, %v4611_v63  ;;  %v4325_v0 = vpop.f32.mrf.mxu0 }
 0x694   : > { %v4429_v32 = vpop.f32.mrf.mxu3  ;;  %5336 = vadd.xlane.f32.xlu1 %v5335_v33  ;;  %4954 = vadd.xlane.f32.xlu2 %v4953_v56 }
 0x695   : > { %v4430_v62 = vadd.f32 %v4429_v32, %v4317_v14  ;;  %v5482_v14 = vmul.f32 %v9528_v38, %v4868_v29  ;;  %v4709_v32 = vmul.f32 %v9489_v31, %v4675_v60 }
 0x696   : > { %4760 = vadd.xlane.f32.xlu0 %v4759_v40 }
 0x697   : > { %v4543_v53 = vadd.f32 %v9638_v36, %v4430_v62  ;;  %v9717_v35 = vpop.xlane.xlu2 %5312  ;;  %v4320_v36 = vadd.f32 %v9519_v30, %v9673_v34  ;;  %v4326_v62 = vadd.f32 %v9519_v30, %v4325_v0  ;;  %v5532_v13 = vsel %vm332_vm1, %v5482_v14, 0.0 }
 0x698   : > { %11320 = vst [vmem:[#allocation13_spill] sm:$0xff] %v9717_v35  ;;  %v4765_v54 = vsel %vm332_vm1, %v4709_v32, 0.0 }
 0x699   : > { %v4612_v4 = vmax.f32 %v4543_v53, 0.0  ;;  %4479 = vmatmul.f32.gmra.mxu3 %v4119_v19  ;;  %v5341_v53 = vsel %vm332_vm1, %v5289_v15, 0.0  ;;  %v4676_v19 = vld [vmem:[#allocation2 + $0x98] sm:$0xff] }
 0x69a   : > { %v9735_v43 = vpop.xlane.xlu0 %5127 }
 0x69b   : > { %4644 = vst.msk [vmem:[#allocation2 + $0xb1] sm:$0xff] %vm332_vm1, %v4612_v4  ;;  %v4328_v59 = vpop.f32.mrf.mxu0  ;;  %v9763_v4 = vpop.f32.mrf.mxu1 }
 0x69c   : > { %v4432_v21 = vpop.f32.mrf.mxu3  ;;  %4763 = vadd.xlane.f32.xlu1 %v4762_v48  ;;  %5151 = vadd.xlane.f32.xlu2 %v5150_v8  ;;  %11323 = vst [vmem:[#allocation16_spill] sm:$0xff] %v9735_v43  ;;  %v4329_v48 = vadd.f32 %v9519_v30, %v4328_v59  ;;  %v5064_v59 = vld [vmem:[#allocation2 + $0x9a] sm:$0xff] }
 0x69d   : > { %v4433_v5 = vadd.f32 %v4432_v21, %v4320_v36  ;;  %v4710_v36 = vmul.f32 %v9489_v31, %v4676_v19  ;;  %v9769_v21 = vpop.xlane.xlu1 %4933 }
 0x69e   : > { %5530 = vadd.xlane.f32.xlu0 %v5529_v16  ;;  %11328 = vst [vmem:[#allocation21_spill] sm:$0xff] %v9769_v21  ;;  %v5483_v16 = vmul.f32 %v9528_v38, %v4869_v17 }
 0x69f   : > { %v4546_v58 = vadd.f32 %v9655_v44, %v4433_v5  ;;  %v9733_v34 = vpop.xlane.xlu2 %4739  ;;  %v4903_v5 = vmul.f32 %v9499_v3, %v4869_v17  ;;  %v4768_v22 = vsel %vm332_vm1, %v4710_v36, 0.0 }
 0x6a0   : > { %11322 = vst [vmem:[#allocation15_spill] sm:$0xff] %v9733_v34  ;;  %v5535_v31 = vsel %vm332_vm1, %v5483_v16, 0.0 }
 0x6a1   : > { %v4613_v45 = vmax.f32 %v4546_v58, 0.0  ;;  %4482 = vmatmul.f32.gmra.mxu3 %v4122_v46  ;;  %v4959_v46 = vsel %vm332_vm1, %v4903_v5, 0.0 }
 0x6a2   : > { %v9757_v40 = vpop.xlane.xlu0 %5315 }
 0x6a3   : > { %4645 = vst.msk [vmem:[#allocation2 + $0xc1] sm:$0xff] %vm332_vm1, %v4613_v45  ;;  %v4331_v52 = vpop.f32.mrf.mxu0  ;;  %v5063_v45 = vld [vmem:[#allocation2 + $0x92] sm:$0xff] }
 0x6a4   : > { %v4435_v44 = vpop.f32.mrf.mxu3  ;;  %5148 = vadd.xlane.f32.xlu1 %v5147_v12  ;;  %5339 = vadd.xlane.f32.xlu2 %v5338_v57  ;;  %11326 = vst [vmem:[#allocation19_spill] sm:$0xff] %v9757_v40  ;;  %v5098_v12 = vmul.f32 %v9508_v26, %v5064_v59  ;;  %v4904_v57 = vmul.f32 %v9499_v3, %v4870_v7  ;;  %v5257_v3 = vld [vmem:[#allocation2 + $0xa8] sm:$0xff]  ;;  %v9828_v59 = vld [vmem:[%s11304_s7] ss:$0 sm:$0xff] }
 0x6a5   : > { %v4436_v47 = vadd.f32 %v4435_v44, %v4323_v24  ;;  %v4563_v24 = vpop.f32.mrf.mxu1  ;;  %v4332_v60 = vadd.f32 %v9519_v30, %v4331_v52 }
 0x6a6   : > { %4957 = vadd.xlane.f32.xlu0 %v4956_v61  ;;  %v5156_v14 = vsel %vm332_vm1, %v5098_v12, 0.0  ;;  %v4962_v32 = vsel %vm332_vm1, %v4904_v57, 0.0 }
 0x6a7   : > { %v4549_v63 = vadd.f32 %v9680_v11, %v4436_v47  ;;  %v9749_v20 = vpop.xlane.xlu2 %5124  ;;  %v5097_v47 = vmul.f32 %v9508_v26, %v5063_v45 }
 0x6a8   : > { %11324 = vst [vmem:[#allocation17_spill] sm:$0xff] %v9749_v20  ;;  %v9784_v61 = vpop.xlane.xlu1 %5318 }
 0x6a9   : > { %v4614_v49 = vmax.f32 %v4549_v63, 0.0  ;;  %11331 = vst [vmem:[#allocation24_spill] sm:$0xff] %v9784_v61  ;;  %v5153_v15 = vsel %vm332_vm1, %v5097_v47, 0.0 }
 0x6ab   : > { %4646 = vst.msk [vmem:[#allocation2 + $0xc9] sm:$0xff] %vm332_vm1, %v4614_v49  ;;  %v4334_v56 = vpop.f32.mrf.mxu0 }
 0x6ac   : > { %v4438_v11 = vpop.f32.mrf.mxu3  ;;  %5533 = vadd.xlane.f32.xlu1 %v5532_v13  ;;  %4766 = vadd.xlane.f32.xlu2 %v4765_v54  ;;  %v5290_v13 = vmul.f32 %v9541_v18, %v4676_v19  ;;  %v5291_v54 = vmul.f32 %v9541_v18, %v5257_v3  ;;  %v4335_v17 = vadd.f32 %v9519_v30, %v4334_v56  ;;  %v4678_v56 = vld [vmem:[#allocation2 + $0xb0] sm:$0xff] }
 0x6ad   : > { %v4439_v33 = vadd.f32 %v4438_v11, %v4326_v62  ;;  %v5484_v11 = vmul.f32 %v9528_v38, %v4870_v7  ;;  %v4712_v7 = vmul.f32 %v9828_v59, %v4678_v56 }
 0x6ae   : > { %5342 = vadd.xlane.f32.xlu0 %v5341_v53  ;;  %v5344_v16 = vsel %vm332_vm1, %v5290_v13, 0.0 }
 0x6af   : > { %v4552_v2 = vadd.f32 %v9701_v10, %v4439_v33  ;;  %v9766_v0 = vpop.xlane.xlu2 %5509  ;;  %v9775_v10 = vpop.xlane.xlu0 %4742  ;;  %v5538_v5 = vsel %vm332_vm1, %v5484_v11, 0.0 }
 0x6b0   : > { %11327 = vst [vmem:[#allocation20_spill] sm:$0xff] %v9766_v0  ;;  %v5637_v0 = vld [vmem:[#allocation2 + $0x4a] sm:$0xff] }
 0x6b1   : > { %v4615_v6 = vmax.f32 %v4552_v2, 0.0  ;;  %11329 = vst [vmem:[#allocation22_spill] sm:$0xff] %v9775_v10  ;;  %v4566_v2 = vpop.f32.mrf.mxu1 }
 0x6b3   : > { %4647 = vst.msk [vmem:[#allocation2 + $0xd9] sm:$0xff] %vm332_vm1, %v4615_v6  ;;  %v4337_v58 = vpop.f32.mrf.mxu0 }
 0x6b4   : > { %v4441_v8 = vpop.f32.mrf.mxu3  ;;  %4960 = vadd.xlane.f32.xlu1 %v4959_v46  ;;  %5536 = vadd.xlane.f32.xlu2 %v5535_v31  ;;  %v9818_v46 = vld [vmem:[%s11304_s7 + $0x1] ss:$0 sm:$0xff] }
 0x6b5   : > { %v4442_v29 = vadd.f32 %v4441_v8, %v4329_v48  ;;  %v5347_v48 = vsel %vm332_vm1, %v5291_v54, 0.0  ;;  %v4871_v8 = vld [vmem:[#allocation2 + $0xa9] sm:$0xff] }
 0x6b6   : > { %4769 = vadd.xlane.f32.xlu0 %v4768_v22  ;;  %v4905_v31 = vmul.f32 %v9818_v46, %v4871_v8 }
 0x6b7   : > { %v4555_v39 = vadd.f32 %v9722_v50, %v4442_v29  ;;  %v9781_v42 = vpop.xlane.xlu2 %4936  ;;  %v9795_v62 = vpop.xlane.xlu0 %5512 }
 0x6b8   : > { %11330 = vst [vmem:[#allocation23_spill] sm:$0xff] %v9781_v42 }
 0x6b9   : > { %v4616_v44 = vmax.f32 %v4555_v39, 0.0  ;;  %11332 = vst [vmem:[#allocation25_spill] sm:$0xff] %v9795_v62  ;;  %v4569_v12 = vpop.f32.mrf.mxu1 }
 0x6bb   : > { %4648 = vst.msk [vmem:[#allocation2 + $0xe1] sm:$0xff] %vm332_vm1, %v4616_v44  ;;  %v9790_v49 = vpop.f32.mrf.mxu0  ;;  %v4338_v44 = vadd.f32 %v9519_v30, %v4337_v58  ;;  %v9842_v58 = vld [vmem:[%s11304_s7 + $0x2] ss:$0 sm:$0xff] }
 0x6bc   : > { %v4444_v50 = vpop.f32.mrf.mxu3  ;;  %5157 = vadd.xlane.f32.xlu1 %v5156_v14  ;;  %4963 = vadd.xlane.f32.xlu2 %v4962_v32 }
 0x6bd   : > { %v4445_v63 = vadd.f32 %v4444_v50, %v4332_v60  ;;  %v4965_v60 = vsel %vm332_vm1, %v4905_v31, 0.0 }
 0x6be   : > { %5154 = vadd.xlane.f32.xlu0 %v5153_v15  ;;  %v5066_v15 = vld [vmem:[#allocation2 + $0xb2] sm:$0xff] }
 0x6bf   : > { %v4558_v26 = vadd.f32 %v9743_v41, %v4445_v63  ;;  %v9799_v33 = vpop.xlane.xlu2 %5133  ;;  %v9801_v53 = vpop.xlane.xlu1 %4745  ;;  %v4774_v63 = vsel %vm332_vm1, %v4712_v7, 0.0 }
 0x6c0   : > { %11333 = vst [vmem:[#allocation26_spill] sm:$0xff] %v9799_v33  ;;  %v9812_v19 = vpop.xlane.xlu0 %4939 }
 0x6c1   : > { %v4617_v52 = vmax.f32 %v4558_v26, 0.0  ;;  %11334 = vst [vmem:[#allocation27_spill] sm:$0xff] %v9801_v53  ;;  %v5065_v26 = vld [vmem:[#allocation2 + $0xaa] sm:$0xff] }
 0x6c2   : > { %11335 = vst [vmem:[#allocation28_spill] sm:$0xff] %v9812_v19  ;;  %v5099_v54 = vmul.f32 %v9842_v58, %v5065_v26  ;;  %v5259_v26 = vld [vmem:[#allocation2 + $0xc0] sm:$0xff] }
 0x6c3   : > { %4649 = vst.msk [vmem:[#allocation2 + $0xf1] sm:$0xff] %vm332_vm1, %v4617_v52  ;;  %v9807_v36 = vpop.f32.mrf.mxu0  ;;  %v5100_v52 = vmul.f32 %v9842_v58, %v5066_v15 }
 0x6c4   : > { %v4447_v41 = vpop.f32.mrf.mxu3  ;;  %5345 = vadd.xlane.f32.xlu1 %v5344_v16  ;;  %5348 = vadd.xlane.f32.xlu2 %v5347_v48 }
 0x6c5   : > { %v4448_v6 = vadd.f32 %v4447_v41, %v4335_v17  ;;  %v9854_v17 = vld [vmem:[%s11303_s6] ss:$0 sm:$0xff]  ;;  %v5162_v16 = vsel %vm332_vm1, %v5100_v52, 0.0  ;;  %v4873_v52 = vld [vmem:[#allocation2 + $0xc1] sm:$0xff] }
 0x6c6   : > { %5539 = vadd.xlane.f32.xlu0 %v5538_v5  ;;  %v4341_v41 = vadd.f32 %v9854_v17, %v9790_v49  ;;  %v5292_v49 = vmul.f32 %v9541_v18, %v4678_v56 }
 0x6c7   : > { %v4561_v29 = vadd.f32 %v9763_v4, %v4448_v6  ;;  %v9821_v45 = vpop.xlane.xlu2 %5321  ;;  %v9823_v39 = vpop.xlane.xlu1 %5130  ;;  %v4711_v4 = vmul.f32 %v9828_v59, %v5257_v3 }
 0x6c8   : > { %11336 = vst [vmem:[#allocation29_spill] sm:$0xff] %v9821_v45  ;;  %v5350_v56 = vsel %vm332_vm1, %v5292_v49, 0.0 }
 0x6c9   : > { %v4618_v22 = vmax.f32 %v4561_v29, 0.0  ;;  %11337 = vst [vmem:[#allocation30_spill] sm:$0xff] %v9823_v39  ;;  %v4771_v50 = vsel %vm332_vm1, %v4711_v4, 0.0  ;;  %v9837_v3 = vpop.xlane.xlu0 %5324 }
 0x6ca   : > { %11338 = vst [vmem:[#allocation31_spill] sm:$0xff] %v9837_v3 }
 0x6cb   : > { %4650 = vst.msk [vmem:[#allocation2 + $0xf9] sm:$0xff] %vm332_vm1, %v4618_v22  ;;  %v4346_v32 = vpop.f32.mrf.mxu0  ;;  %v4872_v22 = vld [vmem:[#allocation2 + $0xb1] sm:$0xff] }
 0x6cc   : > { %v4450_v47 = vpop.f32.mrf.mxu3  ;;  %4772 = vadd.xlane.f32.xlu1 %v4771_v50  ;;  %4775 = vadd.xlane.f32.xlu2 %v4774_v63  ;;  %v4344_v50 = vadd.f32 %v9854_v17, %v9807_v36  ;;  %v4713_v36 = vmul.f32 %v9828_v59, %v5259_v26 }
 0x6cd   : > { %v4451_v57 = vadd.f32 %v4450_v47, %v4338_v44 }
 0x6ce   : > { %4966 = vadd.xlane.f32.xlu0 %v4965_v60  ;;  %v9873_v60 = vld [vmem:[%s11304_s7 + $0x4] ss:$0 sm:$0xff]  ;;  %v4777_v49 = vsel %vm332_vm1, %v4713_v36, 0.0 }
 0x6cf   : > { %v4564_v14 = vadd.f32 %v4563_v24, %v4451_v57  ;;  %v9845_v11 = vpop.xlane.xlu1 %5515  ;;  %v9847_v13 = vpop.xlane.xlu2 %4748  ;;  %v5485_v24 = vmul.f32 %v9528_v38, %v4871_v8  ;;  %v5159_v38 = vsel %vm332_vm1, %v5099_v54, 0.0  ;;  %v4906_v57 = vmul.f32 %v9818_v46, %v4872_v22 }
 0x6d0   : > { %11339 = vst [vmem:[#allocation32_spill] sm:$0xff] %v9845_v11  ;;  %v4572_v8 = vpop.f32.mrf.mxu1 }
 0x6d1   : > { %v4619_v30 = vmax.f32 %v4564_v14, 0.0  ;;  %11340 = vst [vmem:[#allocation33_spill] sm:$0xff] %v9847_v13  ;;  %v5541_v48 = vsel %vm332_vm1, %v5485_v24, 0.0  ;;  %v4968_v15 = vsel %vm332_vm1, %v4906_v57, 0.0 }
 0x6d3   : > { %4651 = vst.msk [vmem:[#allocation2 + $0x109] sm:$0xff] %vm332_vm1, %v4619_v30  ;;  %v4349_v4 = vpop.f32.mrf.mxu0 }
 0x6d4   : > { %v4453_v6 = vpop.f32.mrf.mxu3  ;;  %5542 = vadd.xlane.f32.xlu1 %v5541_v48  ;;  %5160 = vadd.xlane.f32.xlu2 %v5159_v38  ;;  %v4907_v48 = vmul.f32 %v9818_v46, %v4873_v52  ;;  %v4347_v38 = vadd.f32 %v9854_v17, %v4346_v32  ;;  %v5487_v32 = vmul.f32 %v9873_v60, %v4873_v52 }
 0x6d5   : > { %v4454_v5 = vadd.f32 %v4453_v6, %v4341_v41 }
 0x6d6   : > { %5163 = vadd.xlane.f32.xlu0 %v5162_v16  ;;  %v9892_v16 = vld [vmem:[%s11304_s7 + $0x3] ss:$0 sm:$0xff] }
 0x6d7   : > { %v4567_v29 = vadd.f32 %v4566_v2, %v4454_v5  ;;  %v9865_v44 = vpop.xlane.xlu1 %4942  ;;  %v9867_v47 = vpop.xlane.xlu2 %5518  ;;  %v5486_v2 = vmul.f32 %v9873_v60, %v4872_v22 }
 0x6d8   : > { %11342 = vst [vmem:[#allocation35_spill] sm:$0xff] %v9865_v44  ;;  %v4575_v24 = vpop.f32.mrf.mxu1 }
 0x6d9   : > { %v4620_v31 = vmax.f32 %v4567_v29, 0.0  ;;  %v9862_v7 = vpop.xlane.xlu0 %4751  ;;  %11343 = vst [vmem:[#allocation36_spill] sm:$0xff] %v9867_v47  ;;  %v5544_v14 = vsel %vm332_vm1, %v5486_v2, 0.0  ;;  %v4971_v2 = vsel %vm332_vm1, %v4907_v48, 0.0 }
 0x6da   : > { %11341 = vst [vmem:[#allocation34_spill] sm:$0xff] %v9862_v7 }
 0x6db   : > { %4652 = vst.msk [vmem:[#allocation2 + $0x111] sm:$0xff] %vm332_vm1, %v4620_v31  ;;  %v4352_v29 = vpop.f32.mrf.mxu0 }
 0x6dc   : > { %v4456_v63 = vpop.f32.mrf.mxu3  ;;  %4969 = vadd.xlane.f32.xlu1 %v4968_v15  ;;  %5545 = vadd.xlane.f32.xlu2 %v5544_v14 }
 0x6dd   : > { %v4457_v18 = vadd.f32 %v4456_v63, %v4344_v50  ;;  %v4680_v63 = vld [vmem:[#allocation2 + $0xc8] sm:$0xff] }
 0x6de   : > { %5351 = vadd.xlane.f32.xlu0 %v5350_v56 }
 0x6df   : > { %v4570_v30 = vadd.f32 %v4569_v12, %v4457_v18  ;;  %v9885_v6 = vpop.xlane.xlu1 %5139  ;;  %v9887_v5 = vpop.xlane.xlu2 %4945  ;;  %v5293_v12 = vmul.f32 %v9892_v16, %v5259_v26  ;;  %v5068_v18 = vld [vmem:[#allocation2 + $0xca] sm:$0xff] }
 0x6e0   : > { %11345 = vst [vmem:[#allocation38_spill] sm:$0xff] %v9885_v6  ;;  %v4578_v36 = vpop.f32.mrf.mxu1 }
 0x6e1   : > { %v4621_v54 = vmax.f32 %v4570_v30, 0.0  ;;  %v9882_v41 = vpop.xlane.xlu0 %5136  ;;  %11346 = vst [vmem:[#allocation39_spill] sm:$0xff] %v9887_v5  ;;  %v5353_v57 = vsel %vm332_vm1, %v5293_v12, 0.0  ;;  %v4714_v30 = vmul.f32 %v9828_v59, %v4680_v63 }
 0x6e2   : > { %11344 = vst [vmem:[#allocation37_spill] sm:$0xff] %v9882_v41 }
 0x6e3   : > { %4653 = vst.msk [vmem:[#allocation2 + $0x121] sm:$0xff] %vm332_vm1, %v4621_v54  ;;  %v5102_v54 = vmul.f32 %v9842_v58, %v5068_v18  ;;  %v4355_v48 = vpop.f32.mrf.mxu0  ;;  %v4780_v52 = vsel %vm332_vm1, %v4714_v30, 0.0  ;;  %v5294_v30 = vmul.f32 %v9892_v16, %v4680_v63 }
 0x6e4   : > { %v4459_v22 = vpop.f32.mrf.mxu3  ;;  %5354 = vadd.xlane.f32.xlu1 %v5353_v57  ;;  %4972 = vadd.xlane.f32.xlu2 %v4971_v2  ;;  %v5067_v2 = vld [vmem:[#allocation2 + $0xc2] sm:$0xff] }
 0x6e5   : > { %v4460_v31 = vadd.f32 %v4459_v22, %v4347_v38  ;;  %v5547_v22 = vsel %vm332_vm1, %v5487_v32, 0.0  ;;  %v5101_v32 = vmul.f32 %v9842_v58, %v5067_v2 }
 0x6e6   : > { %4778 = vadd.xlane.f32.xlu0 %v4777_v49  ;;  %v4874_v49 = vld [vmem:[#allocation2 + $0xc9] sm:$0xff] }
 0x6e7   : > { %v4573_v50 = vadd.f32 %v4572_v8, %v4460_v31  ;;  %v9904_v14 = vpop.xlane.xlu1 %5327  ;;  %v9906_v26 = vpop.xlane.xlu2 %5330  ;;  %v4350_v8 = vadd.f32 %v9854_v17, %v4349_v4  ;;  %v5168_v31 = vsel %vm332_vm1, %v5102_v54, 0.0  ;;  %v4908_v4 = vmul.f32 %v9818_v46, %v4874_v49 }
 0x6e8   : > { %11348 = vst [vmem:[#allocation41_spill] sm:$0xff] %v9904_v14  ;;  %v4353_v54 = vadd.f32 %v9854_v17, %v4352_v29 }
 0x6e9   : > { %v4622_v56 = vmax.f32 %v4573_v50, 0.0  ;;  %v9901_v15 = vpop.xlane.xlu0 %5521  ;;  %11349 = vst [vmem:[#allocation42_spill] sm:$0xff] %v9906_v26 }
 0x6ea   : > { %11347 = vst [vmem:[#allocation40_spill] sm:$0xff] %v9901_v15 }
 0x6eb   : > { %4654 = vst.msk [vmem:[#allocation2 + $0x129] sm:$0xff] %vm332_vm1, %v4622_v56 }
 0x6ec   : > { %v4462_v12 = vpop.f32.mrf.mxu3  ;;  %4781 = vadd.xlane.f32.xlu1 %v4780_v52  ;;  %5169 = vadd.xlane.f32.xlu2 %v5168_v31  ;;  %v5165_v52 = vsel %vm332_vm1, %v5101_v32, 0.0  ;;  %v5356_v31 = vsel %vm332_vm1, %v5294_v30, 0.0  ;;  %v4356_v30 = vadd.f32 %v9854_v17, %v4355_v48 }
 0x6ed   : > { %v4463_v38 = vadd.f32 %v4462_v12, %v4350_v8  ;;  %v4581_v12 = vpop.f32.mrf.mxu1 }
 0x6ee   : > { %5548 = vadd.xlane.f32.xlu0 %v5547_v22  ;;  %v4974_v22 = vsel %vm332_vm1, %v4908_v4, 0.0  ;;  %v5488_v4 = vmul.f32 %v9873_v60, %v4874_v49  ;;  %v4875_v49 = vld [vmem:[#allocation2 + $0xd9] sm:$0xff] }
 0x6ef   : > { %v4576_v57 = vadd.f32 %v4575_v24, %v4463_v38  ;;  %v9918_v56 = vpop.xlane.xlu1 %4754  ;;  %v9920_v8 = vpop.xlane.xlu2 %4757 }
 0x6f0   : > { %11351 = vst [vmem:[#allocation44_spill] sm:$0xff] %v9918_v56 }
 0x6f1   : > { %v4623_v50 = vmax.f32 %v4576_v57, 0.0  ;;  %v9915_v18 = vpop.xlane.xlu0 %4948  ;;  %11352 = vst [vmem:[#allocation45_spill] sm:$0xff] %v9920_v8  ;;  %v4681_v57 = vld [vmem:[#allocation2 + $0xd8] sm:$0xff] }
 0x6f2   : > { %11350 = vst [vmem:[#allocation43_spill] sm:$0xff] %v9915_v18  ;;  %v4358_v18 = vpop.f32.mrf.mxu0  ;;  %v5295_v29 = vmul.f32 %v9892_v16, %v4681_v57  ;;  %v4715_v32 = vmul.f32 %v9828_v59, %v4681_v57 }
 0x6f3   : > { %4655 = vst.msk [vmem:[#allocation2 + $0x139] sm:$0xff] %vm332_vm1, %v4623_v50 }
 0x6f4   : > { %v4465_v24 = vpop.f32.mrf.mxu3  ;;  %5166 = vadd.xlane.f32.xlu1 %v5165_v52  ;;  %5357 = vadd.xlane.f32.xlu2 %v5356_v31  ;;  %v4682_v52 = vld [vmem:[#allocation2 + $0xe0] sm:$0xff] }
 0x6f5   : > { %v4466_v38 = vadd.f32 %v4465_v24, %v4353_v54  ;;  %v4584_v31 = vpop.f32.mrf.mxu1 }
 0x6f6   : > { %4975 = vadd.xlane.f32.xlu0 %v4974_v22  ;;  %v4783_v22 = vsel %vm332_vm1, %v4715_v32, 0.0  ;;  %v5489_v32 = vmul.f32 %v9873_v60, %v4875_v49 }
 0x6f7   : > { %v4579_v56 = vadd.f32 %v4578_v36, %v4466_v38  ;;  %v9932_v50 = vpop.xlane.xlu1 %5524  ;;  %v9934_v54 = vpop.xlane.xlu2 %5142  ;;  %v5550_v38 = vsel %vm332_vm1, %v5488_v4, 0.0  ;;  %v4909_v4 = vmul.f32 %v9818_v46, %v4875_v49  ;;  %v4876_v49 = vld [vmem:[#allocation2 + $0xe1] sm:$0xff] }
 0x6f8   : > { %11354 = vst [vmem:[#allocation47_spill] sm:$0xff] %v9932_v50 }
 0x6f9   : > { %v4624_v63 = vmax.f32 %v4579_v56, 0.0  ;;  %v9929_v2 = vpop.xlane.xlu0 %5145  ;;  %11355 = vst [vmem:[#allocation48_spill] sm:$0xff] %v9934_v54  ;;  %v5359_v56 = vsel %vm332_vm1, %v5295_v29, 0.0 }
 0x6fa   : > { %11353 = vst [vmem:[#allocation46_spill] sm:$0xff] %v9929_v2  ;;  %v4361_v57 = vpop.f32.mrf.mxu0 }
 0x6fb   : > { %4656 = vst.msk [vmem:[#allocation2 + $0x141] sm:$0xff] %vm332_vm1, %v4624_v63  ;;  %v4716_v63 = vmul.f32 %v9828_v59, %v4682_v52 }
 0x6fc   : > { %v4468_v36 = vpop.f32.mrf.mxu3  ;;  %5551 = vadd.xlane.f32.xlu1 %v5550_v38  ;;  %4784 = vadd.xlane.f32.xlu2 %v4783_v22  ;;  %v5553_v38 = vsel %vm332_vm1, %v5489_v32, 0.0  ;;  %v9957_v22 = vld [vmem:[#allocation2 + $0xda] sm:$0xff] }
 0x6fd   : > { %v4469_v24 = vadd.f32 %v4468_v36, %v4356_v30  ;;  %v4359_v36 = vadd.f32 %v9854_v17, %v4358_v18  ;;  %v4587_v18 = vpop.f32.mrf.mxu1 }
 0x6fe   : > { %5360 = vadd.xlane.f32.xlu0 %v5359_v56  ;;  %v4977_v56 = vsel %vm332_vm1, %v4909_v4, 0.0 }
 0x6ff   : > { %v4582_v2 = vadd.f32 %v4581_v12, %v4469_v24  ;;  %v9946_v30 = vpop.xlane.xlu1 %4951  ;;  %v9948_v29 = vpop.xlane.xlu2 %5527 }
 0x700   : > { %11357 = vst [vmem:[#allocation50_spill] sm:$0xff] %v9946_v30 }
 0x701   : > { %v4625_v54 = vmax.f32 %v4582_v2, 0.0  ;;  %v9943_v48 = vpop.xlane.xlu0 %5333  ;;  %11358 = vst [vmem:[#allocation51_spill] sm:$0xff] %v9948_v29  ;;  %v4786_v2 = vsel %vm332_vm1, %v4716_v63, 0.0  ;;  %v5103_v63 = vmul.f32 %v9842_v58, %v9957_v22 }
 0x702   : > { %11356 = vst [vmem:[#allocation49_spill] sm:$0xff] %v9943_v48  ;;  %v9959_v48 = vld [vmem:[#allocation2 + $0xe2] sm:$0xff] }
 0x703   : > { %4657 = vst.msk [vmem:[#allocation2 + $0x151] sm:$0xff] %vm332_vm1, %v4625_v54  ;;  %v5104_v32 = vmul.f32 %v9842_v58, %v9959_v48 }
 0x704   : > { %v4471_v12 = vpop.f32.mrf.mxu3  ;;  %4978 = vadd.xlane.f32.xlu1 %v4977_v56  ;;  %5554 = vadd.xlane.f32.xlu2 %v5553_v38  ;;  %v5171_v56 = vsel %vm332_vm1, %v5103_v63, 0.0  ;;  %v5296_v63 = vmul.f32 %v9892_v16, %v4682_v52  ;;  %v4684_v52 = vld [vmem:[#allocation2 + $0xf8] sm:$0xff] }
 0x705   : > { %v4472_v24 = vadd.f32 %v4471_v12, %v4359_v36  ;;  %v4362_v12 = vadd.f32 %v9854_v17, %v4361_v57  ;;  %v5174_v38 = vsel %vm332_vm1, %v5104_v32, 0.0  ;;  %v5490_v57 = vmul.f32 %v9873_v60, %v4876_v49 }
 0x706   : > { %4787 = vadd.xlane.f32.xlu0 %v4786_v2 }
 0x707   : > { %v4585_v29 = vadd.f32 %v4584_v31, %v4472_v24  ;;  %v9965_v36 = vpop.xlane.xlu1 %5336  ;;  %v9967_v4 = vpop.xlane.xlu2 %4954  ;;  %v4910_v31 = vmul.f32 %v9818_v46, %v4876_v49  ;;  %v5362_v49 = vsel %vm332_vm1, %v5296_v63, 0.0  ;;  %v4718_v63 = vmul.f32 %v9828_v59, %v4684_v52 }
 0x708   : > { %11360 = vst [vmem:[#allocation53_spill] sm:$0xff] %v9965_v36  ;;  %v4364_v24 = vpop.f32.mrf.mxu0  ;;  %v5263_v36 = vld [vmem:[#allocation2 + $0xf0] sm:$0xff] }
 0x709   : > { %v4626_v6 = vmax.f32 %v4585_v29, 0.0  ;;  %v9961_v54 = vpop.xlane.xlu0 %4760  ;;  %11361 = vst [vmem:[#allocation54_spill] sm:$0xff] %v9967_v4  ;;  %v5297_v32 = vmul.f32 %v9892_v16, %v5263_v36 }
 0x70a   : > { %11359 = vst [vmem:[#allocation52_spill] sm:$0xff] %v9961_v54  ;;  %v4980_v54 = vsel %vm332_vm1, %v4910_v31, 0.0  ;;  %v4365_v31 = vadd.f32 %v9854_v17, %v4364_v24 }
 0x70b   : > { %4658 = vst.msk [vmem:[#allocation2 + $0x159] sm:$0xff] %vm332_vm1, %v4626_v6 }
 0x70c   : > { %v4474_v29 = vpop.f32.mrf.mxu3  ;;  %5175 = vadd.xlane.f32.xlu1 %v5174_v38  ;;  %4981 = vadd.xlane.f32.xlu2 %v4980_v54 }
 0x70d   : > { %v4475_v2 = vadd.f32 %v4474_v29, %v4362_v12 }
 0x70e   : > { %5172 = vadd.xlane.f32.xlu0 %v5171_v56  ;;  %v4877_v56 = vld [vmem:[#allocation2 + $0xf1] sm:$0xff] }
 0x70f   : > { %v4588_v4 = vadd.f32 %v4587_v18, %v4475_v2  ;;  %v9980_v6 = vpop.xlane.xlu1 %4763  ;;  %v9982_v50 = vpop.xlane.xlu2 %5151  ;;  %v5365_v2 = vsel %vm332_vm1, %v5297_v32, 0.0 }
 0x710   : > { %11363 = vst [vmem:[#allocation56_spill] sm:$0xff] %v9980_v6  ;;  %v4590_v18 = vpop.f32.mrf.mxu1  ;;  %v4367_v29 = vpop.f32.mrf.mxu0 }
 0x711   : > { %v4627_v30 = vmax.f32 %v4588_v4, 0.0  ;;  %v9977_v8 = vpop.xlane.xlu0 %5530  ;;  %11364 = vst [vmem:[#allocation57_spill] sm:$0xff] %v9982_v50  ;;  %v5556_v4 = vsel %vm332_vm1, %v5490_v57, 0.0  ;;  %v4717_v57 = vmul.f32 %v9828_v59, %v5263_v36  ;;  %v4368_v32 = vadd.f32 %v9854_v17, %v4367_v29 }
 0x712   : > { %11362 = vst [vmem:[#allocation55_spill] sm:$0xff] %v9977_v8 }
 0x713   : > { %4659 = vst.msk [vmem:[#allocation2 + $0x169] sm:$0xff] %vm332_vm1, %v4627_v30  ;;  %v4911_v30 = vmul.f32 %v9818_v46, %v4877_v56 }
 0x714   : > { %v4477_v54 = vpop.f32.mrf.mxu3  ;;  %5363 = vadd.xlane.f32.xlu1 %v5362_v49  ;;  %5366 = vadd.xlane.f32.xlu2 %v5365_v2  ;;  %v4789_v49 = vsel %vm332_vm1, %v4717_v57, 0.0  ;;  %v4792_v2 = vsel %vm332_vm1, %v4718_v63, 0.0  ;;  %v5491_v63 = vmul.f32 %v9873_v60, %v4877_v56 }
 0x715   : > { %v4478_v12 = vadd.f32 %v4477_v54, %v4365_v31 }
 0x716   : > { %5557 = vadd.xlane.f32.xlu0 %v5556_v4  ;;  %v4983_v4 = vsel %vm332_vm1, %v4911_v30, 0.0 }
 0x717   : > { %v4591_v38 = vadd.f32 %v4590_v18, %v4478_v12  ;;  %v9994_v8 = vpop.xlane.xlu1 %5148  ;;  %v9996_v31 = vpop.xlane.xlu2 %5339 }
 0x718   : > { %11366 = vst [vmem:[#allocation59_spill] sm:$0xff] %v9994_v8  ;;  %v4593_v54 = vpop.f32.mrf.mxu1  ;;  %v10007_v8 = vld [vmem:[#allocation2 + $0xf2] sm:$0xff]  ;;  %v4370_v29 = vpop.f32.mrf.mxu0 }
 0x719   : > { %v4628_v50 = vmax.f32 %v4591_v38, 0.0  ;;  %v9991_v24 = vpop.xlane.xlu0 %4957  ;;  %11367 = vst [vmem:[#allocation60_spill] sm:$0xff] %v9996_v31  ;;  %v10005_v38 = vld [vmem:[#allocation2 + $0xfa] sm:$0xff] }
 0x71a   : > { %11365 = vst [vmem:[#allocation58_spill] sm:$0xff] %v9991_v24 }
 0x71b   : > { %4660 = vst.msk [vmem:[#allocation2 + $0x171] sm:$0xff] %vm332_vm1, %v4628_v50 }
 0x71c   : > { %v4480_v18 = vpop.f32.mrf.mxu3  ;;  %4790 = vadd.xlane.f32.xlu1 %v4789_v49  ;;  %4793 = vadd.xlane.f32.xlu2 %v4792_v2 }
 0x71d   : > { %v4481_v12 = vadd.f32 %v4480_v18, %v4368_v32  ;;  %v5106_v32 = vmul.f32 %v9842_v58, %v10005_v38  ;;  %v5105_v18 = vmul.f32 %v9842_v58, %v10007_v8 }
 0x71e   : > { %4984 = vadd.xlane.f32.xlu0 %v4983_v4  ;;  %v4596_v4 = vpop.f32.mrf.mxu2 }
 0x71f   : > { %v4594_v36 = vadd.f32 %v4593_v54, %v4481_v12  ;;  %v10013_v30 = vpop.xlane.xlu1 %5533  ;;  %v10015_v57 = vpop.xlane.xlu2 %4766  ;;  %v4371_v54 = vadd.f32 %v9854_v17, %v4370_v29  ;;  %v5180_v2 = vsel %vm332_vm1, %v5106_v32, 0.0  ;;  %v5298_v17 = vmul.f32 %v9892_v16, %v4684_v52  ;;  %v4879_v52 = vld [vmem:[#allocation2 + $0x109] sm:$0xff] }
 0x720   : > { %11369 = vst [vmem:[#allocation62_spill] sm:$0xff] %v10013_v30 }
 0x721   : > { %v4629_v24 = vmax.f32 %v4594_v36, 0.0  ;;  %v10009_v50 = vpop.xlane.xlu0 %5342  ;;  %11370 = vst [vmem:[#allocation63_spill] sm:$0xff] %v10015_v57  ;;  %v5559_v36 = vsel %vm332_vm1, %v5491_v63, 0.0  ;;  %v4878_v57 = vld [vmem:[#allocation2 + $0xf9] sm:$0xff] }
 0x722   : > { %11368 = vst [vmem:[#allocation61_spill] sm:$0xff] %v10009_v50  ;;  %v5177_v50 = vsel %vm332_vm1, %v5105_v18, 0.0  ;;  %v4912_v32 = vmul.f32 %v9818_v46, %v4878_v57  ;;  %v5492_v63 = vmul.f32 %v9873_v60, %v4878_v57  ;;  %v5368_v18 = vsel %vm332_vm1, %v5298_v17, 0.0 }
 0x723   : > { %4661 = vst.msk [vmem:[#allocation2 + $0x181] sm:$0xff] %vm332_vm1, %v4629_v24 }
 0x724   : > { %v4483_v12 = vpop.f32.mrf.mxu3  ;;  %5560 = vadd.xlane.f32.xlu1 %v5559_v36  ;;  %5178 = vadd.xlane.f32.xlu2 %v5177_v50  ;;  %v4986_v50 = vsel %vm332_vm1, %v4912_v32, 0.0  ;;  %v4913_v36 = vmul.f32 %v9818_v46, %v4879_v52 }
 0x725   : > { %v4484_v49 = vadd.f32 %v4483_v12, %v4371_v54  ;;  %v5562_v54 = vsel %vm332_vm1, %v5492_v63, 0.0  ;;  %v5265_v12 = vld [vmem:[#allocation2 + $0x108] sm:$0xff]  ;;  %v4686_v63 = vld [vmem:[#allocation2 + $0x110] sm:$0xff] }
 0x726   : > { %5181 = vadd.xlane.f32.xlu0 %v5180_v2  ;;  %v4989_v32 = vsel %vm332_vm1, %v4913_v36, 0.0 }
 0x727   : > { %v4597_v56 = vadd.f32 %v4596_v4, %v4484_v49  ;;  %v10028_v24 = vpop.xlane.xlu1 %4960  ;;  %v10030_v29 = vpop.xlane.xlu2 %5536  ;;  %v4719_v49 = vmul.f32 %v9828_v59, %v5265_v12 }
 0x728   : > { %11372 = vst [vmem:[#allocation65_spill] sm:$0xff] %v10028_v24 }
 0x729   : > { %v4630_v30 = vmax.f32 %v4597_v56, 0.0  ;;  %v10025_v6 = vpop.xlane.xlu0 %4769  ;;  %11373 = vst [vmem:[#allocation66_spill] sm:$0xff] %v10030_v29  ;;  %v4795_v56 = vsel %vm332_vm1, %v4719_v49, 0.0  ;;  %v4720_v49 = vmul.f32 %v9828_v59, %v4686_v63 }
 0x72a   : > { %11371 = vst [vmem:[#allocation64_spill] sm:$0xff] %v10025_v6 }
 0x72b   : > { %4662 = vst.msk [vmem:[#allocation2 + $0x189] sm:$0xff] %vm332_vm1, %v4630_v30  ;;  %v5299_v30 = vmul.f32 %v9892_v16, %v5265_v12 }
 0x72c   : > { %4987 = vadd.xlane.f32.xlu1 %v4986_v50  ;;  %5563 = vadd.xlane.f32.xlu2 %v5562_v54  ;;  %v5493_v54 = vmul.f32 %v9873_v60, %v4879_v52  ;;  %v10067_v52 = vld [vmem:[#allocation2 + $0x10a] sm:$0xff] }
 0x72d   : > { %v5371_v17 = vsel %vm332_vm1, %v5299_v30, 0.0 }
 0x72e   : > { %5369 = vadd.xlane.f32.xlu0 %v5368_v18  ;;  %v10050_v18 = vld [vmem:[#allocation2 + $0x112] sm:$0xff]  ;;  %v5565_v36 = vsel %vm332_vm1, %v5493_v54, 0.0  ;;  %v5107_v54 = vmul.f32 %v9842_v58, %v10067_v52 }
 0x72f   : > { %v10041_v2 = vpop.xlane.xlu1 %5157  ;;  %v10043_v57 = vpop.xlane.xlu2 %4963  ;;  %v5108_v30 = vmul.f32 %v9842_v58, %v10050_v18 }
 0x730   : > { %11375 = vst [vmem:[#allocation68_spill] sm:$0xff] %v10041_v2 }
 0x731   : > { %v10038_v4 = vpop.xlane.xlu0 %5154  ;;  %11376 = vst [vmem:[#allocation69_spill] sm:$0xff] %v10043_v57 }
 0x732   : > { %11374 = vst [vmem:[#allocation67_spill] sm:$0xff] %v10038_v4 }
 0x734   : > { %5372 = vadd.xlane.f32.xlu1 %v5371_v17  ;;  %4990 = vadd.xlane.f32.xlu2 %v4989_v32  ;;  %v5186_v17 = vsel %vm332_vm1, %v5108_v30, 0.0  ;;  %v10065_v32 = vld [vmem:[#allocation2 + $0x111] sm:$0xff] }
 0x735   : > { %v4914_v29 = vmul.f32 %v9818_v46, %v10065_v32  ;;  %v5494_v42 = vmul.f32 %v9873_v60, %v10065_v32 }
 0x736   : > { %4796 = vadd.xlane.f32.xlu0 %v4795_v56  ;;  %v4798_v56 = vsel %vm332_vm1, %v4720_v49, 0.0  ;;  %v5300_v49 = vmul.f32 %v9892_v16, %v4686_v63 }
 0x737   : > { %v10055_v2 = vpop.xlane.xlu1 %5345  ;;  %v10057_v12 = vpop.xlane.xlu2 %5348  ;;  %v4992_v30 = vsel %vm332_vm1, %v4914_v29, 0.0 }
 0x738   : > { %11378 = vst [vmem:[#allocation71_spill] sm:$0xff] %v10055_v2 }
 0x739   : > { %v10052_v50 = vpop.xlane.xlu0 %5539  ;;  %11379 = vst [vmem:[#allocation72_spill] sm:$0xff] %v10057_v12 }
 0x73a   : > { %11377 = vst [vmem:[#allocation70_spill] sm:$0xff] %v10052_v50 }
 0x73c   : > { %4799 = vadd.xlane.f32.xlu1 %v4798_v56  ;;  %5187 = vadd.xlane.f32.xlu2 %v5186_v17  ;;  %v5374_v56 = vsel %vm332_vm1, %v5300_v49, 0.0  ;;  %v4687_v17 = vld [vmem:[#allocation2 + $0x120] sm:$0xff] }
 0x73d   : > { %v4721_v63 = vmul.f32 %v9828_v59, %v4687_v17 }
 0x73e   : > { %5566 = vadd.xlane.f32.xlu0 %v5565_v36  ;;  %v5183_v36 = vsel %vm332_vm1, %v5107_v54, 0.0 }
 0x73f   : > { %v10073_v12 = vpop.xlane.xlu1 %4772  ;;  %v10075_v57 = vpop.xlane.xlu2 %4775 }
 0x740   : > { %11381 = vst [vmem:[#allocation74_spill] sm:$0xff] %v10073_v12 }
 0x741   : > { %v10069_v50 = vpop.xlane.xlu0 %4966  ;;  %11382 = vst [vmem:[#allocation75_spill] sm:$0xff] %v10075_v57  ;;  %v5301_v57 = vmul.f32 %v9892_v16, %v4687_v17 }
 0x742   : > { %11380 = vst [vmem:[#allocation73_spill] sm:$0xff] %v10069_v50  ;;  %v10083_v50 = vld [vmem:[#allocation2 + $0x121] sm:$0xff] }
 0x743   : > { %v4915_v29 = vmul.f32 %v9818_v46, %v10083_v50  ;;  %v5377_v54 = vsel %vm332_vm1, %v5301_v57, 0.0 }
 0x744   : > { %5184 = vadd.xlane.f32.xlu1 %v5183_v36  ;;  %5375 = vadd.xlane.f32.xlu2 %v5374_v56  ;;  %v4688_v36 = vld [vmem:[#allocation2 + $0x128] sm:$0xff] }
 0x745   : > { %v4995_v49 = vsel %vm332_vm1, %v4915_v29, 0.0  ;;  %v10098_v56 = vld [vmem:[#allocation2 + $0x12a] sm:$0xff] }
 0x746   : > { %4993 = vadd.xlane.f32.xlu0 %v4992_v30  ;;  %v4801_v30 = vsel %vm332_vm1, %v4721_v63, 0.0  ;;  %v5110_v57 = vmul.f32 %v9842_v58, %v10098_v56 }
 0x747   : > { %v10088_v6 = vpop.xlane.xlu1 %5542  ;;  %v10090_v2 = vpop.xlane.xlu2 %5160 }
 0x748   : > { %11384 = vst [vmem:[#allocation77_spill] sm:$0xff] %v10088_v6  ;;  %v4722_v6 = vmul.f32 %v9828_v59, %v4688_v36 }
 0x749   : > { %v10085_v12 = vpop.xlane.xlu0 %5163  ;;  %11385 = vst [vmem:[#allocation78_spill] sm:$0xff] %v10090_v2 }
 0x74a   : > { %11383 = vst [vmem:[#allocation76_spill] sm:$0xff] %v10085_v12  ;;  %v10100_v12 = vld [vmem:[#allocation2 + $0x129] sm:$0xff]  ;;  %v4804_v63 = vsel %vm332_vm1, %v4722_v6, 0.0  ;;  %v5302_v6 = vmul.f32 %v9892_v16, %v4688_v36 }
 0x74b   : > { %v4916_v29 = vmul.f32 %v9818_v46, %v10100_v12 }
 0x74c   : > { %4996 = vadd.xlane.f32.xlu1 %v4995_v49  ;;  %4802 = vadd.xlane.f32.xlu2 %v4801_v30  ;;  %v10116_v30 = vld [vmem:[#allocation2 + $0x122] sm:$0xff] }
 0x74d   : > { %v4998_v49 = vsel %vm332_vm1, %v4916_v29, 0.0 }
 0x74e   : > { %5378 = vadd.xlane.f32.xlu0 %v5377_v54  ;;  %v5192_v54 = vsel %vm332_vm1, %v5110_v57, 0.0 }
 0x74f   : > { %v10105_v4 = vpop.xlane.xlu1 %4969  ;;  %v10107_v17 = vpop.xlane.xlu2 %5545 }
 0x750   : > { %11387 = vst [vmem:[#allocation80_spill] sm:$0xff] %v10105_v4 }
 0x751   : > { %v10102_v2 = vpop.xlane.xlu0 %5351  ;;  %11388 = vst [vmem:[#allocation81_spill] sm:$0xff] %v10107_v17  ;;  %v5109_v17 = vmul.f32 %v9842_v58, %v10116_v30 }
 0x752   : > { %11386 = vst [vmem:[#allocation79_spill] sm:$0xff] %v10102_v2  ;;  %v5269_v2 = vld [vmem:[#allocation2 + $0x138] sm:$0xff] }
 0x753   : > { %v5303_v57 = vmul.f32 %v9892_v16, %v5269_v2  ;;  %v5189_v29 = vsel %vm332_vm1, %v5109_v17, 0.0  ;;  %v4723_v17 = vmul.f32 %v9828_v59, %v5269_v2 }
 0x754   : > { %5193 = vadd.xlane.f32.xlu1 %v5192_v54  ;;  %4999 = vadd.xlane.f32.xlu2 %v4998_v49  ;;  %v10131_v49 = vld [vmem:[#allocation2 + $0x139] sm:$0xff] }
 0x755   : > { %v5383_v54 = vsel %vm332_vm1, %v5303_v57, 0.0 }
 0x756   : > { %4805 = vadd.xlane.f32.xlu0 %v4804_v63  ;;  %v5380_v63 = vsel %vm332_vm1, %v5302_v6, 0.0 }
 0x757   : > { %v10122_v24 = vpop.xlane.xlu1 %5354  ;;  %v10124_v31 = vpop.xlane.xlu2 %4972 }
 0x758   : > { %11390 = vst [vmem:[#allocation83_spill] sm:$0xff] %v10122_v24 }
 0x759   : > { %v10118_v4 = vpop.xlane.xlu0 %4778  ;;  %11391 = vst [vmem:[#allocation84_spill] sm:$0xff] %v10124_v31  ;;  %v4917_v31 = vmul.f32 %v9818_v46, %v10131_v49 }
 0x75a   : > { %11389 = vst [vmem:[#allocation82_spill] sm:$0xff] %v10118_v4  ;;  %v4690_v4 = vld [vmem:[#allocation2 + $0x140] sm:$0xff] }
 0x75b   : > { %v4724_v6 = vmul.f32 %v9828_v59, %v4690_v4  ;;  %v5001_v57 = vsel %vm332_vm1, %v4917_v31, 0.0  ;;  %v5304_v26 = vmul.f32 %v9892_v16, %v4690_v4  ;;  %v10185_v4 = vld [vmem:[#allocation2 + $0x158] sm:$0xff] }
 0x75c   : > { %5381 = vadd.xlane.f32.xlu1 %v5380_v63  ;;  %5384 = vadd.xlane.f32.xlu2 %v5383_v54  ;;  %v10146_v54 = vld [vmem:[#allocation2 + $0x142] sm:$0xff] }
 0x75d   : > { %v4810_v63 = vsel %vm332_vm1, %v4724_v6, 0.0  ;;  %v5112_v2 = vmul.f32 %v9842_v58, %v10146_v54 }
 0x75e   : > { %5190 = vadd.xlane.f32.xlu0 %v5189_v29  ;;  %v4807_v29 = vsel %vm332_vm1, %v4723_v17, 0.0 }
 0x75f   : > { %v10137_v36 = vpop.xlane.xlu1 %4781  ;;  %v10139_v24 = vpop.xlane.xlu2 %5169 }
 0x760   : > { %11393 = vst [vmem:[#allocation86_spill] sm:$0xff] %v10137_v36  ;;  %v10150_v36 = vld [vmem:[#allocation2 + $0x13a] sm:$0xff] }
 0x761   : > { %v10133_v15 = vpop.xlane.xlu0 %5548  ;;  %11394 = vst [vmem:[#allocation87_spill] sm:$0xff] %v10139_v24  ;;  %v5111_v6 = vmul.f32 %v9842_v58, %v10150_v36 }
 0x762   : > { %11392 = vst [vmem:[#allocation85_spill] sm:$0xff] %v10133_v15  ;;  %v10148_v15 = vld [vmem:[#allocation2 + $0x141] sm:$0xff] }
 0x763   : > { %v4918_v17 = vmul.f32 %v9818_v46, %v10148_v15 }
 0x764   : > { %4808 = vadd.xlane.f32.xlu1 %v4807_v29  ;;  %4811 = vadd.xlane.f32.xlu2 %v4810_v63  ;;  %v5195_v63 = vsel %vm332_vm1, %v5111_v6, 0.0  ;;  %v5386_v6 = vsel %vm332_vm1, %v5304_v26, 0.0  ;;  %v4726_v26 = vmul.f32 %v9828_v59, %v10185_v4 }
 0x765   : > { %v5004_v29 = vsel %vm332_vm1, %v4918_v17, 0.0 }
 0x766   : > { %5002 = vadd.xlane.f32.xlu0 %v5001_v57  ;;  %v5198_v57 = vsel %vm332_vm1, %v5112_v2, 0.0 }
 0x767   : > { %v10156_v47 = vpop.xlane.xlu1 %5166  ;;  %v10158_v31 = vpop.xlane.xlu2 %5357 }
 0x768   : > { %11396 = vst [vmem:[#allocation89_spill] sm:$0xff] %v10156_v47  ;;  %v10169_v47 = vld [vmem:[#allocation2 + $0x151] sm:$0xff] }
 0x769   : > { %v10152_v24 = vpop.xlane.xlu0 %4975  ;;  %11397 = vst [vmem:[#allocation90_spill] sm:$0xff] %v10158_v31  ;;  %v4919_v17 = vmul.f32 %v9818_v46, %v10169_v47 }
 0x76a   : > { %11395 = vst [vmem:[#allocation88_spill] sm:$0xff] %v10152_v24  ;;  %v10167_v24 = vld [vmem:[#allocation2 + $0x150] sm:$0xff] }
 0x76b   : > { %v5305_v2 = vmul.f32 %v9892_v16, %v10167_v24 }
 0x76c   : > { %5005 = vadd.xlane.f32.xlu1 %v5004_v29  ;;  %5196 = vadd.xlane.f32.xlu2 %v5195_v63  ;;  %v5007_v29 = vsel %vm332_vm1, %v4919_v17, 0.0  ;;  %v10187_v63 = vld [vmem:[#allocation2 + $0x15a] sm:$0xff] }
 0x76e   : > { %5199 = vadd.xlane.f32.xlu0 %v5198_v57  ;;  %v5389_v57 = vsel %vm332_vm1, %v5305_v2, 0.0  ;;  %v5114_v2 = vmul.f32 %v9842_v58, %v10187_v63 }
 0x76f   : > { %v10174_v5 = vpop.xlane.xlu1 %5551  ;;  %v10176_v7 = vpop.xlane.xlu2 %4784 }
 0x770   : > { %11399 = vst [vmem:[#allocation92_spill] sm:$0xff] %v10174_v5 }
 0x771   : > { %v10171_v31 = vpop.xlane.xlu0 %5360  ;;  %11400 = vst [vmem:[#allocation93_spill] sm:$0xff] %v10176_v7  ;;  %v4725_v7 = vmul.f32 %v9828_v59, %v10167_v24 }
 0x772   : > { %11398 = vst [vmem:[#allocation91_spill] sm:$0xff] %v10171_v31 }
 0x773   : > { %v4813_v17 = vsel %vm332_vm1, %v4725_v7, 0.0 }
 0x774   : > { %5390 = vadd.xlane.f32.xlu1 %v5389_v57  ;;  %5008 = vadd.xlane.f32.xlu2 %v5007_v29  ;;  %v5204_v57 = vsel %vm332_vm1, %v5114_v2, 0.0  ;;  %v10204_v29 = vld [vmem:[#allocation2 + $0x159] sm:$0xff] }
 0x776   : > { %5387 = vadd.xlane.f32.xlu0 %v5386_v6  ;;  %v4816_v6 = vsel %vm332_vm1, %v4726_v26, 0.0  ;;  %v5306_v26 = vmul.f32 %v9892_v16, %v10185_v4 }
 0x777   : > { %v10193_v5 = vpop.xlane.xlu1 %4978  ;;  %v10195_v3 = vpop.xlane.xlu2 %5554 }
 0x778   : > { %11402 = vst [vmem:[#allocation95_spill] sm:$0xff] %v10193_v5  ;;  %v4920_v5 = vmul.f32 %v9818_v46, %v10204_v29 }
 0x779   : > { %v10189_v31 = vpop.xlane.xlu0 %4787  ;;  %11403 = vst [vmem:[#allocation96_spill] sm:$0xff] %v10195_v3 }
 0x77a   : > { %11401 = vst [vmem:[#allocation94_spill] sm:$0xff] %v10189_v31  ;;  %v10206_v31 = vld [vmem:[#allocation2 + $0x152] sm:$0xff]  ;;  %v5010_v2 = vsel %vm332_vm1, %v4920_v5, 0.0 }
 0x77b   : > { %v5113_v7 = vmul.f32 %v9842_v58, %v10206_v31 }
 0x77c   : > { %4817 = vadd.xlane.f32.xlu1 %v4816_v6  ;;  %5205 = vadd.xlane.f32.xlu2 %v5204_v57  ;;  %v5392_v6 = vsel %vm332_vm1, %v5306_v26, 0.0  ;;  %v10223_v57 = vld [vmem:[#allocation2 + $0x168] sm:$0xff] }
 0x77e   : > { %4814 = vadd.xlane.f32.xlu0 %v4813_v17  ;;  %v5201_v17 = vsel %vm332_vm1, %v5113_v7, 0.0  ;;  %v4727_v7 = vmul.f32 %v9828_v59, %v10223_v57 }
 0x77f   : > { %v10212_v14 = vpop.xlane.xlu1 %5175  ;;  %v10214_v41 = vpop.xlane.xlu2 %4981 }
 0x780   : > { %11405 = vst [vmem:[#allocation98_spill] sm:$0xff] %v10212_v14  ;;  %v10225_v14 = vld [vmem:[#allocation2 + $0x169] sm:$0xff] }
 0x781   : > { %v10208_v3 = vpop.xlane.xlu0 %5172  ;;  %11406 = vst [vmem:[#allocation99_spill] sm:$0xff] %v10214_v41  ;;  %v4921_v5 = vmul.f32 %v9818_v46, %v10225_v14 }
 0x782   : > { %11404 = vst [vmem:[#allocation97_spill] sm:$0xff] %v10208_v3  ;;  %v5307_v3 = vmul.f32 %v9892_v16, %v10223_v57 }
 0x784   : > { %5202 = vadd.xlane.f32.xlu1 %v5201_v17  ;;  %5393 = vadd.xlane.f32.xlu2 %v5392_v6  ;;  %v5395_v26 = vsel %vm332_vm1, %v5307_v3, 0.0  ;;  %v4819_v17 = vsel %vm332_vm1, %v4727_v7, 0.0  ;;  %v10242_v6 = vld [vmem:[#allocation2 + $0x170] sm:$0xff] }
 0x785   : > { %v4728_v13 = vmul.f32 %v9828_v59, %v10242_v6  ;;  %v10265_v59 = vld [vmem:[#allocation2 + $0x180] sm:$0xff] }
 0x786   : > { %5011 = vadd.xlane.f32.xlu0 %v5010_v2  ;;  %v5013_v2 = vsel %vm332_vm1, %v4921_v5, 0.0 }
 0x787   : > { %v10231_v33 = vpop.xlane.xlu1 %5363  ;;  %v10233_v44 = vpop.xlane.xlu2 %5366 }
 0x788   : > { %11408 = vst [vmem:[#allocation101_spill] sm:$0xff] %v10231_v33 }
 0x789   : > { %v10227_v41 = vpop.xlane.xlu0 %5557  ;;  %11409 = vst [vmem:[#allocation102_spill] sm:$0xff] %v10233_v44  ;;  %v10246_v44 = vld [vmem:[#allocation2 + $0x171] sm:$0xff] }
 0x78a   : > { %11407 = vst [vmem:[#allocation100_spill] sm:$0xff] %v10227_v41  ;;  %v10244_v41 = vld [vmem:[#allocation2 + $0x172] sm:$0xff]  ;;  %v4922_v7 = vmul.f32 %v9818_v46, %v10246_v44 }
 0x78b   : > { %v5116_v5 = vmul.f32 %v9842_v58, %v10244_v41 }
 0x78c   : > { %5014 = vadd.xlane.f32.xlu1 %v5013_v2  ;;  %4820 = vadd.xlane.f32.xlu2 %v4819_v17  ;;  %v5016_v17 = vsel %vm332_vm1, %v4922_v7, 0.0 }
 0x78d   : > { %v5210_v2 = vsel %vm332_vm1, %v5116_v5, 0.0  ;;  %v5309_v5 = vmul.f32 %v9892_v16, %v10265_v59 }
 0x78e   : > { %5396 = vadd.xlane.f32.xlu0 %v5395_v26  ;;  %v4822_v26 = vsel %vm332_vm1, %v4728_v13, 0.0  ;;  %v5308_v13 = vmul.f32 %v9892_v16, %v10242_v6 }
 0x78f   : > { %v10252_v39 = vpop.xlane.xlu1 %4790  ;;  %v10254_v3 = vpop.xlane.xlu2 %4793 }
 0x790   : > { %11411 = vst [vmem:[#allocation104_spill] sm:$0xff] %v10252_v39 }
 0x791   : > { %v10248_v33 = vpop.xlane.xlu0 %4984 }
 0x792   : > { %11410 = vst [vmem:[#allocation103_spill] sm:$0xff] %v10248_v33  ;;  %v10263_v33 = vld [vmem:[#allocation2 + $0x16a] sm:$0xff] }
 0x793   : > { %v5115_v11 = vmul.f32 %v9842_v58, %v10263_v33 }
 0x794   : > { %5211 = vadd.xlane.f32.xlu1 %v5210_v2  ;;  %5017 = vadd.xlane.f32.xlu2 %v5016_v17  ;;  %v5401_v2 = vsel %vm332_vm1, %v5309_v5, 0.0  ;;  %v5496_v17 = vmul.f32 %v9873_v60, %v10100_v12  ;;  %v5568_v5 = vsel %vm332_vm1, %v5494_v42, 0.0  ;;  %v5498_v42 = vmul.f32 %v9873_v60, %v10148_v15 }
 0x795   : > { %v5207_v7 = vsel %vm332_vm1, %v5115_v11, 0.0  ;;  %v5495_v11 = vmul.f32 %v9873_v60, %v10083_v50  ;;  %v5497_v50 = vmul.f32 %v9873_v60, %v10131_v49  ;;  %v5500_v15 = vmul.f32 %v9873_v60, %v10204_v29 }
 0x796   : > { %4823 = vadd.xlane.f32.xlu0 %v4822_v26  ;;  %v5398_v26 = vsel %vm332_vm1, %v5308_v13, 0.0  ;;  %v5574_v13 = vsel %vm332_vm1, %v5496_v17, 0.0 }
 0x797   : > { %v10271_v62 = vpop.xlane.xlu1 %5560  ;;  %v10273_v46 = vpop.xlane.xlu2 %5178 }
 0x798   : > { %11412 = vst [vmem:[#allocation105_spill] sm:$0xff] %v10271_v62 }
 0x799   : > { %v10267_v39 = vpop.xlane.xlu0 %5181  ;;  %11413 = vst [vmem:[#allocation106_spill] sm:$0xff] %v10273_v46 }
 0x79c   : > { %5399 = vadd.xlane.f32.xlu1 %v5398_v26  ;;  %5402 = vadd.xlane.f32.xlu2 %v5401_v2  ;;  %v10297_v26 = vld [vmem:[#allocation2 + $0x188] sm:$0xff] }
 0x79d   : > { %v5310_v2 = vmul.f32 %v9892_v16, %v10297_v26 }
 0x79e   : > { %5208 = vadd.xlane.f32.xlu0 %v5207_v7  ;;  %v5571_v7 = vsel %vm332_vm1, %v5495_v11, 0.0  ;;  %v5577_v11 = vsel %vm332_vm1, %v5497_v50, 0.0 }
 0x79f   : > { %v10286_v46 = vpop.xlane.xlu1 %4987  ;;  %v10288_v62 = vpop.xlane.xlu2 %5563  ;;  %v5404_v17 = vsel %vm332_vm1, %v5310_v2, 0.0  ;;  %v5501_v2 = vmul.f32 %v9873_v60, %v10225_v14 }
 0x7a0   : > { %11415 = vst [vmem:[#allocation108_spill] sm:$0xff] %v10288_v62 }
 0x7a1   : > { %v10282_v58 = vpop.xlane.xlu0 %5369 }
 0x7a2   : > { %11414 = vst [vmem:[#allocation107_spill] sm:$0xff] %v10282_v58  ;;  %v5635_v58 = vld [vmem:[#allocation2 + $0x32] sm:$0xff] }
 0x7a4   : > { %5569 = vadd.xlane.f32.xlu1 %v5568_v5  ;;  %5572 = vadd.xlane.f32.xlu2 %v5571_v7  ;;  %v5499_v5 = vmul.f32 %v9873_v60, %v10169_v47  ;;  %v5469_v47 = vld [vmem:[#allocation2 + $0x181] sm:$0xff] }
 0x7a5   : > { %v5503_v14 = vmul.f32 %v9873_v60, %v5469_v47 }
 0x7a6   : > { %5575 = vadd.xlane.f32.xlu0 %v5574_v13  ;;  %v5580_v13 = vsel %vm332_vm1, %v5498_v42, 0.0  ;;  %v5583_v50 = vsel %vm332_vm1, %v5499_v5, 0.0  ;;  %v5586_v42 = vsel %vm332_vm1, %v5500_v15, 0.0 }
 0x7a7   : > { %v10303_v32 = vpop.xlane.xlu1 %5372  ;;  %v10305_v62 = vpop.xlane.xlu2 %4990 }
 0x7a8   : > { %11416 = vst [vmem:[#allocation109_spill] sm:$0xff] %v10303_v32 }
 0x7a9   : > { %v10299_v12 = vpop.xlane.xlu0 %4796 }
 0x7ac   : > { %5578 = vadd.xlane.f32.xlu1 %v5577_v11  ;;  %5581 = vadd.xlane.f32.xlu2 %v5580_v13  ;;  %v5470_v11 = vld [vmem:[#allocation2 + $0x189] sm:$0xff] }
 0x7ad   : > { %v5504_v5 = vmul.f32 %v9873_v60, %v5470_v11 }
 0x7ae   : > { %5405 = vadd.xlane.f32.xlu0 %v5404_v17  ;;  %v5589_v17 = vsel %vm332_vm1, %v5501_v2, 0.0  ;;  %v10343_v2 = vld [vmem:[%s11304_s7 + $0x5] ss:$0 sm:$0xff] }
 0x7af   : > { %v10318_v7 = vpop.xlane.xlu1 %4799  ;;  %v10320_v49 = vpop.xlane.xlu2 %5187 }
 0x7b1   : > { %v10314_v16 = vpop.xlane.xlu0 %5566 }
 0x7b2   : > { %11417 = vst [vmem:[#allocation110_spill] sm:$0xff] %v10314_v16  ;;  %v5502_v16 = vmul.f32 %v9873_v60, %v10246_v44  ;;  %v5633_v44 = vld [vmem:[#allocation2 + $0x1a] sm:$0xff] }
 0x7b3   : > { %v5667_v60 = vmul.f32 %v10343_v2, %v5633_v44  ;;  %v5638_v44 = vld [vmem:[#allocation2 + $0x52] sm:$0xff] }
 0x7b4   : > { %5587 = vadd.xlane.f32.xlu1 %v5586_v42  ;;  %5590 = vadd.xlane.f32.xlu2 %v5589_v17  ;;  %v5592_v15 = vsel %vm332_vm1, %v5502_v16, 0.0  ;;  %v5598_v42 = vsel %vm332_vm1, %v5504_v5, 0.0  ;;  %v5634_v17 = vld [vmem:[#allocation2 + $0x22] sm:$0xff] }
 0x7b5   : > { %v5668_v10 = vmul.f32 %v10343_v2, %v5634_v17  ;;  %v5699_v5 = vsel %vm332_vm1, %v5667_v60, 0.0 }
 0x7b6   : > { %5584 = vadd.xlane.f32.xlu0 %v5583_v50  ;;  %v5595_v50 = vsel %vm332_vm1, %v5503_v14, 0.0  ;;  %v5669_v14 = vmul.f32 %v10343_v2, %v5635_v58  ;;  %v5671_v58 = vmul.f32 %v10343_v2, %v5637_v0 }
 0x7b7   : > { %v10333_v29 = vpop.xlane.xlu1 %5184  ;;  %v10335_v32 = vpop.xlane.xlu2 %5375 }
 0x7b9   : > { %v10329_v13 = vpop.xlane.xlu0 %4993 }
 0x7bc   : > { %5596 = vadd.xlane.f32.xlu1 %v5595_v50  ;;  %5599 = vadd.xlane.f32.xlu2 %v5598_v42  ;;  %v5705_v50 = vsel %vm332_vm1, %v5669_v14, 0.0  ;;  %v5636_v42 = vld [vmem:[#allocation2 + $0x3a] sm:$0xff]  ;;  %v5711_v14 = vsel %vm332_vm1, %v5671_v58, 0.0 }
 0x7bd   : > { %v5670_v19 = vmul.f32 %v10343_v2, %v5636_v42  ;;  %v5641_v42 = vld [vmem:[#allocation2 + $0x7a] sm:$0xff] }
 0x7be   : > { %5593 = vadd.xlane.f32.xlu0 %v5592_v15  ;;  %v5702_v15 = vsel %vm332_vm1, %v5668_v10, 0.0  ;;  %v5672_v10 = vmul.f32 %v10343_v2, %v5638_v44  ;;  %v5675_v44 = vmul.f32 %v10343_v2, %v5641_v42 }
 0x7bf   : > { %v10350_v16 = vpop.xlane.xlu1 %4996  ;;  %v10352_v11 = vpop.xlane.xlu2 %4802  ;;  %v5708_v60 = vsel %vm332_vm1, %v5670_v19, 0.0 }
 0x7c1   : > { %v10347_v47 = vpop.xlane.xlu0 %5378 }
 0x7c4   : > { %5703 = vadd.xlane.f32.xlu1 %v5702_v15  ;;  %5706 = vadd.xlane.f32.xlu2 %v5705_v50  ;;  %v5639_v15 = vld [vmem:[#allocation2 + $0x62] sm:$0xff]  ;;  %v5640_v50 = vld [vmem:[#allocation2 + $0x6a] sm:$0xff] }
 0x7c5   : > { %v5673_v40 = vmul.f32 %v10343_v2, %v5639_v15  ;;  %v5674_v19 = vmul.f32 %v10343_v2, %v5640_v50  ;;  %v5644_v15 = vld [vmem:[#allocation2 + $0x9a] sm:$0xff] }
 0x7c6   : > { %5700 = vadd.xlane.f32.xlu0 %v5699_v5  ;;  %v5714_v5 = vsel %vm332_vm1, %v5672_v10, 0.0  ;;  %v5678_v42 = vmul.f32 %v10343_v2, %v5644_v15 }
 0x7c7   : > { %v10362_v53 = vpop.xlane.xlu1 %5193  ;;  %v10364_v17 = vpop.xlane.xlu2 %4999  ;;  %v5717_v58 = vsel %vm332_vm1, %v5673_v40, 0.0  ;;  %v5720_v10 = vsel %vm332_vm1, %v5674_v19, 0.0 }
 0x7c9   : > { %v10359_v45 = vpop.xlane.xlu0 %4805 }
 0x7cc   : > { %5712 = vadd.xlane.f32.xlu1 %v5711_v14  ;;  %5715 = vadd.xlane.f32.xlu2 %v5714_v5  ;;  %v5642_v14 = vld [vmem:[#allocation2 + $0x82] sm:$0xff]  ;;  %v5643_v5 = vld [vmem:[#allocation2 + $0x92] sm:$0xff] }
 0x7cd   : > { %v5676_v20 = vmul.f32 %v10343_v2, %v5642_v14  ;;  %v5677_v40 = vmul.f32 %v10343_v2, %v5643_v5  ;;  %v5647_v14 = vld [vmem:[#allocation2 + $0xc2] sm:$0xff] }
 0x7ce   : > { %5709 = vadd.xlane.f32.xlu0 %v5708_v60  ;;  %v5723_v60 = vsel %vm332_vm1, %v5675_v44, 0.0  ;;  %v5681_v15 = vmul.f32 %v10343_v2, %v5647_v14 }
 0x7cf   : > { %v10374_v43 = vpop.xlane.xlu1 %5381  ;;  %v10376_v0 = vpop.xlane.xlu2 %5384  ;;  %v5726_v19 = vsel %vm332_vm1, %v5676_v20, 0.0  ;;  %v5729_v44 = vsel %vm332_vm1, %v5677_v40, 0.0 }
 0x7d1   : > { %v10371_v61 = vpop.xlane.xlu0 %5190 }
 0x7d4   : > { %5721 = vadd.xlane.f32.xlu1 %v5720_v10  ;;  %5724 = vadd.xlane.f32.xlu2 %v5723_v60  ;;  %v5645_v10 = vld [vmem:[#allocation2 + $0xaa] sm:$0xff]  ;;  %v5646_v60 = vld [vmem:[#allocation2 + $0xb2] sm:$0xff] }
 0x7d5   : > { %v5679_v34 = vmul.f32 %v10343_v2, %v5645_v10  ;;  %v5680_v20 = vmul.f32 %v10343_v2, %v5646_v60  ;;  %v5683_v60 = vmul.f32 %v10343_v2, %v9957_v22 }
 0x7d6   : > { %5718 = vadd.xlane.f32.xlu0 %v5717_v58  ;;  %v5732_v58 = vsel %vm332_vm1, %v5678_v42, 0.0 }
 0x7d7   : > { %v10386_v25 = vpop.xlane.xlu1 %4808  ;;  %v10388_v50 = vpop.xlane.xlu2 %4811  ;;  %v5735_v40 = vsel %vm332_vm1, %v5679_v34, 0.0  ;;  %v5738_v42 = vsel %vm332_vm1, %v5680_v20, 0.0  ;;  %v5684_v34 = vmul.f32 %v10343_v2, %v9959_v48  ;;  %v5747_v20 = vsel %vm332_vm1, %v5683_v60, 0.0 }
 0x7d8   : > { %v5686_v48 = vmul.f32 %v10343_v2, %v10005_v38 }
 0x7d9   : > { %v10383_v55 = vpop.xlane.xlu0 %5002 }
 0x7da   : > { %v5756_v60 = vsel %vm332_vm1, %v5686_v48, 0.0 }
 0x7dc   : > { %5730 = vadd.xlane.f32.xlu1 %v5729_v44  ;;  %5733 = vadd.xlane.f32.xlu2 %v5732_v58  ;;  %v5648_v44 = vld [vmem:[#allocation2 + $0xca] sm:$0xff] }
 0x7dd   : > { %v5682_v10 = vmul.f32 %v10343_v2, %v5648_v44  ;;  %v5687_v44 = vmul.f32 %v10343_v2, %v10067_v52  ;;  %v5689_v52 = vmul.f32 %v10343_v2, %v10116_v30  ;;  %v5692_v30 = vmul.f32 %v10343_v2, %v10146_v54 }
 0x7de   : > { %5727 = vadd.xlane.f32.xlu0 %v5726_v19  ;;  %v5741_v19 = vsel %vm332_vm1, %v5681_v15, 0.0  ;;  %v5750_v15 = vsel %vm332_vm1, %v5684_v34, 0.0  ;;  %v5695_v54 = vmul.f32 %v10343_v2, %v10263_v33  ;;  %v5664_v33 = vld [vmem:[#allocation2 + $0x18a] sm:$0xff] }
 0x7df   : > { %v10398_v37 = vpop.xlane.xlu1 %5005  ;;  %v10400_v5 = vpop.xlane.xlu2 %5196  ;;  %v5744_v14 = vsel %vm332_vm1, %v5682_v10, 0.0  ;;  %v5759_v34 = vsel %vm332_vm1, %v5687_v44, 0.0  ;;  %v5765_v48 = vsel %vm332_vm1, %v5689_v52, 0.0  ;;  %v5774_v52 = vsel %vm332_vm1, %v5692_v30, 0.0 }
 0x7e1   : > { %v10395_v21 = vpop.xlane.xlu0 %5199 }
 0x7e4   : > { %5739 = vadd.xlane.f32.xlu1 %v5738_v42  ;;  %5742 = vadd.xlane.f32.xlu2 %v5741_v19  ;;  %v5685_v42 = vmul.f32 %v10343_v2, %v10007_v8 }
 0x7e6   : > { %5736 = vadd.xlane.f32.xlu0 %v5735_v40  ;;  %v5753_v10 = vsel %vm332_vm1, %v5685_v42, 0.0 }
 0x7e7   : > { %v10410_v9 = vpop.xlane.xlu1 %5390  ;;  %v10412_v28 = vpop.xlane.xlu2 %5008 }
 0x7e9   : > { %v10407_v58 = vpop.xlane.xlu0 %5387 }
 0x7ec   : > { %5748 = vadd.xlane.f32.xlu1 %v5747_v20  ;;  %5751 = vadd.xlane.f32.xlu2 %v5750_v15  ;;  %v5690_v15 = vmul.f32 %v10343_v2, %v10098_v56  ;;  %v5693_v56 = vmul.f32 %v10343_v2, %v10206_v31  ;;  %v5696_v31 = vmul.f32 %v10343_v2, %v10244_v41 }
 0x7ee   : > { %5745 = vadd.xlane.f32.xlu0 %v5744_v14  ;;  %v5688_v14 = vmul.f32 %v10343_v2, %v10050_v18  ;;  %v5768_v44 = vsel %vm332_vm1, %v5690_v15, 0.0  ;;  %v5777_v15 = vsel %vm332_vm1, %v5693_v56, 0.0  ;;  %v5783_v56 = vsel %vm332_vm1, %v5695_v54, 0.0 }
 0x7ef   : > { %v10425_v19 = vpop.xlane.xlu1 %4817  ;;  %v10427_v22 = vpop.xlane.xlu2 %5205 }
 0x7f0   : > { %v5762_v42 = vsel %vm332_vm1, %v5688_v14, 0.0 }
 0x7f1   : > { %v10421_v40 = vpop.xlane.xlu0 %4814 }
 0x7f4   : > { %5757 = vadd.xlane.f32.xlu1 %v5756_v60  ;;  %5760 = vadd.xlane.f32.xlu2 %v5759_v34 }
 0x7f6   : > { %5754 = vadd.xlane.f32.xlu0 %v5753_v10  ;;  %v5691_v10 = vmul.f32 %v10343_v2, %v10150_v36  ;;  %v5694_v36 = vmul.f32 %v10343_v2, %v10187_v63  ;;  %v10474_v63 = vld [vmem:[%s11304_s7 + $0x6] ss:$0 sm:$0xff] }
 0x7f7   : > { %v10440_v20 = vpop.xlane.xlu1 %5202  ;;  %v10442_v38 = vpop.xlane.xlu2 %5393 }
 0x7f8   : > { %11418 = vst [vmem:[#allocation111_spill] sm:$0xff] %v10440_v20  ;;  %v5771_v14 = vsel %vm332_vm1, %v5691_v10, 0.0  ;;  %v5780_v30 = vsel %vm332_vm1, %v5694_v36, 0.0 }
 0x7f9   : > { %v10436_v8 = vpop.xlane.xlu0 %5011  ;;  %11419 = vst [vmem:[#allocation112_spill] sm:$0xff] %v10442_v38 }
 0x7fc   : > { %5766 = vadd.xlane.f32.xlu1 %v5765_v48  ;;  %5769 = vadd.xlane.f32.xlu2 %v5768_v44 }
 0x7fe   : > { %5763 = vadd.xlane.f32.xlu0 %v5762_v42 }
 0x7ff   : > { %v5015_v60 = vpop.xlane.xlu1 %5014  ;;  %v4821_v34 = vpop.xlane.xlu2 %4820 }
 0x800   : > { %v5049_v41 = vadd.f32 %v5015_v60, %v4821_v34  ;;  %v5828_v60 = vld [vmem:[#allocation2 + $0x38] sm:$0xff]  ;;  %v5829_v34 = vld [vmem:[#allocation2 + $0x48] sm:$0xff] }
 0x801   : > { %v10451_v18 = vpop.xlane.xlu0 %5396 }
 0x802   : > { %11420 = vst [vmem:[#allocation113_spill] sm:$0xff] %v10451_v18  ;;  %v5836_v18 = vld [vmem:[#allocation2 + $0x98] sm:$0xff] }
 0x804   : > { %5775 = vadd.xlane.f32.xlu1 %v5774_v52  ;;  %5778 = vadd.xlane.f32.xlu2 %v5777_v15  ;;  %v5663_v52 = vld [vmem:[#allocation2 + $0x182] sm:$0xff]  ;;  %v5827_v15 = vld [vmem:[#allocation2 + $0x30] sm:$0xff] }
 0x805   : > { %v5697_v36 = vmul.f32 %v10343_v2, %v5663_v52  ;;  %v5830_v52 = vld [vmem:[#allocation2 + $0x50] sm:$0xff] }
 0x806   : > { %5772 = vadd.xlane.f32.xlu0 %v5771_v14  ;;  %v5786_v14 = vsel %vm332_vm1, %v5696_v31, 0.0  ;;  %v5698_v31 = vmul.f32 %v10343_v2, %v5664_v33  ;;  %v5862_v2 = vmul.f32 %v10474_v63, %v5828_v60 }
 0x807   : > { %v5212_v48 = vpop.xlane.xlu1 %5211  ;;  %v5018_v44 = vpop.xlane.xlu2 %5017  ;;  %v5789_v35 = vsel %vm332_vm1, %v5697_v36, 0.0 }
 0x808   : > { %v5896_v36 = vsel %vm332_vm1, %v5862_v2, 0.0 }
 0x809   : > { %v4824_v42 = vpop.xlane.xlu0 %4823 }
 0x80a   : > { %v5050_v10 = vadd.f32 %v5018_v44, %v4824_v42 }
 0x80c   : > { %v5244_v23 = vadd.f32 %v5212_v48, %v5050_v10  ;;  %5784 = vadd.xlane.f32.xlu1 %v5783_v56  ;;  %5787 = vadd.xlane.f32.xlu2 %v5786_v14  ;;  %v5861_v10 = vmul.f32 %v10474_v63, %v5827_v15  ;;  %v5792_v56 = vsel %vm332_vm1, %v5698_v31, 0.0  ;;  %v5832_v31 = vld [vmem:[#allocation2 + $0x68] sm:$0xff] }
 0x80d   : > { %v5866_v2 = vmul.f32 %v10474_v63, %v5832_v31  ;;  %v5048_v31 = vadd.f32 %v10436_v8, %v10425_v19  ;;  %v5838_v19 = vld [vmem:[#allocation2 + $0xb0] sm:$0xff]  ;;  %v5839_v8 = vld [vmem:[#allocation2 + $0xc0] sm:$0xff] }
 0x80e   : > { %5781 = vadd.xlane.f32.xlu0 %v5780_v30  ;;  %v5893_v14 = vsel %vm332_vm1, %v5861_v10, 0.0  ;;  %v5833_v10 = vld [vmem:[#allocation2 + $0x78] sm:$0xff] }
 0x80f   : > { %v10477_v48 = vpop.xlane.xlu1 %5399  ;;  %v5403_v44 = vpop.xlane.xlu2 %5402 }
 0x811   : > { %v5209_v42 = vpop.xlane.xlu0 %5208 }
 0x812   : > { %v5243_v54 = vadd.f32 %v5209_v42, %v5049_v41  ;;  %v5863_v41 = vmul.f32 %v10474_v63, %v5829_v34  ;;  %v5864_v42 = vmul.f32 %v10474_v63, %v5830_v52 }
 0x814   : > { %v10481_v30 = vadd.f32 %v5403_v44, %v5243_v54  ;;  %5793 = vadd.xlane.f32.xlu1 %v5792_v56  ;;  %5894 = vadd.xlane.f32.xlu2 %v5893_v14  ;;  %v5902_v44 = vsel %vm332_vm1, %v5864_v42, 0.0  ;;  %v5831_v54 = vld [vmem:[#allocation2 + $0x60] sm:$0xff] }
 0x815   : > { %v5865_v14 = vmul.f32 %v10474_v63, %v5831_v54  ;;  %v5835_v54 = vld [vmem:[#allocation2 + $0x90] sm:$0xff] }
 0x816   : > { %5790 = vadd.xlane.f32.xlu0 %v5789_v35  ;;  %v5899_v35 = vsel %vm332_vm1, %v5863_v41, 0.0  ;;  %v5867_v41 = vmul.f32 %v10474_v63, %v5833_v10 }
 0x817   : > { %v10489_v33 = vpop.xlane.xlu1 %5569  ;;  %v10491_v15 = vpop.xlane.xlu2 %5572  ;;  %v5905_v42 = vsel %vm332_vm1, %v5865_v14, 0.0  ;;  %v5869_v14 = vmul.f32 %v10474_v63, %v5835_v54 }
 0x819   : > { %v10486_v27 = vpop.xlane.xlu0 %5575 }
 0x81c   : > { %5900 = vadd.xlane.f32.xlu1 %v5899_v35  ;;  %5903 = vadd.xlane.f32.xlu2 %v5902_v44  ;;  %v5911_v35 = vsel %vm332_vm1, %v5867_v41, 0.0  ;;  %v5834_v44 = vld [vmem:[#allocation2 + $0x80] sm:$0xff] }
 0x81e   : > { %5897 = vadd.xlane.f32.xlu0 %v5896_v36  ;;  %v5908_v36 = vsel %vm332_vm1, %v5866_v2, 0.0  ;;  %v5870_v2 = vmul.f32 %v10474_v63, %v5836_v18 }
 0x81f   : > { %v10499_v60 = vpop.xlane.xlu1 %5578  ;;  %v10501_v34 = vpop.xlane.xlu2 %5581 }
 0x821   : > { %v5406_v56 = vpop.xlane.xlu0 %5405 }
 0x822   : > { %v5438_v52 = vadd.f32 %v5406_v56, %v5244_v23  ;;  %v5868_v23 = vmul.f32 %v10474_v63, %v5834_v44  ;;  %v5837_v44 = vld [vmem:[#allocation2 + $0xa8] sm:$0xff] }
 0x823   : > { %v5871_v54 = vmul.f32 %v10474_v63, %v5837_v44 }
 0x824   : > { %5909 = vadd.xlane.f32.xlu1 %v5908_v36  ;;  %5912 = vadd.xlane.f32.xlu2 %v5911_v35  ;;  %v5914_v41 = vsel %vm332_vm1, %v5868_v23, 0.0  ;;  %v5917_v36 = vsel %vm332_vm1, %v5869_v14, 0.0  ;;  %v5920_v35 = vsel %vm332_vm1, %v5870_v2, 0.0 }
 0x826   : > { %5906 = vadd.xlane.f32.xlu0 %v5905_v42  ;;  %v5242_v42 = vadd.f32 %v10427_v22, %v5048_v31  ;;  %v5872_v22 = vmul.f32 %v10474_v63, %v5838_v19  ;;  %v5873_v31 = vmul.f32 %v10474_v63, %v5839_v8 }
 0x827   : > { %v10513_v10 = vpop.xlane.xlu1 %5587  ;;  %v10515_v56 = vpop.xlane.xlu2 %5590 }
 0x828   : > { %11421 = vst [vmem:[#allocation114_spill] sm:$0xff] %v10513_v10 }
 0x829   : > { %v10508_v38 = vpop.xlane.xlu0 %5584  ;;  %11422 = vst [vmem:[#allocation115_spill] sm:$0xff] %v10515_v56  ;;  %v5436_v56 = vadd.f32 %v10477_v48, %v5242_v42  ;;  %v5926_v48 = vsel %vm332_vm1, %v5872_v22, 0.0  ;;  %v5929_v42 = vsel %vm332_vm1, %v5873_v31, 0.0  ;;  %v5843_v22 = vld [vmem:[#allocation2 + $0xf0] sm:$0xff]  ;;  %v5844_v31 = vld [vmem:[#allocation2 + $0xf8] sm:$0xff] }
 0x82c   : > { %5918 = vadd.xlane.f32.xlu1 %v5917_v36  ;;  %5921 = vadd.xlane.f32.xlu2 %v5920_v35  ;;  %v5840_v36 = vld [vmem:[#allocation2 + $0xc8] sm:$0xff] }
 0x82d   : > { %v5874_v44 = vmul.f32 %v10474_v63, %v5840_v36 }
 0x82e   : > { %5915 = vadd.xlane.f32.xlu0 %v5914_v41  ;;  %v5923_v41 = vsel %vm332_vm1, %v5871_v54, 0.0 }
 0x82f   : > { %v5597_v18 = vpop.xlane.xlu1 %5596  ;;  %v5600_v20 = vpop.xlane.xlu2 %5599  ;;  %v5932_v8 = vsel %vm332_vm1, %v5874_v44, 0.0 }
 0x830   : > { %v10530_v14 = vadd.f32 %v5597_v18, %v10481_v30  ;;  %v10532_v2 = vadd.f32 %v5600_v20, %v5438_v52 }
 0x831   : > { %v5594_v10 = vpop.xlane.xlu0 %5593 }
 0x832   : > { %v10525_v23 = vadd.f32 %v5594_v10, %v5436_v56  ;;  %v5841_v10 = vld [vmem:[#allocation2 + $0xd8] sm:$0xff]  ;;  %v5842_v56 = vld [vmem:[#allocation2 + $0xe0] sm:$0xff] }
 0x833   : > { %v5875_v52 = vmul.f32 %v10474_v63, %v5841_v10  ;;  %v5876_v19 = vmul.f32 %v10474_v63, %v5842_v56  ;;  %v5878_v56 = vmul.f32 %v10474_v63, %v5844_v31 }
 0x834   : > { %5927 = vadd.xlane.f32.xlu1 %v5926_v48  ;;  %5930 = vadd.xlane.f32.xlu2 %v5929_v42  ;;  %v5877_v42 = vmul.f32 %v10474_v63, %v5843_v22  ;;  %v5848_v22 = vld [vmem:[#allocation2 + $0x128] sm:$0xff] }
 0x835   : > { %v5935_v54 = vsel %vm332_vm1, %v5875_v52, 0.0  ;;  %v5938_v18 = vsel %vm332_vm1, %v5876_v19, 0.0  ;;  %v5944_v19 = vsel %vm332_vm1, %v5878_v56, 0.0 }
 0x836   : > { %5924 = vadd.xlane.f32.xlu0 %v5923_v41  ;;  %v5845_v41 = vld [vmem:[#allocation2 + $0x108] sm:$0xff]  ;;  %v5941_v52 = vsel %vm332_vm1, %v5877_v42, 0.0  ;;  %v5882_v42 = vmul.f32 %v10474_v63, %v5848_v22 }
 0x837   : > { %v10540_v30 = vpop.xlane.xlu1 %5703  ;;  %v10542_v20 = vpop.xlane.xlu2 %5706  ;;  %v5879_v44 = vmul.f32 %v10474_v63, %v5845_v41 }
 0x839   : > { %v10537_v35 = vpop.xlane.xlu0 %5700 }
 0x83c   : > { %5936 = vadd.xlane.f32.xlu1 %v5935_v54  ;;  %5939 = vadd.xlane.f32.xlu2 %v5938_v18  ;;  %v5846_v54 = vld [vmem:[#allocation2 + $0x110] sm:$0xff]  ;;  %v5847_v18 = vld [vmem:[#allocation2 + $0x120] sm:$0xff] }
 0x83d   : > { %v5881_v41 = vmul.f32 %v10474_v63, %v5847_v18 }
 0x83e   : > { %5933 = vadd.xlane.f32.xlu0 %v5932_v8  ;;  %v5947_v8 = vsel %vm332_vm1, %v5879_v44, 0.0 }
 0x83f   : > { %v10552_v36 = vpop.xlane.xlu1 %5712  ;;  %v10554_v10 = vpop.xlane.xlu2 %5715  ;;  %v5953_v44 = vsel %vm332_vm1, %v5881_v41, 0.0 }
 0x840   : > { %11424 = vst [vmem:[#allocation117_spill] sm:$0xff] %v10552_v36 }
 0x841   : > { %v10549_v48 = vpop.xlane.xlu0 %5709  ;;  %11425 = vst [vmem:[#allocation118_spill] sm:$0xff] %v10554_v10  ;;  %v5880_v10 = vmul.f32 %v10474_v63, %v5846_v54 }
 0x842   : > { %11423 = vst [vmem:[#allocation116_spill] sm:$0xff] %v10549_v48 }
 0x843   : > { %v5950_v56 = vsel %vm332_vm1, %v5880_v10, 0.0  ;;  %v5885_v10 = vmul.f32 %v10474_v63, %v10167_v24  ;;  %v5887_v24 = vmul.f32 %v10474_v63, %v10223_v57  ;;  %v5889_v57 = vmul.f32 %v10474_v63, %v10265_v59  ;;  %v6021_v59 = vld [vmem:[#allocation2 + $0x31] sm:$0xff] }
 0x844   : > { %5945 = vadd.xlane.f32.xlu1 %v5944_v19  ;;  %5948 = vadd.xlane.f32.xlu2 %v5947_v8  ;;  %v5849_v19 = vld [vmem:[#allocation2 + $0x138] sm:$0xff]  ;;  %v5850_v8 = vld [vmem:[#allocation2 + $0x140] sm:$0xff] }
 0x845   : > { %v5884_v22 = vmul.f32 %v10474_v63, %v5850_v8 }
 0x846   : > { %5942 = vadd.xlane.f32.xlu0 %v5941_v52  ;;  %v5956_v52 = vsel %vm332_vm1, %v5882_v42, 0.0 }
 0x847   : > { %v10564_v36 = vpop.xlane.xlu1 %5721  ;;  %v10566_v31 = vpop.xlane.xlu2 %5724  ;;  %v5962_v42 = vsel %vm332_vm1, %v5884_v22, 0.0 }
 0x848   : > { %11426 = vst [vmem:[#allocation119_spill] sm:$0xff] %v10564_v36  ;;  %v5883_v36 = vmul.f32 %v10474_v63, %v5849_v19 }
 0x849   : > { %v10561_v48 = vpop.xlane.xlu0 %5718  ;;  %11427 = vst [vmem:[#allocation120_spill] sm:$0xff] %v10566_v31 }
 0x84a   : > { %v5959_v41 = vsel %vm332_vm1, %v5883_v36, 0.0  ;;  %v5888_v36 = vmul.f32 %v10474_v63, %v10242_v6 }
 0x84c   : > { %5954 = vadd.xlane.f32.xlu1 %v5953_v44  ;;  %5957 = vadd.xlane.f32.xlu2 %v5956_v52  ;;  %v5886_v52 = vmul.f32 %v10474_v63, %v10185_v4 }
 0x84e   : > { %5951 = vadd.xlane.f32.xlu0 %v5950_v56  ;;  %v5965_v56 = vsel %vm332_vm1, %v5885_v10, 0.0  ;;  %v5968_v22 = vsel %vm332_vm1, %v5886_v52, 0.0  ;;  %v5857_v10 = vld [vmem:[#allocation2 + $0x198] sm:$0xff]  ;;  %v5890_v52 = vmul.f32 %v10474_v63, %v10297_v26  ;;  %v5040_v26 = vadd.f32 %v10286_v46, %v10254_v3 }
 0x84f   : > { %v10576_v31 = vpop.xlane.xlu1 %5730  ;;  %v10578_v18 = vpop.xlane.xlu2 %5733  ;;  %v5891_v4 = vmul.f32 %v10474_v63, %v5857_v10  ;;  %v10618_v10 = vld [vmem:[%s11304_s7 + $0x7] ss:$0 sm:$0xff] }
 0x850   : > { %v5234_v3 = vadd.f32 %v10267_v39, %v5040_v26  ;;  %v6025_v39 = vld [vmem:[#allocation2 + $0x61] sm:$0xff] }
 0x851   : > { %v10573_v54 = vpop.xlane.xlu0 %5727 }
 0x854   : > { %5963 = vadd.xlane.f32.xlu1 %v5962_v42  ;;  %5966 = vadd.xlane.f32.xlu2 %v5965_v56  ;;  %v5974_v42 = vsel %vm332_vm1, %v5888_v36, 0.0  ;;  %v5858_v36 = vld [vmem:[#allocation2 + $0x1a0] sm:$0xff] }
 0x856   : > { %5960 = vadd.xlane.f32.xlu0 %v5959_v41  ;;  %v5971_v41 = vsel %vm332_vm1, %v5887_v24, 0.0  ;;  %v5983_v24 = vsel %vm332_vm1, %v5891_v4, 0.0  ;;  %v5042_v4 = vadd.f32 %v10329_v13, %v10318_v7  ;;  %v5428_v13 = vadd.f32 %v10335_v32, %v5234_v3 }
 0x857   : > { %v10590_v19 = vpop.xlane.xlu1 %5739  ;;  %v10592_v8 = vpop.xlane.xlu2 %5742  ;;  %v5044_v32 = vadd.f32 %v10364_v17, %v10359_v45  ;;  %v5045_v45 = vadd.f32 %v10383_v55, %v10386_v25 }
 0x858   : > { %11428 = vst [vmem:[#allocation121_spill] sm:$0xff] %v10592_v8  ;;  %v5236_v7 = vadd.f32 %v10320_v49, %v5042_v4  ;;  %v5622_v49 = vadd.f32 %v10489_v33, %v5428_v13 }
 0x859   : > { %v10586_v44 = vpop.xlane.xlu0 %5736 }
 0x85c   : > { %5972 = vadd.xlane.f32.xlu1 %v5971_v41  ;;  %5975 = vadd.xlane.f32.xlu2 %v5974_v42  ;;  %v5980_v41 = vsel %vm332_vm1, %v5890_v52, 0.0  ;;  %v6022_v42 = vld [vmem:[#allocation2 + $0x39] sm:$0xff] }
 0x85e   : > { %5969 = vadd.xlane.f32.xlu0 %v5968_v22  ;;  %v5977_v22 = vsel %vm332_vm1, %v5889_v57, 0.0 }
 0x85f   : > { %v10606_v8 = vpop.xlane.xlu1 %5748  ;;  %v10608_v6 = vpop.xlane.xlu2 %5751 }
 0x860   : > { %11429 = vst [vmem:[#allocation122_spill] sm:$0xff] %v10606_v8  ;;  %v6055_v8 = vmul.f32 %v10618_v10, %v6021_v59  ;;  %v6023_v59 = vld [vmem:[#allocation2 + $0x49] sm:$0xff] }
 0x861   : > { %v10602_v56 = vpop.xlane.xlu0 %5745  ;;  %11430 = vst [vmem:[#allocation123_spill] sm:$0xff] %v10608_v6  ;;  %v5892_v6 = vmul.f32 %v10474_v63, %v5858_v36 }
 0x862   : > { %v6087_v36 = vsel %vm332_vm1, %v6055_v8, 0.0 }
 0x863   : > { %v5986_v63 = vsel %vm332_vm1, %v5892_v6, 0.0 }
 0x864   : > { %5981 = vadd.xlane.f32.xlu1 %v5980_v41  ;;  %5984 = vadd.xlane.f32.xlu2 %v5983_v24  ;;  %v6056_v24 = vmul.f32 %v10618_v10, %v6022_v42  ;;  %v5041_v41 = vadd.f32 %v10305_v62, %v10299_v12  ;;  %v5430_v62 = vadd.f32 %v10374_v43, %v5236_v7  ;;  %v6024_v12 = vld [vmem:[#allocation2 + $0x51] sm:$0xff]  ;;  %v6027_v7 = vld [vmem:[#allocation2 + $0x79] sm:$0xff] }
 0x866   : > { %5978 = vadd.xlane.f32.xlu0 %v5977_v22  ;;  %v5235_v46 = vadd.f32 %v10333_v29, %v5041_v41  ;;  %v5043_v29 = vadd.f32 %v10350_v16, %v10352_v11  ;;  %v5624_v6 = vadd.f32 %v10486_v27, %v5430_v62  ;;  %v6058_v16 = vmul.f32 %v10618_v10, %v6024_v12 }
 0x867   : > { %v10627_v52 = vpop.xlane.xlu1 %5757  ;;  %v10629_v22 = vpop.xlane.xlu2 %5760  ;;  %v6059_v11 = vmul.f32 %v10618_v10, %v6025_v39  ;;  %v5239_v27 = vadd.f32 %v10400_v5, %v5045_v45  ;;  %v6028_v5 = vld [vmem:[#allocation2 + $0x81] sm:$0xff] }
 0x868   : > { %11431 = vst [vmem:[#allocation124_spill] sm:$0xff] %v10629_v22  ;;  %v6090_v22 = vsel %vm332_vm1, %v6056_v24, 0.0  ;;  %v5429_v42 = vadd.f32 %v10347_v47, %v5235_v46  ;;  %v6057_v47 = vmul.f32 %v10618_v10, %v6023_v59  ;;  %v5237_v43 = vadd.f32 %v10371_v61, %v5043_v29  ;;  %v6026_v46 = vld [vmem:[#allocation2 + $0x69] sm:$0xff] }
 0x869   : > { %v10625_v57 = vpop.xlane.xlu0 %5754  ;;  %v6099_v3 = vsel %vm332_vm1, %v6059_v11, 0.0  ;;  %v5433_v55 = vadd.f32 %v10410_v9, %v5239_v27  ;;  %v6062_v39 = vmul.f32 %v10618_v10, %v6028_v5  ;;  %v11432_v29 = vld [vmem:[#allocation111_spill] sm:$0xff] }
 0x86a   : > { %v5623_v8 = vadd.f32 %v10491_v15, %v5429_v42  ;;  %v5238_v15 = vadd.f32 %v10362_v53, %v5044_v32  ;;  %v6093_v61 = vsel %vm332_vm1, %v6057_v47, 0.0  ;;  %v5431_v41 = vadd.f32 %v10376_v0, %v5237_v43  ;;  %v11437_v11 = vld [vmem:[#allocation115_spill] sm:$0xff] }
 0x86b   : > { %v5046_v53 = vadd.f32 %v10398_v37, %v10388_v50  ;;  %v6060_v42 = vmul.f32 %v10618_v10, %v6026_v46  ;;  %v5047_v37 = vadd.f32 %v10412_v28, %v10421_v40  ;;  %v6108_v47 = vsel %vm332_vm1, %v6062_v39, 0.0  ;;  %v6029_v28 = vld [vmem:[#allocation2 + $0x91] sm:$0xff] }
 0x86c   : > { %6088 = vadd.xlane.f32.xlu1 %v6087_v36  ;;  %6091 = vadd.xlane.f32.xlu2 %v6090_v22  ;;  %v5432_v25 = vadd.f32 %v10407_v58, %v5238_v15  ;;  %v5625_v13 = vadd.f32 %v10499_v60, %v5431_v41  ;;  %v5627_v36 = vadd.f32 %v10508_v38, %v5433_v55  ;;  %v11434_v40 = vld [vmem:[#allocation113_spill] sm:$0xff] }
 0x86d   : > { %v6061_v58 = vmul.f32 %v10618_v10, %v6027_v7  ;;  %v5240_v38 = vadd.f32 %v10395_v21, %v5046_v53  ;;  %v6102_v32 = vsel %vm332_vm1, %v6060_v42, 0.0  ;;  %v6030_v21 = vld [vmem:[#allocation2 + $0x99] sm:$0xff]  ;;  %v6063_v15 = vmul.f32 %v10618_v10, %v6029_v28 }
 0x86e   : > { %5987 = vadd.xlane.f32.xlu0 %v5986_v63  ;;  %v6096_v63 = vsel %vm332_vm1, %v6058_v16, 0.0  ;;  %v5626_v0 = vadd.f32 %v10501_v34, %v5432_v25  ;;  %v5019_v34 = vadd.f32 %v9709_v1, %v9669_v51  ;;  %v11436_v1 = vld [vmem:[#allocation8_spill] sm:$0xff]  ;;  %v11438_v55 = vld [vmem:[#allocation13_spill] sm:$0xff] }
 0x86f   : > { %v5767_v4 = vpop.xlane.xlu1 %5766  ;;  %v5770_v22 = vpop.xlane.xlu2 %5769  ;;  %v6111_v53 = vsel %vm332_vm1, %v6063_v15, 0.0 }
 0x870   : > { %v10659_v17 = vadd.f32 %v5767_v4, %v5623_v8  ;;  %v10661_v33 = vadd.f32 %v5770_v22, %v5624_v6  ;;  %v11433_v8 = vld [vmem:[#allocation112_spill] sm:$0xff]  ;;  %v11435_v22 = vld [vmem:[#allocation114_spill] sm:$0xff]  ;;  %v5213_v16 = vadd.f32 %v11436_v1, %v5019_v34 }
 0x871   : > { %v5764_v26 = vpop.xlane.xlu0 %5763  ;;  %v5434_v6 = vadd.f32 %v11433_v8, %v5240_v38  ;;  %v6031_v4 = vld [vmem:[#allocation2 + $0xa9] sm:$0xff]  ;;  %v11444_v38 = vld [vmem:[#allocation21_spill] sm:$0xff] }
 0x872   : > { %v10653_v24 = vadd.f32 %v5764_v26, %v5622_v49  ;;  %v5241_v49 = vadd.f32 %v11432_v29, %v5047_v37  ;;  %v6105_v26 = vsel %vm332_vm1, %v6061_v58, 0.0  ;;  %v6065_v46 = vmul.f32 %v10618_v10, %v6031_v4  ;;  %v11442_v58 = vld [vmem:[#allocation12_spill] sm:$0xff]  ;;  %v11443_v37 = vld [vmem:[#allocation15_spill] sm:$0xff]  ;;  %v11445_v29 = vld [vmem:[#allocation18_spill] sm:$0xff] }
 0x873   : > { %v5628_v51 = vadd.f32 %v11435_v22, %v5434_v6  ;;  %v5407_v25 = vadd.f32 %v11438_v55, %v5213_v16  ;;  %v5022_v34 = vadd.f32 %v11444_v38, %v11443_v37  ;;  %v11446_v8 = vld [vmem:[#allocation17_spill] sm:$0xff]  ;;  %v11448_v16 = vld [vmem:[#allocation16_spill] sm:$0xff] }
 0x874   : > { %6097 = vadd.xlane.f32.xlu1 %v6096_v63  ;;  %6100 = vadd.xlane.f32.xlu2 %v6099_v3  ;;  %v5435_v43 = vadd.f32 %v11434_v40, %v5241_v49  ;;  %v6064_v3 = vmul.f32 %v10618_v10, %v6030_v21  ;;  %v6117_v42 = vsel %vm332_vm1, %v6065_v46, 0.0  ;;  %v6033_v49 = vld [vmem:[#allocation2 + $0xc1] sm:$0xff]  ;;  %v11452_v46 = vld [vmem:[#allocation28_spill] sm:$0xff] }
 0x875   : > { %v11447_v40 = vld [vmem:[#allocation14_spill] sm:$0xff]  ;;  %v11458_v37 = vld [vmem:[#allocation32_spill] sm:$0xff] }
 0x876   : > { %6094 = vadd.xlane.f32.xlu0 %v6093_v61  ;;  %v5629_v45 = vadd.f32 %v11437_v11, %v5435_v43  ;;  %v5216_v11 = vadd.f32 %v11448_v16, %v5022_v34  ;;  %v6036_v34 = vld [vmem:[#allocation2 + $0xe1] sm:$0xff] }
 0x877   : > { %v5776_v62 = vpop.xlane.xlu1 %5775  ;;  %v5779_v9 = vpop.xlane.xlu2 %5778 }
 0x878   : > { %v10683_v50 = vadd.f32 %v5776_v62, %v5626_v0  ;;  %v10685_v60 = vadd.f32 %v5779_v9, %v5627_v36  ;;  %v11440_v0 = vld [vmem:[#allocation9_spill] sm:$0xff]  ;;  %v11441_v9 = vld [vmem:[#allocation11_spill] sm:$0xff] }
 0x879   : > { %v5773_v59 = vpop.xlane.xlu0 %5772  ;;  %v6032_v62 = vld [vmem:[#allocation2 + $0xb1] sm:$0xff]  ;;  %v5021_v39 = vadd.f32 %v11442_v58, %v11441_v9 }
 0x87a   : > { %v10677_v12 = vadd.f32 %v5773_v59, %v5625_v13  ;;  %v11439_v13 = vld [vmem:[#allocation10_spill] sm:$0xff]  ;;  %v6114_v59 = vsel %vm332_vm1, %v6064_v3, 0.0  ;;  %v6066_v28 = vmul.f32 %v10618_v10, %v6032_v62  ;;  %v11451_v3 = vld [vmem:[#allocation27_spill] sm:$0xff]  ;;  %v11457_v58 = vld [vmem:[#allocation25_spill] sm:$0xff] }
 0x87b   : > { %v5020_v36 = vadd.f32 %v11440_v0, %v11439_v13  ;;  %v5215_v6 = vadd.f32 %v11446_v8, %v5021_v39  ;;  %v5024_v55 = vadd.f32 %v11452_v46, %v11451_v3  ;;  %v6035_v13 = vld [vmem:[#allocation2 + $0xd9] sm:$0xff]  ;;  %v11454_v0 = vld [vmem:[#allocation20_spill] sm:$0xff] }
 0x87c   : > { %6106 = vadd.xlane.f32.xlu1 %v6105_v26  ;;  %6109 = vadd.xlane.f32.xlu2 %v6108_v47  ;;  %v6069_v8 = vmul.f32 %v10618_v10, %v6035_v13 }
 0x87d   : > { %v5214_v43 = vadd.f32 %v11447_v40, %v5020_v36 }
 0x87e   : > { %6103 = vadd.xlane.f32.xlu0 %v6102_v32  ;;  %v6034_v32 = vld [vmem:[#allocation2 + $0xc9] sm:$0xff] }
 0x87f   : > { %v5785_v61 = vpop.xlane.xlu1 %5784  ;;  %v5788_v41 = vpop.xlane.xlu2 %5787  ;;  %v6068_v1 = vmul.f32 %v10618_v10, %v6034_v32 }
 0x880   : > { %v10705_v7 = vadd.f32 %v5785_v61, %v5629_v45  ;;  %v10708_v5 = vadd.f32 %v5788_v41, %v10525_v23  ;;  %v5601_v23 = vadd.f32 %v11445_v29, %v5407_v25  ;;  %v11450_v61 = vld [vmem:[#allocation24_spill] sm:$0xff] }
 0x881   : > { %v5782_v27 = vpop.xlane.xlu0 %5781  ;;  %v5409_v41 = vadd.f32 %v11450_v61, %v5215_v6  ;;  %v6126_v9 = vsel %vm332_vm1, %v6068_v1, 0.0  ;;  %v6037_v29 = vld [vmem:[#allocation2 + $0xf1] sm:$0xff] }
 0x882   : > { %v10700_v63 = vadd.f32 %v5782_v27, %v5628_v51  ;;  %v5795_v26 = vadd.f32 %v10537_v35, %v5601_v23  ;;  %v6067_v51 = vmul.f32 %v10618_v10, %v6033_v49  ;;  %v11449_v27 = vld [vmem:[#allocation19_spill] sm:$0xff]  ;;  %v11459_v23 = vld [vmem:[#allocation30_spill] sm:$0xff]  ;;  %v11460_v6 = vld [vmem:[#allocation33_spill] sm:$0xff] }
 0x883   : > { %v5408_v15 = vadd.f32 %v11449_v27, %v5214_v43  ;;  %v5603_v39 = vadd.f32 %v11457_v58, %v5409_v41  ;;  %v6070_v27 = vmul.f32 %v10618_v10, %v6036_v34  ;;  %v11465_v41 = vld [vmem:[#allocation41_spill] sm:$0xff] }
 0x884   : > { %6115 = vadd.xlane.f32.xlu1 %v6114_v59  ;;  %6118 = vadd.xlane.f32.xlu2 %v6117_v42  ;;  %v11455_v59 = vld [vmem:[#allocation22_spill] sm:$0xff]  ;;  %v11456_v42 = vld [vmem:[#allocation23_spill] sm:$0xff]  ;;  %v6123_v62 = vsel %vm332_vm1, %v6067_v51, 0.0 }
 0x885   : > { %v5602_v36 = vadd.f32 %v11454_v0, %v5408_v15  ;;  %v5797_v43 = vadd.f32 %v10542_v20, %v5603_v39  ;;  %v11464_v15 = vld [vmem:[#allocation37_spill] sm:$0xff]  ;;  %v11466_v20 = vld [vmem:[#allocation31_spill] sm:$0xff]  ;;  %v11469_v0 = vld [vmem:[#allocation42_spill] sm:$0xff] }
 0x886   : > { %6112 = vadd.xlane.f32.xlu0 %v6111_v53  ;;  %v6120_v53 = vsel %vm332_vm1, %v6066_v28, 0.0  ;;  %v11462_v28 = vld [vmem:[#allocation26_spill] sm:$0xff]  ;;  %v11471_v39 = vld [vmem:[#allocation40_spill] sm:$0xff] }
 0x887   : > { %v5794_v21 = vpop.xlane.xlu1 %5793  ;;  %v5895_v4 = vpop.xlane.xlu2 %5894  ;;  %v5796_v32 = vadd.f32 %v10540_v30, %v5602_v36  ;;  %v5218_v40 = vadd.f32 %v11462_v28, %v5024_v55  ;;  %v6071_v30 = vmul.f32 %v10618_v10, %v6037_v29  ;;  %v6038_v58 = vld [vmem:[#allocation2 + $0xf9] sm:$0xff] }
 0x888   : > { %v10731_v45 = vadd.f32 %v5794_v21, %v10532_v2  ;;  %v10733_v35 = vadd.f32 %v5895_v4, %v5795_v26  ;;  %v5023_v2 = vadd.f32 %v11456_v42, %v11455_v59  ;;  %v11461_v26 = vld [vmem:[#allocation35_spill] sm:$0xff]  ;;  %v11463_v21 = vld [vmem:[#allocation116_spill] sm:$0xff]  ;;  %v6129_v59 = vsel %vm332_vm1, %v6069_v8, 0.0  ;;  %v11473_v29 = vld [vmem:[#allocation45_spill] sm:$0xff] }
 0x889   : > { %v5791_v47 = vpop.xlane.xlu0 %5790  ;;  %v5412_v3 = vadd.f32 %v11465_v41, %v5218_v40  ;;  %v11470_v42 = vld [vmem:[#allocation36_spill] sm:$0xff]  ;;  %v11475_v8 = vld [vmem:[#allocation38_spill] sm:$0xff] }
 0x88a   : > { %v10725_v22 = vadd.f32 %v5791_v47, %v10530_v14  ;;  %v11453_v14 = vld [vmem:[#allocation29_spill] sm:$0xff]  ;;  %v5217_v49 = vadd.f32 %v11459_v23, %v5023_v2  ;;  %v5025_v47 = vadd.f32 %v11461_v26, %v11460_v6  ;;  %v11474_v23 = vld [vmem:[#allocation50_spill] sm:$0xff]  ;;  %v11477_v40 = vld [vmem:[#allocation44_spill] sm:$0xff] }
 0x88b   : > { %v5410_v25 = vadd.f32 %v11453_v14, %v5216_v11  ;;  %v6040_v6 = vld [vmem:[#allocation2 + $0x111] sm:$0xff] }
 0x88c   : > { %6124 = vadd.xlane.f32.xlu1 %v6123_v62  ;;  %6127 = vadd.xlane.f32.xlu2 %v6126_v9  ;;  %v5219_v61 = vadd.f32 %v11464_v15, %v5025_v47  ;;  %v5411_v14 = vadd.f32 %v11466_v20, %v5217_v49  ;;  %v6132_v62 = vsel %vm332_vm1, %v6070_v27, 0.0  ;;  %v6135_v9 = vsel %vm332_vm1, %v6071_v30, 0.0  ;;  %v11476_v47 = vld [vmem:[#allocation117_spill] sm:$0xff] }
 0x88d   : > { %v5604_v38 = vadd.f32 %v11458_v37, %v5410_v25  ;;  %v11467_v25 = vld [vmem:[#allocation34_spill] sm:$0xff]  ;;  %v5606_v37 = vadd.f32 %v11471_v39, %v5412_v3  ;;  %v5028_v49 = vadd.f32 %v11474_v23, %v11473_v29  ;;  %v6072_v27 = vmul.f32 %v10618_v10, %v6038_v58  ;;  %v11480_v30 = vld [vmem:[#allocation49_spill] sm:$0xff] }
 0x88e   : > { %6121 = vadd.xlane.f32.xlu0 %v6120_v53  ;;  %v11468_v53 = vld [vmem:[#allocation39_spill] sm:$0xff]  ;;  %v5413_v36 = vadd.f32 %v11469_v0, %v5219_v61  ;;  %v5605_v2 = vadd.f32 %v11470_v42, %v5411_v14  ;;  %v6074_v14 = vmul.f32 %v10618_v10, %v6040_v6  ;;  %v11486_v58 = vld [vmem:[#allocation58_spill] sm:$0xff] }
 0x88f   : > { %v5798_v4 = vadd.f32 %v11463_v21, %v5604_v38  ;;  %v5901_v1 = vpop.xlane.xlu1 %5900  ;;  %v5904_v16 = vpop.xlane.xlu2 %5903  ;;  %v5026_v13 = vadd.f32 %v11468_v53, %v11467_v25  ;;  %v11472_v38 = vld [vmem:[#allocation47_spill] sm:$0xff]  ;;  %v11481_v25 = vld [vmem:[#allocation48_spill] sm:$0xff] }
 0x890   : > { %v10762_v46 = vadd.f32 %v5901_v1, %v5797_v43  ;;  %v5607_v34 = vadd.f32 %v11472_v38, %v5413_v36  ;;  %v5799_v28 = vadd.f32 %v11476_v47, %v5605_v2  ;;  %v11478_v43 = vld [vmem:[#allocation43_spill] sm:$0xff]  ;;  %v11484_v2 = vld [vmem:[#allocation60_spill] sm:$0xff] }
 0x891   : > { %v5898_v51 = vpop.xlane.xlu0 %5897  ;;  %v10764_v55 = vadd.f32 %v5904_v16, %v5798_v4  ;;  %v5220_v26 = vadd.f32 %v11475_v8, %v5026_v13  ;;  %v5027_v21 = vadd.f32 %v11478_v43, %v11477_v40  ;;  %v11479_v4 = vld [vmem:[#allocation118_spill] sm:$0xff]  ;;  %v6042_v47 = vld [vmem:[#allocation2 + $0x129] sm:$0xff] }
 0x892   : > { %v10756_v11 = vadd.f32 %v5898_v51, %v5796_v32  ;;  %v6039_v32 = vld [vmem:[#allocation2 + $0x109] sm:$0xff]  ;;  %v5800_v51 = vadd.f32 %v11479_v4, %v5606_v37  ;;  %v5801_v1 = vadd.f32 %v10561_v48, %v5607_v34  ;;  %v11482_v13 = vld [vmem:[#allocation46_spill] sm:$0xff]  ;;  %v6138_v37 = vsel %vm332_vm1, %v6072_v27, 0.0  ;;  %v11494_v27 = vld [vmem:[#allocation65_spill] sm:$0xff] }
 0x893   : > { %v5414_v15 = vadd.f32 %v11480_v30, %v5220_v26  ;;  %v6073_v20 = vmul.f32 %v10618_v10, %v6039_v32  ;;  %v5221_v53 = vadd.f32 %v11481_v25, %v5027_v21  ;;  %v5222_v0 = vadd.f32 %v11482_v13, %v5028_v49  ;;  %v6041_v38 = vld [vmem:[#allocation2 + $0x121] sm:$0xff]  ;;  %v11490_v40 = vld [vmem:[#allocation52_spill] sm:$0xff] }
 0x894   : > { %6133 = vadd.xlane.f32.xlu1 %v6132_v62  ;;  %6136 = vadd.xlane.f32.xlu2 %v6135_v9  ;;  %v11485_v9 = vld [vmem:[#allocation56_spill] sm:$0xff]  ;;  %v11487_v34 = vld [vmem:[#allocation51_spill] sm:$0xff]  ;;  %v6144_v49 = vsel %vm332_vm1, %v6074_v14, 0.0  ;;  %v11489_v8 = vld [vmem:[#allocation62_spill] sm:$0xff] }
 0x895   : > { %v5416_v62 = vadd.f32 %v11484_v2, %v5222_v0  ;;  %v5030_v39 = vadd.f32 %v11486_v58, %v11485_v9  ;;  %v5608_v29 = vadd.f32 %v11487_v34, %v5414_v15  ;;  %v6141_v23 = vsel %vm332_vm1, %v6073_v20, 0.0  ;;  %v11488_v32 = vld [vmem:[#allocation55_spill] sm:$0xff]  ;;  %v11491_v43 = vld [vmem:[#allocation54_spill] sm:$0xff]  ;;  %v11495_v15 = vld [vmem:[#allocation57_spill] sm:$0xff] }
 0x896   : > { %6130 = vadd.xlane.f32.xlu0 %v6129_v59  ;;  %v11483_v59 = vld [vmem:[#allocation53_spill] sm:$0xff]  ;;  %v5029_v21 = vadd.f32 %v11491_v43, %v11490_v40  ;;  %v11492_v4 = vld [vmem:[#allocation119_spill] sm:$0xff]  ;;  %v6076_v2 = vmul.f32 %v10618_v10, %v6042_v47  ;;  %v11504_v47 = vld [vmem:[#allocation66_spill] sm:$0xff] }
 0x897   : > { %v5910_v61 = vpop.xlane.xlu1 %5909  ;;  %v5913_v41 = vpop.xlane.xlu2 %5912  ;;  %v5415_v42 = vadd.f32 %v11483_v59, %v5221_v53  ;;  %v5610_v26 = vadd.f32 %v11489_v8, %v5416_v62  ;;  %v11497_v53 = vld [vmem:[#allocation59_spill] sm:$0xff] }
 0x898   : > { %v10792_v36 = vadd.f32 %v5910_v61, %v5800_v51  ;;  %v10794_v48 = vadd.f32 %v5913_v41, %v5801_v1  ;;  %v5802_v51 = vadd.f32 %v11492_v4, %v5608_v29  ;;  %v6075_v1 = vmul.f32 %v10618_v10, %v6041_v38  ;;  %v11496_v41 = vld [vmem:[#allocation120_spill] sm:$0xff]  ;;  %v11498_v9 = vld [vmem:[#allocation67_spill] sm:$0xff]  ;;  %v11505_v4 = vld [vmem:[#allocation70_spill] sm:$0xff] }
 0x899   : > { %v5907_v16 = vpop.xlane.xlu0 %5906  ;;  %v5609_v6 = vadd.f32 %v11488_v32, %v5415_v42  ;;  %v5224_v61 = vadd.f32 %v11495_v15, %v5030_v39  ;;  %v5804_v14 = vadd.f32 %v10573_v54, %v5610_v26  ;;  %v5223_v13 = vadd.f32 %v11497_v53, %v5029_v21  ;;  %v11500_v54 = vld [vmem:[#allocation61_spill] sm:$0xff]  ;;  %v6044_v21 = vld [vmem:[#allocation2 + $0x141] sm:$0xff]  ;;  %v11508_v15 = vld [vmem:[#allocation80_spill] sm:$0xff] }
 0x89a   : > { %v10786_v3 = vadd.f32 %v5907_v16, %v5799_v28  ;;  %v6043_v28 = vld [vmem:[#allocation2 + $0x139] sm:$0xff]  ;;  %v11493_v16 = vld [vmem:[#allocation63_spill] sm:$0xff]  ;;  %v6147_v26 = vsel %vm332_vm1, %v6075_v1, 0.0  ;;  %v11509_v1 = vld [vmem:[#allocation68_spill] sm:$0xff] }
 0x89b   : > { %v5031_v30 = vadd.f32 %v11494_v27, %v11493_v16  ;;  %v5803_v20 = vadd.f32 %v11496_v41, %v5609_v6  ;;  %v6077_v62 = vmul.f32 %v10618_v10, %v6043_v28  ;;  %v5417_v29 = vadd.f32 %v11500_v54, %v5223_v13  ;;  %v11503_v6 = vld [vmem:[#allocation72_spill] sm:$0xff]  ;;  %v11506_v16 = vld [vmem:[#allocation77_spill] sm:$0xff]  ;;  %v11510_v53 = vld [vmem:[#allocation74_spill] sm:$0xff] }
 0x89c   : > { %6142 = vadd.xlane.f32.xlu1 %v6141_v23  ;;  %6145 = vadd.xlane.f32.xlu2 %v6144_v49  ;;  %v11501_v23 = vld [vmem:[#allocation64_spill] sm:$0xff]  ;;  %v11502_v49 = vld [vmem:[#allocation69_spill] sm:$0xff]  ;;  %v6150_v28 = vsel %vm332_vm1, %v6076_v2, 0.0 }
 0x89d   : > { %v5225_v58 = vadd.f32 %v11498_v9, %v5031_v30  ;;  %v5032_v32 = vadd.f32 %v11502_v49, %v11501_v23  ;;  %v5611_v40 = vadd.f32 %v11504_v47, %v5417_v29  ;;  %v6153_v43 = vsel %vm332_vm1, %v6077_v62, 0.0  ;;  %v11507_v30 = vld [vmem:[#allocation75_spill] sm:$0xff]  ;;  %v6045_v41 = vld [vmem:[#allocation2 + $0x151] sm:$0xff]  ;;  %v11513_v49 = vld [vmem:[#allocation78_spill] sm:$0xff] }
 0x89e   : > { %6139 = vadd.xlane.f32.xlu0 %v6138_v37  ;;  %v11499_v37 = vld [vmem:[#allocation71_spill] sm:$0xff]  ;;  %v11511_v13 = vld [vmem:[#allocation73_spill] sm:$0xff]  ;;  %v6078_v9 = vmul.f32 %v10618_v10, %v6044_v21  ;;  %v6079_v23 = vmul.f32 %v10618_v10, %v6045_v41  ;;  %v11518_v21 = vld [vmem:[#allocation88_spill] sm:$0xff] }
 0x89f   : > { %v5919_v0 = vpop.xlane.xlu1 %5918  ;;  %v5922_v59 = vpop.xlane.xlu2 %5921  ;;  %v5418_v38 = vadd.f32 %v11499_v37, %v5224_v61  ;;  %v5419_v8 = vadd.f32 %v11503_v6, %v5225_v58  ;;  %v5034_v61 = vadd.f32 %v11508_v15, %v11507_v30  ;;  %v11512_v58 = vld [vmem:[#allocation79_spill] sm:$0xff]  ;;  %v11514_v6 = vld [vmem:[#allocation76_spill] sm:$0xff]  ;;  %v11520_v41 = vld [vmem:[#allocation85_spill] sm:$0xff] }
 0x8a0   : > { %v10822_v39 = vadd.f32 %v5919_v0, %v5803_v20  ;;  %v10824_v34 = vadd.f32 %v5922_v59, %v5804_v14  ;;  %v6046_v20 = vld [vmem:[#allocation2 + $0x159] sm:$0xff]  ;;  %v5226_v14 = vadd.f32 %v11509_v1, %v5032_v32  ;;  %v5033_v0 = vadd.f32 %v11511_v13, %v11510_v53  ;;  %v11521_v1 = vld [vmem:[#allocation92_spill] sm:$0xff]  ;;  %v6049_v53 = vld [vmem:[#allocation2 + $0x181] sm:$0xff] }
 0x8a1   : > { %v5916_v25 = vpop.xlane.xlu0 %5915  ;;  %v5613_v27 = vadd.f32 %v11506_v16, %v5419_v8  ;;  %v5228_v8 = vadd.f32 %v11514_v6, %v5034_v61  ;;  %v6047_v16 = vld [vmem:[#allocation2 + $0x169] sm:$0xff]  ;;  %v6159_v15 = vsel %vm332_vm1, %v6079_v23, 0.0  ;;  %v11522_v13 = vld [vmem:[#allocation82_spill] sm:$0xff]  ;;  %v11527_v23 = vld [vmem:[#allocation121_spill] sm:$0xff] }
 0x8a2   : > { %v10816_v42 = vadd.f32 %v5916_v25, %v5802_v51  ;;  %v5612_v51 = vadd.f32 %v11505_v4, %v5418_v38  ;;  %v5805_v25 = vadd.f32 %v10576_v31, %v5611_v40  ;;  %v5420_v37 = vadd.f32 %v11512_v58, %v5226_v14  ;;  %v11516_v40 = vld [vmem:[#allocation90_spill] sm:$0xff]  ;;  %v11525_v58 = vld [vmem:[#allocation95_spill] sm:$0xff]  ;;  %v11528_v6 = vld [vmem:[#allocation89_spill] sm:$0xff] }
 0x8a3   : > { %v5807_v2 = vadd.f32 %v10586_v44, %v5613_v27  ;;  %v6080_v31 = vmul.f32 %v10618_v10, %v6046_v20  ;;  %v5227_v32 = vadd.f32 %v11513_v49, %v5033_v0  ;;  %v11519_v27 = vld [vmem:[#allocation81_spill] sm:$0xff]  ;;  %v11523_v0 = vld [vmem:[#allocation84_spill] sm:$0xff] }
 0x8a4   : > { %6151 = vadd.xlane.f32.xlu1 %v6150_v28  ;;  %6154 = vadd.xlane.f32.xlu2 %v6153_v43  ;;  %v5806_v59 = vadd.f32 %v10578_v18, %v5612_v51  ;;  %v5422_v28 = vadd.f32 %v11516_v40, %v5228_v8  ;;  %v11517_v43 = vld [vmem:[#allocation86_spill] sm:$0xff]  ;;  %v6156_v51 = vsel %vm332_vm1, %v6078_v9, 0.0  ;;  %v5614_v30 = vadd.f32 %v11519_v27, %v5420_v37  ;;  %v11524_v9 = vld [vmem:[#allocation93_spill] sm:$0xff] }
 0x8a5   : > { %v5036_v4 = vadd.f32 %v11518_v21, %v11517_v43  ;;  %v6162_v61 = vsel %vm332_vm1, %v6080_v31, 0.0  ;;  %v5037_v37 = vadd.f32 %v11525_v58, %v11524_v9  ;;  %v11529_v43 = vld [vmem:[#allocation97_spill] sm:$0xff]  ;;  %v6050_v9 = vld [vmem:[#allocation2 + $0x189] sm:$0xff] }
 0x8a6   : > { %6148 = vadd.xlane.f32.xlu0 %v6147_v26  ;;  %v11515_v26 = vld [vmem:[#allocation83_spill] sm:$0xff]  ;;  %v5616_v14 = vadd.f32 %v11521_v1, %v5422_v28  ;;  %v6083_v28 = vmul.f32 %v10618_v10, %v6049_v53  ;;  %v11535_v53 = vld [vmem:[#allocation96_spill] sm:$0xff] }
 0x8a7   : > { %v5928_v38 = vpop.xlane.xlu1 %5927  ;;  %v5931_v54 = vpop.xlane.xlu2 %5930  ;;  %v5421_v47 = vadd.f32 %v11515_v26, %v5227_v32  ;;  %v5231_v21 = vadd.f32 %v11529_v43, %v5037_v37  ;;  %v11536_v58 = vld [vmem:[#allocation100_spill] sm:$0xff] }
 0x8a8   : > { %v10852_v18 = vadd.f32 %v5928_v38, %v5806_v59  ;;  %v10854_v44 = vadd.f32 %v5931_v54, %v5807_v2  ;;  %v5035_v59 = vadd.f32 %v11523_v0, %v11522_v13  ;;  %v5808_v2 = vadd.f32 %v10590_v19, %v5614_v30  ;;  %v11526_v38 = vld [vmem:[#allocation87_spill] sm:$0xff] }
 0x8a9   : > { %v5925_v62 = vpop.xlane.xlu0 %5924  ;;  %v5615_v20 = vadd.f32 %v11520_v41, %v5421_v47  ;;  %v5230_v54 = vadd.f32 %v11526_v38, %v5036_v4  ;;  %v5810_v49 = vadd.f32 %v10602_v56, %v5616_v14  ;;  %v11531_v56 = vld [vmem:[#allocation91_spill] sm:$0xff]  ;;  %v11537_v38 = vld [vmem:[#allocation105_spill] sm:$0xff] }
 0x8aa   : > { %v10846_v29 = vadd.f32 %v5925_v62, %v5805_v25  ;;  %v6048_v25 = vld [vmem:[#allocation2 + $0x171] sm:$0xff]  ;;  %v6081_v62 = vmul.f32 %v10618_v10, %v6047_v16  ;;  %v5229_v8 = vadd.f32 %v11528_v6, %v5035_v59  ;;  %v6052_v13 = vld [vmem:[#allocation2 + $0x1a1] sm:$0xff] }
 0x8ab   : > { %v5809_v31 = vadd.f32 %v11527_v23, %v5615_v20  ;;  %v6082_v19 = vmul.f32 %v10618_v10, %v6048_v25  ;;  %v11534_v20 = vld [vmem:[#allocation102_spill] sm:$0xff]  ;;  %v6086_v6 = vmul.f32 %v10618_v10, %v6052_v13 }
 0x8ac   : > { %6160 = vadd.xlane.f32.xlu1 %v6159_v15  ;;  %6163 = vadd.xlane.f32.xlu2 %v6162_v61  ;;  %v5423_v30 = vadd.f32 %v11531_v56, %v5229_v8  ;;  %v11532_v15 = vld [vmem:[#allocation94_spill] sm:$0xff]  ;;  %v11533_v61 = vld [vmem:[#allocation99_spill] sm:$0xff]  ;;  %v5425_v1 = vadd.f32 %v11534_v20, %v5231_v21  ;;  %v6165_v14 = vsel %vm332_vm1, %v6081_v62, 0.0  ;;  %v11540_v8 = vld [vmem:[#allocation104_spill] sm:$0xff] }
 0x8ad   : > { %v5038_v41 = vadd.f32 %v11533_v61, %v11532_v15  ;;  %v6051_v25 = vld [vmem:[#allocation2 + $0x199] sm:$0xff]  ;;  %v6168_v59 = vsel %vm332_vm1, %v6082_v19, 0.0  ;;  %v11542_v19 = vld [vmem:[#allocation123_spill] sm:$0xff]  ;;  %v6180_v13 = vsel %vm332_vm1, %v6086_v6, 0.0 }
 0x8ae   : > { %6157 = vadd.xlane.f32.xlu0 %v6156_v51  ;;  %v11530_v51 = vld [vmem:[#allocation101_spill] sm:$0xff]  ;;  %v5617_v0 = vadd.f32 %v11535_v53, %v5423_v30  ;;  %v11538_v23 = vld [vmem:[#allocation98_spill] sm:$0xff] }
 0x8af   : > { %v5937_v26 = vpop.xlane.xlu1 %5936  ;;  %v5940_v47 = vpop.xlane.xlu2 %5939  ;;  %v5424_v16 = vadd.f32 %v11530_v51, %v5230_v54  ;;  %v5619_v54 = vadd.f32 %v11537_v38, %v5425_v1  ;;  %v6084_v51 = vmul.f32 %v10618_v10, %v6050_v9  ;;  %v6215_v9 = vld [vmem:[#allocation2 + $0x32] sm:$0xff]  ;;  %v6216_v38 = vld [vmem:[#allocation2 + $0x3a] sm:$0xff] }
 0x8b0   : > { %v10882_v4 = vadd.f32 %v5937_v26, %v5809_v31  ;;  %v10884_v27 = vadd.f32 %v5940_v47, %v5810_v49  ;;  %v5232_v31 = vadd.f32 %v11538_v23, %v5038_v41  ;;  %v11539_v49 = vld [vmem:[#allocation122_spill] sm:$0xff]  ;;  %v11541_v26 = vld [vmem:[#allocation103_spill] sm:$0xff] }
 0x8b1   : > { %v5934_v32 = vpop.xlane.xlu0 %5933  ;;  %v5618_v37 = vadd.f32 %v11536_v58, %v5424_v16  ;;  %v5811_v62 = vadd.f32 %v11539_v49, %v5617_v0  ;;  %v5039_v47 = vadd.f32 %v11541_v26, %v11540_v8  ;;  %v5813_v43 = vadd.f32 %v10625_v57, %v5619_v54  ;;  %v11543_v16 = vld [vmem:[#allocation107_spill] sm:$0xff]  ;;  %v11544_v41 = vld [vmem:[#allocation106_spill] sm:$0xff]  ;;  %v11545_v57 = vld [vmem:[#allocation109_spill] sm:$0xff] }
 0x8b2   : > { %v10876_v40 = vadd.f32 %v5934_v32, %v5808_v2  ;;  %v6171_v2 = vsel %vm332_vm1, %v6083_v28, 0.0  ;;  %v6085_v32 = vmul.f32 %v10618_v10, %v6051_v25  ;;  %v5426_v56 = vadd.f32 %v11543_v16, %v5232_v31  ;;  %v10920_v0 = vld [vmem:[%s11304_s7 + $0x8] ss:$0 sm:$0xff]  ;;  %v11547_v58 = vld [vmem:[#allocation110_spill] sm:$0xff]  ;;  %v6217_v54 = vld [vmem:[#allocation2 + $0x4a] sm:$0xff] }
 0x8b3   : > { %v5812_v28 = vadd.f32 %v11542_v19, %v5618_v37  ;;  %v5233_v20 = vadd.f32 %v11544_v41, %v5039_v47  ;;  %v6174_v10 = vsel %vm332_vm1, %v6084_v51, 0.0  ;;  %v11548_v31 = vld [vmem:[#allocation124_spill] sm:$0xff]  ;;  %v6250_v47 = vmul.f32 %v10920_v0, %v6216_v38 }
 0x8b4   : > { %6169 = vadd.xlane.f32.xlu1 %v6168_v59  ;;  %6172 = vadd.xlane.f32.xlu2 %v6171_v2  ;;  %v6177_v25 = vsel %vm332_vm1, %v6085_v32, 0.0  ;;  %v11546_v59 = vld [vmem:[#allocation108_spill] sm:$0xff]  ;;  %v6249_v32 = vmul.f32 %v10920_v0, %v6215_v9  ;;  %v6251_v19 = vmul.f32 %v10920_v0, %v6217_v54 }
 0x8b5   : > { %v5427_v53 = vadd.f32 %v11545_v57, %v5233_v20  ;;  %v5620_v2 = vadd.f32 %v11546_v59, %v5426_v56  ;;  %v6218_v16 = vld [vmem:[#allocation2 + $0x52] sm:$0xff]  ;;  %v6219_v56 = vld [vmem:[#allocation2 + $0x62] sm:$0xff] }
 0x8b6   : > { %6166 = vadd.xlane.f32.xlu0 %v6165_v14  ;;  %v6287_v51 = vsel %vm332_vm1, %v6251_v19, 0.0  ;;  %v6252_v41 = vmul.f32 %v10920_v0, %v6218_v16  ;;  %v6224_v19 = vld [vmem:[#allocation2 + $0x9a] sm:$0xff] }
 0x8b7   : > { %v5946_v30 = vpop.xlane.xlu1 %5945  ;;  %v5949_v15 = vpop.xlane.xlu2 %5948  ;;  %v5621_v37 = vadd.f32 %v11547_v58, %v5427_v53  ;;  %v5814_v23 = vadd.f32 %v10627_v52, %v5620_v2  ;;  %v6281_v52 = vsel %vm332_vm1, %v6249_v32, 0.0  ;;  %v6221_v58 = vld [vmem:[#allocation2 + $0x7a] sm:$0xff] }
 0x8b8   : > { %v10909_v1 = vadd.f32 %v5946_v30, %v5812_v28  ;;  %v10911_v14 = vadd.f32 %v5949_v15, %v5813_v43  ;;  %v6220_v30 = vld [vmem:[#allocation2 + $0x6a] sm:$0xff]  ;;  %v6290_v59 = vsel %vm332_vm1, %v6252_v41, 0.0  ;;  %v6255_v54 = vmul.f32 %v10920_v0, %v6221_v58 }
 0x8b9   : > { %v5943_v21 = vpop.xlane.xlu0 %5942  ;;  %v5815_v49 = vadd.f32 %v11548_v31, %v5621_v37  ;;  %v6254_v57 = vmul.f32 %v10920_v0, %v6220_v30  ;;  %v6223_v37 = vld [vmem:[#allocation2 + $0x92] sm:$0xff] }
 0x8ba   : > { %v10906_v61 = vadd.f32 %v5943_v21, %v5811_v62  ;;  %v6284_v21 = vsel %vm332_vm1, %v6250_v47, 0.0 }
 0x8bb   : > { %v6296_v9 = vsel %vm332_vm1, %v6254_v57, 0.0  ;;  %v6227_v57 = vld [vmem:[#allocation2 + $0xc2] sm:$0xff] }
 0x8bc   : > { %6178 = vadd.xlane.f32.xlu1 %v6177_v25  ;;  %6181 = vadd.xlane.f32.xlu2 %v6180_v13  ;;  %v6253_v13 = vmul.f32 %v10920_v0, %v6219_v56 }
 0x8be   : > { %6175 = vadd.xlane.f32.xlu0 %v6174_v10  ;;  %v6293_v2 = vsel %vm332_vm1, %v6253_v13, 0.0 }
 0x8bf   : > { %v5955_v6 = vpop.xlane.xlu1 %5954  ;;  %v5958_v8 = vpop.xlane.xlu2 %5957 }
 0x8c0   : > { %v10931_v28 = vadd.f32 %v5955_v6, %v5815_v49  ;;  %v10934_v43 = vadd.f32 %v5958_v8, %v10653_v24  ;;  %v6257_v49 = vmul.f32 %v10920_v0, %v6223_v37  ;;  %v6299_v6 = vsel %vm332_vm1, %v6255_v54, 0.0 }
 0x8c1   : > { %v5952_v62 = vpop.xlane.xlu0 %5951 }
 0x8c2   : > { %v10927_v26 = vadd.f32 %v5952_v62, %v5814_v23  ;;  %v6305_v47 = vsel %vm332_vm1, %v6257_v49, 0.0  ;;  %v6232_v49 = vld [vmem:[#allocation2 + $0xfa] sm:$0xff] }
 0x8c4   : > { %6285 = vadd.xlane.f32.xlu1 %v6284_v21  ;;  %6288 = vadd.xlane.f32.xlu2 %v6287_v51  ;;  %v6258_v51 = vmul.f32 %v10920_v0, %v6224_v19 }
 0x8c6   : > { %6282 = vadd.xlane.f32.xlu0 %v6281_v52  ;;  %v6226_v52 = vld [vmem:[#allocation2 + $0xb2] sm:$0xff] }
 0x8c7   : > { %v5964_v20 = vpop.xlane.xlu1 %5963  ;;  %v5967_v25 = vpop.xlane.xlu2 %5966  ;;  %v6260_v30 = vmul.f32 %v10920_v0, %v6226_v52 }
 0x8c8   : > { %v10946_v53 = vadd.f32 %v5964_v20, %v10661_v33  ;;  %v10949_v10 = vadd.f32 %v5967_v25, %v10677_v12  ;;  %v6308_v20 = vsel %vm332_vm1, %v6258_v51, 0.0 }
 0x8c9   : > { %v5961_v15 = vpop.xlane.xlu0 %5960  ;;  %v6314_v13 = vsel %vm332_vm1, %v6260_v30, 0.0  ;;  %v6235_v30 = vld [vmem:[#allocation2 + $0x122] sm:$0xff] }
 0x8ca   : > { %v10941_v24 = vadd.f32 %v5961_v15, %v10659_v17  ;;  %v6222_v17 = vld [vmem:[#allocation2 + $0x82] sm:$0xff] }
 0x8cb   : > { %v6256_v31 = vmul.f32 %v10920_v0, %v6222_v17 }
 0x8cc   : > { %6294 = vadd.xlane.f32.xlu1 %v6293_v2  ;;  %6297 = vadd.xlane.f32.xlu2 %v6296_v9  ;;  %v6261_v9 = vmul.f32 %v10920_v0, %v6227_v57 }
 0x8cd   : > { %v6302_v8 = vsel %vm332_vm1, %v6256_v31, 0.0 }
 0x8ce   : > { %6291 = vadd.xlane.f32.xlu0 %v6290_v59  ;;  %v6231_v59 = vld [vmem:[#allocation2 + $0xf2] sm:$0xff] }
 0x8cf   : > { %v5973_v33 = vpop.xlane.xlu1 %5972  ;;  %v5976_v23 = vpop.xlane.xlu2 %5975  ;;  %v6265_v37 = vmul.f32 %v10920_v0, %v6231_v59 }
 0x8d0   : > { %v10961_v62 = vadd.f32 %v5973_v33, %v10685_v60  ;;  %v10964_v32 = vadd.f32 %v5976_v23, %v10700_v63  ;;  %v6317_v33 = vsel %vm332_vm1, %v6261_v9, 0.0 }
 0x8d1   : > { %v5970_v38 = vpop.xlane.xlu0 %5969  ;;  %v6329_v31 = vsel %vm332_vm1, %v6265_v37, 0.0  ;;  %v6238_v37 = vld [vmem:[#allocation2 + $0x142] sm:$0xff] }
 0x8d2   : > { %v10956_v12 = vadd.f32 %v5970_v38, %v10683_v50  ;;  %v6225_v50 = vld [vmem:[#allocation2 + $0xaa] sm:$0xff] }
 0x8d3   : > { %v6259_v56 = vmul.f32 %v10920_v0, %v6225_v50 }
 0x8d4   : > { %6303 = vadd.xlane.f32.xlu1 %v6302_v8  ;;  %6306 = vadd.xlane.f32.xlu2 %v6305_v47  ;;  %v6266_v47 = vmul.f32 %v10920_v0, %v6232_v49 }
 0x8d5   : > { %v6311_v25 = vsel %vm332_vm1, %v6259_v56, 0.0 }
 0x8d6   : > { %6300 = vadd.xlane.f32.xlu0 %v6299_v6  ;;  %v6234_v6 = vld [vmem:[#allocation2 + $0x112] sm:$0xff] }
 0x8d7   : > { %v5982_v60 = vpop.xlane.xlu1 %5981  ;;  %v5985_v16 = vpop.xlane.xlu2 %5984  ;;  %v6268_v52 = vmul.f32 %v10920_v0, %v6234_v6 }
 0x8d8   : > { %v10976_v15 = vadd.f32 %v5982_v60, %v10708_v5  ;;  %v10979_v41 = vadd.f32 %v5985_v16, %v10725_v22  ;;  %v6332_v60 = vsel %vm332_vm1, %v6266_v47, 0.0 }
 0x8d9   : > { %v5979_v21 = vpop.xlane.xlu0 %5978  ;;  %v6338_v56 = vsel %vm332_vm1, %v6268_v52, 0.0  ;;  %v6241_v52 = vld [vmem:[#allocation2 + $0x16a] sm:$0xff] }
 0x8da   : > { %v10971_v63 = vadd.f32 %v5979_v21, %v10705_v7  ;;  %v6228_v7 = vld [vmem:[#allocation2 + $0xca] sm:$0xff] }
 0x8db   : > { %v6262_v17 = vmul.f32 %v10920_v0, %v6228_v7 }
 0x8dc   : > { %6312 = vadd.xlane.f32.xlu1 %v6311_v25  ;;  %6315 = vadd.xlane.f32.xlu2 %v6314_v13  ;;  %v6269_v13 = vmul.f32 %v10920_v0, %v6235_v30 }
 0x8dd   : > { %v6320_v23 = vsel %vm332_vm1, %v6262_v17, 0.0 }
 0x8de   : > { %6309 = vadd.xlane.f32.xlu0 %v6308_v20  ;;  %v6237_v20 = vld [vmem:[#allocation2 + $0x13a] sm:$0xff] }
 0x8df   : > { %v6089_v5 = vpop.xlane.xlu1 %6088  ;;  %v6092_v58 = vpop.xlane.xlu2 %6091  ;;  %v6271_v59 = vmul.f32 %v10920_v0, %v6237_v20 }
 0x8e0   : > { %v10991_v38 = vadd.f32 %v6089_v5, %v10733_v35  ;;  %v10994_v54 = vadd.f32 %v6092_v58, %v10756_v11  ;;  %v6341_v5 = vsel %vm332_vm1, %v6269_v13, 0.0 }
 0x8e1   : > { %v5988_v2 = vpop.xlane.xlu0 %5987  ;;  %v6347_v17 = vsel %vm332_vm1, %v6271_v59, 0.0  ;;  %v6244_v59 = vld [vmem:[#allocation2 + $0x18a] sm:$0xff] }
 0x8e2   : > { %v10986_v22 = vadd.f32 %v5988_v2, %v10731_v45  ;;  %v6233_v45 = vld [vmem:[#allocation2 + $0x10a] sm:$0xff] }
 0x8e3   : > { %v6267_v50 = vmul.f32 %v10920_v0, %v6233_v45 }
 0x8e4   : > { %6321 = vadd.xlane.f32.xlu1 %v6320_v23  ;;  %6330 = vadd.xlane.f32.xlu2 %v6329_v31  ;;  %v6272_v31 = vmul.f32 %v10920_v0, %v6238_v37 }
 0x8e5   : > { %v6335_v16 = vsel %vm332_vm1, %v6267_v50, 0.0 }
 0x8e6   : > { %6318 = vadd.xlane.f32.xlu0 %v6317_v33  ;;  %v6240_v33 = vld [vmem:[#allocation2 + $0x15a] sm:$0xff] }
 0x8e7   : > { %v6098_v35 = vpop.xlane.xlu1 %6097  ;;  %v6101_v19 = vpop.xlane.xlu2 %6100  ;;  %v6274_v6 = vmul.f32 %v10920_v0, %v6240_v33 }
 0x8e8   : > { %v11006_v21 = vadd.f32 %v6098_v35, %v10764_v55  ;;  %v11009_v51 = vadd.f32 %v6101_v19, %v10786_v3  ;;  %v6350_v35 = vsel %vm332_vm1, %v6272_v31, 0.0 }
 0x8e9   : > { %v6095_v8 = vpop.xlane.xlu0 %6094  ;;  %v6356_v50 = vsel %vm332_vm1, %v6274_v6, 0.0 }
 0x8ea   : > { %v11001_v11 = vadd.f32 %v6095_v8, %v10762_v46  ;;  %v6236_v46 = vld [vmem:[#allocation2 + $0x12a] sm:$0xff] }
 0x8eb   : > { %v6270_v7 = vmul.f32 %v10920_v0, %v6236_v46 }
 0x8ec   : > { %6336 = vadd.xlane.f32.xlu1 %v6335_v16  ;;  %6339 = vadd.xlane.f32.xlu2 %v6338_v56  ;;  %v6275_v56 = vmul.f32 %v10920_v0, %v6241_v52 }
 0x8ed   : > { %v6344_v58 = vsel %vm332_vm1, %v6270_v7, 0.0 }
 0x8ee   : > { %6333 = vadd.xlane.f32.xlu0 %v6332_v60  ;;  %v6243_v60 = vld [vmem:[#allocation2 + $0x182] sm:$0xff] }
 0x8ef   : > { %v6107_v55 = vpop.xlane.xlu1 %6106  ;;  %v6110_v57 = vpop.xlane.xlu2 %6109  ;;  %v6277_v20 = vmul.f32 %v10920_v0, %v6243_v60 }
 0x8f0   : > { %v11021_v2 = vadd.f32 %v6107_v55, %v10794_v48  ;;  %v11024_v9 = vadd.f32 %v6110_v57, %v10816_v42  ;;  %v6359_v55 = vsel %vm332_vm1, %v6275_v56, 0.0 }
 0x8f1   : > { %v6104_v25 = vpop.xlane.xlu0 %6103  ;;  %v6365_v7 = vsel %vm332_vm1, %v6277_v20, 0.0 }
 0x8f2   : > { %v11016_v3 = vadd.f32 %v6104_v25, %v10792_v36  ;;  %v6239_v36 = vld [vmem:[#allocation2 + $0x152] sm:$0xff] }
 0x8f3   : > { %v6273_v45 = vmul.f32 %v10920_v0, %v6239_v36 }
 0x8f4   : > { %6345 = vadd.xlane.f32.xlu1 %v6344_v58  ;;  %6348 = vadd.xlane.f32.xlu2 %v6347_v17  ;;  %v6278_v17 = vmul.f32 %v10920_v0, %v6244_v59 }
 0x8f5   : > { %v6353_v19 = vsel %vm332_vm1, %v6273_v45, 0.0  ;;  %v6246_v45 = vld [vmem:[#allocation2 + $0x1a2] sm:$0xff] }
 0x8f6   : > { %6342 = vadd.xlane.f32.xlu0 %v6341_v5  ;;  %v6230_v5 = vld [vmem:[#allocation2 + $0xe2] sm:$0xff] }
 0x8f7   : > { %v6116_v48 = vpop.xlane.xlu1 %6115  ;;  %v6119_v49 = vpop.xlane.xlu2 %6118  ;;  %v6264_v33 = vmul.f32 %v10920_v0, %v6230_v5 }
 0x8f8   : > { %v11036_v8 = vadd.f32 %v6116_v48, %v10824_v34  ;;  %v11039_v47 = vadd.f32 %v6119_v49, %v10846_v29  ;;  %v6245_v48 = vld [vmem:[#allocation2 + $0x19a] sm:$0xff]  ;;  %v6368_v49 = vsel %vm332_vm1, %v6278_v17, 0.0 }
 0x8f9   : > { %v6113_v23 = vpop.xlane.xlu0 %6112 }
 0x8fa   : > { %v11031_v42 = vadd.f32 %v6113_v23, %v10822_v39  ;;  %v6242_v39 = vld [vmem:[#allocation2 + $0x172] sm:$0xff] }
 0x8fb   : > { %v6276_v46 = vmul.f32 %v10920_v0, %v6242_v39 }
 0x8fc   : > { %6354 = vadd.xlane.f32.xlu1 %v6353_v19  ;;  %6357 = vadd.xlane.f32.xlu2 %v6356_v50  ;;  %v6280_v19 = vmul.f32 %v10920_v0, %v6246_v45 }
 0x8fd   : > { %v6362_v57 = vsel %vm332_vm1, %v6276_v46, 0.0 }
 0x8fe   : > { %6351 = vadd.xlane.f32.xlu0 %v6350_v35  ;;  %v6326_v35 = vsel %vm332_vm1, %v6264_v33, 0.0  ;;  %v6374_v56 = vsel %vm332_vm1, %v6280_v19, 0.0 }
 0x8ff   : > { %v6125_v34 = vpop.xlane.xlu1 %6124  ;;  %v6128_v30 = vpop.xlane.xlu2 %6127 }
 0x900   : > { %v11051_v25 = vadd.f32 %v6125_v34, %v10854_v44  ;;  %v11054_v13 = vadd.f32 %v6128_v30, %v10876_v40 }
 0x901   : > { %v6122_v16 = vpop.xlane.xlu0 %6121 }
 0x902   : > { %v11046_v29 = vadd.f32 %v6122_v16, %v10852_v18  ;;  %v6229_v18 = vld [vmem:[#allocation2 + $0xda] sm:$0xff] }
 0x903   : > { %v6263_v36 = vmul.f32 %v10920_v0, %v6229_v18 }
 0x904   : > { %6363 = vadd.xlane.f32.xlu1 %v6362_v57  ;;  %6366 = vadd.xlane.f32.xlu2 %v6365_v7 }
 0x905   : > { %v6323_v6 = vsel %vm332_vm1, %v6263_v36, 0.0 }
 0x906   : > { %6360 = vadd.xlane.f32.xlu0 %v6359_v55 }
 0x907   : > { %v6134_v44 = vpop.xlane.xlu1 %6133  ;;  %v6137_v37 = vpop.xlane.xlu2 %6136 }
 0x908   : > { %v11066_v23 = vadd.f32 %v6134_v44, %v10884_v27  ;;  %v11069_v31 = vadd.f32 %v6137_v37, %v10906_v61 }
 0x909   : > { %v6131_v58 = vpop.xlane.xlu0 %6130 }
 0x90a   : > { %v11061_v40 = vadd.f32 %v6131_v58, %v10882_v4  ;;  %v6279_v4 = vmul.f32 %v10920_v0, %v6245_v48 }
 0x90c   : > { %6324 = vadd.xlane.f32.xlu1 %v6323_v6  ;;  %6327 = vadd.xlane.f32.xlu2 %v6326_v35  ;;  %v6371_v16 = vsel %vm332_vm1, %v6279_v4, 0.0 }
 0x90e   : > { %6369 = vadd.xlane.f32.xlu0 %v6368_v49 }
 0x90f   : > { %v6143_v50 = vpop.xlane.xlu1 %6142  ;;  %v6146_v52 = vpop.xlane.xlu2 %6145 }
 0x910   : > { %v11080_v39 = vadd.f32 %v6143_v50, %v10911_v14  ;;  %v11083_v60 = vadd.f32 %v6146_v52, %v10927_v26 }
 0x911   : > { %v6140_v27 = vpop.xlane.xlu0 %6139 }
 0x912   : > { %v11077_v61 = vadd.f32 %v6140_v27, %v10909_v1 }
 0x914   : > { %6375 = vadd.xlane.f32.xlu1 %v6374_v56 }
 0x916   : > { %6372 = vadd.xlane.f32.xlu0 %v6371_v16 }
 0x917   : > { %v6152_v0 = vpop.xlane.xlu1 %6151  ;;  %v6155_v30 = vpop.xlane.xlu2 %6154 }
 0x918   : > { %v11091_v1 = vadd.f32 %v6152_v0, %v10934_v43  ;;  %v11094_v14 = vadd.f32 %v6155_v30, %v10941_v24 }
 0x919   : > { %v6149_v34 = vpop.xlane.xlu0 %6148 }
 0x91a   : > { %v11088_v46 = vadd.f32 %v6149_v34, %v10931_v28 }
 0x91f   : > { %v6161_v20 = vpop.xlane.xlu1 %6160  ;;  %v6164_v55 = vpop.xlane.xlu2 %6163 }
 0x920   : > { %v11100_v7 = vadd.f32 %v6161_v20, %v10949_v10  ;;  %v11103_v59 = vadd.f32 %v6164_v55, %v10956_v12 }
 0x921   : > { %v6158_v26 = vpop.xlane.xlu0 %6157 }
 0x922   : > { %v11097_v57 = vadd.f32 %v6158_v26, %v10946_v53 }
 0x927   : > { %v6170_v18 = vpop.xlane.xlu1 %6169  ;;  %v6173_v5 = vpop.xlane.xlu2 %6172 }
 0x928   : > { %v11109_v24 = vadd.f32 %v6170_v18, %v10964_v32  ;;  %v11112_v58 = vadd.f32 %v6173_v5, %v10971_v63  ;;  %v11125_v32 = vstv %s6409_s23 }
 0x929   : > { %v6167_v28 = vpop.xlane.xlu0 %6166 }
 0x92a   : > { %v11106_v43 = vadd.f32 %v6167_v28, %v10961_v62  ;;  %v6475_v62 = vlaneseq }
 0x92c   : > { %v11123_v36 = vand.u32 127, %v6475_v62 }
 0x92e   : > { %v11129_v45 = vadd.s32 4294967288, %v11123_v36 }
 0x92f   : > { %v6179_v17 = vpop.xlane.xlu1 %6178  ;;  %v6182_v10 = vpop.xlane.xlu2 %6181 }
 0x930   : > { %v11118_v12 = vadd.f32 %v6179_v17, %v10979_v41  ;;  %v11121_v37 = vadd.f32 %v6182_v10, %v10986_v22 }
 0x931   : > { %v6176_v53 = vpop.xlane.xlu0 %6175 }
 0x932   : > { %v11115_v44 = vadd.f32 %v6176_v53, %v10976_v15 }
 0x937   : > { %v6286_v33 = vpop.xlane.xlu1 %6285  ;;  %v6289_v48 = vpop.xlane.xlu2 %6288 }
 0x938   : > { %v6378_v15 = vadd.f32 %v6286_v33, %v10994_v54  ;;  %v6379_v41 = vadd.f32 %v6289_v48, %v11001_v11 }
 0x939   : > { %v6283_v63 = vpop.xlane.xlu0 %6282 }
 0x93a   : > { %v6377_v49 = vadd.f32 %v6283_v63, %v10991_v38  ;;  %v6412_v6 = vadd.f32 %v11125_v32, %v6378_v15  ;;  %v6413_v38 = vadd.f32 %v11125_v32, %v6379_v41 }
 0x93c   : > { %v6411_v22 = vadd.f32 %v11125_v32, %v6377_v49  ;;  %v6479_v4 = vperm.slane %v6412_v6, %v11129_v45  ;;  %v6482_v30 = vperm.slane %v6413_v38, %v11123_v36 }
 0x93e   : > { %v6477_v35 = vperm.slane %v6411_v22, %v11123_v36 }
 0x93f   : > { %v6295_v50 = vpop.xlane.xlu1 %6294  ;;  %v6298_v52 = vpop.xlane.xlu2 %6297 }
 0x940   : > { %v6481_v19 = vsel %vm6480_vm6, %v6479_v4, %v6477_v35  ;;  %v6381_v11 = vadd.f32 %v6295_v50, %v11009_v51  ;;  %v6382_v16 = vadd.f32 %v6298_v52, %v11016_v3 }
 0x941   : > { %v6292_v27 = vpop.xlane.xlu0 %6291 }
 0x942   : > { %v6380_v54 = vadd.f32 %v6292_v27, %v11006_v21  ;;  %v6415_v34 = vadd.f32 %v11125_v32, %v6381_v11  ;;  %v6416_v0 = vadd.f32 %v11125_v32, %v6382_v16 }
 0x944   : > { %v6414_v56 = vadd.f32 %v11125_v32, %v6380_v54  ;;  %v6485_v20 = vperm.slane %v6415_v34, %v11123_v36  ;;  %v6486_v55 = vperm.slane %v6416_v0, %v11129_v45 }
 0x946   : > { %v6483_v26 = vperm.slane %v6414_v56, %v11129_v45  ;;  %v6487_v51 = vsel %vm6480_vm6, %v6486_v55, %v6485_v20 }
 0x947   : > { %v6304_v18 = vpop.xlane.xlu1 %6303  ;;  %v6307_v5 = vpop.xlane.xlu2 %6306 }
 0x948   : > { %v6484_v21 = vsel %vm6480_vm6, %v6483_v26, %v6482_v30  ;;  %v6384_v10 = vadd.f32 %v6304_v18, %v11024_v9  ;;  %v6385_v33 = vadd.f32 %v6307_v5, %v11031_v42 }
 0x949   : > { %v6528_v3 = vsel %vm6527_vm7, %v6484_v21, %v6481_v19  ;;  %v6301_v28 = vpop.xlane.xlu0 %6300 }
 0x94a   : > { %v6383_v53 = vadd.f32 %v6301_v28, %v11021_v2  ;;  %v6530_v17 = vsel %vm6529_vm8, %v6487_v51, %v6528_v3  ;;  %v6418_v63 = vadd.f32 %v11125_v32, %v6384_v10  ;;  %v6419_v2 = vadd.f32 %v11125_v32, %v6385_v33 }
 0x94c   : > { %v6417_v62 = vadd.f32 %v11125_v32, %v6383_v53  ;;  %v6489_v49 = vperm.slane %v6418_v63, %v11129_v45  ;;  %v6491_v50 = vperm.slane %v6419_v2, %v11123_v36 }
 0x94e   : > { %v6488_v48 = vperm.slane %v6417_v62, %v11123_v36 }
 0x94f   : > { %v6313_v6 = vpop.xlane.xlu1 %6312  ;;  %v6316_v9 = vpop.xlane.xlu2 %6315 }
 0x950   : > { %v6490_v15 = vsel %vm6480_vm6, %v6489_v49, %v6488_v48  ;;  %v6387_v4 = vadd.f32 %v6313_v6, %v11039_v47  ;;  %v6388_v42 = vadd.f32 %v6316_v9, %v11046_v29 }
 0x951   : > { %v6310_v41 = vpop.xlane.xlu0 %6309  ;;  %v6532_v22 = vsel %vm6531_vm9, %v6490_v15, %v6530_v17 }
 0x952   : > { %v6386_v35 = vadd.f32 %v6310_v41, %v11036_v8  ;;  %v6421_v27 = vadd.f32 %v11125_v32, %v6387_v4  ;;  %v6422_v38 = vadd.f32 %v11125_v32, %v6388_v42 }
 0x954   : > { %v6420_v19 = vadd.f32 %v11125_v32, %v6386_v35  ;;  %v6494_v54 = vperm.slane %v6421_v27, %v11123_v36  ;;  %v6495_v11 = vperm.slane %v6422_v38, %v11129_v45 }
 0x956   : > { %v6492_v52 = vperm.slane %v6420_v19, %v11129_v45  ;;  %v6496_v47 = vsel %vm6480_vm6, %v6495_v11, %v6494_v54 }
 0x957   : > { %v6322_v56 = vpop.xlane.xlu1 %6321  ;;  %v6331_v34 = vpop.xlane.xlu2 %6330 }
 0x958   : > { %v6493_v8 = vsel %vm6480_vm6, %v6492_v52, %v6491_v50  ;;  %v6390_v26 = vadd.f32 %v6322_v56, %v11054_v13  ;;  %v6393_v21 = vadd.f32 %v6331_v34, %v11069_v31 }
 0x959   : > { %v6534_v29 = vsel %vm6533_vm10, %v6493_v8, %v6532_v22  ;;  %v6319_v16 = vpop.xlane.xlu0 %6318 }
 0x95a   : > { %v6389_v0 = vadd.f32 %v6319_v16, %v11051_v25  ;;  %v6536_v30 = vsel %vm6535_vm11, %v6496_v47, %v6534_v29  ;;  %v6424_v55 = vadd.f32 %v11125_v32, %v6390_v26  ;;  %v6427_v25 = vadd.f32 %v11125_v32, %v6393_v21 }
 0x95c   : > { %v6423_v20 = vadd.f32 %v11125_v32, %v6389_v0  ;;  %v6498_v3 = vperm.slane %v6424_v55, %v11129_v45  ;;  %v6503_v48 = vperm.slane %v6427_v25, %v11123_v36 }
 0x95e   : > { %v6497_v51 = vperm.slane %v6423_v20, %v11123_v36 }
 0x95f   : > { %v6337_v13 = vpop.xlane.xlu1 %6336  ;;  %v6340_v53 = vpop.xlane.xlu2 %6339 }
 0x960   : > { %v6499_v28 = vsel %vm6480_vm6, %v6498_v3, %v6497_v51  ;;  %v6395_v10 = vadd.f32 %v6337_v13, %v11080_v39  ;;  %v6396_v31 = vadd.f32 %v6340_v53, %v11083_v60 }
 0x961   : > { %v6334_v18 = vpop.xlane.xlu0 %6333  ;;  %v11187_v5 = vsel %vm6537_vm12, %v6499_v28, %v6536_v30 }
 0x962   : > { %v6394_v17 = vadd.f32 %v6334_v18, %v11077_v61  ;;  %v6429_v63 = vadd.f32 %v11125_v32, %v6395_v10  ;;  %v6430_v33 = vadd.f32 %v11125_v32, %v6396_v31 }
 0x964   : > { %v6428_v62 = vadd.f32 %v11125_v32, %v6394_v17  ;;  %v6506_v15 = vperm.slane %v6429_v63, %v11123_v36  ;;  %v6507_v41 = vperm.slane %v6430_v33, %v11129_v45 }
 0x966   : > { %v6504_v49 = vperm.slane %v6428_v62, %v11129_v45  ;;  %v6508_v39 = vsel %vm6480_vm6, %v6507_v41, %v6506_v15 }
 0x967   : > { %v6346_v22 = vpop.xlane.xlu1 %6345  ;;  %v6349_v6 = vpop.xlane.xlu2 %6348 }
 0x968   : > { %v6505_v61 = vsel %vm6480_vm6, %v6504_v49, %v6503_v48  ;;  %v6398_v35 = vadd.f32 %v6346_v22, %v11091_v1  ;;  %v6399_v19 = vadd.f32 %v6349_v6, %v11094_v14 }
 0x969   : > { %v6343_v2 = vpop.xlane.xlu0 %6342  ;;  %v6541_v60 = vsel %vm6527_vm7, %v6508_v39, %v6505_v61 }
 0x96a   : > { %v6397_v9 = vadd.f32 %v6343_v2, %v11088_v46  ;;  %v6432_v42 = vadd.f32 %v11125_v32, %v6398_v35  ;;  %v6433_v54 = vadd.f32 %v11125_v32, %v6399_v19 }
 0x96c   : > { %v6431_v4 = vadd.f32 %v11125_v32, %v6397_v9  ;;  %v6510_v38 = vperm.slane %v6432_v42, %v11129_v45  ;;  %v6512_v34 = vperm.slane %v6433_v54, %v11123_v36 }
 0x96e   : > { %v6509_v27 = vperm.slane %v6431_v4, %v11123_v36 }
 0x96f   : > { %v6355_v46 = vpop.xlane.xlu1 %6354  ;;  %v6358_v8 = vpop.xlane.xlu2 %6357 }
 0x970   : > { %v6511_v50 = vsel %vm6480_vm6, %v6510_v38, %v6509_v27  ;;  %v6401_v47 = vadd.f32 %v6355_v46, %v11100_v7  ;;  %v6402_v29 = vadd.f32 %v6358_v8, %v11103_v59 }
 0x971   : > { %v6352_v52 = vpop.xlane.xlu0 %6351  ;;  %v6542_v11 = vsel %vm6529_vm8, %v6511_v50, %v6541_v60 }
 0x972   : > { %v6400_v1 = vadd.f32 %v6352_v52, %v11097_v57  ;;  %v6435_v16 = vadd.f32 %v11125_v32, %v6401_v47  ;;  %v6436_v56 = vadd.f32 %v11125_v32, %v6402_v29 }
 0x974   : > { %v6434_v14 = vadd.f32 %v11125_v32, %v6400_v1  ;;  %v6515_v30 = vperm.slane %v6435_v16, %v11123_v36  ;;  %v6516_v26 = vperm.slane %v6436_v56, %v11129_v45 }
 0x976   : > { %v6513_v0 = vperm.slane %v6434_v14, %v11129_v45  ;;  %v6517_v7 = vsel %vm6480_vm6, %v6516_v26, %v6515_v30 }
 0x977   : > { %v6364_v55 = vpop.xlane.xlu1 %6363  ;;  %v6367_v21 = vpop.xlane.xlu2 %6366 }
 0x978   : > { %v6514_v57 = vsel %vm6480_vm6, %v6513_v0, %v6512_v34  ;;  %v6404_v28 = vadd.f32 %v6364_v55, %v11109_v24  ;;  %v6405_v13 = vadd.f32 %v6367_v21, %v11112_v58 }
 0x979   : > { %v6543_v59 = vsel %vm6531_vm9, %v6514_v57, %v6542_v11  ;;  %v6361_v20 = vpop.xlane.xlu0 %6360 }
 0x97a   : > { %v6403_v51 = vadd.f32 %v6361_v20, %v11106_v43  ;;  %v6544_v3 = vsel %vm6533_vm10, %v6517_v7, %v6543_v59  ;;  %v6438_v25 = vadd.f32 %v11125_v32, %v6404_v28  ;;  %v6439_v43 = vadd.f32 %v11125_v32, %v6405_v13 }
 0x97c   : > { %v6437_v18 = vadd.f32 %v11125_v32, %v6403_v51  ;;  %v6519_v17 = vperm.slane %v6438_v25, %v11129_v45  ;;  %v6521_v61 = vperm.slane %v6439_v43, %v11123_v36 }
 0x97e   : > { %v6518_v53 = vperm.slane %v6437_v18, %v11123_v36 }
 0x97f   : > { %v6325_v63 = vpop.xlane.xlu1 %6324  ;;  %v6328_v24 = vpop.xlane.xlu2 %6327 }
 0x980   : > { %v6520_v10 = vsel %vm6480_vm6, %v6519_v17, %v6518_v53  ;;  %v6391_v58 = vadd.f32 %v6325_v63, %v11061_v40  ;;  %v6392_v48 = vadd.f32 %v6328_v24, %v11066_v23 }
 0x981   : > { %v6370_v31 = vpop.xlane.xlu0 %6369  ;;  %v6545_v62 = vsel %vm6535_vm11, %v6520_v10, %v6544_v3 }
 0x982   : > { %v6406_v33 = vadd.f32 %v6370_v31, %v11115_v44  ;;  %v6425_v15 = vadd.f32 %v11125_v32, %v6391_v58  ;;  %v6426_v41 = vadd.f32 %v11125_v32, %v6392_v48 }
 0x984   : > { %v6440_v49 = vadd.f32 %v11125_v32, %v6406_v33  ;;  %v6500_v2 = vperm.slane %v6425_v15, %v11123_v36  ;;  %v6501_v44 = vperm.slane %v6426_v41, %v11129_v45 }
 0x986   : > { %v6522_v39 = vperm.slane %v6440_v49, %v11129_v45  ;;  %v6502_v23 = vsel %vm6480_vm6, %v6501_v44, %v6500_v2 }
 0x987   : > { %v6540_v6 = vsel %vm6539_vm13, %v6502_v23, %v11187_v5  ;;  %v6376_v9 = vpop.xlane.xlu1 %6375 }
 0x988   : > { %v6523_v40 = vsel %vm6480_vm6, %v6522_v39, %v6521_v61  ;;  %v6408_v4 = vadd.f32 %v6376_v9, %v11121_v37  ;;  %6550 = vst.msk [vmem:[%s326_s27] sm:$0xff] %vm426_vm0, %v6540_v6 }
 0x989   : > { %v6546_v60 = vsel %vm6537_vm12, %v6523_v40, %v6545_v62  ;;  %v6373_v22 = vpop.xlane.xlu0 %6372 }
 0x98a   : > { %v6407_v35 = vadd.f32 %v6373_v22, %v11118_v12  ;;  %v6442_v19 = vadd.f32 %v11125_v32, %v6408_v4 }
 0x98c   : > { %v6441_v42 = vadd.f32 %v11125_v32, %v6407_v35  ;;  %v6525_v12 = vperm.slane %v6442_v19, %v11129_v45 }
 0x98e   : > { %v6524_v5 = vperm.slane %v6441_v42, %v11123_v36 }
 0x990   : > { %v6526_v37 = vsel %vm6480_vm6, %v6525_v12, %v6524_v5 }
 0x991   : > { %v6547_v27 = vsel %vm6539_vm13, %v6526_v37, %v6546_v60 }
 0x992   : > { %6551 = vst.msk [vmem:[%s326_s27 + $0x8] sm:$0xff] %vm426_vm0, %v6547_v27 }
 0x993   : > { %6862 = shalt.err (!%p6859_p3)
}
 0x994   : > { %s6903_s24 = smov 128   ;;  %s6904_s27 = smov 8  }
 0x995   : > { %6766 = dma.vmem_to_hbm [thread:$0]  (%p6996_p5), %s6566_s22, 256, %s6568_s10, %s6553_s29, %s6903_s24, %s6903_s24, %s6904_s27  }
 0x996 PF: > { %p6772_p4 = scmp.ge.s32.totalorder %s6897_s14, 2  ;;  %s6582_s28 = sand.u32 1, %s6885_s11  }
 0x997   : > { %s6583_s8 = scalar_lea.sflag [#allocation6], %s6582_s28 }
 0x998   : > { %p6769_p7 = pnand %p6772_p4, %p7000_p6 }
 0x99a   : > { %p6770_p8 = pneg %p6769_p7 }
 0x99c   : > { %6880 = dma.done.wait (%p6770_p8), %s6583_s8, 256  }
 0x99d   : > { %6882 = vsyncadd (%p6770_p8), %s6583_s8, 4294967040  ;;  %p20_p9 = scmp.ge.s32.totalorder %s6983_s16, 4   ;;  %s11549_s11 = smov %s6889_s12 }
 0x99e   : > { %s11550_s12 = smov %s6893_s13  ;;  %s11551_s13 = smov %s6994_s19 }
 0x99f   : > { %s11552_s14 = smov %s6983_s16  ;;  %22 = sbr.rel (!%p20_p9) target bundleno = 5 (0x5), region = 93 }
 0x9a4   :  { %6589 = vsyncpa [#allocation6], 1 }
 0x9a5   :  { %6591 = vsyncpa [#allocation6 + $0x1], 1 }

</bundles_post_ra>
